<compile_context>
chip_gen: v7x
topology: tpu7x:2x2x1
jax: 0.10.0
libtpu: 0.0.40
codegen_flags: <defaults>
</compile_context>

<pallas_src>
import functools
import math

import jax
import jax.numpy as jnp
from jax import lax
from jax.experimental import pallas as pl
from jax.experimental.pallas import tpu as pltpu


_VMEM_LIMIT_BYTES = 64 * 1024 * 1024


def _round_up(x, m):
    return ((x + m - 1) // m) * m


def _choose_tile(m, blk, target_lanes):
    """Largest whole-block tile <= target that divides m; prefer >=2 steps."""
    nb = m // blk
    s = 1
    for cand in range(1, nb + 1):
        if nb % cand == 0 and cand * blk <= max(target_lanes, blk):
            s = cand
    if s == nb and nb > 1:
        # Split into >=2 grid steps so ("parallel",) can use both v7x cores.
        for cand in range(nb // 2, 0, -1):
            if nb % cand == 0:
                s = cand
                break
    return s * blk


# ---------------------------------------------------------------------------
# Kernel 1: dense layer (ConvT k4 s1 p0 on a 1x1 input == fully connected)
#   out[n, co*16 + s] = relu( x[n, :] @ W[:, co*16 + s] + b[co] )
# ---------------------------------------------------------------------------
def _dense_kernel(x_ref, w_ref, b_ref, o_ref, *, act):
    acc = jnp.dot(x_ref[...], w_ref[...], preferred_element_type=jnp.float32)
    y = acc + b_ref[...]
    y = jnp.maximum(y, 0.0) if act == "relu" else jnp.tanh(y)
    o_ref[...] = y.astype(o_ref.dtype)


def dense_fused(x2, wmat, bvec, act, out_dtype, target_lanes=4096):
    n_p, k = x2.shape
    k2, c = wmat.shape
    assert k2 == k and c % 128 == 0
    tile_c = _choose_tile(c, 128, target_lanes)
    return pl.pallas_call(
        functools.partial(_dense_kernel, act=act),
        out_shape=jax.ShapeDtypeStruct((n_p, c), out_dtype),
        grid_spec=pltpu.PrefetchScalarGridSpec(
            num_scalar_prefetch=0,
            grid=(c // tile_c,),
            in_specs=[
                pl.BlockSpec((n_p, k), lambda j: (0, 0)),
                pl.BlockSpec((k, tile_c), lambda j: (0, j)),
                pl.BlockSpec((1, tile_c), lambda j: (0, j)),
            ],
            out_specs=pl.BlockSpec((n_p, tile_c), lambda j: (0, j)),
        ),
        compiler_params=pltpu.CompilerParams(
            dimension_semantics=("parallel",),
            vmem_limit_bytes=_VMEM_LIMIT_BYTES),
    )(x2, wmat, bvec)


# ---------------------------------------------------------------------------
# Kernel 2: stride-2 ConvTranspose (k4 s2 p1) via sub-pixel decomposition.
# Activation layout: (C_in, M) with M = N*H*W flattened n-major / row / col.
# For tap (a, b) of the shared 3x3 window over the 1-padded input, the
# shifted plane is   S_ab[:, f] = X[:, f + d],  d = (a-1)*W + (b-1),
# realized with an in-VMEM lane rotation (np.roll semantics: out[i]=in[i-s],
# so s = (-d) mod TM) plus masks that zero the image-border / wrap positions.
# Tiles always contain whole samples, so wrap positions are exactly the
# masked border rows/cols.
# ---------------------------------------------------------------------------
def _conv_s2_kernel(x_ref, w_ref, b_ref, o_ref, *, h, w, act):
    xf = x_ref[...].astype(jnp.float32)           # (C_in, TM); 32-bit for roll
    rp, tm = o_ref.shape

    flat = lax.broadcasted_iota(jnp.int32, (1, tm), 1)
    if (w & (w - 1)) == 0 and (h & (h - 1)) == 0:   # DCGAN sizes: powers of 2
        col = flat & (w - 1)
        row = (flat >> int(math.log2(w))) & (h - 1)
    else:
        col = flat % w
        row = (flat // w) % h
    not_top, not_bot = row != 0, row != (h - 1)
    not_left, not_right = col != 0, col != (w - 1)

    acc = jnp.zeros((rp, tm), jnp.float32)
    for a in range(3):
        for b in range(3):
            d = (a - 1) * w + (b - 1)
            xs = xf if d == 0 else pltpu.roll(xf, (-d) % tm, 1)
            mask = None
            if a == 0:
                mask = not_top
            elif a == 2:
                mask = not_bot
            if b == 0:
                mask = not_left if mask is None else jnp.logical_and(mask, not_left)
            elif b == 2:
                mask = not_right if mask is None else jnp.logical_and(mask, not_right)
            if mask is not None:
                xs = jnp.where(mask, xs, 0.0)
            acc = acc + jnp.dot(w_ref[a * 3 + b], xs.astype(jnp.bfloat16),
                                preferred_element_type=jnp.float32)

    y = acc + b_ref[...]
    y = jnp.maximum(y, 0.0) if act == "relu" else jnp.tanh(y)
    o_ref[...] = y.astype(o_ref.dtype)


def conv_s2_fused(x_cm, w9, bvec, h, w, act, out_dtype, target_lanes=2048):
    cin_p, m = x_cm.shape
    ntap, rp, cin_p2 = w9.shape
    assert ntap == 9 and cin_p2 == cin_p
    hw = h * w
    blk = (hw * 128) // math.gcd(hw, 128)          # lcm(h*w, 128)
    assert m % blk == 0, (m, blk)
    tile_m = _choose_tile(m, blk, target_lanes)
    return pl.pallas_call(
        functools.partial(_conv_s2_kernel, h=h, w=w, act=act),
        out_shape=jax.ShapeDtypeStruct((rp, m), out_dtype),
        grid_spec=pltpu.PrefetchScalarGridSpec(
            num_scalar_prefetch=0,
            grid=(m // tile_m,),
            in_specs=[
                pl.BlockSpec((cin_p, tile_m), lambda i: (0, i)),   # activation
                pl.BlockSpec((9, rp, cin_p), lambda i: (0, 0, 0)),  # tap weights
                pl.BlockSpec((rp, 1), lambda i: (0, 0)),            # bias
            ],
            out_specs=pl.BlockSpec((rp, tile_m), lambda i: (0, i)),
        ),
        compiler_params=pltpu.CompilerParams(
            dimension_semantics=("parallel",),
            vmem_limit_bytes=_VMEM_LIMIT_BYTES),
    )(x_cm, w9, bvec)


# ---------------------------------------------------------------------------
# Generator forward (Pallas layers + small XLA glue for phase de-interleave)
# ---------------------------------------------------------------------------
def generator_forward(packed, x):
    n, nz = x.shape[0], x.shape[1]
    # Pad the batch once so every layer's flat spatial length N*H*W is a
    # multiple of 128 (smallest H*W is 4*4 = 16 -> need N % 8 == 0).
    n_pad = _round_up(n, 8)

    p0 = packed[0]
    x2 = x.reshape(n, nz)
    x2 = jnp.pad(x2, ((0, n_pad - n), (0, 0))).astype(jnp.bfloat16)
    y0 = dense_fused(x2, p0["w"], p0["b"], p0["act"], p0["out_dtype"])
    c1 = p0["c_out"]
    act = y0.reshape(n_pad, c1, 16).transpose(1, 0, 2).reshape(c1, n_pad * 16)

    h = w = 4
    for p in packed[1:]:
        c_in, cin_p, c_out = p["c_in"], p["cin_p"], p["c_out"]
        if cin_p != c_in:
            act = jnp.pad(act, ((0, cin_p - c_in), (0, 0)))
        out = conv_s2_fused(act.astype(jnp.bfloat16), p["w"], p["b"],
                            h, w, p["act"], p["out_dtype"])
        # Phase de-interleave: rows (dy, dx, co) x cols (n, m, x) -> (co, n*2h*2w)
        o = out[:4 * c_out].reshape(2, 2, c_out, n_pad, h, w)
        o = o.transpose(2, 3, 4, 0, 5, 1)          # (co, n, m, dy, x, dx)
        act = o.reshape(c_out, n_pad * (2 * h) * (2 * w))
        h, w = 2 * h, 2 * w

    img_c = packed[-1]["c_out"]
    y = act.reshape(img_c, n_pad, h, w).transpose(1, 0, 2, 3)
    return y[:n]


# ---------------------------------------------------------------------------
# Parameter init (deterministic, synthetic) and one-time weight packing
# ---------------------------------------------------------------------------
def init_generator_params(key, noise_channels, img_channels, features_g):
    chans = [noise_channels, features_g * 16, features_g * 8,
             features_g * 4, features_g * 2, img_channels]
    eps = 1e-5
    layers = []
    for li in range(5):
        c_in, c_out = chans[li], chans[li + 1]
        key, k1, k2, k3, k4, k5, k6 = jax.random.split(key, 7)
        wt = 0.05 * jax.random.normal(k1, (c_in, c_out, 4, 4), jnp.float32)
        cbias = 0.05 * jax.random.normal(k2, (c_out,), jnp.float32)
        if li < 4:
            # BatchNorm2d folded in eval mode (running stats) into scale/bias.
            gamma = 1.0 + 0.1 * jax.random.normal(k3, (c_out,), jnp.float32)
            beta = 0.1 * jax.random.normal(k4, (c_out,), jnp.float32)
            rmean = 0.1 * jax.random.normal(k5, (c_out,), jnp.float32)
            rvar = 1.0 + 0.1 * jax.random.uniform(k6, (c_out,), jnp.float32)
            scale = gamma / jnp.sqrt(rvar + eps)
            bias = beta + scale * (cbias - rmean)
            act = "relu"
        else:
            scale = jnp.ones((c_out,), jnp.float32)
            bias = cbias
            act = "tanh"
        layers.append(dict(wt=wt, scale=scale, bias=bias, act=act,
                           c_in=c_in, c_out=c_out))
    return layers


# Tap map for the sub-pixel decomposition (stride 2, pad 1, k 4):
#   output row oy = 2*iy + ky - 1.  Window element a in {0,1,2} over the
#   1-padded input maps to kernel index ky (None => unused for that phase).
_TAP = {(0, 0): 3, (0, 1): 1, (1, 1): 2, (1, 2): 0}


def pack_generator_params(layers):
    packed = []
    for li, L in enumerate(layers):
        c_in, c_out = L["c_in"], L["c_out"]
        wt, scale, bias, act = L["wt"], L["scale"], L["bias"], L["act"]
        out_dtype = jnp.bfloat16 if li < 4 else jnp.float32

        if li == 0:
            # Dense: out[n, co*16 + (oy*4+ox)] = sum_ci x[n,ci] * wt[ci,co,oy,ox]
            wm = (wt * scale[None, :, None, None]).reshape(c_in, c_out * 16)
            bv = jnp.repeat(bias, 16).reshape(1, c_out * 16)
            packed.append(dict(kind="dense", w=wm.astype(jnp.bfloat16),
                               b=bv.astype(jnp.float32), act=act,
                               c_out=c_out, out_dtype=out_dtype))
        else:
            # Combined phase weights over the shared 3x3 window, tap-major.
            cin_p = _round_up(c_in, 16)
            r = 4 * c_out
            rp = _round_up(r, 16)
            wc = jnp.zeros((2, 2, c_out, c_in, 3, 3), jnp.float32)
            for dy in range(2):
                for dx in range(2):
                    for a in range(3):
                        ky = _TAP.get((dy, a))
                        if ky is None:
                            continue
                        for b in range(3):
                            kx = _TAP.get((dx, b))
                            if kx is None:
                                continue
                            wc = wc.at[dy, dx, :, :, a, b].set(
                                wt[:, :, ky, kx].T * scale[:, None])
            w9 = wc.transpose(4, 5, 0, 1, 2, 3).reshape(9, r, c_in)
            w9 = jnp.pad(w9, ((0, 0), (0, rp - r), (0, cin_p - c_in)))
            bv = jnp.tile(bias, 4)
            bv = jnp.pad(bv, (0, rp - r)).reshape(rp, 1)
            packed.append(dict(kind="conv", w=w9.astype(jnp.bfloat16),
                               b=bv.astype(jnp.float32), act=act,
                               c_in=c_in, cin_p=cin_p, c_out=c_out, rp=rp,
                               out_dtype=out_dtype))
    return packed


# ---------------------------------------------------------------------------
# Pure-JAX reference (eval-mode BN), for a runtime correctness check
# ---------------------------------------------------------------------------
def reference_forward(layers, x):
    y = x
    for li, L in enumerate(layers):
        wt, scale, bias, act = L["wt"], L["scale"], L["bias"], L["act"]
        k = 4
        s, pd = (1, 0) if li == 0 else (2, 1)
        w_eff = jnp.flip(wt, (2, 3)).transpose(1, 0, 2, 3)   # (C_out,C_in,k,k)
        y = lax.conv_general_dilated(
            y, w_eff, window_strides=(1, 1),
            padding=[(k - 1 - pd, k - 1 - pd)] * 2,
            lhs_dilation=(s, s),
            dimension_numbers=("NCHW", "OIHW", "NCHW"))
        y = y * scale[None, :, None, None] + bias[None, :, None, None]
        y = jnp.maximum(y, 0.0) if act == "relu" else jnp.tanh(y)
    return y


if __name__ == "__main__":
    noise_channels, img_channels, features_g = 8, 3, 4
    batch = 2

    layers = init_generator_params(
        jax.random.PRNGKey(42), noise_channels, img_channels, features_g)
    packed = pack_generator_params(layers)

    # DCGAN generator input: (N, noise_channels, 1, 1)
    x = jax.random.normal(jax.random.PRNGKey(0),
                          (batch, noise_channels, 1, 1), jnp.float32)

    fwd = jax.jit(lambda inp: generator_forward(packed, inp))
    y = fwd(x)
    jax.block_until_ready(y)

    assert y.shape == (batch, img_channels, 64, 64), y.shape
    assert bool(jnp.all(jnp.isfinite(y)))
    assert bool(jnp.all(jnp.abs(y) <= 1.0 + 1e-6))  # tanh range

    y_ref = jax.jit(lambda inp: reference_forward(layers, inp))(x)
    jax.block_until_ready(y_ref)
    assert bool(jnp.allclose(y, y_ref, atol=2e-2, rtol=2e-2)), \
        float(jnp.max(jnp.abs(y - y_ref)))

    print("KERNEL_OK")
</pallas_src>

<mosaic_0001>
module attributes {stable_mosaic.version = 11 : i64} {
  func.func @_dense_kernel(%arg0: i32, %arg1: memref<8x8xbf16, #tpu.memory_space<vmem>>, %arg2: memref<8x512xbf16, #tpu.memory_space<vmem>>, %arg3: memref<1x512xf32, #tpu.memory_space<vmem>>, %arg4: memref<8x512xbf16, #tpu.memory_space<vmem>>) attributes {dimension_semantics = [#tpu.dimension_semantics<parallel>], iteration_bounds = array<i64: 2>, scalar_prefetch = 0 : i64, scratch_operands = 0 : i64, tpu.core_type = #tpu.core_type<tc>, window_params = [{pipeline_mode = #tpu.pipeline_mode<synchronous>, transform_indices = @transform_0, window_bounds = array<i64: 8, 8>}, {transform_indices = @transform_1, window_bounds = array<i64: 8, 512>}, {transform_indices = @transform_2, window_bounds = array<i64: 1, 512>}, {transform_indices = @transform_3, window_bounds = array<i64: 8, 512>}]} {
    %c0 = arith.constant 0 : index
    %c0_0 = arith.constant 0 : index
    %0 = vector.load %arg1[%c0, %c0_0] : memref<8x8xbf16, #tpu.memory_space<vmem>>, vector<8x8xbf16>
    %c0_1 = arith.constant 0 : index
    %c0_2 = arith.constant 0 : index
    %1 = vector.load %arg2[%c0_1, %c0_2] : memref<8x512xbf16, #tpu.memory_space<vmem>>, vector<8x512xbf16>
    %cst = arith.constant dense<0.000000e+00> : vector<8x512xf32>
    %2 = tpu.matmul %0, %1, %cst {dimension_numbers = #tpu.dot_dimension_numbers<[1], [0], [0], [1], [0, 0, 1, 1], [], []>} : vector<8x8xbf16>, vector<8x512xbf16>, vector<8x512xf32> -> vector<8x512xf32>
    %c0_3 = arith.constant 0 : index
    %c0_4 = arith.constant 0 : index
    %3 = vector.load %arg3[%c0_3, %c0_4] : memref<1x512xf32, #tpu.memory_space<vmem>>, vector<1x512xf32>
    %4 = vector.broadcast %3 : vector<1x512xf32> to vector<8x512xf32>
    %5 = arith.addf %2, %4 : vector<8x512xf32>
    %cst_5 = arith.constant 0.000000e+00 : f32
    %6 = vector.broadcast %cst_5 : f32 to vector<8x512xf32>
    %7 = arith.maximumf %5, %6 : vector<8x512xf32>
    %8 = arith.truncf %7 : vector<8x512xf32> to vector<8x512xbf16>
    %c0_6 = arith.constant 0 : index
    %c0_7 = arith.constant 0 : index
    %9 = vector.load %arg4[%c0_6, %c0_7] : memref<8x512xbf16, #tpu.memory_space<vmem>>, vector<8x512xbf16>
    tpu.vector_store %arg4[%c0_6, %c0_7], %8 {strides = array<i32>} : memref<8x512xbf16, #tpu.memory_space<vmem>>, vector<8x512xbf16>,
    return
  }
  func.func @transform_0(%arg0: i32) -> (i32, i32) {
    %c0_i32 = arith.constant 0 : i32
    %c0_i32_0 = arith.constant 0 : i32
    %c0_i32_1 = arith.constant 0 : i32
    return %c0_i32, %c0_i32_0 : i32, i32
  }
  func.func @transform_1(%arg0: i32) -> (i32, i32) {
    %c0_i32 = arith.constant 0 : i32
    %c0_i32_0 = arith.constant 0 : i32
    return %c0_i32, %arg0 : i32, i32
  }
  func.func @transform_2(%arg0: i32) -> (i32, i32) {
    %c0_i32 = arith.constant 0 : i32
    %c0_i32_0 = arith.constant 0 : i32
    return %c0_i32, %arg0 : i32, i32
  }
  func.func @transform_3(%arg0: i32) -> (i32, i32) {
    %c0_i32 = arith.constant 0 : i32
    %c0_i32_0 = arith.constant 0 : i32
    return %c0_i32, %arg0 : i32, i32
  }
}

module attributes {stable_mosaic.version = 11 : i64} {
  func.func @_conv_s2_kernel(%arg0: i32, %arg1: memref<64x128xbf16, #tpu.memory_space<vmem>>, %arg2: memref<9x128x64xbf16, #tpu.memory_space<vmem>>, %arg3: memref<128x1xf32, #tpu.memory_space<vmem>>, %arg4: memref<128x128xbf16, #tpu.memory_space<vmem>>) attributes {dimension_semantics = [#tpu.dimension_semantics<parallel>], iteration_bounds = array<i64: 1>, scalar_prefetch = 0 : i64, scratch_operands = 0 : i64, tpu.core_type = #tpu.core_type<tc>, window_params = [{transform_indices = @transform_0, window_bounds = array<i64: 64, 128>}, {pipeline_mode = #tpu.pipeline_mode<synchronous>, transform_indices = @transform_1, window_bounds = array<i64: 9, 128, 64>}, {pipeline_mode = #tpu.pipeline_mode<synchronous>, transform_indices = @transform_2, window_bounds = array<i64: 128, 1>}, {transform_indices = @transform_3, window_bounds = array<i64: 128, 128>}]} {
    %c0 = arith.constant 0 : index
    %c0_0 = arith.constant 0 : index
    %0 = vector.load %arg1[%c0, %c0_0] : memref<64x128xbf16, #tpu.memory_space<vmem>>, vector<64x128xbf16>
    %1 = arith.extf %0 : vector<64x128xbf16> to vector<64x128xf32>
    %2 = tpu.iota {dimensions = array<i32: 1>} : vector<1x128xi32>
    %c3_i32 = arith.constant 3 : i32
    %3 = vector.broadcast %c3_i32 : i32 to vector<1x128xi32>
    %4 = arith.andi %2, %3 : vector<1x128xi32>
    %c2_i32 = arith.constant 2 : i32
    %5 = vector.broadcast %c2_i32 : i32 to vector<1x128xi32>
    %6 = arith.shrsi %2, %5 : vector<1x128xi32>
    %c3_i32_1 = arith.constant 3 : i32
    %7 = vector.broadcast %c3_i32_1 : i32 to vector<1x128xi32>
    %8 = arith.andi %6, %7 : vector<1x128xi32>
    %c0_i32 = arith.constant 0 : i32
    %9 = vector.broadcast %c0_i32 : i32 to vector<1x128xi32>
    %10 = arith.cmpi ne, %8, %9 : vector<1x128xi32>
    %c3_i32_2 = arith.constant 3 : i32
    %11 = vector.broadcast %c3_i32_2 : i32 to vector<1x128xi32>
    %12 = arith.cmpi ne, %8, %11 : vector<1x128xi32>
    %c0_i32_3 = arith.constant 0 : i32
    %13 = vector.broadcast %c0_i32_3 : i32 to vector<1x128xi32>
    %14 = arith.cmpi ne, %4, %13 : vector<1x128xi32>
    %c3_i32_4 = arith.constant 3 : i32
    %15 = vector.broadcast %c3_i32_4 : i32 to vector<1x128xi32>
    %16 = arith.cmpi ne, %4, %15 : vector<1x128xi32>
    %cst = arith.constant 0.000000e+00 : f32
    %17 = vector.broadcast %cst : f32 to vector<128x128xf32>
    %c5_i32 = arith.constant 5 : i32
    %18 = tpu.dynamic_rotate %1 by %c5_i32 dim 1 : vector<64x128xf32>, i32 -> vector<64x128xf32>
    %19 = arith.andi %10, %14 : vector<1x128xi1>
    %cst_5 = arith.constant 0.000000e+00 : f32
    %20 = vector.shape_cast %19 : vector<1x128xi1> to vector<1x128xi1>
    %21 = vector.broadcast %20 : vector<1x128xi1> to vector<64x128xi1>
    %22 = vector.broadcast %cst_5 : f32 to vector<64x128xf32>
    %23 = arith.select %21, %18, %22 : vector<64x128xi1>, vector<64x128xf32>
    %c0_6 = arith.constant 0 : index
    %c0_7 = arith.constant 0 : index
    %c0_8 = arith.constant 0 : index
    %24 = vector.load %arg2[%c0_6, %c0_7, %c0_8] : memref<9x128x64xbf16, #tpu.memory_space<vmem>>, vector<1x128x64xbf16>
    %25 = vector.shape_cast %24 : vector<1x128x64xbf16> to vector<128x64xbf16>
    %26 = arith.truncf %23 : vector<64x128xf32> to vector<64x128xbf16>
    %cst_9 = arith.constant dense<0.000000e+00> : vector<128x128xf32>
    %27 = tpu.matmul %25, %26, %cst_9 {dimension_numbers = #tpu.dot_dimension_numbers<[1], [0], [0], [1], [0, 0, 1, 1], [], []>} : vector<128x64xbf16>, vector<64x128xbf16>, vector<128x128xf32> -> vector<128x128xf32>
    %28 = arith.addf %17, %27 : vector<128x128xf32>
    %c4_i32 = arith.constant 4 : i32
    %29 = tpu.dynamic_rotate %1 by %c4_i32 dim 1 : vector<64x128xf32>, i32 -> vector<64x128xf32>
    %cst_10 = arith.constant 0.000000e+00 : f32
    %30 = vector.shape_cast %10 : vector<1x128xi1> to vector<1x128xi1>
    %31 = vector.broadcast %30 : vector<1x128xi1> to vector<64x128xi1>
    %32 = vector.broadcast %cst_10 : f32 to vector<64x128xf32>
    %33 = arith.select %31, %29, %32 : vector<64x128xi1>, vector<64x128xf32>
    %c1 = arith.constant 1 : index
    %c0_11 = arith.constant 0 : index
    %c0_12 = arith.constant 0 : index
    %34 = vector.load %arg2[%c1, %c0_11, %c0_12] : memref<9x128x64xbf16, #tpu.memory_space<vmem>>, vector<1x128x64xbf16>
    %35 = vector.shape_cast %34 : vector<1x128x64xbf16> to vector<128x64xbf16>
    %36 = arith.truncf %33 : vector<64x128xf32> to vector<64x128xbf16>
    %cst_13 = arith.constant dense<0.000000e+00> : vector<128x128xf32>
    %37 = tpu.matmul %35, %36, %cst_13 {dimension_numbers = #tpu.dot_dimension_numbers<[1], [0], [0], [1], [0, 0, 1, 1], [], []>} : vector<128x64xbf16>, vector<64x128xbf16>, vector<128x128xf32> -> vector<128x128xf32>
    %38 = arith.addf %28, %37 : vector<128x128xf32>
    %c3_i32_14 = arith.constant 3 : i32
    %39 = tpu.dynamic_rotate %1 by %c3_i32_14 dim 1 : vector<64x128xf32>, i32 -> vector<64x128xf32>
    %40 = arith.andi %10, %16 : vector<1x128xi1>
    %cst_15 = arith.constant 0.000000e+00 : f32
    %41 = vector.shape_cast %40 : vector<1x128xi1> to vector<1x128xi1>
    %42 = vector.broadcast %41 : vector<1x128xi1> to vector<64x128xi1>
    %43 = vector.broadcast %cst_15 : f32 to vector<64x128xf32>
    %44 = arith.select %42, %39, %43 : vector<64x128xi1>, vector<64x128xf32>
    %c2 = arith.constant 2 : index
    %c0_16 = arith.constant 0 : index
    %c0_17 = arith.constant 0 : index
    %45 = vector.load %arg2[%c2, %c0_16, %c0_17] : memref<9x128x64xbf16, #tpu.memory_space<vmem>>, vector<1x128x64xbf16>
    %46 = vector.shape_cast %45 : vector<1x128x64xbf16> to vector<128x64xbf16>
    %47 = arith.truncf %44 : vector<64x128xf32> to vector<64x128xbf16>
    %cst_18 = arith.constant dense<0.000000e+00> : vector<128x128xf32>
    %48 = tpu.matmul %46, %47, %cst_18 {dimension_numbers = #tpu.dot_dimension_numbers<[1], [0], [0], [1], [0, 0, 1, 1], [], []>} : vector<128x64xbf16>, vector<64x128xbf16>, vector<128x128xf32> -> vector<128x128xf32>
    %49 = arith.addf %38, %48 : vector<128x128xf32>
    %c1_i32 = arith.constant 1 : i32
    %50 = tpu.dynamic_rotate %1 by %c1_i32 dim 1 : vector<64x128xf32>, i32 -> vector<64x128xf32>
    %cst_19 = arith.constant 0.000000e+00 : f32
    %51 = vector.shape_cast %14 : vector<1x128xi1> to vector<1x128xi1>
    %52 = vector.broadcast %51 : vector<1x128xi1> to vector<64x128xi1>
    %53 = vector.broadcast %cst_19 : f32 to vector<64x128xf32>
    %54 = arith.select %52, %50, %53 : vector<64x128xi1>, vector<64x128xf32>
    %c3 = arith.constant 3 : index
    %c0_20 = arith.constant 0 : index
    %c0_21 = arith.constant 0 : index
    %55 = vector.load %arg2[%c3, %c0_20, %c0_21] : memref<9x128x64xbf16, #tpu.memory_space<vmem>>, vector<1x128x64xbf16>
    %56 = vector.shape_cast %55 : vector<1x128x64xbf16> to vector<128x64xbf16>
    %57 = arith.truncf %54 : vector<64x128xf32> to vector<64x128xbf16>
    %cst_22 = arith.constant dense<0.000000e+00> : vector<128x128xf32>
    %58 = tpu.matmul %56, %57, %cst_22 {dimension_numbers = #tpu.dot_dimension_numbers<[1], [0], [0], [1], [0, 0, 1, 1], [], []>} : vector<128x64xbf16>, vector<64x128xbf16>, vector<128x128xf32> -> vector<128x128xf32>
    %59 = arith.addf %49, %58 : vector<128x128xf32>
    %c4 = arith.constant 4 : index
    %c0_23 = arith.constant 0 : index
    %c0_24 = arith.constant 0 : index
    %60 = vector.load %arg2[%c4, %c0_23, %c0_24] : memref<9x128x64xbf16, #tpu.memory_space<vmem>>, vector<1x128x64xbf16>
    %61 = vector.shape_cast %60 : vector<1x128x64xbf16> to vector<128x64xbf16>
    %62 = arith.truncf %1 : vector<64x128xf32> to vector<64x128xbf16>
    %cst_25 = arith.constant dense<0.000000e+00> : vector<128x128xf32>
    %63 = tpu.matmul %61, %62, %cst_25 {dimension_numbers = #tpu.dot_dimension_numbers<[1], [0], [0], [1], [0, 0, 1, 1], [], []>} : vector<128x64xbf16>, vector<64x128xbf16>, vector<128x128xf32> -> vector<128x128xf32>
    %64 = arith.addf %59, %63 : vector<128x128xf32>
    %c127_i32 = arith.constant 127 : i32
    %65 = tpu.dynamic_rotate %1 by %c127_i32 dim 1 : vector<64x128xf32>, i32 -> vector<64x128xf32>
    %cst_26 = arith.constant 0.000000e+00 : f32
    %66 = vector.shape_cast %16 : vector<1x128xi1> to vector<1x128xi1>
    %67 = vector.broadcast %66 : vector<1x128xi1> to vector<64x128xi1>
    %68 = vector.broadcast %cst_26 : f32 to vector<64x128xf32>
    %69 = arith.select %67, %65, %68 : vector<64x128xi1>, vector<64x128xf32>
    %c5 = arith.constant 5 : index
    %c0_27 = arith.constant 0 : index
    %c0_28 = arith.constant 0 : index
    %70 = vector.load %arg2[%c5, %c0_27, %c0_28] : memref<9x128x64xbf16, #tpu.memory_space<vmem>>, vector<1x128x64xbf16>
    %71 = vector.shape_cast %70 : vector<1x128x64xbf16> to vector<128x64xbf16>
    %72 = arith.truncf %69 : vector<64x128xf32> to vector<64x128xbf16>
    %cst_29 = arith.constant dense<0.000000e+00> : vector<128x128xf32>
    %73 = tpu.matmul %71, %72, %cst_29 {dimension_numbers = #tpu.dot_dimension_numbers<[1], [0], [0], [1], [0, 0, 1, 1], [], []>} : vector<128x64xbf16>, vector<64x128xbf16>, vector<128x128xf32> -> vector<128x128xf32>
    %74 = arith.addf %64, %73 : vector<128x128xf32>
    %c125_i32 = arith.constant 125 : i32
    %75 = tpu.dynamic_rotate %1 by %c125_i32 dim 1 : vector<64x128xf32>, i32 -> vector<64x128xf32>
    %76 = arith.andi %12, %14 : vector<1x128xi1>
    %cst_30 = arith.constant 0.000000e+00 : f32
    %77 = vector.shape_cast %76 : vector<1x128xi1> to vector<1x128xi1>
    %78 = vector.broadcast %77 : vector<1x128xi1> to vector<64x128xi1>
    %79 = vector.broadcast %cst_30 : f32 to vector<64x128xf32>
    %80 = arith.select %78, %75, %79 : vector<64x128xi1>, vector<64x128xf32>
    %c6 = arith.constant 6 : index
    %c0_31 = arith.constant 0 : index
    %c0_32 = arith.constant 0 : index
    %81 = vector.load %arg2[%c6, %c0_31, %c0_32] : memref<9x128x64xbf16, #tpu.memory_space<vmem>>, vector<1x128x64xbf16>
    %82 = vector.shape_cast %81 : vector<1x128x64xbf16> to vector<128x64xbf16>
    %83 = arith.truncf %80 : vector<64x128xf32> to vector<64x128xbf16>
    %cst_33 = arith.constant dense<0.000000e+00> : vector<128x128xf32>
    %84 = tpu.matmul %82, %83, %cst_33 {dimension_numbers = #tpu.dot_dimension_numbers<[1], [0], [0], [1], [0, 0, 1, 1], [], []>} : vector<128x64xbf16>, vector<64x128xbf16>, vector<128x128xf32> -> vector<128x128xf32>
    %85 = arith.addf %74, %84 : vector<128x128xf32>
    %c124_i32 = arith.constant 124 : i32
    %86 = tpu.dynamic_rotate %1 by %c124_i32 dim 1 : vector<64x128xf32>, i32 -> vector<64x128xf32>
    %cst_34 = arith.constant 0.000000e+00 : f32
    %87 = vector.shape_cast %12 : vector<1x128xi1> to vector<1x128xi1>
    %88 = vector.broadcast %87 : vector<1x128xi1> to vector<64x128xi1>
    %89 = vector.broadcast %cst_34 : f32 to vector<64x128xf32>
    %90 = arith.select %88, %86, %89 : vector<64x128xi1>, vector<64x128xf32>
    %c7 = arith.constant 7 : index
    %c0_35 = arith.constant 0 : index
    %c0_36 = arith.constant 0 : index
    %91 = vector.load %arg2[%c7, %c0_35, %c0_36] : memref<9x128x64xbf16, #tpu.memory_space<vmem>>, vector<1x128x64xbf16>
    %92 = vector.shape_cast %91 : vector<1x128x64xbf16> to vector<128x64xbf16>
    %93 = arith.truncf %90 : vector<64x128xf32> to vector<64x128xbf16>
    %cst_37 = arith.constant dense<0.000000e+00> : vector<128x128xf32>
    %94 = tpu.matmul %92, %93, %cst_37 {dimension_numbers = #tpu.dot_dimension_numbers<[1], [0], [0], [1], [0, 0, 1, 1], [], []>} : vector<128x64xbf16>, vector<64x128xbf16>, vector<128x128xf32> -> vector<128x128xf32>
    %95 = arith.addf %85, %94 : vector<128x128xf32>
    %c123_i32 = arith.constant 123 : i32
    %96 = tpu.dynamic_rotate %1 by %c123_i32 dim 1 : vector<64x128xf32>, i32 -> vector<64x128xf32>
    %97 = arith.andi %12, %16 : vector<1x128xi1>
    %cst_38 = arith.constant 0.000000e+00 : f32
    %98 = vector.shape_cast %97 : vector<1x128xi1> to vector<1x128xi1>
    %99 = vector.broadcast %98 : vector<1x128xi1> to vector<64x128xi1>
    %100 = vector.broadcast %cst_38 : f32 to vector<64x128xf32>
    %101 = arith.select %99, %96, %100 : vector<64x128xi1>, vector<64x128xf32>
    %c8 = arith.constant 8 : index
    %c0_39 = arith.constant 0 : index
    %c0_40 = arith.constant 0 : index
    %102 = vector.load %arg2[%c8, %c0_39, %c0_40] : memref<9x128x64xbf16, #tpu.memory_space<vmem>>, vector<1x128x64xbf16>
    %103 = vector.shape_cast %102 : vector<1x128x64xbf16> to vector<128x64xbf16>
    %104 = arith.truncf %101 : vector<64x128xf32> to vector<64x128xbf16>
    %cst_41 = arith.constant dense<0.000000e+00> : vector<128x128xf32>
    %105 = tpu.matmul %103, %104, %cst_41 {dimension_numbers = #tpu.dot_dimension_numbers<[1], [0], [0], [1], [0, 0, 1, 1], [], []>} : vector<128x64xbf16>, vector<64x128xbf16>, vector<128x128xf32> -> vector<128x128xf32>
    %106 = arith.addf %95, %105 : vector<128x128xf32>
    %c0_42 = arith.constant 0 : index
    %c0_43 = arith.constant 0 : index
    %107 = vector.load %arg3[%c0_42, %c0_43] : memref<128x1xf32, #tpu.memory_space<vmem>>, vector<128x1xf32>
    %108 = vector.broadcast %107 : vector<128x1xf32> to vector<128x128xf32>
    %109 = arith.addf %106, %108 : vector<128x128xf32>
    %cst_44 = arith.constant 0.000000e+00 : f32
    %110 = vector.broadcast %cst_44 : f32 to vector<128x128xf32>
    %111 = arith.maximumf %109, %110 : vector<128x128xf32>
    %112 = arith.truncf %111 : vector<128x128xf32> to vector<128x128xbf16>
    %c0_45 = arith.constant 0 : index
    %c0_46 = arith.constant 0 : index
    %113 = vector.load %arg4[%c0_45, %c0_46] : memref<128x128xbf16, #tpu.memory_space<vmem>>, vector<128x128xbf16>
    tpu.vector_store %arg4[%c0_45, %c0_46], %112 {strides = array<i32>} : memref<128x128xbf16, #tpu.memory_space<vmem>>, vector<128x128xbf16>,
    return
  }
  func.func @transform_0(%arg0: i32) -> (i32, i32) {
    %c0_i32 = arith.constant 0 : i32
    %c0_i32_0 = arith.constant 0 : i32
    return %c0_i32, %arg0 : i32, i32
  }
  func.func @transform_1(%arg0: i32) -> (i32, i32, i32) {
    %c0_i32 = arith.constant 0 : i32
    %c0_i32_0 = arith.constant 0 : i32
    %c0_i32_1 = arith.constant 0 : i32
    %c0_i32_2 = arith.constant 0 : i32
    return %c0_i32, %c0_i32_0, %c0_i32_1 : i32, i32, i32
  }
  func.func @transform_2(%arg0: i32) -> (i32, i32) {
    %c0_i32 = arith.constant 0 : i32
    %c0_i32_0 = arith.constant 0 : i32
    %c0_i32_1 = arith.constant 0 : i32
    return %c0_i32, %c0_i32_0 : i32, i32
  }
  func.func @transform_3(%arg0: i32) -> (i32, i32) {
    %c0_i32 = arith.constant 0 : i32
    %c0_i32_0 = arith.constant 0 : i32
    return %c0_i32, %arg0 : i32, i32
  }
}

module attributes {stable_mosaic.version = 11 : i64} {
  func.func @_conv_s2_kernel(%arg0: i32, %arg1: memref<32x256xbf16, #tpu.memory_space<vmem>>, %arg2: memref<9x64x32xbf16, #tpu.memory_space<vmem>>, %arg3: memref<64x1xf32, #tpu.memory_space<vmem>>, %arg4: memref<64x256xbf16, #tpu.memory_space<vmem>>) attributes {dimension_semantics = [#tpu.dimension_semantics<parallel>], iteration_bounds = array<i64: 2>, scalar_prefetch = 0 : i64, scratch_operands = 0 : i64, tpu.core_type = #tpu.core_type<tc>, window_params = [{transform_indices = @transform_0, window_bounds = array<i64: 32, 256>}, {pipeline_mode = #tpu.pipeline_mode<synchronous>, transform_indices = @transform_1, window_bounds = array<i64: 9, 64, 32>}, {pipeline_mode = #tpu.pipeline_mode<synchronous>, transform_indices = @transform_2, window_bounds = array<i64: 64, 1>}, {transform_indices = @transform_3, window_bounds = array<i64: 64, 256>}]} {
    %c0 = arith.constant 0 : index
    %c0_0 = arith.constant 0 : index
    %0 = vector.load %arg1[%c0, %c0_0] : memref<32x256xbf16, #tpu.memory_space<vmem>>, vector<32x256xbf16>
    %1 = arith.extf %0 : vector<32x256xbf16> to vector<32x256xf32>
    %2 = tpu.iota {dimensions = array<i32: 1>} : vector<1x256xi32>
    %c7_i32 = arith.constant 7 : i32
    %3 = vector.broadcast %c7_i32 : i32 to vector<1x256xi32>
    %4 = arith.andi %2, %3 : vector<1x256xi32>
    %c3_i32 = arith.constant 3 : i32
    %5 = vector.broadcast %c3_i32 : i32 to vector<1x256xi32>
    %6 = arith.shrsi %2, %5 : vector<1x256xi32>
    %c7_i32_1 = arith.constant 7 : i32
    %7 = vector.broadcast %c7_i32_1 : i32 to vector<1x256xi32>
    %8 = arith.andi %6, %7 : vector<1x256xi32>
    %c0_i32 = arith.constant 0 : i32
    %9 = vector.broadcast %c0_i32 : i32 to vector<1x256xi32>
    %10 = arith.cmpi ne, %8, %9 : vector<1x256xi32>
    %c7_i32_2 = arith.constant 7 : i32
    %11 = vector.broadcast %c7_i32_2 : i32 to vector<1x256xi32>
    %12 = arith.cmpi ne, %8, %11 : vector<1x256xi32>
    %c0_i32_3 = arith.constant 0 : i32
    %13 = vector.broadcast %c0_i32_3 : i32 to vector<1x256xi32>
    %14 = arith.cmpi ne, %4, %13 : vector<1x256xi32>
    %c7_i32_4 = arith.constant 7 : i32
    %15 = vector.broadcast %c7_i32_4 : i32 to vector<1x256xi32>
    %16 = arith.cmpi ne, %4, %15 : vector<1x256xi32>
    %cst = arith.constant 0.000000e+00 : f32
    %17 = vector.broadcast %cst : f32 to vector<64x256xf32>
    %c9_i32 = arith.constant 9 : i32
    %18 = tpu.dynamic_rotate %1 by %c9_i32 dim 1 : vector<32x256xf32>, i32 -> vector<32x256xf32>
    %19 = arith.andi %10, %14 : vector<1x256xi1>
    %cst_5 = arith.constant 0.000000e+00 : f32
    %20 = vector.shape_cast %19 : vector<1x256xi1> to vector<1x256xi1>
    %21 = vector.broadcast %20 : vector<1x256xi1> to vector<32x256xi1>
    %22 = vector.broadcast %cst_5 : f32 to vector<32x256xf32>
    %23 = arith.select %21, %18, %22 : vector<32x256xi1>, vector<32x256xf32>
    %c0_6 = arith.constant 0 : index
    %c0_7 = arith.constant 0 : index
    %c0_8 = arith.constant 0 : index
    %24 = vector.load %arg2[%c0_6, %c0_7, %c0_8] : memref<9x64x32xbf16, #tpu.memory_space<vmem>>, vector<1x64x32xbf16>
    %25 = vector.shape_cast %24 : vector<1x64x32xbf16> to vector<64x32xbf16>
    %26 = arith.truncf %23 : vector<32x256xf32> to vector<32x256xbf16>
    %cst_9 = arith.constant dense<0.000000e+00> : vector<64x256xf32>
    %27 = tpu.matmul %25, %26, %cst_9 {dimension_numbers = #tpu.dot_dimension_numbers<[1], [0], [0], [1], [0, 0, 1, 1], [], []>} : vector<64x32xbf16>, vector<32x256xbf16>, vector<64x256xf32> -> vector<64x256xf32>
    %28 = arith.addf %17, %27 : vector<64x256xf32>
    %c8_i32 = arith.constant 8 : i32
    %29 = tpu.dynamic_rotate %1 by %c8_i32 dim 1 : vector<32x256xf32>, i32 -> vector<32x256xf32>
    %cst_10 = arith.constant 0.000000e+00 : f32
    %30 = vector.shape_cast %10 : vector<1x256xi1> to vector<1x256xi1>
    %31 = vector.broadcast %30 : vector<1x256xi1> to vector<32x256xi1>
    %32 = vector.broadcast %cst_10 : f32 to vector<32x256xf32>
    %33 = arith.select %31, %29, %32 : vector<32x256xi1>, vector<32x256xf32>
    %c1 = arith.constant 1 : index
    %c0_11 = arith.constant 0 : index
    %c0_12 = arith.constant 0 : index
    %34 = vector.load %arg2[%c1, %c0_11, %c0_12] : memref<9x64x32xbf16, #tpu.memory_space<vmem>>, vector<1x64x32xbf16>
    %35 = vector.shape_cast %34 : vector<1x64x32xbf16> to vector<64x32xbf16>
    %36 = arith.truncf %33 : vector<32x256xf32> to vector<32x256xbf16>
    %cst_13 = arith.constant dense<0.000000e+00> : vector<64x256xf32>
    %37 = tpu.matmul %35, %36, %cst_13 {dimension_numbers = #tpu.dot_dimension_numbers<[1], [0], [0], [1], [0, 0, 1, 1], [], []>} : vector<64x32xbf16>, vector<32x256xbf16>, vector<64x256xf32> -> vector<64x256xf32>
    %38 = arith.addf %28, %37 : vector<64x256xf32>
    %c7_i32_14 = arith.constant 7 : i32
    %39 = tpu.dynamic_rotate %1 by %c7_i32_14 dim 1 : vector<32x256xf32>, i32 -> vector<32x256xf32>
    %40 = arith.andi %10, %16 : vector<1x256xi1>
    %cst_15 = arith.constant 0.000000e+00 : f32
    %41 = vector.shape_cast %40 : vector<1x256xi1> to vector<1x256xi1>
    %42 = vector.broadcast %41 : vector<1x256xi1> to vector<32x256xi1>
    %43 = vector.broadcast %cst_15 : f32 to vector<32x256xf32>
    %44 = arith.select %42, %39, %43 : vector<32x256xi1>, vector<32x256xf32>
    %c2 = arith.constant 2 : index
    %c0_16 = arith.constant 0 : index
    %c0_17 = arith.constant 0 : index
    %45 = vector.load %arg2[%c2, %c0_16, %c0_17] : memref<9x64x32xbf16, #tpu.memory_space<vmem>>, vector<1x64x32xbf16>
    %46 = vector.shape_cast %45 : vector<1x64x32xbf16> to vector<64x32xbf16>
    %47 = arith.truncf %44 : vector<32x256xf32> to vector<32x256xbf16>
    %cst_18 = arith.constant dense<0.000000e+00> : vector<64x256xf32>
    %48 = tpu.matmul %46, %47, %cst_18 {dimension_numbers = #tpu.dot_dimension_numbers<[1], [0], [0], [1], [0, 0, 1, 1], [], []>} : vector<64x32xbf16>, vector<32x256xbf16>, vector<64x256xf32> -> vector<64x256xf32>
    %49 = arith.addf %38, %48 : vector<64x256xf32>
    %c1_i32 = arith.constant 1 : i32
    %50 = tpu.dynamic_rotate %1 by %c1_i32 dim 1 : vector<32x256xf32>, i32 -> vector<32x256xf32>
    %cst_19 = arith.constant 0.000000e+00 : f32
    %51 = vector.shape_cast %14 : vector<1x256xi1> to vector<1x256xi1>
    %52 = vector.broadcast %51 : vector<1x256xi1> to vector<32x256xi1>
    %53 = vector.broadcast %cst_19 : f32 to vector<32x256xf32>
    %54 = arith.select %52, %50, %53 : vector<32x256xi1>, vector<32x256xf32>
    %c3 = arith.constant 3 : index
    %c0_20 = arith.constant 0 : index
    %c0_21 = arith.constant 0 : index
    %55 = vector.load %arg2[%c3, %c0_20, %c0_21] : memref<9x64x32xbf16, #tpu.memory_space<vmem>>, vector<1x64x32xbf16>
    %56 = vector.shape_cast %55 : vector<1x64x32xbf16> to vector<64x32xbf16>
    %57 = arith.truncf %54 : vector<32x256xf32> to vector<32x256xbf16>
    %cst_22 = arith.constant dense<0.000000e+00> : vector<64x256xf32>
    %58 = tpu.matmul %56, %57, %cst_22 {dimension_numbers = #tpu.dot_dimension_numbers<[1], [0], [0], [1], [0, 0, 1, 1], [], []>} : vector<64x32xbf16>, vector<32x256xbf16>, vector<64x256xf32> -> vector<64x256xf32>
    %59 = arith.addf %49, %58 : vector<64x256xf32>
    %c4 = arith.constant 4 : index
    %c0_23 = arith.constant 0 : index
    %c0_24 = arith.constant 0 : index
    %60 = vector.load %arg2[%c4, %c0_23, %c0_24] : memref<9x64x32xbf16, #tpu.memory_space<vmem>>, vector<1x64x32xbf16>
    %61 = vector.shape_cast %60 : vector<1x64x32xbf16> to vector<64x32xbf16>
    %62 = arith.truncf %1 : vector<32x256xf32> to vector<32x256xbf16>
    %cst_25 = arith.constant dense<0.000000e+00> : vector<64x256xf32>
    %63 = tpu.matmul %61, %62, %cst_25 {dimension_numbers = #tpu.dot_dimension_numbers<[1], [0], [0], [1], [0, 0, 1, 1], [], []>} : vector<64x32xbf16>, vector<32x256xbf16>, vector<64x256xf32> -> vector<64x256xf32>
    %64 = arith.addf %59, %63 : vector<64x256xf32>
    %c255_i32 = arith.constant 255 : i32
    %65 = tpu.dynamic_rotate %1 by %c255_i32 dim 1 : vector<32x256xf32>, i32 -> vector<32x256xf32>
    %cst_26 = arith.constant 0.000000e+00 : f32
    %66 = vector.shape_cast %16 : vector<1x256xi1> to vector<1x256xi1>
    %67 = vector.broadcast %66 : vector<1x256xi1> to vector<32x256xi1>
    %68 = vector.broadcast %cst_26 : f32 to vector<32x256xf32>
    %69 = arith.select %67, %65, %68 : vector<32x256xi1>, vector<32x256xf32>
    %c5 = arith.constant 5 : index
    %c0_27 = arith.constant 0 : index
    %c0_28 = arith.constant 0 : index
    %70 = vector.load %arg2[%c5, %c0_27, %c0_28] : memref<9x64x32xbf16, #tpu.memory_space<vmem>>, vector<1x64x32xbf16>
    %71 = vector.shape_cast %70 : vector<1x64x32xbf16> to vector<64x32xbf16>
    %72 = arith.truncf %69 : vector<32x256xf32> to vector<32x256xbf16>
    %cst_29 = arith.constant dense<0.000000e+00> : vector<64x256xf32>
    %73 = tpu.matmul %71, %72, %cst_29 {dimension_numbers = #tpu.dot_dimension_numbers<[1], [0], [0], [1], [0, 0, 1, 1], [], []>} : vector<64x32xbf16>, vector<32x256xbf16>, vector<64x256xf32> -> vector<64x256xf32>
    %74 = arith.addf %64, %73 : vector<64x256xf32>
    %c249_i32 = arith.constant 249 : i32
    %75 = tpu.dynamic_rotate %1 by %c249_i32 dim 1 : vector<32x256xf32>, i32 -> vector<32x256xf32>
    %76 = arith.andi %12, %14 : vector<1x256xi1>
    %cst_30 = arith.constant 0.000000e+00 : f32
    %77 = vector.shape_cast %76 : vector<1x256xi1> to vector<1x256xi1>
    %78 = vector.broadcast %77 : vector<1x256xi1> to vector<32x256xi1>
    %79 = vector.broadcast %cst_30 : f32 to vector<32x256xf32>
    %80 = arith.select %78, %75, %79 : vector<32x256xi1>, vector<32x256xf32>
    %c6 = arith.constant 6 : index
    %c0_31 = arith.constant 0 : index
    %c0_32 = arith.constant 0 : index
    %81 = vector.load %arg2[%c6, %c0_31, %c0_32] : memref<9x64x32xbf16, #tpu.memory_space<vmem>>, vector<1x64x32xbf16>
    %82 = vector.shape_cast %81 : vector<1x64x32xbf16> to vector<64x32xbf16>
    %83 = arith.truncf %80 : vector<32x256xf32> to vector<32x256xbf16>
    %cst_33 = arith.constant dense<0.000000e+00> : vector<64x256xf32>
    %84 = tpu.matmul %82, %83, %cst_33 {dimension_numbers = #tpu.dot_dimension_numbers<[1], [0], [0], [1], [0, 0, 1, 1], [], []>} : vector<64x32xbf16>, vector<32x256xbf16>, vector<64x256xf32> -> vector<64x256xf32>
    %85 = arith.addf %74, %84 : vector<64x256xf32>
    %c248_i32 = arith.constant 248 : i32
    %86 = tpu.dynamic_rotate %1 by %c248_i32 dim 1 : vector<32x256xf32>, i32 -> vector<32x256xf32>
    %cst_34 = arith.constant 0.000000e+00 : f32
    %87 = vector.shape_cast %12 : vector<1x256xi1> to vector<1x256xi1>
    %88 = vector.broadcast %87 : vector<1x256xi1> to vector<32x256xi1>
    %89 = vector.broadcast %cst_34 : f32 to vector<32x256xf32>
    %90 = arith.select %88, %86, %89 : vector<32x256xi1>, vector<32x256xf32>
    %c7 = arith.constant 7 : index
    %c0_35 = arith.constant 0 : index
    %c0_36 = arith.constant 0 : index
    %91 = vector.load %arg2[%c7, %c0_35, %c0_36] : memref<9x64x32xbf16, #tpu.memory_space<vmem>>, vector<1x64x32xbf16>
    %92 = vector.shape_cast %91 : vector<1x64x32xbf16> to vector<64x32xbf16>
    %93 = arith.truncf %90 : vector<32x256xf32> to vector<32x256xbf16>
    %cst_37 = arith.constant dense<0.000000e+00> : vector<64x256xf32>
    %94 = tpu.matmul %92, %93, %cst_37 {dimension_numbers = #tpu.dot_dimension_numbers<[1], [0], [0], [1], [0, 0, 1, 1], [], []>} : vector<64x32xbf16>, vector<32x256xbf16>, vector<64x256xf32> -> vector<64x256xf32>
    %95 = arith.addf %85, %94 : vector<64x256xf32>
    %c247_i32 = arith.constant 247 : i32
    %96 = tpu.dynamic_rotate %1 by %c247_i32 dim 1 : vector<32x256xf32>, i32 -> vector<32x256xf32>
    %97 = arith.andi %12, %16 : vector<1x256xi1>
    %cst_38 = arith.constant 0.000000e+00 : f32
    %98 = vector.shape_cast %97 : vector<1x256xi1> to vector<1x256xi1>
    %99 = vector.broadcast %98 : vector<1x256xi1> to vector<32x256xi1>
    %100 = vector.broadcast %cst_38 : f32 to vector<32x256xf32>
    %101 = arith.select %99, %96, %100 : vector<32x256xi1>, vector<32x256xf32>
    %c8 = arith.constant 8 : index
    %c0_39 = arith.constant 0 : index
    %c0_40 = arith.constant 0 : index
    %102 = vector.load %arg2[%c8, %c0_39, %c0_40] : memref<9x64x32xbf16, #tpu.memory_space<vmem>>, vector<1x64x32xbf16>
    %103 = vector.shape_cast %102 : vector<1x64x32xbf16> to vector<64x32xbf16>
    %104 = arith.truncf %101 : vector<32x256xf32> to vector<32x256xbf16>
    %cst_41 = arith.constant dense<0.000000e+00> : vector<64x256xf32>
    %105 = tpu.matmul %103, %104, %cst_41 {dimension_numbers = #tpu.dot_dimension_numbers<[1], [0], [0], [1], [0, 0, 1, 1], [], []>} : vector<64x32xbf16>, vector<32x256xbf16>, vector<64x256xf32> -> vector<64x256xf32>
    %106 = arith.addf %95, %105 : vector<64x256xf32>
    %c0_42 = arith.constant 0 : index
    %c0_43 = arith.constant 0 : index
    %107 = vector.load %arg3[%c0_42, %c0_43] : memref<64x1xf32, #tpu.memory_space<vmem>>, vector<64x1xf32>
    %108 = vector.broadcast %107 : vector<64x1xf32> to vector<64x256xf32>
    %109 = arith.addf %106, %108 : vector<64x256xf32>
    %cst_44 = arith.constant 0.000000e+00 : f32
    %110 = vector.broadcast %cst_44 : f32 to vector<64x256xf32>
    %111 = arith.maximumf %109, %110 : vector<64x256xf32>
    %112 = arith.truncf %111 : vector<64x256xf32> to vector<64x256xbf16>
    %c0_45 = arith.constant 0 : index
    %c0_46 = arith.constant 0 : index
    %113 = vector.load %arg4[%c0_45, %c0_46] : memref<64x256xbf16, #tpu.memory_space<vmem>>, vector<64x256xbf16>
    tpu.vector_store %arg4[%c0_45, %c0_46], %112 {strides = array<i32>} : memref<64x256xbf16, #tpu.memory_space<vmem>>, vector<64x256xbf16>,
    return
  }
  func.func @transform_0(%arg0: i32) -> (i32, i32) {
    %c0_i32 = arith.constant 0 : i32
    %c0_i32_0 = arith.constant 0 : i32
    return %c0_i32, %arg0 : i32, i32
  }
  func.func @transform_1(%arg0: i32) -> (i32, i32, i32) {
    %c0_i32 = arith.constant 0 : i32
    %c0_i32_0 = arith.constant 0 : i32
    %c0_i32_1 = arith.constant 0 : i32
    %c0_i32_2 = arith.constant 0 : i32
    return %c0_i32, %c0_i32_0, %c0_i32_1 : i32, i32, i32
  }
  func.func @transform_2(%arg0: i32) -> (i32, i32) {
    %c0_i32 = arith.constant 0 : i32
    %c0_i32_0 = arith.constant 0 : i32
    %c0_i32_1 = arith.constant 0 : i32
    return %c0_i32, %c0_i32_0 : i32, i32
  }
  func.func @transform_3(%arg0: i32) -> (i32, i32) {
    %c0_i32 = arith.constant 0 : i32
    %c0_i32_0 = arith.constant 0 : i32
    return %c0_i32, %arg0 : i32, i32
  }
}

module attributes {stable_mosaic.version = 11 : i64} {
  func.func @_conv_s2_kernel(%arg0: i32, %arg1: memref<16x1024xbf16, #tpu.memory_space<vmem>>, %arg2: memref<9x32x16xbf16, #tpu.memory_space<vmem>>, %arg3: memref<32x1xf32, #tpu.memory_space<vmem>>, %arg4: memref<32x1024xbf16, #tpu.memory_space<vmem>>) attributes {dimension_semantics = [#tpu.dimension_semantics<parallel>], iteration_bounds = array<i64: 2>, scalar_prefetch = 0 : i64, scratch_operands = 0 : i64, tpu.core_type = #tpu.core_type<tc>, window_params = [{transform_indices = @transform_0, window_bounds = array<i64: 16, 1024>}, {pipeline_mode = #tpu.pipeline_mode<synchronous>, transform_indices = @transform_1, window_bounds = array<i64: 9, 32, 16>}, {pipeline_mode = #tpu.pipeline_mode<synchronous>, transform_indices = @transform_2, window_bounds = array<i64: 32, 1>}, {transform_indices = @transform_3, window_bounds = array<i64: 32, 1024>}]} {
    %c0 = arith.constant 0 : index
    %c0_0 = arith.constant 0 : index
    %0 = vector.load %arg1[%c0, %c0_0] : memref<16x1024xbf16, #tpu.memory_space<vmem>>, vector<16x1024xbf16>
    %1 = arith.extf %0 : vector<16x1024xbf16> to vector<16x1024xf32>
    %2 = tpu.iota {dimensions = array<i32: 1>} : vector<1x1024xi32>
    %c15_i32 = arith.constant 15 : i32
    %3 = vector.broadcast %c15_i32 : i32 to vector<1x1024xi32>
    %4 = arith.andi %2, %3 : vector<1x1024xi32>
    %c4_i32 = arith.constant 4 : i32
    %5 = vector.broadcast %c4_i32 : i32 to vector<1x1024xi32>
    %6 = arith.shrsi %2, %5 : vector<1x1024xi32>
    %c15_i32_1 = arith.constant 15 : i32
    %7 = vector.broadcast %c15_i32_1 : i32 to vector<1x1024xi32>
    %8 = arith.andi %6, %7 : vector<1x1024xi32>
    %c0_i32 = arith.constant 0 : i32
    %9 = vector.broadcast %c0_i32 : i32 to vector<1x1024xi32>
    %10 = arith.cmpi ne, %8, %9 : vector<1x1024xi32>
    %c15_i32_2 = arith.constant 15 : i32
    %11 = vector.broadcast %c15_i32_2 : i32 to vector<1x1024xi32>
    %12 = arith.cmpi ne, %8, %11 : vector<1x1024xi32>
    %c0_i32_3 = arith.constant 0 : i32
    %13 = vector.broadcast %c0_i32_3 : i32 to vector<1x1024xi32>
    %14 = arith.cmpi ne, %4, %13 : vector<1x1024xi32>
    %c15_i32_4 = arith.constant 15 : i32
    %15 = vector.broadcast %c15_i32_4 : i32 to vector<1x1024xi32>
    %16 = arith.cmpi ne, %4, %15 : vector<1x1024xi32>
    %cst = arith.constant 0.000000e+00 : f32
    %17 = vector.broadcast %cst : f32 to vector<32x1024xf32>
    %c17_i32 = arith.constant 17 : i32
    %18 = tpu.dynamic_rotate %1 by %c17_i32 dim 1 : vector<16x1024xf32>, i32 -> vector<16x1024xf32>
    %19 = arith.andi %10, %14 : vector<1x1024xi1>
    %cst_5 = arith.constant 0.000000e+00 : f32
    %20 = vector.shape_cast %19 : vector<1x1024xi1> to vector<1x1024xi1>
    %21 = vector.broadcast %20 : vector<1x1024xi1> to vector<16x1024xi1>
    %22 = vector.broadcast %cst_5 : f32 to vector<16x1024xf32>
    %23 = arith.select %21, %18, %22 : vector<16x1024xi1>, vector<16x1024xf32>
    %c0_6 = arith.constant 0 : index
    %c0_7 = arith.constant 0 : index
    %c0_8 = arith.constant 0 : index
    %24 = vector.load %arg2[%c0_6, %c0_7, %c0_8] : memref<9x32x16xbf16, #tpu.memory_space<vmem>>, vector<1x32x16xbf16>
    %25 = vector.shape_cast %24 : vector<1x32x16xbf16> to vector<32x16xbf16>
    %26 = arith.truncf %23 : vector<16x1024xf32> to vector<16x1024xbf16>
    %cst_9 = arith.constant dense<0.000000e+00> : vector<32x1024xf32>
    %27 = tpu.matmul %25, %26, %cst_9 {dimension_numbers = #tpu.dot_dimension_numbers<[1], [0], [0], [1], [0, 0, 1, 1], [], []>} : vector<32x16xbf16>, vector<16x1024xbf16>, vector<32x1024xf32> -> vector<32x1024xf32>
    %28 = arith.addf %17, %27 : vector<32x1024xf32>
    %c16_i32 = arith.constant 16 : i32
    %29 = tpu.dynamic_rotate %1 by %c16_i32 dim 1 : vector<16x1024xf32>, i32 -> vector<16x1024xf32>
    %cst_10 = arith.constant 0.000000e+00 : f32
    %30 = vector.shape_cast %10 : vector<1x1024xi1> to vector<1x1024xi1>
    %31 = vector.broadcast %30 : vector<1x1024xi1> to vector<16x1024xi1>
    %32 = vector.broadcast %cst_10 : f32 to vector<16x1024xf32>
    %33 = arith.select %31, %29, %32 : vector<16x1024xi1>, vector<16x1024xf32>
    %c1 = arith.constant 1 : index
    %c0_11 = arith.constant 0 : index
    %c0_12 = arith.constant 0 : index
    %34 = vector.load %arg2[%c1, %c0_11, %c0_12] : memref<9x32x16xbf16, #tpu.memory_space<vmem>>, vector<1x32x16xbf16>
    %35 = vector.shape_cast %34 : vector<1x32x16xbf16> to vector<32x16xbf16>
    %36 = arith.truncf %33 : vector<16x1024xf32> to vector<16x1024xbf16>
    %cst_13 = arith.constant dense<0.000000e+00> : vector<32x1024xf32>
    %37 = tpu.matmul %35, %36, %cst_13 {dimension_numbers = #tpu.dot_dimension_numbers<[1], [0], [0], [1], [0, 0, 1, 1], [], []>} : vector<32x16xbf16>, vector<16x1024xbf16>, vector<32x1024xf32> -> vector<32x1024xf32>
    %38 = arith.addf %28, %37 : vector<32x1024xf32>
    %c15_i32_14 = arith.constant 15 : i32
    %39 = tpu.dynamic_rotate %1 by %c15_i32_14 dim 1 : vector<16x1024xf32>, i32 -> vector<16x1024xf32>
    %40 = arith.andi %10, %16 : vector<1x1024xi1>
    %cst_15 = arith.constant 0.000000e+00 : f32
    %41 = vector.shape_cast %40 : vector<1x1024xi1> to vector<1x1024xi1>
    %42 = vector.broadcast %41 : vector<1x1024xi1> to vector<16x1024xi1>
    %43 = vector.broadcast %cst_15 : f32 to vector<16x1024xf32>
    %44 = arith.select %42, %39, %43 : vector<16x1024xi1>, vector<16x1024xf32>
    %c2 = arith.constant 2 : index
    %c0_16 = arith.constant 0 : index
    %c0_17 = arith.constant 0 : index
    %45 = vector.load %arg2[%c2, %c0_16, %c0_17] : memref<9x32x16xbf16, #tpu.memory_space<vmem>>, vector<1x32x16xbf16>
    %46 = vector.shape_cast %45 : vector<1x32x16xbf16> to vector<32x16xbf16>
    %47 = arith.truncf %44 : vector<16x1024xf32> to vector<16x1024xbf16>
    %cst_18 = arith.constant dense<0.000000e+00> : vector<32x1024xf32>
    %48 = tpu.matmul %46, %47, %cst_18 {dimension_numbers = #tpu.dot_dimension_numbers<[1], [0], [0], [1], [0, 0, 1, 1], [], []>} : vector<32x16xbf16>, vector<16x1024xbf16>, vector<32x1024xf32> -> vector<32x1024xf32>
    %49 = arith.addf %38, %48 : vector<32x1024xf32>
    %c1_i32 = arith.constant 1 : i32
    %50 = tpu.dynamic_rotate %1 by %c1_i32 dim 1 : vector<16x1024xf32>, i32 -> vector<16x1024xf32>
    %cst_19 = arith.constant 0.000000e+00 : f32
    %51 = vector.shape_cast %14 : vector<1x1024xi1> to vector<1x1024xi1>
    %52 = vector.broadcast %51 : vector<1x1024xi1> to vector<16x1024xi1>
    %53 = vector.broadcast %cst_19 : f32 to vector<16x1024xf32>
    %54 = arith.select %52, %50, %53 : vector<16x1024xi1>, vector<16x1024xf32>
    %c3 = arith.constant 3 : index
    %c0_20 = arith.constant 0 : index
    %c0_21 = arith.constant 0 : index
    %55 = vector.load %arg2[%c3, %c0_20, %c0_21] : memref<9x32x16xbf16, #tpu.memory_space<vmem>>, vector<1x32x16xbf16>
    %56 = vector.shape_cast %55 : vector<1x32x16xbf16> to vector<32x16xbf16>
    %57 = arith.truncf %54 : vector<16x1024xf32> to vector<16x1024xbf16>
    %cst_22 = arith.constant dense<0.000000e+00> : vector<32x1024xf32>
    %58 = tpu.matmul %56, %57, %cst_22 {dimension_numbers = #tpu.dot_dimension_numbers<[1], [0], [0], [1], [0, 0, 1, 1], [], []>} : vector<32x16xbf16>, vector<16x1024xbf16>, vector<32x1024xf32> -> vector<32x1024xf32>
    %59 = arith.addf %49, %58 : vector<32x1024xf32>
    %c4 = arith.constant 4 : index
    %c0_23 = arith.constant 0 : index
    %c0_24 = arith.constant 0 : index
    %60 = vector.load %arg2[%c4, %c0_23, %c0_24] : memref<9x32x16xbf16, #tpu.memory_space<vmem>>, vector<1x32x16xbf16>
    %61 = vector.shape_cast %60 : vector<1x32x16xbf16> to vector<32x16xbf16>
    %62 = arith.truncf %1 : vector<16x1024xf32> to vector<16x1024xbf16>
    %cst_25 = arith.constant dense<0.000000e+00> : vector<32x1024xf32>
    %63 = tpu.matmul %61, %62, %cst_25 {dimension_numbers = #tpu.dot_dimension_numbers<[1], [0], [0], [1], [0, 0, 1, 1], [], []>} : vector<32x16xbf16>, vector<16x1024xbf16>, vector<32x1024xf32> -> vector<32x1024xf32>
    %64 = arith.addf %59, %63 : vector<32x1024xf32>
    %c1023_i32 = arith.constant 1023 : i32
    %65 = tpu.dynamic_rotate %1 by %c1023_i32 dim 1 : vector<16x1024xf32>, i32 -> vector<16x1024xf32>
    %cst_26 = arith.constant 0.000000e+00 : f32
    %66 = vector.shape_cast %16 : vector<1x1024xi1> to vector<1x1024xi1>
    %67 = vector.broadcast %66 : vector<1x1024xi1> to vector<16x1024xi1>
    %68 = vector.broadcast %cst_26 : f32 to vector<16x1024xf32>
    %69 = arith.select %67, %65, %68 : vector<16x1024xi1>, vector<16x1024xf32>
    %c5 = arith.constant 5 : index
    %c0_27 = arith.constant 0 : index
    %c0_28 = arith.constant 0 : index
    %70 = vector.load %arg2[%c5, %c0_27, %c0_28] : memref<9x32x16xbf16, #tpu.memory_space<vmem>>, vector<1x32x16xbf16>
    %71 = vector.shape_cast %70 : vector<1x32x16xbf16> to vector<32x16xbf16>
    %72 = arith.truncf %69 : vector<16x1024xf32> to vector<16x1024xbf16>
    %cst_29 = arith.constant dense<0.000000e+00> : vector<32x1024xf32>
    %73 = tpu.matmul %71, %72, %cst_29 {dimension_numbers = #tpu.dot_dimension_numbers<[1], [0], [0], [1], [0, 0, 1, 1], [], []>} : vector<32x16xbf16>, vector<16x1024xbf16>, vector<32x1024xf32> -> vector<32x1024xf32>
    %74 = arith.addf %64, %73 : vector<32x1024xf32>
    %c1009_i32 = arith.constant 1009 : i32
    %75 = tpu.dynamic_rotate %1 by %c1009_i32 dim 1 : vector<16x1024xf32>, i32 -> vector<16x1024xf32>
    %76 = arith.andi %12, %14 : vector<1x1024xi1>
    %cst_30 = arith.constant 0.000000e+00 : f32
    %77 = vector.shape_cast %76 : vector<1x1024xi1> to vector<1x1024xi1>
    %78 = vector.broadcast %77 : vector<1x1024xi1> to vector<16x1024xi1>
    %79 = vector.broadcast %cst_30 : f32 to vector<16x1024xf32>
    %80 = arith.select %78, %75, %79 : vector<16x1024xi1>, vector<16x1024xf32>
    %c6 = arith.constant 6 : index
    %c0_31 = arith.constant 0 : index
    %c0_32 = arith.constant 0 : index
    %81 = vector.load %arg2[%c6, %c0_31, %c0_32] : memref<9x32x16xbf16, #tpu.memory_space<vmem>>, vector<1x32x16xbf16>
    %82 = vector.shape_cast %81 : vector<1x32x16xbf16> to vector<32x16xbf16>
    %83 = arith.truncf %80 : vector<16x1024xf32> to vector<16x1024xbf16>
    %cst_33 = arith.constant dense<0.000000e+00> : vector<32x1024xf32>
    %84 = tpu.matmul %82, %83, %cst_33 {dimension_numbers = #tpu.dot_dimension_numbers<[1], [0], [0], [1], [0, 0, 1, 1], [], []>} : vector<32x16xbf16>, vector<16x1024xbf16>, vector<32x1024xf32> -> vector<32x1024xf32>
    %85 = arith.addf %74, %84 : vector<32x1024xf32>
    %c1008_i32 = arith.constant 1008 : i32
    %86 = tpu.dynamic_rotate %1 by %c1008_i32 dim 1 : vector<16x1024xf32>, i32 -> vector<16x1024xf32>
    %cst_34 = arith.constant 0.000000e+00 : f32
    %87 = vector.shape_cast %12 : vector<1x1024xi1> to vector<1x1024xi1>
    %88 = vector.broadcast %87 : vector<1x1024xi1> to vector<16x1024xi1>
    %89 = vector.broadcast %cst_34 : f32 to vector<16x1024xf32>
    %90 = arith.select %88, %86, %89 : vector<16x1024xi1>, vector<16x1024xf32>
    %c7 = arith.constant 7 : index
    %c0_35 = arith.constant 0 : index
    %c0_36 = arith.constant 0 : index
    %91 = vector.load %arg2[%c7, %c0_35, %c0_36] : memref<9x32x16xbf16, #tpu.memory_space<vmem>>, vector<1x32x16xbf16>
    %92 = vector.shape_cast %91 : vector<1x32x16xbf16> to vector<32x16xbf16>
    %93 = arith.truncf %90 : vector<16x1024xf32> to vector<16x1024xbf16>
    %cst_37 = arith.constant dense<0.000000e+00> : vector<32x1024xf32>
    %94 = tpu.matmul %92, %93, %cst_37 {dimension_numbers = #tpu.dot_dimension_numbers<[1], [0], [0], [1], [0, 0, 1, 1], [], []>} : vector<32x16xbf16>, vector<16x1024xbf16>, vector<32x1024xf32> -> vector<32x1024xf32>
    %95 = arith.addf %85, %94 : vector<32x1024xf32>
    %c1007_i32 = arith.constant 1007 : i32
    %96 = tpu.dynamic_rotate %1 by %c1007_i32 dim 1 : vector<16x1024xf32>, i32 -> vector<16x1024xf32>
    %97 = arith.andi %12, %16 : vector<1x1024xi1>
    %cst_38 = arith.constant 0.000000e+00 : f32
    %98 = vector.shape_cast %97 : vector<1x1024xi1> to vector<1x1024xi1>
    %99 = vector.broadcast %98 : vector<1x1024xi1> to vector<16x1024xi1>
    %100 = vector.broadcast %cst_38 : f32 to vector<16x1024xf32>
    %101 = arith.select %99, %96, %100 : vector<16x1024xi1>, vector<16x1024xf32>
    %c8 = arith.constant 8 : index
    %c0_39 = arith.constant 0 : index
    %c0_40 = arith.constant 0 : index
    %102 = vector.load %arg2[%c8, %c0_39, %c0_40] : memref<9x32x16xbf16, #tpu.memory_space<vmem>>, vector<1x32x16xbf16>
    %103 = vector.shape_cast %102 : vector<1x32x16xbf16> to vector<32x16xbf16>
    %104 = arith.truncf %101 : vector<16x1024xf32> to vector<16x1024xbf16>
    %cst_41 = arith.constant dense<0.000000e+00> : vector<32x1024xf32>
    %105 = tpu.matmul %103, %104, %cst_41 {dimension_numbers = #tpu.dot_dimension_numbers<[1], [0], [0], [1], [0, 0, 1, 1], [], []>} : vector<32x16xbf16>, vector<16x1024xbf16>, vector<32x1024xf32> -> vector<32x1024xf32>
    %106 = arith.addf %95, %105 : vector<32x1024xf32>
    %c0_42 = arith.constant 0 : index
    %c0_43 = arith.constant 0 : index
    %107 = vector.load %arg3[%c0_42, %c0_43] : memref<32x1xf32, #tpu.memory_space<vmem>>, vector<32x1xf32>
    %108 = vector.broadcast %107 : vector<32x1xf32> to vector<32x1024xf32>
    %109 = arith.addf %106, %108 : vector<32x1024xf32>
    %cst_44 = arith.constant 0.000000e+00 : f32
    %110 = vector.broadcast %cst_44 : f32 to vector<32x1024xf32>
    %111 = arith.maximumf %109, %110 : vector<32x1024xf32>
    %112 = arith.truncf %111 : vector<32x1024xf32> to vector<32x1024xbf16>
    %c0_45 = arith.constant 0 : index
    %c0_46 = arith.constant 0 : index
    %113 = vector.load %arg4[%c0_45, %c0_46] : memref<32x1024xbf16, #tpu.memory_space<vmem>>, vector<32x1024xbf16>
    tpu.vector_store %arg4[%c0_45, %c0_46], %112 {strides = array<i32>} : memref<32x1024xbf16, #tpu.memory_space<vmem>>, vector<32x1024xbf16>,
    return
  }
  func.func @transform_0(%arg0: i32) -> (i32, i32) {
    %c0_i32 = arith.constant 0 : i32
    %c0_i32_0 = arith.constant 0 : i32
    return %c0_i32, %arg0 : i32, i32
  }
  func.func @transform_1(%arg0: i32) -> (i32, i32, i32) {
    %c0_i32 = arith.constant 0 : i32
    %c0_i32_0 = arith.constant 0 : i32
    %c0_i32_1 = arith.constant 0 : i32
    %c0_i32_2 = arith.constant 0 : i32
    return %c0_i32, %c0_i32_0, %c0_i32_1 : i32, i32, i32
  }
  func.func @transform_2(%arg0: i32) -> (i32, i32) {
    %c0_i32 = arith.constant 0 : i32
    %c0_i32_0 = arith.constant 0 : i32
    %c0_i32_1 = arith.constant 0 : i32
    return %c0_i32, %c0_i32_0 : i32, i32
  }
  func.func @transform_3(%arg0: i32) -> (i32, i32) {
    %c0_i32 = arith.constant 0 : i32
    %c0_i32_0 = arith.constant 0 : i32
    return %c0_i32, %arg0 : i32, i32
  }
}

module attributes {stable_mosaic.version = 11 : i64} {
  func.func @_conv_s2_kernel(%arg0: i32, %arg1: memref<16x2048xbf16, #tpu.memory_space<vmem>>, %arg2: memref<9x16x16xbf16, #tpu.memory_space<vmem>>, %arg3: memref<16x1xf32, #tpu.memory_space<vmem>>, %arg4: memref<16x2048xf32, #tpu.memory_space<vmem>>) attributes {dimension_semantics = [#tpu.dimension_semantics<parallel>], iteration_bounds = array<i64: 4>, scalar_prefetch = 0 : i64, scratch_operands = 0 : i64, tpu.core_type = #tpu.core_type<tc>, window_params = [{transform_indices = @transform_0, window_bounds = array<i64: 16, 2048>}, {pipeline_mode = #tpu.pipeline_mode<synchronous>, transform_indices = @transform_1, window_bounds = array<i64: 9, 16, 16>}, {pipeline_mode = #tpu.pipeline_mode<synchronous>, transform_indices = @transform_2, window_bounds = array<i64: 16, 1>}, {transform_indices = @transform_3, window_bounds = array<i64: 16, 2048>}]} {
    %c0 = arith.constant 0 : index
    %c0_0 = arith.constant 0 : index
    %0 = vector.load %arg1[%c0, %c0_0] : memref<16x2048xbf16, #tpu.memory_space<vmem>>, vector<16x2048xbf16>
    %1 = arith.extf %0 : vector<16x2048xbf16> to vector<16x2048xf32>
    %2 = tpu.iota {dimensions = array<i32: 1>} : vector<1x2048xi32>
    %c31_i32 = arith.constant 31 : i32
    %3 = vector.broadcast %c31_i32 : i32 to vector<1x2048xi32>
    %4 = arith.andi %2, %3 : vector<1x2048xi32>
    %c5_i32 = arith.constant 5 : i32
    %5 = vector.broadcast %c5_i32 : i32 to vector<1x2048xi32>
    %6 = arith.shrsi %2, %5 : vector<1x2048xi32>
    %c31_i32_1 = arith.constant 31 : i32
    %7 = vector.broadcast %c31_i32_1 : i32 to vector<1x2048xi32>
    %8 = arith.andi %6, %7 : vector<1x2048xi32>
    %c0_i32 = arith.constant 0 : i32
    %9 = vector.broadcast %c0_i32 : i32 to vector<1x2048xi32>
    %10 = arith.cmpi ne, %8, %9 : vector<1x2048xi32>
    %c31_i32_2 = arith.constant 31 : i32
    %11 = vector.broadcast %c31_i32_2 : i32 to vector<1x2048xi32>
    %12 = arith.cmpi ne, %8, %11 : vector<1x2048xi32>
    %c0_i32_3 = arith.constant 0 : i32
    %13 = vector.broadcast %c0_i32_3 : i32 to vector<1x2048xi32>
    %14 = arith.cmpi ne, %4, %13 : vector<1x2048xi32>
    %c31_i32_4 = arith.constant 31 : i32
    %15 = vector.broadcast %c31_i32_4 : i32 to vector<1x2048xi32>
    %16 = arith.cmpi ne, %4, %15 : vector<1x2048xi32>
    %cst = arith.constant 0.000000e+00 : f32
    %17 = vector.broadcast %cst : f32 to vector<16x2048xf32>
    %c33_i32 = arith.constant 33 : i32
    %18 = tpu.dynamic_rotate %1 by %c33_i32 dim 1 : vector<16x2048xf32>, i32 -> vector<16x2048xf32>
    %19 = arith.andi %10, %14 : vector<1x2048xi1>
    %cst_5 = arith.constant 0.000000e+00 : f32
    %20 = vector.shape_cast %19 : vector<1x2048xi1> to vector<1x2048xi1>
    %21 = vector.broadcast %20 : vector<1x2048xi1> to vector<16x2048xi1>
    %22 = vector.broadcast %cst_5 : f32 to vector<16x2048xf32>
    %23 = arith.select %21, %18, %22 : vector<16x2048xi1>, vector<16x2048xf32>
    %c0_6 = arith.constant 0 : index
    %c0_7 = arith.constant 0 : index
    %c0_8 = arith.constant 0 : index
    %24 = vector.load %arg2[%c0_6, %c0_7, %c0_8] : memref<9x16x16xbf16, #tpu.memory_space<vmem>>, vector<1x16x16xbf16>
    %25 = vector.shape_cast %24 : vector<1x16x16xbf16> to vector<16x16xbf16>
    %26 = arith.truncf %23 : vector<16x2048xf32> to vector<16x2048xbf16>
    %cst_9 = arith.constant dense<0.000000e+00> : vector<16x2048xf32>
    %27 = tpu.matmul %25, %26, %cst_9 {dimension_numbers = #tpu.dot_dimension_numbers<[1], [0], [0], [1], [0, 0, 1, 1], [], []>} : vector<16x16xbf16>, vector<16x2048xbf16>, vector<16x2048xf32> -> vector<16x2048xf32>
    %28 = arith.addf %17, %27 : vector<16x2048xf32>
    %c32_i32 = arith.constant 32 : i32
    %29 = tpu.dynamic_rotate %1 by %c32_i32 dim 1 : vector<16x2048xf32>, i32 -> vector<16x2048xf32>
    %cst_10 = arith.constant 0.000000e+00 : f32
    %30 = vector.shape_cast %10 : vector<1x2048xi1> to vector<1x2048xi1>
    %31 = vector.broadcast %30 : vector<1x2048xi1> to vector<16x2048xi1>
    %32 = vector.broadcast %cst_10 : f32 to vector<16x2048xf32>
    %33 = arith.select %31, %29, %32 : vector<16x2048xi1>, vector<16x2048xf32>
    %c1 = arith.constant 1 : index
    %c0_11 = arith.constant 0 : index
    %c0_12 = arith.constant 0 : index
    %34 = vector.load %arg2[%c1, %c0_11, %c0_12] : memref<9x16x16xbf16, #tpu.memory_space<vmem>>, vector<1x16x16xbf16>
    %35 = vector.shape_cast %34 : vector<1x16x16xbf16> to vector<16x16xbf16>
    %36 = arith.truncf %33 : vector<16x2048xf32> to vector<16x2048xbf16>
    %cst_13 = arith.constant dense<0.000000e+00> : vector<16x2048xf32>
    %37 = tpu.matmul %35, %36, %cst_13 {dimension_numbers = #tpu.dot_dimension_numbers<[1], [0], [0], [1], [0, 0, 1, 1], [], []>} : vector<16x16xbf16>, vector<16x2048xbf16>, vector<16x2048xf32> -> vector<16x2048xf32>
    %38 = arith.addf %28, %37 : vector<16x2048xf32>
    %c31_i32_14 = arith.constant 31 : i32
    %39 = tpu.dynamic_rotate %1 by %c31_i32_14 dim 1 : vector<16x2048xf32>, i32 -> vector<16x2048xf32>
    %40 = arith.andi %10, %16 : vector<1x2048xi1>
    %cst_15 = arith.constant 0.000000e+00 : f32
    %41 = vector.shape_cast %40 : vector<1x2048xi1> to vector<1x2048xi1>
    %42 = vector.broadcast %41 : vector<1x2048xi1> to vector<16x2048xi1>
    %43 = vector.broadcast %cst_15 : f32 to vector<16x2048xf32>
    %44 = arith.select %42, %39, %43 : vector<16x2048xi1>, vector<16x2048xf32>
    %c2 = arith.constant 2 : index
    %c0_16 = arith.constant 0 : index
    %c0_17 = arith.constant 0 : index
    %45 = vector.load %arg2[%c2, %c0_16, %c0_17] : memref<9x16x16xbf16, #tpu.memory_space<vmem>>, vector<1x16x16xbf16>
    %46 = vector.shape_cast %45 : vector<1x16x16xbf16> to vector<16x16xbf16>
    %47 = arith.truncf %44 : vector<16x2048xf32> to vector<16x2048xbf16>
    %cst_18 = arith.constant dense<0.000000e+00> : vector<16x2048xf32>
    %48 = tpu.matmul %46, %47, %cst_18 {dimension_numbers = #tpu.dot_dimension_numbers<[1], [0], [0], [1], [0, 0, 1, 1], [], []>} : vector<16x16xbf16>, vector<16x2048xbf16>, vector<16x2048xf32> -> vector<16x2048xf32>
    %49 = arith.addf %38, %48 : vector<16x2048xf32>
    %c1_i32 = arith.constant 1 : i32
    %50 = tpu.dynamic_rotate %1 by %c1_i32 dim 1 : vector<16x2048xf32>, i32 -> vector<16x2048xf32>
    %cst_19 = arith.constant 0.000000e+00 : f32
    %51 = vector.shape_cast %14 : vector<1x2048xi1> to vector<1x2048xi1>
    %52 = vector.broadcast %51 : vector<1x2048xi1> to vector<16x2048xi1>
    %53 = vector.broadcast %cst_19 : f32 to vector<16x2048xf32>
    %54 = arith.select %52, %50, %53 : vector<16x2048xi1>, vector<16x2048xf32>
    %c3 = arith.constant 3 : index
    %c0_20 = arith.constant 0 : index
    %c0_21 = arith.constant 0 : index
    %55 = vector.load %arg2[%c3, %c0_20, %c0_21] : memref<9x16x16xbf16, #tpu.memory_space<vmem>>, vector<1x16x16xbf16>
    %56 = vector.shape_cast %55 : vector<1x16x16xbf16> to vector<16x16xbf16>
    %57 = arith.truncf %54 : vector<16x2048xf32> to vector<16x2048xbf16>
    %cst_22 = arith.constant dense<0.000000e+00> : vector<16x2048xf32>
    %58 = tpu.matmul %56, %57, %cst_22 {dimension_numbers = #tpu.dot_dimension_numbers<[1], [0], [0], [1], [0, 0, 1, 1], [], []>} : vector<16x16xbf16>, vector<16x2048xbf16>, vector<16x2048xf32> -> vector<16x2048xf32>
    %59 = arith.addf %49, %58 : vector<16x2048xf32>
    %c4 = arith.constant 4 : index
    %c0_23 = arith.constant 0 : index
    %c0_24 = arith.constant 0 : index
    %60 = vector.load %arg2[%c4, %c0_23, %c0_24] : memref<9x16x16xbf16, #tpu.memory_space<vmem>>, vector<1x16x16xbf16>
    %61 = vector.shape_cast %60 : vector<1x16x16xbf16> to vector<16x16xbf16>
    %62 = arith.truncf %1 : vector<16x2048xf32> to vector<16x2048xbf16>
    %cst_25 = arith.constant dense<0.000000e+00> : vector<16x2048xf32>
    %63 = tpu.matmul %61, %62, %cst_25 {dimension_numbers = #tpu.dot_dimension_numbers<[1], [0], [0], [1], [0, 0, 1, 1], [], []>} : vector<16x16xbf16>, vector<16x2048xbf16>, vector<16x2048xf32> -> vector<16x2048xf32>
    %64 = arith.addf %59, %63 : vector<16x2048xf32>
    %c2047_i32 = arith.constant 2047 : i32
    %65 = tpu.dynamic_rotate %1 by %c2047_i32 dim 1 : vector<16x2048xf32>, i32 -> vector<16x2048xf32>
    %cst_26 = arith.constant 0.000000e+00 : f32
    %66 = vector.shape_cast %16 : vector<1x2048xi1> to vector<1x2048xi1>
    %67 = vector.broadcast %66 : vector<1x2048xi1> to vector<16x2048xi1>
    %68 = vector.broadcast %cst_26 : f32 to vector<16x2048xf32>
    %69 = arith.select %67, %65, %68 : vector<16x2048xi1>, vector<16x2048xf32>
    %c5 = arith.constant 5 : index
    %c0_27 = arith.constant 0 : index
    %c0_28 = arith.constant 0 : index
    %70 = vector.load %arg2[%c5, %c0_27, %c0_28] : memref<9x16x16xbf16, #tpu.memory_space<vmem>>, vector<1x16x16xbf16>
    %71 = vector.shape_cast %70 : vector<1x16x16xbf16> to vector<16x16xbf16>
    %72 = arith.truncf %69 : vector<16x2048xf32> to vector<16x2048xbf16>
    %cst_29 = arith.constant dense<0.000000e+00> : vector<16x2048xf32>
    %73 = tpu.matmul %71, %72, %cst_29 {dimension_numbers = #tpu.dot_dimension_numbers<[1], [0], [0], [1], [0, 0, 1, 1], [], []>} : vector<16x16xbf16>, vector<16x2048xbf16>, vector<16x2048xf32> -> vector<16x2048xf32>
    %74 = arith.addf %64, %73 : vector<16x2048xf32>
    %c2017_i32 = arith.constant 2017 : i32
    %75 = tpu.dynamic_rotate %1 by %c2017_i32 dim 1 : vector<16x2048xf32>, i32 -> vector<16x2048xf32>
    %76 = arith.andi %12, %14 : vector<1x2048xi1>
    %cst_30 = arith.constant 0.000000e+00 : f32
    %77 = vector.shape_cast %76 : vector<1x2048xi1> to vector<1x2048xi1>
    %78 = vector.broadcast %77 : vector<1x2048xi1> to vector<16x2048xi1>
    %79 = vector.broadcast %cst_30 : f32 to vector<16x2048xf32>
    %80 = arith.select %78, %75, %79 : vector<16x2048xi1>, vector<16x2048xf32>
    %c6 = arith.constant 6 : index
    %c0_31 = arith.constant 0 : index
    %c0_32 = arith.constant 0 : index
    %81 = vector.load %arg2[%c6, %c0_31, %c0_32] : memref<9x16x16xbf16, #tpu.memory_space<vmem>>, vector<1x16x16xbf16>
    %82 = vector.shape_cast %81 : vector<1x16x16xbf16> to vector<16x16xbf16>
    %83 = arith.truncf %80 : vector<16x2048xf32> to vector<16x2048xbf16>
    %cst_33 = arith.constant dense<0.000000e+00> : vector<16x2048xf32>
    %84 = tpu.matmul %82, %83, %cst_33 {dimension_numbers = #tpu.dot_dimension_numbers<[1], [0], [0], [1], [0, 0, 1, 1], [], []>} : vector<16x16xbf16>, vector<16x2048xbf16>, vector<16x2048xf32> -> vector<16x2048xf32>
    %85 = arith.addf %74, %84 : vector<16x2048xf32>
    %c2016_i32 = arith.constant 2016 : i32
    %86 = tpu.dynamic_rotate %1 by %c2016_i32 dim 1 : vector<16x2048xf32>, i32 -> vector<16x2048xf32>
    %cst_34 = arith.constant 0.000000e+00 : f32
    %87 = vector.shape_cast %12 : vector<1x2048xi1> to vector<1x2048xi1>
    %88 = vector.broadcast %87 : vector<1x2048xi1> to vector<16x2048xi1>
    %89 = vector.broadcast %cst_34 : f32 to vector<16x2048xf32>
    %90 = arith.select %88, %86, %89 : vector<16x2048xi1>, vector<16x2048xf32>
    %c7 = arith.constant 7 : index
    %c0_35 = arith.constant 0 : index
    %c0_36 = arith.constant 0 : index
    %91 = vector.load %arg2[%c7, %c0_35, %c0_36] : memref<9x16x16xbf16, #tpu.memory_space<vmem>>, vector<1x16x16xbf16>
    %92 = vector.shape_cast %91 : vector<1x16x16xbf16> to vector<16x16xbf16>
    %93 = arith.truncf %90 : vector<16x2048xf32> to vector<16x2048xbf16>
    %cst_37 = arith.constant dense<0.000000e+00> : vector<16x2048xf32>
    %94 = tpu.matmul %92, %93, %cst_37 {dimension_numbers = #tpu.dot_dimension_numbers<[1], [0], [0], [1], [0, 0, 1, 1], [], []>} : vector<16x16xbf16>, vector<16x2048xbf16>, vector<16x2048xf32> -> vector<16x2048xf32>
    %95 = arith.addf %85, %94 : vector<16x2048xf32>
    %c2015_i32 = arith.constant 2015 : i32
    %96 = tpu.dynamic_rotate %1 by %c2015_i32 dim 1 : vector<16x2048xf32>, i32 -> vector<16x2048xf32>
    %97 = arith.andi %12, %16 : vector<1x2048xi1>
    %cst_38 = arith.constant 0.000000e+00 : f32
    %98 = vector.shape_cast %97 : vector<1x2048xi1> to vector<1x2048xi1>
    %99 = vector.broadcast %98 : vector<1x2048xi1> to vector<16x2048xi1>
    %100 = vector.broadcast %cst_38 : f32 to vector<16x2048xf32>
    %101 = arith.select %99, %96, %100 : vector<16x2048xi1>, vector<16x2048xf32>
    %c8 = arith.constant 8 : index
    %c0_39 = arith.constant 0 : index
    %c0_40 = arith.constant 0 : index
    %102 = vector.load %arg2[%c8, %c0_39, %c0_40] : memref<9x16x16xbf16, #tpu.memory_space<vmem>>, vector<1x16x16xbf16>
    %103 = vector.shape_cast %102 : vector<1x16x16xbf16> to vector<16x16xbf16>
    %104 = arith.truncf %101 : vector<16x2048xf32> to vector<16x2048xbf16>
    %cst_41 = arith.constant dense<0.000000e+00> : vector<16x2048xf32>
    %105 = tpu.matmul %103, %104, %cst_41 {dimension_numbers = #tpu.dot_dimension_numbers<[1], [0], [0], [1], [0, 0, 1, 1], [], []>} : vector<16x16xbf16>, vector<16x2048xbf16>, vector<16x2048xf32> -> vector<16x2048xf32>
    %106 = arith.addf %95, %105 : vector<16x2048xf32>
    %c0_42 = arith.constant 0 : index
    %c0_43 = arith.constant 0 : index
    %107 = vector.load %arg3[%c0_42, %c0_43] : memref<16x1xf32, #tpu.memory_space<vmem>>, vector<16x1xf32>
    %108 = vector.broadcast %107 : vector<16x1xf32> to vector<16x2048xf32>
    %109 = arith.addf %106, %108 : vector<16x2048xf32>
    %110 = math.tanh %109 : vector<16x2048xf32>
    %c0_44 = arith.constant 0 : index
    %c0_45 = arith.constant 0 : index
    %111 = vector.load %arg4[%c0_44, %c0_45] : memref<16x2048xf32, #tpu.memory_space<vmem>>, vector<16x2048xf32>
    tpu.vector_store %arg4[%c0_44, %c0_45], %110 {strides = array<i32>} : memref<16x2048xf32, #tpu.memory_space<vmem>>, vector<16x2048xf32>,
    return
  }
  func.func @transform_0(%arg0: i32) -> (i32, i32) {
    %c0_i32 = arith.constant 0 : i32
    %c0_i32_0 = arith.constant 0 : i32
    return %c0_i32, %arg0 : i32, i32
  }
  func.func @transform_1(%arg0: i32) -> (i32, i32, i32) {
    %c0_i32 = arith.constant 0 : i32
    %c0_i32_0 = arith.constant 0 : i32
    %c0_i32_1 = arith.constant 0 : i32
    %c0_i32_2 = arith.constant 0 : i32
    return %c0_i32, %c0_i32_0, %c0_i32_1 : i32, i32, i32
  }
  func.func @transform_2(%arg0: i32) -> (i32, i32) {
    %c0_i32 = arith.constant 0 : i32
    %c0_i32_0 = arith.constant 0 : i32
    %c0_i32_1 = arith.constant 0 : i32
    return %c0_i32, %c0_i32_0 : i32, i32
  }
  func.func @transform_3(%arg0: i32) -> (i32, i32) {
    %c0_i32 = arith.constant 0 : i32
    %c0_i32_0 = arith.constant 0 : i32
    return %c0_i32, %arg0 : i32, i32
  }
}

</mosaic_0001>

<bundles_post_ra>
// kernel: _lambda_.5
= control target key start
LH: loop header
LB: loop body
LE: loop exit
PB: predicated region body
PF: predicated region fallthrough
CT: control target
= control target key end

     0   :  { %8 = vsyncpa [#allocation3], 0  ;;  %s1037_s0 = inlined_call_operand.hbm [shape: bf16[8,8], index: 0, kind: input, shape index: {}]   ;;  %s1038_s1 = inlined_call_operand.hbm [shape: bf16[8,1024], index: 1, kind: input, shape index: {}]   ;;  %s1039_s2 = inlined_call_operand.hbm [shape: f32[1,1024], index: 2, kind: input, shape index: {}]   ;;  %s1040_s3 = inlined_call_operand.hbm [shape: bf16[8,1024], index: 3, kind: output, shape index: {}]  }
   0x1   :  { %9 = vsyncpa [#allocation6], 0 }
   0x2   :  { %11 = vsyncpa [#allocation6 + $0x1], 0 }
   0x3   :  { %12 = vsyncpa [#allocation4], 0 }
   0x4   :  { %14 = vsyncpa [#allocation4 + $0x1], 0  ;;  %s799_s12 = smov 0   ;;  %s801_s13 = smov 0  }
   0x5   :  { %s803_s14 = smov 0   ;;  %s805_s15 = smov 0  }
   0x6 LB: > { %s820_s16 = sadd.s32 1, %s772_s15   ;;  %s48_s17 = sadd.s32 1, %s768_s14  ;;  %s772_s15 = sphi %s805_s15, %s1063_s15   ;;  %s768_s14 = sphi %s803_s14, %s1062_s14   ;;  %s764_s13 = sphi %s801_s13, %s1061_s13   ;;  %s760_s12 = sphi %s799_s12, %s1060_s12  }
   0x7   : > { %s45_s18 = ssub.s32 %s772_s15, %s820_s16  ;;  %p55_p0 = scmp.ne.s32.totalorder %s768_s14, %s764_s13 }
   0x8   : > { %p46_p1 = scmp.eq.s32.totalorder %s45_s18, 0  ;;  %p56_p2 = scmp.eq.s32.totalorder %s772_s15, 0 }
   0x9   : > { %p573_p4 = scmp.lt.s32.totalorder %s772_s15, 2  ;;  %s148_s20 = sand.u32 1, %s772_s15  }
   0xa   : > { %s831_s19 = scalar_select %p46_p1, %s768_s14, %s48_s17  }
   0xb   : > { %p57_p5 = por %p56_p2, %p55_p0  ;;  %s150_s21 = sand.u32 1, %s768_s14  }
   0xc   : > { %s516_s22 = sshll.u32 %s150_s21, 4  ;;  %s542_s23 = sshll.u32 %s772_s15, 8 }
   0xd   : > { %s842_s26 = scalar_lea.hbm %s1038_s1, %s542_s23  ;;  %s152_s27 = scalar_lea.vmem [#allocation5], %s516_s22 }
   0xe   : > { %s160_s28 = sshll.u32 %s152_s27, 4  ;;  %p844_p6 = pnand %p573_p4, %p57_p5  ;;  %s848_s28 = int_to_ptr.vmem [resolvable:$true] %s160_s28 }
   0xf   : > { %s850_s30 = sshll.u32 %s150_s21, 2  ;;  %s852_s4 = scalar_lea.sflag [#allocation6], %s148_s20 }
  0x10   : > { %s614_s5 = scalar_lea.hbm %s842_s26, 256  ;;  %p616_p8 = pneg %p844_p6 }
  0x11   : > { %p615_p7 = scmp.ne.s32.totalorder %s842_s26, %s614_s5  ;;  %s619_s8 = scalar_lea.hbm %s1038_s1, 512 }
  0x12   : > { %p620_p11 = scmp.lt.u32.totalorder %s842_s26, %s1038_s1  ;;  %p621_p12 = scmp.lt.u32.totalorder %s619_s8, %s614_s5 }
  0x13   : > { %p617_p9 = pnand %p616_p8, %p615_p7  ;;  %p623_p1 = scmp.lt.u32.totalorder %s614_s5, %s842_s26 }
  0x14   : > { %p622_p13 = por %p621_p12, %p620_p11 }
  0x15   : > { %p618_p10 = pneg %p617_p9 }
  0x16   : > { %p624_p2 = por %p623_p1, %p622_p13 }
  0x18   : > { %p625_p4 = pnand %p624_p2, %p618_p10 }
  0x1a   : > { %628 = shalt.err (!%p625_p4)
}
  0x1b   : > { %s629_s11 = scalar_lea.vmem %s848_s28, 256  ;;  %s774_s17 = smov [#allocation5]  }
  0x1c   : > { %p630_p5 = scmp.ne.s32.totalorder %s848_s28, %s629_s11  ;;  %s634_s18 = sshll.u32 %s774_s17, 4  ;;  %s635_s18 = int_to_ptr.vmem [resolvable:$false] %s634_s18 }
  0x1d   : > { %s636_s20 = scalar_lea.vmem %s635_s18, 512  ;;  %p637_p3 = scmp.lt.s32.totalorder %s848_s28, %s635_s18 }
  0x1e   : > { %p632_p7 = pnand %p630_p5, %p616_p8  ;;  %p638_p11 = scmp.lt.s32.totalorder %s636_s20, %s629_s11 }
  0x20   : > { %p633_p9 = pneg %p632_p7  ;;  %p639_p12 = por %p638_p11, %p637_p3 }
  0x22   : > { %p640_p13 = pnand %p639_p12, %p633_p9 }
  0x24   : > { %643 = shalt.err (!%p640_p13)
}
  0x25   : > { %564 = dma.hbm_to_vmem [thread:$0]  (!%p844_p6), %s842_s26, 256, %s848_s28, %s852_s4  }
  0x26   : > { %s881_s21 = sadd.s32 4294967295, %s772_s15   ;;  %s512_s22 = sadd.s32 4294967294, %s772_s15  }
  0x27   : > { %p61_p3 = scmp.ne.s32.totalorder %s764_s13, %s760_s12  ;;  %p1041_p10 = scmp.eq.s32.totalorder %s881_s21, 0 }
  0x28   : > { %p111_p1 = scmp.eq.s32.totalorder %s881_s21, 1  ;;  %p117_p2 = scmp.eq.s32.totalorder %s512_s22, 1 }
  0x29   : > { %p513_p4 = scmp.ge.s32.totalorder %s772_s15, 1  ;;  %p891_p5 = por %p1041_p10, %p61_p3 }
  0x2a   : > { %p898_p7 = por %p111_p1, %p55_p0  ;;  %p902_p9 = por %p117_p2, %p61_p3 }
  0x2b   : > { %s1047_s23 = scalar_select %p891_p5, 1, 0 }
  0x2c   : > { %s1048_s24 = scalar_select %p898_p7, 1, 0 }
  0x2d   : > { %s1049_s25 = scalar_select %p902_p9, 1, 0 }
  0x2e   : > { %p124_p11 = scmp.lt.s32.totalorder %s772_s15, 3  ;;  %s775_s27 = smov [#allocation2]  }
  0x2f   : > { %s137_s28 = sshll.u32 %s775_s27, 4  ;;  %s543_s5 = sshll.u32 %s772_s15, 6  ;;  %s911_s28 = int_to_ptr.vmem [resolvable:$true] %s137_s28 }
  0x30   : > { %p907_p12 = pnand %p513_p4, %p124_p11  ;;  %s919_s8 = scalar_lea.hbm %s1039_s2, %s543_s5 }
  0x31   : > { %s171_s9 = scalar_lea.vmem [#allocation7], %s850_s30  ;;  %s644_s17 = scalar_lea.hbm %s919_s8, 64 }
  0x32   : > { %s1050_s26 = scalar_select %p907_p12, 1, 0 }
  0x33   : > { %p557_p0 = pneg %p907_p12  ;;  %s179_s10 = sshll.u32 %s171_s9, 4  ;;  %s180_s10 = int_to_ptr.vmem [resolvable:$true] %s179_s10 }
  0x34   : > { %p645_p3 = scmp.ne.s32.totalorder %s919_s8, %s644_s17  ;;  %s649_s22 = scalar_lea.hbm %s1039_s2, 128 }
  0x35   : > { %p924_p13 = pnand %p557_p0, %p1041_p10  ;;  %p650_p4 = scmp.lt.u32.totalorder %s919_s8, %s1039_s2 }
  0x36   : > { %p647_p1 = pnand %p645_p3, %p616_p8  ;;  %p651_p11 = scmp.lt.u32.totalorder %s649_s22, %s644_s17 }
  0x37   : > { %s1051_s11 = scalar_select %p924_p13, 1, 0 }
  0x38   : > { %p648_p2 = pneg %p647_p1  ;;  %p652_p0 = por %p651_p11, %p650_p4 }
  0x39   : > { %p653_p10 = scmp.lt.u32.totalorder %s644_s17, %s919_s8 }
  0x3b   : > { %p654_p9 = por %p653_p10, %p652_p0 }
  0x3d   : > { %p655_p7 = pnand %p654_p9, %p648_p2 }
  0x3f   : > { %658 = shalt.err (!%p655_p7)
}
  0x40   : > { %s659_s30 = scalar_lea.vmem %s180_s10, 64  ;;  %s776_s6 = smov [#allocation7]  }
  0x41   : > { %p660_p5 = scmp.ne.s32.totalorder %s180_s10, %s659_s30  ;;  %s664_s7 = sshll.u32 %s776_s6, 4  ;;  %s665_s7 = int_to_ptr.vmem [resolvable:$false] %s664_s7 }
  0x42   : > { %s666_s9 = scalar_lea.vmem %s665_s7, 128  ;;  %p667_p12 = scmp.lt.s32.totalorder %s180_s10, %s665_s7 }
  0x43   : > { %p662_p3 = pnand %p660_p5, %p616_p8  ;;  %p668_p13 = scmp.lt.s32.totalorder %s666_s9, %s659_s30 }
  0x45   : > { %p663_p1 = pneg %p662_p3  ;;  %p669_p4 = por %p668_p13, %p667_p12 }
  0x47   : > { %p670_p11 = pnand %p669_p4, %p663_p1 }
  0x49   : > { %673 = shalt.err (!%p670_p11)
}
  0x4a   : > { %567 = dma.hbm_to_vmem [thread:$0]  (!%p844_p6), %s919_s8, 64, %s180_s10, %s852_s4  }
  0x4b   : > { %s674_s20 = scalar_lea.hbm %s1037_s0, 64  ;;  %p1052_p10 = scmp.ne.s32.totalorder %s1051_s11, 0 }
  0x4c   : > { %p675_p8 = scmp.ne.s32.totalorder %s1037_s0, %s674_s20  ;;  %p681_p12 = scmp.lt.u32.totalorder %s674_s20, %s1037_s0 }
  0x4d   : > { %p676_p5 = pneg %p1052_p10 }
  0x4f   : > { %p677_p7 = pnand %p676_p5, %p675_p8 }
  0x51   : > { %p678_p9 = pneg %p677_p7 }
  0x53   : > { %p683_p13 = pnand %p681_p12, %p678_p9 }
  0x55   : > { %686 = shalt.err (!%p683_p13)
}
  0x56   : > { %s687_s29 = scalar_lea.vmem %s911_s28, 64  ;;  %p695_p3 = scmp.lt.s32.totalorder %s911_s28, %s911_s28 }
  0x57   : > { %p688_p6 = scmp.ne.s32.totalorder %s911_s28, %s687_s29  ;;  %p696_p1 = scmp.lt.s32.totalorder %s687_s29, %s687_s29 }
  0x59   : > { %p690_p2 = pnand %p688_p6, %p676_p5  ;;  %p697_p4 = por %p696_p1, %p695_p3 }
  0x5b   : > { %p691_p0 = pneg %p690_p2 }
  0x5d   : > { %p698_p11 = pnand %p697_p4, %p691_p0 }
  0x5f   : > { %701 = shalt.err (!%p698_p11)
}
  0x60   : > { %560 = dma.hbm_to_vmem [thread:$0]  (!%p1052_p10), %s1037_s0, 64, %s911_s28, [#allocation3]  }
  0x61   : > { %p1053_p8 = scmp.ne.s32.totalorder %s1050_s26, 0 }
  0x62   : > { %p1054_p7 = scmp.eq.s32.totalorder (!%p1053_p8), %s881_s21, 0 }
  0x63   : > { %188 = sbr.rel (%p1053_p8) target bundleno = 353 (0x161), region = 32 }
  0x6a   : > { %747 = dma.done.wait (%p1054_p7), [#allocation3], 64   ;;  %p1055_p5 = pmov %p1054_p7 }
  0x6b   : > { %s194_s10 = sand.u32 1, %s881_s21   ;;  %s977_s6 = sand.u32 1, %s764_s13  }
  0x6c   : > { %749 = vsyncadd (%p1055_p5), [#allocation3], 4294967232  ;;  %s524_s11 = sshll.u32 %s977_s6, 4  ;;  %s195_s7 = scalar_lea.sflag [#allocation6], %s194_s10 }
  0x6d   : > { %s198_s28 = scalar_lea.vmem [#allocation5], %s524_s11  ;;  %p1056_p10 = scmp.ne.s32.totalorder %s1047_s23, 0 }
  0x6f   : > { %751 = dma.done.wait (%p1056_p10), %s195_s7, 320  }
  0x70   : > { %753 = vsyncadd (%p1056_p10), %s195_s7, 4294966976  ;;  %v777_v0 = vmov 0   ;;  %v240_v1 = vld [vmem:[%s198_s28] sm:$0xff]  ;;  %vm278_vm0 = vcmask 1043456   ;;  %v241_v2 = vld [vmem:[%s198_s28 + $0x8] sm:$0xff]  ;;  %vm274_vm1 = vcmask 64512   ;;  %v244_v10 = vlaneseq }
  0x71   : > { %323 = vmatprep.mubr.bf16.mxu0 %v777_v0  ;;  %364 = vmatprep.mubr.bf16.mxu1 %v777_v0  ;;  %v528_v3 = vcombine.high %v240_v1, %v240_v1  ;;  %v530_v4 = vcombine.high %v241_v2, %v241_v2  ;;  %v527_v5 = vcombine.low %v240_v1, %v240_v1  ;;  %v239_v9 = vld [vmem:[#allocation2] sm:$0xf]  ;;  %s525_s23 = sshll.u32 %s977_s6, 2  ;;  %s546_s9 = sshll.u32 %s881_s21, 8 }
  0x72   : > { %v529_v6 = vcombine.low %v241_v2, %v241_v2  ;;  %v245_v11 = vshrl.u32 %v244_v10, 7  ;;  %s207_s26 = scalar_lea.vmem [#allocation7], %s525_s23  ;;  %s234_s17 = scalar_lea.vmem [#allocation8], %s524_s11 }
  0x73   : > { %531 = vmatprep.subr.msk.bf16.mxu0 %vm278_vm0, %v528_v3  ;;  %533 = vmatprep.subr.msk.bf16.mxu1 %vm278_vm0, %v530_v4  ;;  %v280_v7 = vsel %vm278_vm0, %v527_v5, 0  ;;  %v242_v14 = vld [vmem:[%s207_s26] sm:$0xf]  ;;  %s410_s18 = sshll.u32 %s234_s17, 4  ;;  %s993_s27 = scalar_lea.hbm %s1040_s3, %s546_s9  ;;  %s995_s18 = int_to_ptr.vmem [resolvable:$true] %s410_s18 }
  0x74   : > { %v286_v8 = vsel %vm278_vm0, %v529_v6, 0  ;;  %292 = vmatpush1.bf16.msra.mxu0 %v280_v7  ;;  %v246_v12 = vsub.s32 0, %v245_v11  ;;  %v254_v13 = vsub.s32 2, %v245_v11  ;;  %v250_v15 = vsub.s32 1, %v245_v11  ;;  %s396_s21 = scalar_lea.sflag [#allocation4], %s977_s6  ;;  %s702_s5 = scalar_lea.vmem %s995_s18, 256 }
  0x75   : > { %333 = vmatpush1.bf16.msra.mxu1 %v286_v8  ;;  %v258_v16 = vsub.s32 3, %v245_v11  ;;  %p703_p9 = scmp.ne.s32.totalorder %s995_s18, %s702_s5  ;;  %p1057_p12 = scmp.ne.s32.totalorder %s1048_s24, 0 }
  0x76   : > { %v247_v17 = vrot.slane %v242_v14, %v246_v12  ;;  %v255_v18 = vrot.slane %v242_v14, %v254_v13  ;;  %v251_v19 = vrot.slane %v242_v14, %v250_v15  ;;  %s778_s30 = smov [#allocation8]  }
  0x77   : > { %532 = vmatmul.mubr.msk.bf16.vlgmr.msra.gmra.mrb[0].mxu0 %vm274_vm1, %v239_v9  ;;  %v259_v20 = vrot.slane %v242_v14, %v258_v16  ;;  %p704_p13 = pnand %p703_p9, %p1057_p12  ;;  %s706_s29 = sshll.u32 %s778_s30, 4  ;;  %s707_s29 = int_to_ptr.vmem [resolvable:$false] %s706_s29 }
  0x78   : > { %534 = vmatmul.mubr.msk.bf16.vlgmr.msra.gmra.mrb[0].mxu1 %vm274_vm1, %v239_v9  ;;  %s708_s4 = scalar_lea.vmem %s707_s29, 512  ;;  %p709_p2 = scmp.lt.s32.totalorder %s995_s18, %s707_s29 }
  0x79   : > { %p705_p6 = pneg %p704_p13  ;;  %p710_p0 = scmp.lt.s32.totalorder %s708_s4, %s702_s5 }
  0x7b   : > { %p711_p3 = por %p710_p0, %p709_p2 }
  0x7d   : > { %p712_p1 = pnand %p711_p3, %p705_p6 }
 0x14a   : > { %v325_v21 = vpop.f32.mrb[0].mxu0 }
 0x14b   : > { %v366_v22 = vpop.f32.mrb[0].mxu1  ;;  %v326_v23 = vadd.f32 %v325_v21, %v247_v17  ;;  %v327_v25 = vpop.f32.mrb[1].mxu0 }
 0x14c   : > { %v367_v24 = vadd.f32 %v366_v22, %v255_v18  ;;  %v368_v26 = vpop.f32.mrb[1].mxu1  ;;  %v328_v27 = vadd.f32 %v327_v25, %v251_v19  ;;  %v329_v29 = vpop.f32.mrb[2].mxu0 }
 0x14d   : > { %v369_v28 = vadd.f32 %v368_v26, %v259_v20  ;;  %v370_v30 = vpop.f32.mrb[2].mxu1  ;;  %v373_v31 = vmax.f32 %v326_v23, 0.0  ;;  %v330_v33 = vpop.f32.mrb[3].mxu0 }
 0x14e   : > { %v375_v32 = vmax.f32 %v367_v24, 0.0  ;;  %v371_v34 = vpop.f32.mrb[3].mxu1  ;;  %v374_v35 = vmax.f32 %v328_v27, 0.0 }
 0x14f   : > { %v376_v36 = vmax.f32 %v369_v28, 0.0 }
 0x150   : > { %v544_v37 = vpack.c.bf16 %v374_v35, %v373_v31 }
 0x151   : > { %v545_v38 = vpack.c.bf16 %v376_v36, %v375_v32 }
 0x152   : > { %393 = vst [vmem:[%s234_s17] sm:$0xff] %v544_v37 }
 0x153   : > { %394 = vst [vmem:[%s234_s17 + $0x8] sm:$0xff] %v545_v38 }
 0x154   : > { %715 = shalt.err (!%p712_p1)
}
 0x155   : > { %s716_s8 = scalar_lea.hbm %s993_s27, 256  ;;  %s720_s11 = scalar_lea.hbm %s1040_s3, 512 }
 0x156   : > { %p717_p4 = scmp.ne.s32.totalorder %s993_s27, %s716_s8  ;;  %p721_p7 = scmp.lt.u32.totalorder %s993_s27, %s1040_s3 }
 0x157   : > { %p722_p5 = scmp.lt.u32.totalorder %s720_s11, %s716_s8  ;;  %p724_p9 = scmp.lt.u32.totalorder %s716_s8, %s993_s27 }
 0x158   : > { %p718_p11 = pnand %p717_p4, %p1057_p12 }
 0x159   : > { %p723_p10 = por %p722_p5, %p721_p7 }
 0x15a   : > { %p719_p8 = pneg %p718_p11 }
 0x15b   : > { %p725_p13 = por %p724_p9, %p723_p10 }
 0x15d   : > { %p726_p6 = pnand %p725_p13, %p719_p8 }
 0x15f   : > { %729 = shalt.err (!%p726_p6)
}
 0x160   : > { %555 = dma.vmem_to_hbm [thread:$0]  (%p1057_p12), %s995_s18, 256, %s993_s27, %s396_s21  }
 0x161 PF: > { %s422_s23 = sand.u32 1, %s760_s12   ;;  %p1058_p2 = scmp.ne.s32.totalorder %s1049_s25, 0 }
 0x162   : > { %p1059_p0 = scmp.ge.s32.totalorder %s772_s15, 2  ;;  %s423_s26 = scalar_lea.sflag [#allocation4], %s422_s23 }
 0x164   : > { %p569_p3 = pnand %p1059_p0, %p1058_p2 }
 0x166   : > { %755 = dma.done.wait (!%p569_p3), %s423_s26, 256  }
 0x167   : > { %757 = vsyncadd (!%p569_p3), %s423_s26, 4294967040  ;;  %p17_p1 = scmp.ge.s32.totalorder %s820_s16, 4   ;;  %s1060_s12 = smov %s764_s13 }
 0x168   : > { %s1061_s13 = smov %s768_s14  ;;  %s1062_s14 = smov %s831_s19 }
 0x169   : > { %s1063_s15 = smov %s820_s16  ;;  %19 = sbr.rel (!%p17_p1) target bundleno = 6 (0x6), region = 93 }
 0x170   :  { %428 = vsyncpa [#allocation3], 1 }
 0x171   :  { %430 = vsyncpa [#allocation3 + $0x1], 1 }
 0x172   :  { %431 = vsyncpa [#allocation6], 1 }
 0x173   :  { %433 = vsyncpa [#allocation6 + $0x1], 1 }
 0x174   :  { %434 = vsyncpa [#allocation4], 1 }
 0x175   :  { %436 = vsyncpa [#allocation4 + $0x1], 1 }

// kernel: _lambda_.6
= control target key start
LH: loop header
LB: loop body
LE: loop exit
PB: predicated region body
PF: predicated region fallthrough
CT: control target
= control target key end

     0   :  { %8 = vsyncpa [#allocation3], 0  ;;  %s3841_s0 = inlined_call_operand.hbm [shape: bf16[64,128], index: 0, kind: input, shape index: {}]   ;;  %s3842_s1 = inlined_call_operand.hbm [shape: bf16[9,128,64], index: 1, kind: input, shape index: {}]   ;;  %s3843_s2 = inlined_call_operand.hbm [shape: f32[128,1], index: 2, kind: input, shape index: {}]   ;;  %s3844_s3 = inlined_call_operand.hbm [shape: bf16[128,128], index: 3, kind: output, shape index: {}]  }
   0x1   :  { %9 = vsyncpa [#allocation6], 0 }
   0x2   :  { %10 = vsyncpa [#allocation4], 0  ;;  %s3425_s12 = smov [#allocation5]   ;;  %s3426_s14 = smov [#allocation2]  }
   0x3   :  { %s28_s13 = sshll.u32 %s3425_s12, 4  ;;  %s16_s15 = sshll.u32 %s3426_s14, 4  ;;  %s29_s13 = int_to_ptr.vmem [resolvable:$true] %s28_s13  ;;  %s3461_s15 = int_to_ptr.vmem [resolvable:$true] %s16_s15 }
   0x4   :  { %s3331_s18 = scalar_lea.hbm %s3842_s1, 9216 }
   0x5   :  { %p3332_p0 = scmp.ne.s32.totalorder %s3842_s1, %s3331_s18  ;;  %p3335_p1 = scmp.lt.u32.totalorder %s3331_s18, %s3842_s1 }
   0x7   :  { %p3337_p2 = pnand %p3335_p1, %p3332_p0 }
   0x9   :  { %3340 = shalt.err (!%p3337_p2)
}
   0xa   :  { %s3341_s23 = scalar_lea.vmem %s29_s13, 9216  ;;  %p3346_p4 = scmp.lt.s32.totalorder %s29_s13, %s29_s13 }
   0xb   :  { %p3342_p3 = scmp.ne.s32.totalorder %s29_s13, %s3341_s23  ;;  %p3347_p5 = scmp.lt.s32.totalorder %s3341_s23, %s3341_s23 }
   0xd   :  { %p3348_p6 = por %p3347_p5, %p3346_p4 }
   0xf   :  { %p3349_p7 = pnand %p3348_p6, %p3342_p3 }
  0x11   :  { %3352 = shalt.err (!%p3349_p7)
}
  0x12   :  { %s3427_s24 = smov 64   ;;  %s3428_s25 = smov 4  }
  0x13   :  { %34 = dma.hbm_to_vmem [thread:$0]  %s3842_s1, 9216, %s29_s13, [#allocation6], %s3427_s24, %s3427_s24, %s3428_s25  }
  0x14   :  { %s3353_s30 = scalar_lea.hbm %s3841_s0, 512 }
  0x15   :  { %p3354_p8 = scmp.ne.s32.totalorder %s3841_s0, %s3353_s30  ;;  %p3357_p9 = scmp.lt.u32.totalorder %s3353_s30, %s3841_s0 }
  0x17   :  { %p3359_p10 = pnand %p3357_p9, %p3354_p8 }
  0x19   :  { %3362 = shalt.err (!%p3359_p10)
}
  0x1a   :  { %s3363_s8 = scalar_lea.vmem %s3461_s15, 512  ;;  %p3368_p12 = scmp.lt.s32.totalorder %s3461_s15, %s3461_s15 }
  0x1b   :  { %p3364_p11 = scmp.ne.s32.totalorder %s3461_s15, %s3363_s8  ;;  %p3369_p13 = scmp.lt.s32.totalorder %s3363_s8, %s3363_s8 }
  0x1d   :  { %p3370_p0 = por %p3369_p13, %p3368_p12 }
  0x1f   :  { %p3371_p1 = pnand %p3370_p0, %p3364_p11 }
  0x21   :  { %3374 = shalt.err (!%p3371_p1)
}
  0x22   :  { %22 = dma.hbm_to_vmem [thread:$0]  %s3841_s0, 512, %s3461_s15, [#allocation3], %s3427_s24, %s3427_s24, %s3428_s25  }
  0x23   :  { %s3429_s10 = smov [#allocation7]   ;;  %s3375_s14 = scalar_lea.hbm %s3843_s2, 2048 }
  0x24   :  { %s40_s11 = sshll.u32 %s3429_s10, 4  ;;  %p3376_p2 = scmp.ne.s32.totalorder %s3843_s2, %s3375_s14  ;;  %s41_s11 = int_to_ptr.vmem [resolvable:$true] %s40_s11 }
  0x25   :  { %p3379_p3 = scmp.lt.u32.totalorder %s3375_s14, %s3843_s2 }
  0x27   :  { %p3381_p4 = pnand %p3379_p3, %p3376_p2 }
  0x29   :  { %3384 = shalt.err (!%p3381_p4)
}
  0x2a   :  { %s3385_s20 = scalar_lea.vmem %s41_s11, 2048  ;;  %p3390_p6 = scmp.lt.s32.totalorder %s41_s11, %s41_s11 }
  0x2b   :  { %p3386_p5 = scmp.ne.s32.totalorder %s41_s11, %s3385_s20  ;;  %p3391_p7 = scmp.lt.s32.totalorder %s3385_s20, %s3385_s20 }
  0x2d   :  { %p3392_p8 = por %p3391_p7, %p3390_p6 }
  0x2f   :  { %p3393_p9 = pnand %p3392_p8, %p3386_p5 }
  0x31   :  { %3396 = shalt.err (!%p3393_p9)
}
  0x32   :  { %s3430_s0 = smov 128   ;;  %s3431_s15 = smov 8  }
  0x33   :  { %46 = dma.hbm_to_vmem [thread:$0]  %s3843_s2, 2048, %s41_s11, [#allocation6], %s3430_s0, %s3430_s0, %s3431_s15  }
  0x34   :  { %3419 = dma.done.wait [#allocation3], 512  }
  0x35   :  { %3420 = vsyncadd [#allocation3], 4294966784 }
  0x36   :  { %3421 = dma.done.wait [#allocation6], 11264  }
  0x37   :  { %3422 = vsyncadd [#allocation6], 4294956032  ;;  %v3510_v0 = vld [vmem:[#allocation2] sm:$0xff]   ;;  %v3512_v1 = vld [vmem:[#allocation2 + $0x10] sm:$0xff]   ;;  %vm216_vm0 = vcmask 523264   ;;  %s3432_s2 = smov 127   ;;  %v73_v22 = vlaneseq }
  0x38   :  { %v3514_v2 = vld [vmem:[#allocation2 + $0x8] sm:$0xff]   ;;  %v65_v3 = vunpack.c.l.bf16 %v3510_v0  ;;  %v66_v4 = vunpack.c.h.bf16 %v3510_v0  ;;  %v69_v5 = vunpack.c.l.bf16 %v3512_v1  ;;  %v70_v6 = vunpack.c.h.bf16 %v3512_v1  ;;  %v3520_v7 = vld [vmem:[#allocation2 + $0x18] sm:$0xff]   ;;  %2817 = vmatprep.subr.bf16.mxu0 %v3510_v0  ;;  %v3255_v16 = vld [vmem:[#allocation5 + $0x100] sm:$0xff]   ;;  %s3433_s23 = smov 5   ;;  %s3434_s26 = smov 125  }
  0x39   :  { %v67_v8 = vunpack.c.l.bf16 %v3514_v2  ;;  %v68_v9 = vunpack.c.h.bf16 %v3514_v2  ;;  %v71_v10 = vunpack.c.l.bf16 %v3520_v7  ;;  %v72_v11 = vunpack.c.h.bf16 %v3520_v7  ;;  %2818 = vmatpush3.bf16.msra.mxu0 %v3510_v0  ;;  %v3257_v17 = vld [vmem:[#allocation5 + $0x40] sm:$0xff]   ;;  %2825 = vmatprep.mubr.msk.bf16.mxu0 %vm216_vm0, %v3255_v16  ;;  %v3256_v18 = vld [vmem:[#allocation5 + $0x108] sm:$0xff]   ;;  %v3258_v19 = vld [vmem:[#allocation5 + $0x110] sm:$0xff]   ;;  %s3435_s27 = smov 3   ;;  %s3436_s28 = smov 124  }
  0x3a   :  { %v3089_v12 = vpack.i.bf16 %v66_v4, %v65_v3  ;;  %v3099_v13 = vpack.i.bf16 %v70_v6, %v69_v5  ;;  %2819 = vmatprep.subr.bf16.mxu0 %v3514_v2  ;;  %2729 = vmatprep.mubr.msk.bf16.mxu1 %vm216_vm0, %v3257_v17  ;;  %v3260_v20 = vld [vmem:[#allocation5 + $0x118] sm:$0xff]   ;;  %v3262_v21 = vld [vmem:[#allocation5 + $0x140] sm:$0xff]   ;;  %s3437_s29 = smov 1   ;;  %s3438_s30 = smov 123   ;;  %v74_v23 = vand.u32 127, %v73_v22  ;;  %v3259_v5 = vld [vmem:[#allocation5 + $0x48] sm:$0xff]  }
  0x3b   :  { %v3094_v14 = vpack.i.bf16 %v68_v9, %v67_v8  ;;  %v3104_v15 = vpack.i.bf16 %v72_v11, %v71_v10  ;;  %v3265_v30 = vld [vmem:[#allocation5 + $0x60] sm:$0xff]   ;;  %v3439_v50 = vmov 0   ;;  %v3274_v9 = vld [vmem:[#allocation5 + $0x170] sm:$0xff]   ;;  %s3440_s4 = smov [#allocation8]  }
  0x3c   :  { %3090 = vrot.lane.b32.xlu0 %v3089_v12, %s3428_s25  ;;  %3100 = vrot.lane.b32.xlu1 %v3099_v13, %s3428_s25  ;;  %v76_v24 = vshra.s32 %v74_v23, 2  ;;  %v75_v31 = vand.u32 3, %v74_v23  ;;  %v3263_v23 = vld [vmem:[#allocation5 + $0x58] sm:$0xff]   ;;  %v3290_v39 = vld [vmem:[#allocation5 + $0x1b0] sm:$0xff]   ;;  %s2277_s5 = sshll.u32 %s3440_s4, 4  ;;  %s2278_s5 = int_to_ptr.vmem [resolvable:$true] %s2277_s5 }
  0x3d   :  { %2820 = vmatpush3.bf16.msra.mxu0 %v3514_v2  ;;  %3250 = vset.pattern.permute.xlu1 %v3439_v50  ;;  %s3397_s6 = scalar_lea.vmem %s2278_s5, 1024  ;;  %p3402_p11 = scmp.lt.s32.totalorder %s2278_s5, %s2278_s5 }
  0x3e   :  { %2821 = vmatprep.subr.bf16.mxu0 %v3512_v1  ;;  %v3544_v25 = vand.u32 3, %v76_v24  ;;  %vm3558_vm3 = vcmp.ne.s32.totalorder %v75_v31, 3  ;;  %vm3575_vm5 = vcmp.ne.s32.totalorder %v75_v31, 0  ;;  %v3264_v24 = vld [vmem:[#allocation5 + $0x148] sm:$0xff]   ;;  %3249 = vset.pattern.permute.xlu0 %v3439_v50  ;;  %p3398_p10 = scmp.ne.s32.totalorder %s2278_s5, %s3397_s6  ;;  %p3403_p12 = scmp.lt.s32.totalorder %s3397_s6, %s3397_s6 }
  0x3f   :  { %vm3569_vm4 = vmpackc.low %vm3558_vm3, %vm3558_vm3 }
  0x40   :  { %3095 = vrot.lane.b32.xlu0 %v3094_v14, %s3428_s25  ;;  %3105 = vrot.lane.b32.xlu1 %v3104_v15, %s3428_s25  ;;  %vm78_vm1 = vcmp.ne.s32.totalorder %v3544_v25, 0  ;;  %vm79_vm8 = vcmp.ne.s32.totalorder %v3544_v25, 3  ;;  %vm3716_vm14 = vmpackc.low %vm3575_vm5, %vm3575_vm5  ;;  %p3404_p13 = por %p3403_p12, %p3402_p11 }
  0x41   :  { %2822 = vmatpush3.bf16.msra.mxu0 %v3512_v1  ;;  %vm3550_vm2 = vmpackc.low %vm78_vm1, %vm78_vm1 }
  0x42   :  { %2823 = vmatprep.subr.bf16.mxu0 %v3520_v7  ;;  %vm98_vm6 = vmand %vm78_vm1, %vm3575_vm5  ;;  %p3405_p0 = pnand %p3404_p13, %p3398_p10 }
  0x43   :  { %vm3597_vm7 = vmpackc.low %vm98_vm6, %vm98_vm6 }
  0x44   :  { %3110 = vrot.lane.b32.xlu0 %v3089_v12, %s3432_s2  ;;  %3115 = vrot.lane.b32.xlu1 %v3094_v14, %s3432_s2  ;;  %vm1406_vm9 = vmand %vm79_vm8, %vm3575_vm5 }
  0x45   :  { %2824 = vmatpush3.bf16.msra.mxu0 %v3520_v7  ;;  %vm3626_vm10 = vmpackc.low %vm1406_vm9, %vm1406_vm9 }
  0x46   :  { %vm515_vm11 = vmand %vm78_vm1, %vm3558_vm3 }
  0x47   :  { %vm3652_vm12 = vmpackc.low %vm515_vm11, %vm515_vm11 }
  0x48   :  { %3120 = vrot.lane.b32.xlu0 %v3099_v13, %s3432_s2  ;;  %3125 = vrot.lane.b32.xlu1 %v3104_v15, %s3432_s2  ;;  %vm3675_vm13 = vmpackc.low %vm79_vm8, %vm79_vm8 }
  0x49   :  { %2826 = vmatmul.mubr.msk.bf16.vlgmr.msra.gmra.mrb[0].mxu0 %vm216_vm0, %v3256_v18  ;;  %vm1855_vm15 = vmand %vm79_vm8, %vm3558_vm3 }
  0x4a   :  { %2829 = vmatprep.mubr.msk.bf16.mxu0 %vm216_vm0, %v3258_v19  ;;  %vm3740_vm1 = vmpackc.low %vm1855_vm15, %vm1855_vm15 }
  0x4c   :  { %3130 = vrot.lane.b32.xlu0 %v3089_v12, %s3433_s23  ;;  %3135 = vrot.lane.b32.xlu1 %v3094_v14, %s3433_s23 }
  0x50   :  { %3140 = vrot.lane.b32.xlu0 %v3099_v13, %s3433_s23  ;;  %3145 = vrot.lane.b32.xlu1 %v3104_v15, %s3433_s23 }
  0x51   :  { %2830 = vmatmul.mubr.msk.bf16.gmra.mrb[4].mxu0 %vm216_vm0, %v3260_v20 }
  0x52   :  { %2849 = vmatprep.mubr.msk.bf16.mxu0 %vm216_vm0, %v3262_v21 }
  0x54   :  { %3150 = vrot.lane.b32.xlu0 %v3089_v12, %s3434_s26  ;;  %3155 = vrot.lane.b32.xlu1 %v3094_v14, %s3434_s26 }
  0x58   :  { %3160 = vrot.lane.b32.xlu0 %v3099_v13, %s3434_s26  ;;  %3165 = vrot.lane.b32.xlu1 %v3104_v15, %s3434_s26 }
  0x5c   :  { %3170 = vrot.lane.b32.xlu0 %v3089_v12, %s3435_s27  ;;  %3175 = vrot.lane.b32.xlu1 %v3094_v14, %s3435_s27 }
  0x60   :  { %3180 = vrot.lane.b32.xlu0 %v3099_v13, %s3435_s27  ;;  %3185 = vrot.lane.b32.xlu1 %v3104_v15, %s3435_s27 }
  0x64   :  { %3190 = vrot.lane.b32.xlu0 %v3089_v12, %s3436_s28  ;;  %3195 = vrot.lane.b32.xlu1 %v3094_v14, %s3436_s28 }
  0x68   :  { %3200 = vrot.lane.b32.xlu0 %v3099_v13, %s3436_s28  ;;  %3205 = vrot.lane.b32.xlu1 %v3104_v15, %s3436_s28 }
  0x6c   :  { %3210 = vrot.lane.b32.xlu0 %v3089_v12, %s3437_s29  ;;  %3215 = vrot.lane.b32.xlu1 %v3094_v14, %s3437_s29 }
  0x70   :  { %3220 = vrot.lane.b32.xlu0 %v3099_v13, %s3437_s29  ;;  %3225 = vrot.lane.b32.xlu1 %v3104_v15, %s3437_s29 }
  0x74   :  { %3230 = vrot.lane.b32.xlu0 %v3089_v12, %s3438_s30  ;;  %3235 = vrot.lane.b32.xlu1 %v3094_v14, %s3438_s30  ;;  %v3261_v12 = vld [vmem:[#allocation5 + $0x50] sm:$0xff]  }
  0x78   :  { %3240 = vrot.lane.b32.xlu0 %v3099_v13, %s3438_s30  ;;  %3245 = vrot.lane.b32.xlu1 %v3104_v15, %s3438_s30 }
  0xae   :  { %v3091_v26 = vpop.permute.xlu0 %3090  ;;  %v3101_v27 = vpop.permute.xlu1 %3100 }
  0xaf   :  { %v3093_v28 = vunpack.i.h.bf16 %v3091_v26  ;;  %v3092_v29 = vunpack.i.l.bf16 %v3091_v26  ;;  %v3103_v32 = vunpack.i.h.bf16 %v3101_v27  ;;  %v3102_v33 = vunpack.i.l.bf16 %v3101_v27 }
  0xb1   :  { %v2299_v34 = vpack.c.bf16 %v3093_v28, %v3092_v29  ;;  %v2305_v40 = vpack.c.bf16 %v3103_v32, %v3102_v33  ;;  %v3266_v32 = vld [vmem:[#allocation5 + $0x150] sm:$0xff]  }
  0xb2   :  { %v3096_v35 = vpop.permute.xlu0 %3095  ;;  %v3106_v36 = vpop.permute.xlu1 %3105 }
  0xb3   :  { %v3098_v37 = vunpack.i.h.bf16 %v3096_v35  ;;  %v3097_v38 = vunpack.i.l.bf16 %v3096_v35  ;;  %2721 = vmatprep.subr.msk.bf16.mxu1 %vm3550_vm2, %v2299_v34  ;;  %v3108_v42 = vunpack.i.h.bf16 %v3106_v36  ;;  %v3107_v43 = vunpack.i.l.bf16 %v3106_v36 }
  0xb4   :  { %2722 = vmatpush3.bf16.msk.msra.mxu1 %vm3550_vm2, %v2299_v34 }
  0xb5   :  { %v2302_v41 = vpack.c.bf16 %v3098_v37, %v3097_v38  ;;  %v2308_v51 = vpack.c.bf16 %v3108_v42, %v3107_v43  ;;  %v2065_v42 = vld [vmem:[#allocation7 + $0x8] sm:$0xff]  ;;  %v2064_v43 = vld [vmem:[#allocation7] sm:$0xff] }
  0xb6   :  { %v3111_v44 = vpop.permute.xlu0 %3110  ;;  %v3116_v45 = vpop.permute.xlu1 %3115  ;;  %2087 = vperm.xlu1 %3250, %v2065_v42   ;;  %2082 = vperm.xlu0 %3249, %v2064_v43   ;;  %v3281_v42 = vld [vmem:[#allocation5 + $0x20] sm:$0xff]   ;;  %v3282_v43 = vld [vmem:[#allocation5 + $0x190] sm:$0xff]  }
  0xb7   :  { %v3113_v46 = vunpack.i.h.bf16 %v3111_v44  ;;  %v3112_v47 = vunpack.i.l.bf16 %v3111_v44  ;;  %2723 = vmatprep.subr.msk.bf16.mxu1 %vm3550_vm2, %v2302_v41  ;;  %v3118_v48 = vunpack.i.h.bf16 %v3116_v45  ;;  %v3117_v49 = vunpack.i.l.bf16 %v3116_v45  ;;  %v3267_v44 = vld [vmem:[#allocation5 + $0x68] sm:$0xff]   ;;  %v3268_v45 = vld [vmem:[#allocation5 + $0x158] sm:$0xff]  }
  0xb8   :  { %2724 = vmatpush3.bf16.msk.msra.mxu1 %vm3550_vm2, %v2302_v41 }
  0xb9   :  { %v2431_v52 = vpack.c.bf16 %v3113_v46, %v3112_v47  ;;  %v2434_v53 = vpack.c.bf16 %v3118_v48, %v3117_v49  ;;  %2725 = vmatprep.subr.msk.bf16.mxu1 %vm3550_vm2, %v2305_v40 }
  0xba   :  { %v3121_v54 = vpop.permute.xlu0 %3120  ;;  %v3126_v55 = vpop.permute.xlu1 %3125 }
  0xbb   :  { %v3123_v57 = vunpack.i.h.bf16 %v3121_v54  ;;  %v3122_v58 = vunpack.i.l.bf16 %v3121_v54  ;;  %2841 = vmatprep.subr.msk.bf16.mxu0 %vm3569_vm4, %v2431_v52  ;;  %v3128_v60 = vunpack.i.h.bf16 %v3126_v55  ;;  %v3127_v61 = vunpack.i.l.bf16 %v3126_v55 }
  0xbc   :  { %2726 = vmatpush3.bf16.msk.msra.mxu1 %vm3550_vm2, %v2305_v40  ;;  %2842 = vmatpush3.bf16.msk.msra.mxu0 %vm3569_vm4, %v2431_v52  ;;  %v3270_v52 = vld [vmem:[#allocation5 + $0x160] sm:$0xff]  }
  0xbd   :  { %v2437_v59 = vpack.c.bf16 %v3123_v57, %v3122_v58  ;;  %2727 = vmatprep.subr.msk.bf16.mxu1 %vm3550_vm2, %v2308_v51  ;;  %2843 = vmatprep.subr.msk.bf16.mxu0 %vm3569_vm4, %v2434_v53  ;;  %v2440_v11 = vpack.c.bf16 %v3128_v60, %v3127_v61  ;;  %v2067_v60 = vld [vmem:[#allocation7 + $0x18] sm:$0xff] }
  0xbe   :  { %v3131_v62 = vpop.permute.xlu0 %3130  ;;  %v3136_v63 = vpop.permute.xlu1 %3135  ;;  %2097 = vperm.xlu0 %3249, %v2067_v60   ;;  %v3312_v60 = vld [vmem:[#allocation5 + $0x208] sm:$0xff]  }
  0xbf   :  { %v3133_v3 = vunpack.i.h.bf16 %v3131_v62  ;;  %v3132_v4 = vunpack.i.l.bf16 %v3131_v62  ;;  %v3138_v6 = vunpack.i.h.bf16 %v3136_v63  ;;  %v3137_v8 = vunpack.i.l.bf16 %v3136_v63  ;;  %v3271_v62 = vld [vmem:[#allocation5 + $0x78] sm:$0xff]   ;;  %v3272_v63 = vld [vmem:[#allocation5 + $0x168] sm:$0xff]  }
  0xc0   :  { %2728 = vmatpush3.bf16.msk.msra.mxu1 %vm3550_vm2, %v2308_v51  ;;  %2844 = vmatpush3.bf16.msk.msra.mxu0 %vm3569_vm4, %v2434_v53  ;;  %v3269_v51 = vld [vmem:[#allocation5 + $0x70] sm:$0xff]  }
  0xc1   :  { %v2327_v10 = vpack.c.bf16 %v3133_v3, %v3132_v4  ;;  %2845 = vmatprep.subr.msk.bf16.mxu0 %vm3569_vm4, %v2437_v59  ;;  %v2330_v13 = vpack.c.bf16 %v3138_v6, %v3137_v8  ;;  %v2068_v6 = vld [vmem:[#allocation7 + $0x20] sm:$0xff] }
  0xc2   :  { %v3141_v14 = vpop.permute.xlu0 %3140  ;;  %v3146_v15 = vpop.permute.xlu1 %3145  ;;  %v3273_v8 = vld [vmem:[#allocation5] sm:$0xff]  }
  0xc3   :  { %2730 = vmatmul.mubr.msk.bf16.vlgmr.msra.gmra.mrb[0].mxu1 %vm216_vm0, %v3259_v5  ;;  %2745 = vmatprep.subr.msk.bf16.mxu1 %vm3597_vm7, %v2327_v10  ;;  %v3143_v16 = vunpack.i.h.bf16 %v3141_v14  ;;  %v3142_v17 = vunpack.i.l.bf16 %v3141_v14  ;;  %v3148_v20 = vunpack.i.h.bf16 %v3146_v15  ;;  %v3147_v21 = vunpack.i.l.bf16 %v3146_v15 }
  0xc4   :  { %2746 = vmatpush3.bf16.msk.msra.mxu1 %vm3597_vm7, %v2327_v10  ;;  %2846 = vmatpush3.bf16.msk.msra.mxu0 %vm3569_vm4, %v2437_v59  ;;  %v2066_v59 = vld [vmem:[#allocation7 + $0x10] sm:$0xff] }
  0xc5   :  { %2847 = vmatprep.subr.msk.bf16.mxu0 %vm3569_vm4, %v2440_v11  ;;  %v2333_v18 = vpack.c.bf16 %v3143_v16, %v3142_v17  ;;  %2733 = vmatprep.mubr.msk.bf16.mxu1 %vm216_vm0, %v3261_v12  ;;  %v2336_v33 = vpack.c.bf16 %v3148_v20, %v3147_v21  ;;  %v2069_v12 = vld [vmem:[#allocation7 + $0x28] sm:$0xff]  ;;  %v2071_v17 = vld [vmem:[#allocation7 + $0x38] sm:$0xff]  ;;  %v2072_v21 = vld [vmem:[#allocation7 + $0x40] sm:$0xff] }
  0xc6   :  { %2747 = vmatprep.subr.msk.bf16.mxu1 %vm3597_vm7, %v2330_v13  ;;  %v3151_v19 = vpop.permute.xlu0 %3150  ;;  %v3156_v22 = vpop.permute.xlu1 %3155  ;;  %2092 = vperm.xlu1 %3250, %v2066_v59  }
  0xc7   :  { %v3153_v26 = vunpack.i.h.bf16 %v3151_v19  ;;  %v3152_v27 = vunpack.i.l.bf16 %v3151_v19  ;;  %v3158_v28 = vunpack.i.h.bf16 %v3156_v22  ;;  %v3157_v29 = vunpack.i.l.bf16 %v3156_v22  ;;  %2107 = vperm.xlu0 %3249, %v2069_v12   ;;  %v3276_v19 = vld [vmem:[#allocation5 + $0x178] sm:$0xff]   ;;  %v3277_v22 = vld [vmem:[#allocation5 + $0x10] sm:$0xff]  }
  0xc8   :  { %2848 = vmatpush3.bf16.msk.msra.mxu0 %vm3569_vm4, %v2440_v11  ;;  %2748 = vmatpush3.bf16.msk.msra.mxu1 %vm3597_vm7, %v2330_v13  ;;  %v2070_v13 = vld [vmem:[#allocation7 + $0x30] sm:$0xff] }
  0xc9   :  { %v2459_v31 = vpack.c.bf16 %v3153_v26, %v3152_v27  ;;  %2749 = vmatprep.subr.msk.bf16.mxu1 %vm3597_vm7, %v2333_v18  ;;  %v2462_v36 = vpack.c.bf16 %v3158_v28, %v3157_v29  ;;  %v3278_v27 = vld [vmem:[#allocation5 + $0x180] sm:$0xff]  }
  0xca   :  { %v3161_v35 = vpop.permute.xlu0 %3160  ;;  %v3166_v37 = vpop.permute.xlu1 %3165  ;;  %2102 = vperm.xlu1 %3250, %v2068_v6  }
  0xcb   :  { %2734 = vmatmul.mubr.msk.bf16.gmra.mrb[4].mxu1 %vm216_vm0, %v3263_v23  ;;  %2850 = vmatmul.mubr.msk.bf16.vlgmr.msra.gmra.mrb[0].mxu0 %vm216_vm0, %v3264_v24  ;;  %v3163_v38 = vunpack.i.h.bf16 %v3161_v35  ;;  %v3162_v40 = vunpack.i.l.bf16 %v3161_v35  ;;  %v3168_v48 = vunpack.i.h.bf16 %v3166_v37  ;;  %v3167_v49 = vunpack.i.l.bf16 %v3166_v37 }
  0xcc   :  { %2750 = vmatpush3.bf16.msk.msra.mxu1 %vm3597_vm7, %v2333_v18  ;;  %2737 = vmatprep.mubr.msk.bf16.mxu1 %vm216_vm0, %v3265_v30  ;;  %v3275_v18 = vld [vmem:[#allocation5 + $0x8] sm:$0xff]  }
  0xcd   :  { %2853 = vmatprep.mubr.msk.bf16.mxu0 %vm216_vm0, %v3266_v32  ;;  %2865 = vmatprep.subr.msk.bf16.mxu0 %vm3626_vm10, %v2459_v31  ;;  %v2465_v53 = vpack.c.bf16 %v3163_v38, %v3162_v40  ;;  %v2468_v58 = vpack.c.bf16 %v3168_v48, %v3167_v49  ;;  %v2073_v30 = vld [vmem:[#allocation7 + $0x48] sm:$0xff]  ;;  %v2075_v40 = vld [vmem:[#allocation7 + $0x58] sm:$0xff] }
  0xce   :  { %2866 = vmatpush3.bf16.msk.msra.mxu0 %vm3626_vm10, %v2459_v31  ;;  %2751 = vmatprep.subr.msk.bf16.mxu1 %vm3597_vm7, %v2336_v33  ;;  %v3171_v41 = vpop.permute.xlu0 %3170  ;;  %v3176_v3 = vpop.permute.xlu1 %3175  ;;  %v2074_v31 = vld [vmem:[#allocation7 + $0x50] sm:$0xff]  ;;  %v3280_v38 = vld [vmem:[#allocation5 + $0x188] sm:$0xff]  }
  0xcf   :  { %2867 = vmatprep.subr.msk.bf16.mxu0 %vm3626_vm10, %v2462_v36  ;;  %v3173_v46 = vunpack.i.h.bf16 %v3171_v41  ;;  %v3172_v47 = vunpack.i.l.bf16 %v3171_v41  ;;  %v3178_v14 = vunpack.i.h.bf16 %v3176_v3  ;;  %v3177_v15 = vunpack.i.l.bf16 %v3176_v3  ;;  %2112 = vperm.xlu1 %3250, %v2070_v13   ;;  %v2076_v41 = vld [vmem:[#allocation7 + $0x60] sm:$0xff]  ;;  %v3285_v3 = vld [vmem:[#allocation5 + $0x30] sm:$0xff]  }
  0xd0   :  { %2752 = vmatpush3.bf16.msk.msra.mxu1 %vm3597_vm7, %v2336_v33  ;;  %2117 = vperm.xlu0 %3249, %v2071_v17   ;;  %v3279_v33 = vld [vmem:[#allocation5 + $0x18] sm:$0xff]   ;;  %v3291_v17 = vld [vmem:[#allocation5 + $0x88] sm:$0xff]  }
  0xd1   :  { %v2355_v54 = vpack.c.bf16 %v3173_v46, %v3172_v47  ;;  %v2358_v23 = vpack.c.bf16 %v3178_v14, %v3177_v15  ;;  %v3289_v14 = vld [vmem:[#allocation5 + $0x80] sm:$0xff]  }
  0xd2   :  { %2868 = vmatpush3.bf16.msk.msra.mxu0 %vm3626_vm10, %v2462_v36  ;;  %v3181_v57 = vpop.permute.xlu0 %3180  ;;  %v3186_v16 = vpop.permute.xlu1 %3185 }
  0xd3   :  { %2738 = vmatmul.mubr.msk.bf16.gmra.mrb[8].mxu1 %vm216_vm0, %v3267_v44  ;;  %2854 = vmatmul.mubr.msk.bf16.gmra.mrb[4].mxu0 %vm216_vm0, %v3268_v45  ;;  %v3183_v24 = vunpack.i.h.bf16 %v3181_v57  ;;  %v3182_v26 = vunpack.i.l.bf16 %v3181_v57  ;;  %v3188_v34 = vunpack.i.h.bf16 %v3186_v16  ;;  %v3187_v35 = vunpack.i.l.bf16 %v3186_v16 }
  0xd4   :  { %2741 = vmatprep.mubr.msk.bf16.mxu1 %vm216_vm0, %v3269_v51  ;;  %2857 = vmatprep.mubr.msk.bf16.mxu0 %vm216_vm0, %v3270_v52  ;;  %v2077_v52 = vld [vmem:[#allocation7 + $0x68] sm:$0xff] }
  0xd5   :  { %2869 = vmatprep.subr.msk.bf16.mxu0 %vm3626_vm10, %v2465_v53  ;;  %2769 = vmatprep.subr.msk.bf16.mxu1 %vm3652_vm12, %v2355_v54  ;;  %v2361_v32 = vpack.c.bf16 %v3183_v24, %v3182_v26  ;;  %v2364_v47 = vpack.c.bf16 %v3188_v34, %v3187_v35  ;;  %v3298_v34 = vld [vmem:[#allocation5 + $0x1d0] sm:$0xff]  }
  0xd6   :  { %2870 = vmatpush3.bf16.msk.msra.mxu0 %vm3626_vm10, %v2465_v53  ;;  %v3191_v61 = vpop.permute.xlu0 %3190  ;;  %2122 = vperm.xlu1 %3250, %v2072_v21   ;;  %v3196_v28 = vpop.permute.xlu1 %3195  ;;  %v2078_v53 = vld [vmem:[#allocation7 + $0x70] sm:$0xff] }
  0xd7   :  { %2871 = vmatprep.subr.msk.bf16.mxu0 %vm3626_vm10, %v2468_v58  ;;  %v3193_v4 = vunpack.i.h.bf16 %v3191_v61  ;;  %v3192_v5 = vunpack.i.l.bf16 %v3191_v61  ;;  %v3198_v36 = vunpack.i.h.bf16 %v3196_v28  ;;  %v3197_v37 = vunpack.i.l.bf16 %v3196_v28  ;;  %2127 = vperm.xlu0 %3249, %v2073_v30   ;;  %v3283_v61 = vld [vmem:[#allocation5 + $0x28] sm:$0xff]   ;;  %v3295_v30 = vld [vmem:[#allocation5 + $0x98] sm:$0xff]  }
  0xd9   :  { %v3668_v10 = vpack.c.bf16 %v3193_v4, %v3192_v5  ;;  %v2490_v48 = vpack.c.bf16 %v3198_v36, %v3197_v37  ;;  %v3286_v4 = vld [vmem:[#allocation5 + $0x1a0] sm:$0xff]  }
  0xda   :  { %2872 = vmatpush3.bf16.msk.msra.mxu0 %vm3626_vm10, %v2468_v58  ;;  %v3201_v20 = vpop.permute.xlu0 %3200  ;;  %2132 = vperm.xlu1 %3250, %v2074_v31   ;;  %v3206_v51 = vpop.permute.xlu1 %3205  ;;  %v3296_v31 = vld [vmem:[#allocation5 + $0x1c8] sm:$0xff]  }
  0xdb   :  { %2742 = vmatmul.mubr.msk.bf16.gmra.mrb[12].mxu1 %vm216_vm0, %v3271_v62  ;;  %2858 = vmatmul.mubr.msk.bf16.gmra.mrb[8].mxu0 %vm216_vm0, %v3272_v63  ;;  %v3203_v49 = vunpack.i.h.bf16 %v3201_v20  ;;  %v3202_v50 = vunpack.i.l.bf16 %v3201_v20  ;;  %v3208_v58 = vunpack.i.h.bf16 %v3206_v51  ;;  %v3207_v59 = vunpack.i.l.bf16 %v3206_v51  ;;  %v3284_v62 = vld [vmem:[#allocation5 + $0x198] sm:$0xff]   ;;  %v3305_v51 = vld [vmem:[#allocation5 + $0xc0] sm:$0xff]  }
  0xdc   :  { %2753 = vmatprep.mubr.msk.bf16.mxu1 %vm216_vm0, %v3273_v8  ;;  %2861 = vmatprep.mubr.msk.bf16.mxu0 %vm216_vm0, %v3274_v9  ;;  %v2079_v8 = vld [vmem:[#allocation7 + $0x78] sm:$0xff] }
  0xdd   :  { %2889 = vmatprep.subr.msk.bf16.mxu0 %vm3675_vm13, %v3668_v10  ;;  %2137 = vperm.xlu0 %3249, %v2075_v40   ;;  %v2493_v57 = vpack.c.bf16 %v3203_v49, %v3202_v50  ;;  %v2496_v56 = vpack.c.bf16 %v3208_v58, %v3207_v59  ;;  %v3287_v9 = vld [vmem:[#allocation5 + $0x38] sm:$0xff]   ;;  %v3304_v50 = vld [vmem:[#allocation5 + $0x1e8] sm:$0xff]   ;;  %v3310_v58 = vld [vmem:[#allocation5 + $0x200] sm:$0xff]  }
  0xde   :  { %v3211_v29 = vpop.permute.xlu0 %3210  ;;  %2142 = vperm.xlu1 %3250, %v2076_v41   ;;  %v3216_v12 = vpop.permute.xlu1 %3215  ;;  %v3303_v49 = vld [vmem:[#allocation5 + $0xb8] sm:$0xff]  }
  0xdf   :  { %v3213_v44 = vunpack.i.h.bf16 %v3211_v29  ;;  %v3212_v45 = vunpack.i.l.bf16 %v3211_v29  ;;  %v3218_v25 = vunpack.i.h.bf16 %v3216_v12  ;;  %v3217_v15 = vunpack.i.l.bf16 %v3216_v12  ;;  %v3311_v59 = vld [vmem:[#allocation5 + $0xd8] sm:$0xff]  }
  0xe1   :  { %2147 = vperm.xlu0 %3249, %v2077_v52   ;;  %v2386_v20 = vpack.c.bf16 %v3218_v25, %v3217_v15  ;;  %v3306_v52 = vld [vmem:[#allocation5 + $0x1f0] sm:$0xff]  }
  0xe2   :  { %v3698_v46 = vpop.permute.xlu0 %3220  ;;  %2152 = vperm.xlu1 %3250, %v2078_v53   ;;  %v3226_v16 = vpop.permute.xlu1 %3225  ;;  %v3307_v53 = vld [vmem:[#allocation5 + $0xc8] sm:$0xff]  }
  0xe3   :  { %2754 = vmatmul.mubr.msk.bf16.vlgmr.msra.gmra.mrb[0].mxu1 %vm216_vm0, %v3275_v18  ;;  %2862 = vmatmul.mubr.msk.bf16.gmra.mrb[12].mxu0 %vm216_vm0, %v3276_v19  ;;  %v3292_v18 = vld [vmem:[#allocation5 + $0x1b8] sm:$0xff]   ;;  %v3293_v19 = vld [vmem:[#allocation5 + $0x90] sm:$0xff]   ;;  %v3223_v11 = vunpack.i.h.bf16 %v3698_v46  ;;  %v3222_v21 = vunpack.i.l.bf16 %v3698_v46  ;;  %v3228_v26 = vunpack.i.h.bf16 %v3226_v16 }
  0xe4   :  { %2770 = vmatpush3.bf16.msk.msra.mxu1 %vm3652_vm12, %v2355_v54  ;;  %2757 = vmatprep.mubr.msk.bf16.mxu1 %vm216_vm0, %v3277_v22  ;;  %v2383_v54 = vpack.c.bf16 %v3213_v44, %v3212_v45  ;;  %v3294_v22 = vld [vmem:[#allocation5 + $0x1c0] sm:$0xff]   ;;  %v3299_v44 = vld [vmem:[#allocation5 + $0xa8] sm:$0xff]   ;;  %v3300_v45 = vld [vmem:[#allocation5 + $0x1d8] sm:$0xff]  }
  0xe5   :  { %2771 = vmatprep.subr.msk.bf16.mxu1 %vm3652_vm12, %v2358_v23  ;;  %2873 = vmatprep.mubr.msk.bf16.mxu0 %vm216_vm0, %v3278_v27  ;;  %v2389_v24 = vpack.c.bf16 %v3223_v11, %v3222_v21  ;;  %v3227_v27 = vunpack.i.l.bf16 %v3226_v16  ;;  %v3301_v46 = vld [vmem:[#allocation5 + $0xb0] sm:$0xff]  }
  0xe6   :  { %v3231_v63 = vpop.permute.xlu0 %3230  ;;  %2157 = vperm.xlu0 %3249, %v2079_v8   ;;  %v3325_v8 = vld [vmem:[#allocation5 + $0x130] sm:$0xff]  }
  0xe7   :  { %v3233_v5 = vunpack.i.h.bf16 %v3231_v63  ;;  %v3232_v6 = vunpack.i.l.bf16 %v3231_v63  ;;  %v2392_v35 = vpack.c.bf16 %v3228_v26, %v3227_v27  ;;  %v3316_v63 = vld [vmem:[#allocation5 + $0x218] sm:$0xff]  }
  0xe8   :  { %2772 = vmatpush3.bf16.msk.msra.mxu1 %vm3652_vm12, %v2358_v23  ;;  %v3236_v23 = vpop.permute.xlu1 %3235 }
  0xe9   :  { %2773 = vmatprep.subr.msk.bf16.mxu1 %vm3652_vm12, %v2361_v32  ;;  %v2515_v55 = vpack.c.bf16 %v3233_v5, %v3232_v6  ;;  %v3238_v28 = vunpack.i.h.bf16 %v3236_v23  ;;  %v3237_v29 = vunpack.i.l.bf16 %v3236_v23  ;;  %v3321_v5 = vld [vmem:[#allocation5 + $0x120] sm:$0xff]   ;;  %v3324_v6 = vld [vmem:[#allocation5 + $0x238] sm:$0xff]  }
  0xeb   :  { %2758 = vmatmul.mubr.msk.bf16.gmra.mrb[4].mxu1 %vm216_vm0, %v3279_v33  ;;  %2874 = vmatmul.mubr.msk.bf16.vlgmr.msra.gmra.mrb[0].mxu0 %vm216_vm0, %v3280_v38  ;;  %v3297_v33 = vld [vmem:[#allocation5 + $0xa0] sm:$0xff]   ;;  %v2518_v36 = vpack.c.bf16 %v3238_v28, %v3237_v29 }
  0xec   :  { %2774 = vmatpush3.bf16.msk.msra.mxu1 %vm3652_vm12, %v2361_v32  ;;  %2761 = vmatprep.mubr.msk.bf16.mxu1 %vm216_vm0, %v3281_v42  ;;  %v3241_v32 = vpop.permute.xlu0 %3240  ;;  %v3246_v40 = vpop.permute.xlu1 %3245 }
  0xed   :  { %2877 = vmatprep.mubr.msk.bf16.mxu0 %vm216_vm0, %v3282_v43  ;;  %2890 = vmatpush3.bf16.msk.msra.mxu0 %vm3675_vm13, %v3668_v10  ;;  %v3288_v10 = vld [vmem:[#allocation5 + $0x1a8] sm:$0xff]   ;;  %v3243_v37 = vunpack.i.h.bf16 %v3241_v32  ;;  %v3242_v38 = vunpack.i.l.bf16 %v3241_v32  ;;  %v3248_v42 = vunpack.i.h.bf16 %v3246_v40  ;;  %v3247_v43 = vunpack.i.l.bf16 %v3246_v40 }
  0xee   :  { %2775 = vmatprep.subr.msk.bf16.mxu1 %vm3652_vm12, %v2364_v47  ;;  %2891 = vmatprep.subr.msk.bf16.mxu0 %vm3675_vm13, %v2490_v48 }
  0xef   :  { %v2521_v41 = vpack.c.bf16 %v3243_v37, %v3242_v38 }
  0xf0   :  { %2776 = vmatpush3.bf16.msk.msra.mxu1 %vm3652_vm12, %v2364_v47  ;;  %v3302_v47 = vld [vmem:[#allocation5 + $0x1e0] sm:$0xff]  }
  0xf1   :  { %2892 = vmatpush3.bf16.msk.msra.mxu0 %vm3675_vm13, %v2490_v48  ;;  %2793 = vmatprep.subr.msk.bf16.mxu1 %vm3716_vm14, %v2383_v54  ;;  %v2524_v48 = vpack.c.bf16 %v3248_v42, %v3247_v43 }
  0xf2   :  { %2893 = vmatprep.subr.msk.bf16.mxu0 %vm3675_vm13, %v2493_v57 }
  0xf3   :  { %2762 = vmatmul.mubr.msk.bf16.gmra.mrb[8].mxu1 %vm216_vm0, %v3283_v61  ;;  %2878 = vmatmul.mubr.msk.bf16.gmra.mrb[4].mxu0 %vm216_vm0, %v3284_v62  ;;  %v3313_v61 = vld [vmem:[#allocation5 + $0xe0] sm:$0xff]   ;;  %v3314_v62 = vld [vmem:[#allocation5 + $0x210] sm:$0xff]  }
  0xf4   :  { %2765 = vmatprep.mubr.msk.bf16.mxu1 %vm216_vm0, %v3285_v3  ;;  %2881 = vmatprep.mubr.msk.bf16.mxu0 %vm216_vm0, %v3286_v4  ;;  %v3317_v3 = vld [vmem:[#allocation5 + $0xf0] sm:$0xff]   ;;  %v3319_v4 = vld [vmem:[#allocation5 + $0xf8] sm:$0xff]  }
  0xf5   :  { %2894 = vmatpush3.bf16.msk.msra.mxu0 %vm3675_vm13, %v2493_v57  ;;  %v3309_v57 = vld [vmem:[#allocation5 + $0xd0] sm:$0xff]  }
  0xf6   :  { %2895 = vmatprep.subr.msk.bf16.mxu0 %vm3675_vm13, %v2496_v56 }
  0xf9   :  { %2896 = vmatpush3.bf16.msk.msra.mxu0 %vm3675_vm13, %v2496_v56  ;;  %v3320_v56 = vld [vmem:[#allocation5 + $0x228] sm:$0xff]  }
  0xfa   :  { %2913 = vmatprep.subr.msk.bf16.mxu0 %vm3740_vm1, %v2515_v55 }
  0xfb   :  { %2766 = vmatmul.mubr.msk.bf16.gmra.mrb[12].mxu1 %vm216_vm0, %v3287_v9  ;;  %2882 = vmatmul.mubr.msk.bf16.gmra.mrb[8].mxu0 %vm216_vm0, %v3288_v10 }
  0xfc   :  { %2777 = vmatprep.mubr.msk.bf16.mxu1 %vm216_vm0, %v3289_v14  ;;  %2885 = vmatprep.mubr.msk.bf16.mxu0 %vm216_vm0, %v3290_v39 }
 0x103   :  { %2778 = vmatmul.mubr.msk.bf16.vlgmr.msra.gmra.mrb[0].mxu1 %vm216_vm0, %v3291_v17  ;;  %2886 = vmatmul.mubr.msk.bf16.gmra.mrb[12].mxu0 %vm216_vm0, %v3292_v18 }
 0x104   :  { %2794 = vmatpush3.bf16.msk.msra.mxu1 %vm3716_vm14, %v2383_v54  ;;  %2781 = vmatprep.mubr.msk.bf16.mxu1 %vm216_vm0, %v3293_v19  ;;  %v3308_v54 = vld [vmem:[#allocation5 + $0x1f8] sm:$0xff]  }
 0x105   :  { %2795 = vmatprep.subr.msk.bf16.mxu1 %vm3716_vm14, %v2386_v20  ;;  %2897 = vmatprep.mubr.msk.bf16.mxu0 %vm216_vm0, %v3294_v22 }
 0x108   :  { %2796 = vmatpush3.bf16.msk.msra.mxu1 %vm3716_vm14, %v2386_v20 }
 0x109   :  { %2797 = vmatprep.subr.msk.bf16.mxu1 %vm3716_vm14, %v2389_v24 }
 0x10b   :  { %2782 = vmatmul.mubr.msk.bf16.gmra.mrb[4].mxu1 %vm216_vm0, %v3295_v30  ;;  %2898 = vmatmul.mubr.msk.bf16.vlgmr.msra.gmra.mrb[0].mxu0 %vm216_vm0, %v3296_v31 }
 0x10c   :  { %2798 = vmatpush3.bf16.msk.msra.mxu1 %vm3716_vm14, %v2389_v24  ;;  %2785 = vmatprep.mubr.msk.bf16.mxu1 %vm216_vm0, %v3297_v33 }
 0x10d   :  { %2901 = vmatprep.mubr.msk.bf16.mxu0 %vm216_vm0, %v3298_v34  ;;  %2914 = vmatpush3.bf16.msk.msra.mxu0 %vm3740_vm1, %v2515_v55  ;;  %v3326_v55 = vld [vmem:[#allocation5 + $0x138] sm:$0xff]  }
 0x10e   :  { %2799 = vmatprep.subr.msk.bf16.mxu1 %vm3716_vm14, %v2392_v35  ;;  %2915 = vmatprep.subr.msk.bf16.mxu0 %vm3740_vm1, %v2518_v36 }
 0x110   :  { %2800 = vmatpush3.bf16.msk.msra.mxu1 %vm3716_vm14, %v2392_v35 }
 0x111   :  { %2916 = vmatpush3.bf16.msk.msra.mxu0 %vm3740_vm1, %v2518_v36  ;;  %2937 = vmatprep.subr.bf16.mxu1 %v3510_v0 }
 0x112   :  { %2917 = vmatprep.subr.msk.bf16.mxu0 %vm3740_vm1, %v2521_v41 }
 0x113   :  { %2786 = vmatmul.mubr.msk.bf16.gmra.mrb[8].mxu1 %vm216_vm0, %v3299_v44  ;;  %2902 = vmatmul.mubr.msk.bf16.gmra.mrb[4].mxu0 %vm216_vm0, %v3300_v45 }
 0x114   :  { %2789 = vmatprep.mubr.msk.bf16.mxu1 %vm216_vm0, %v3301_v46  ;;  %2905 = vmatprep.mubr.msk.bf16.mxu0 %vm216_vm0, %v3302_v47 }
 0x115   :  { %2918 = vmatpush3.bf16.msk.msra.mxu0 %vm3740_vm1, %v2521_v41 }
 0x116   :  { %2919 = vmatprep.subr.msk.bf16.mxu0 %vm3740_vm1, %v2524_v48 }
 0x119   :  { %2920 = vmatpush3.bf16.msk.msra.mxu0 %vm3740_vm1, %v2524_v48 }
 0x11b   :  { %2790 = vmatmul.mubr.msk.bf16.gmra.mrb[12].mxu1 %vm216_vm0, %v3303_v49  ;;  %2906 = vmatmul.mubr.msk.bf16.gmra.mrb[8].mxu0 %vm216_vm0, %v3304_v50 }
 0x11c   :  { %2801 = vmatprep.mubr.msk.bf16.mxu1 %vm216_vm0, %v3305_v51  ;;  %2909 = vmatprep.mubr.msk.bf16.mxu0 %vm216_vm0, %v3306_v52 }
 0x123   :  { %2802 = vmatmul.mubr.msk.bf16.vlgmr.msra.gmra.mrb[0].mxu1 %vm216_vm0, %v3307_v53  ;;  %2910 = vmatmul.mubr.msk.bf16.gmra.mrb[12].mxu0 %vm216_vm0, %v3308_v54 }
 0x124   :  { %2941 = vmatpush3.bf16.msra.mxu1 %v3510_v0  ;;  %2805 = vmatprep.mubr.msk.bf16.mxu1 %vm216_vm0, %v3309_v57  ;;  %v3315_v0 = vld [vmem:[#allocation5 + $0xe8] sm:$0xff]  }
 0x125   :  { %2921 = vmatprep.mubr.msk.bf16.mxu0 %vm216_vm0, %v3310_v58  ;;  %2938 = vmatprep.subr.bf16.mxu1 %v3514_v2 }
 0x128   :  { %2942 = vmatpush3.bf16.msra.mxu1 %v3514_v2  ;;  %v3318_v2 = vld [vmem:[#allocation5 + $0x220] sm:$0xff]  }
 0x129   :  { %2939 = vmatprep.subr.bf16.mxu1 %v3512_v1 }
 0x12b   :  { %2806 = vmatmul.mubr.msk.bf16.gmra.mrb[4].mxu1 %vm216_vm0, %v3311_v59  ;;  %2922 = vmatmul.mubr.msk.bf16.vlgmr.msra.gmra.mrb[0].mxu0 %vm216_vm0, %v3312_v60 }
 0x12c   :  { %2809 = vmatprep.mubr.msk.bf16.mxu1 %vm216_vm0, %v3313_v61  ;;  %2925 = vmatprep.mubr.msk.bf16.mxu0 %vm216_vm0, %v3314_v62 }
 0x12d   :  { %2943 = vmatpush3.bf16.msra.mxu1 %v3512_v1  ;;  %v3322_v1 = vld [vmem:[#allocation5 + $0x230] sm:$0xff]  }
 0x12e   :  { %2940 = vmatprep.subr.bf16.mxu1 %v3520_v7 }
 0x131   :  { %2944 = vmatpush3.bf16.msra.mxu1 %v3520_v7  ;;  %v3323_v7 = vld [vmem:[#allocation5 + $0x128] sm:$0xff]  }
 0x133   :  { %2810 = vmatmul.mubr.msk.bf16.gmra.mrb[8].mxu1 %vm216_vm0, %v3315_v0  ;;  %2926 = vmatmul.mubr.msk.bf16.gmra.mrb[4].mxu0 %vm216_vm0, %v3316_v63 }
 0x134   :  { %2813 = vmatprep.mubr.msk.bf16.mxu1 %vm216_vm0, %v3317_v3  ;;  %2929 = vmatprep.mubr.msk.bf16.mxu0 %vm216_vm0, %v3318_v2 }
 0x135   :  { %v2088_v9 = vpop.permute.xlu1 %2087  ;;  %v2083_v12 = vpop.permute.xlu0 %2082 }
 0x13b   :  { %2814 = vmatmul.mubr.msk.bf16.gmra.mrb[12].mxu1 %vm216_vm0, %v3319_v4  ;;  %2930 = vmatmul.mubr.msk.bf16.gmra.mrb[8].mxu0 %vm216_vm0, %v3320_v56 }
 0x13c   :  { %2833 = vmatprep.mubr.msk.bf16.mxu1 %vm216_vm0, %v3321_v5  ;;  %2933 = vmatprep.mubr.msk.bf16.mxu0 %vm216_vm0, %v3322_v1 }
 0x13d   :  { %v2098_v15 = vpop.permute.xlu0 %2097 }
 0x143   :  { %2834 = vmatmul.mubr.msk.bf16.vlgmr.msra.gmra.mrb[8].mxu1 %vm216_vm0, %v3323_v7  ;;  %2934 = vmatmul.mubr.msk.bf16.gmra.mrb[12].mxu0 %vm216_vm0, %v3324_v6 }
 0x144   :  { %2837 = vmatprep.mubr.msk.bf16.mxu1 %vm216_vm0, %v3325_v8 }
 0x145   :  { %v2093_v25 = vpop.permute.xlu1 %2092 }
 0x146   :  { %v2108_v31 = vpop.permute.xlu0 %2107 }
 0x149   :  { %v2103_v28 = vpop.permute.xlu1 %2102 }
 0x14b   :  { %2838 = vmatmul.mubr.msk.bf16.gmra.mrb[12].mxu1 %vm216_vm0, %v3326_v55 }
 0x14e   :  { %v2113_v43 = vpop.permute.xlu1 %2112 }
 0x14f   :  { %v2118_v47 = vpop.permute.xlu0 %2117 }
 0x155   :  { %v2123_v59 = vpop.permute.xlu1 %2122 }
 0x156   :  { %v2128_v0 = vpop.permute.xlu0 %2127 }
 0x159   :  { %v2133_v5 = vpop.permute.xlu1 %2132 }
 0x15c   :  { %v2138_v1 = vpop.permute.xlu0 %2137 }
 0x1f6   :  { %v2803_v10 = vpop.f32.mrb[0].mxu1 }
 0x1f7   :  { %v869_v13 = vpop.f32.mrb[1].mxu1 }
 0x1f8   :  { %v2804_v14 = vpop.f32.mrb[2].mxu1 }
 0x1f9   :  { %v872_v39 = vpop.f32.mrb[3].mxu1 }
 0x1fe   :  { %v2807_v16 = vpop.f32.mrb[4].mxu1  ;;  %v2923_v17 = vpop.f32.mrb[0].mxu0 }
 0x1ff   :  { %v2945_v18 = vadd.f32 %v2923_v17, %v2803_v10  ;;  %v885_v19 = vpop.f32.mrb[5].mxu1  ;;  %v1985_v20 = vpop.f32.mrb[1].mxu0 }
 0x200   :  { %v2946_v11 = vadd.f32 %v1985_v20, %v869_v13  ;;  %v2808_v21 = vpop.f32.mrb[6].mxu1  ;;  %v2924_v22 = vpop.f32.mrb[2].mxu0 }
 0x201   :  { %v2162_v23 = vadd.f32 %v2945_v18, %v2093_v25  ;;  %v2947_v24 = vadd.f32 %v2924_v22, %v2804_v14  ;;  %v888_v26 = vpop.f32.mrb[7].mxu1  ;;  %v1988_v27 = vpop.f32.mrb[3].mxu0 }
 0x202   :  { %v2160_v29 = vadd.f32 %v2946_v11, %v2083_v12  ;;  %v2948_v30 = vadd.f32 %v1988_v27, %v872_v39  ;;  %v2148_v20 = vpop.permute.xlu0 %2147 }
 0x203   :  { %v2163_v32 = vadd.f32 %v2947_v24, %v2098_v15  ;;  %v2178_v34 = vmax.f32 %v2162_v23, 0.0 }
 0x204   :  { %v2161_v33 = vadd.f32 %v2948_v30, %v2088_v9  ;;  %v2176_v36 = vmax.f32 %v2160_v29, 0.0 }
 0x205   :  { %v2179_v35 = vmax.f32 %v2163_v32, 0.0 }
 0x206   :  { %v2177_v37 = vmax.f32 %v2161_v33, 0.0  ;;  %v2927_v38 = vpop.f32.mrb[4].mxu0 }
 0x207   :  { %v2574_v40 = vpack.c.bf16 %v2179_v35, %v2178_v34  ;;  %v2949_v41 = vadd.f32 %v2927_v38, %v2807_v16  ;;  %v2001_v42 = vpop.f32.mrb[5].mxu0  ;;  %v2143_v16 = vpop.permute.xlu1 %2142 }
 0x208   :  { %v2569_v44 = vpack.c.bf16 %v2177_v37, %v2176_v36  ;;  %v2950_v45 = vadd.f32 %v2001_v42, %v885_v19  ;;  %v2928_v46 = vpop.f32.mrb[6].mxu0  ;;  %v2158_v37 = vpop.permute.xlu0 %2157 }
 0x209   :  { %2606 = vst [vmem:[#allocation8 + $0x8] sm:$0xff] %v2574_v40   ;;  %v2166_v48 = vadd.f32 %v2949_v41, %v2113_v43  ;;  %v2951_v49 = vadd.f32 %v2928_v46, %v2808_v21  ;;  %v2004_v50 = vpop.f32.mrb[7].mxu0 }
 0x20a   :  { %2570 = vst [vmem:[#allocation8] sm:$0xff] %v2569_v44   ;;  %v2164_v51 = vadd.f32 %v2950_v45, %v2103_v28  ;;  %v2952_v52 = vadd.f32 %v2004_v50, %v888_v26 }
 0x20b   :  { %v2167_v53 = vadd.f32 %v2951_v49, %v2118_v47  ;;  %v2182_v57 = vmax.f32 %v2166_v48, 0.0  ;;  %v2153_v30 = vpop.permute.xlu1 %2152 }
 0x20c   :  { %v2165_v54 = vadd.f32 %v2952_v52, %v2108_v31  ;;  %v2180_v60 = vmax.f32 %v2164_v51, 0.0 }
 0x20d   :  { %v2183_v58 = vmax.f32 %v2167_v53, 0.0 }
 0x20e   :  { %v2181_v61 = vmax.f32 %v2165_v54, 0.0  ;;  %v2931_v62 = vpop.f32.mrb[8].mxu0 }
 0x20f   :  { %v2584_v63 = vpack.c.bf16 %v2183_v58, %v2182_v57  ;;  %v2017_v3 = vpop.f32.mrb[9].mxu0 }
 0x210   :  { %v2579_v2 = vpack.c.bf16 %v2181_v61, %v2180_v60  ;;  %v2932_v4 = vpop.f32.mrb[10].mxu0 }
 0x211   :  { %2608 = vst [vmem:[#allocation8 + $0x18] sm:$0xff] %v2584_v63   ;;  %v2020_v56 = vpop.f32.mrb[11].mxu0 }
 0x212   :  { %2607 = vst [vmem:[#allocation8 + $0x10] sm:$0xff] %v2579_v2  }
 0x216   :  { %v2835_v7 = vpop.f32.mrb[8].mxu1  ;;  %v2935_v6 = vpop.f32.mrb[12].mxu0 }
 0x217   :  { %v2953_v8 = vadd.f32 %v2931_v62, %v2835_v7  ;;  %v1119_v55 = vpop.f32.mrb[9].mxu1  ;;  %v2033_v9 = vpop.f32.mrb[13].mxu0 }
 0x218   :  { %v2954_v10 = vadd.f32 %v2017_v3, %v1119_v55  ;;  %v2836_v12 = vpop.f32.mrb[10].mxu1  ;;  %v2936_v13 = vpop.f32.mrb[14].mxu0 }
 0x219   :  { %v2170_v14 = vadd.f32 %v2953_v8, %v2133_v5  ;;  %v2955_v39 = vadd.f32 %v2932_v4, %v2836_v12  ;;  %v1122_v25 = vpop.f32.mrb[11].mxu1  ;;  %v2036_v15 = vpop.f32.mrb[15].mxu0 }
 0x21a   :  { %v2168_v17 = vadd.f32 %v2954_v10, %v2123_v59  ;;  %v2956_v18 = vadd.f32 %v2020_v56, %v1122_v25 }
 0x21b   :  { %v2171_v19 = vadd.f32 %v2955_v39, %v2138_v1  ;;  %v2186_v21 = vmax.f32 %v2170_v14, 0.0 }
 0x21c   :  { %v2169_v11 = vadd.f32 %v2956_v18, %v2128_v0  ;;  %v2184_v23 = vmax.f32 %v2168_v17, 0.0 }
 0x21d   :  { %v2187_v22 = vmax.f32 %v2171_v19, 0.0 }
 0x21e   :  { %v2185_v24 = vmax.f32 %v2169_v11, 0.0  ;;  %v2839_v26 = vpop.f32.mrb[12].mxu1 }
 0x21f   :  { %v2594_v27 = vpack.c.bf16 %v2187_v22, %v2186_v21  ;;  %v2957_v28 = vadd.f32 %v2935_v6, %v2839_v26  ;;  %v1135_v29 = vpop.f32.mrb[13].mxu1 }
 0x220   :  { %v2589_v31 = vpack.c.bf16 %v2185_v24, %v2184_v23  ;;  %v2958_v32 = vadd.f32 %v2033_v9, %v1135_v29  ;;  %v2840_v33 = vpop.f32.mrb[14].mxu1 }
 0x221   :  { %2610 = vst [vmem:[#allocation8 + $0x28] sm:$0xff] %v2594_v27   ;;  %v2174_v34 = vadd.f32 %v2957_v28, %v2153_v30  ;;  %v2959_v35 = vadd.f32 %v2936_v13, %v2840_v33  ;;  %v1138_v36 = vpop.f32.mrb[15].mxu1 }
 0x222   :  { %2609 = vst [vmem:[#allocation8 + $0x20] sm:$0xff] %v2589_v31   ;;  %v2172_v38 = vadd.f32 %v2958_v32, %v2143_v16  ;;  %v2960_v40 = vadd.f32 %v2036_v15, %v1138_v36 }
 0x223   :  { %v2175_v41 = vadd.f32 %v2959_v35, %v2158_v37  ;;  %v2190_v43 = vmax.f32 %v2174_v34, 0.0 }
 0x224   :  { %v2173_v42 = vadd.f32 %v2960_v40, %v2148_v20  ;;  %v2188_v45 = vmax.f32 %v2172_v38, 0.0 }
 0x225   :  { %v2191_v44 = vmax.f32 %v2175_v41, 0.0 }
 0x226   :  { %v2189_v46 = vmax.f32 %v2173_v42, 0.0 }
 0x227   :  { %v2604_v47 = vpack.c.bf16 %v2191_v44, %v2190_v43 }
 0x228   :  { %v2599_v48 = vpack.c.bf16 %v2189_v46, %v2188_v45 }
 0x229   :  { %2612 = vst [vmem:[#allocation8 + $0x38] sm:$0xff] %v2604_v47  }
 0x22a   :  { %2611 = vst [vmem:[#allocation8 + $0x30] sm:$0xff] %v2599_v48  }
 0x22b   :  { %3408 = shalt.err (!%p3405_p0)
}
 0x22c   :  { %s3409_s1 = scalar_lea.hbm %s3844_s3, 1024 }
 0x22d   :  { %p3410_p1 = scmp.ne.s32.totalorder %s3844_s3, %s3409_s1  ;;  %p3413_p2 = scmp.lt.u32.totalorder %s3409_s1, %s3844_s3 }
 0x22f   :  { %p3415_p3 = pnand %p3413_p2, %p3410_p1 }
 0x231   :  { %3418 = shalt.err (!%p3415_p3)
}
 0x232   :  { %2283 = dma.vmem_to_hbm [thread:$0]  %s2278_s5, 1024, %s3844_s3, [#allocation4], %s3427_s24, %s3427_s24, %s3428_s25  }
 0x233   :  { %3423 = dma.done.wait [#allocation4], 1024  }
 0x234   :  { %3424 = vsyncadd [#allocation4], 4294966272 }
 0x235   :  { %2287 = vsyncpa [#allocation3], 1 }
 0x236   :  { %2288 = vsyncpa [#allocation6], 1 }
 0x237   :  { %2289 = vsyncpa [#allocation4], 1 }

// kernel: _lambda_.7
= control target key start
LH: loop header
LB: loop body
LE: loop exit
PB: predicated region body
PF: predicated region fallthrough
CT: control target
= control target key end

     0   :  { %8 = vsyncpa [#allocation3], 0  ;;  %s3598_s0 = inlined_call_operand.hbm [shape: bf16[32,512], index: 0, kind: input, shape index: {}]   ;;  %s3599_s1 = inlined_call_operand.hbm [shape: bf16[9,64,32], index: 1, kind: input, shape index: {}]   ;;  %s3600_s2 = inlined_call_operand.hbm [shape: f32[64,1], index: 2, kind: input, shape index: {}]   ;;  %s3601_s3 = inlined_call_operand.hbm [shape: bf16[64,512], index: 3, kind: output, shape index: {}]  }
   0x1   :  { %10 = vsyncpa [#allocation3 + $0x1], 0 }
   0x2   :  { %11 = vsyncpa [#allocation6], 0 }
   0x3   :  { %12 = vsyncpa [#allocation4], 0 }
   0x4   :  { %14 = vsyncpa [#allocation4 + $0x1], 0  ;;  %s2809_s12 = smov 0   ;;  %s2811_s13 = smov 0  }
   0x5   :  { %s2813_s14 = smov 0   ;;  %s2815_s15 = smov 0  }
   0x6 LB: > { %s2830_s16 = sadd.s32 4294967295, %s2767_s15   ;;  %s1986_s17 = sadd.s32 4294967294, %s2767_s15   ;;  %s2767_s15 = sphi %s2815_s15, %s3659_s15   ;;  %s2763_s14 = sphi %s2813_s14, %s3658_s14   ;;  %s2759_s13 = sphi %s2811_s13, %s3657_s13   ;;  %s2755_s12 = sphi %s2809_s12, %s3656_s12  }
   0x7   : > { %s2834_s18 = sadd.s32 1, %s2767_s15   ;;  %s27_s19 = sadd.s32 1, %s2763_s14 }
   0x8   : > { %s24_s20 = ssub.s32 %s2767_s15, %s2834_s18  ;;  %p34_p0 = scmp.ne.s32.totalorder %s2763_s14, %s2759_s13 }
   0x9   : > { %p25_p1 = scmp.eq.s32.totalorder %s24_s20, 0  ;;  %p35_p2 = scmp.eq.s32.totalorder %s2767_s15, 0 }
   0xa   : > { %p40_p3 = scmp.ne.s32.totalorder %s2759_s13, %s2755_s12  ;;  %p3602_p4 = scmp.eq.s32.totalorder %s2830_s16, 0 }
   0xb   : > { %s2846_s21 = scalar_select %p25_p1, %s2763_s14, %s27_s19  }
   0xc   : > { %p2848_p5 = por %p35_p2, %p34_p0  ;;  %p2854_p6 = por %p3602_p4, %p40_p3 }
   0xd   : > { %p106_p7 = scmp.eq.s32.totalorder %s2830_s16, 1  ;;  %p112_p8 = scmp.eq.s32.totalorder %s1986_s17, 1 }
   0xe   : > { %s3607_s22 = scalar_select %p2848_p5, 1, 0 }
   0xf   : > { %s3608_s23 = scalar_select %p2854_p6, 1, 0 }
  0x10   : > { %p1987_p9 = scmp.ge.s32.totalorder %s2767_s15, 1  ;;  %p119_p10 = scmp.lt.s32.totalorder %s2767_s15, 3 }
  0x11   : > { %p2861_p11 = por %p106_p7, %p34_p0  ;;  %p2865_p12 = por %p112_p8, %p40_p3 }
  0x12   : > { %p2869_p13 = pnand %p1987_p9, %p119_p10  ;;  %s2769_s27 = smov [#allocation5]  }
  0x13   : > { %s3609_s24 = scalar_select %p2861_p11, 1, 0 }
  0x14   : > { %s3610_s25 = scalar_select %p2865_p12, 1, 0 }
  0x15   : > { %s3611_s26 = scalar_select %p2869_p13, 1, 0 }
  0x16   : > { %p2338_p1 = pneg %p2869_p13  ;;  %s131_s28 = sshll.u32 %s2769_s27, 4  ;;  %s132_s28 = int_to_ptr.vmem [resolvable:$true] %s131_s28 }
  0x17   : > { %s2770_s30 = smov [#allocation7]   ;;  %s2611_s7 = scalar_lea.hbm %s3599_s1, 4608 }
  0x18   : > { %p2877_p2 = pnand %p2338_p1, %p3602_p4  ;;  %s144_s4 = sshll.u32 %s2770_s30, 4  ;;  %s145_s4 = int_to_ptr.vmem [resolvable:$true] %s144_s4 }
  0x19   : > { %p2612_p7 = scmp.ne.s32.totalorder %s3599_s1, %s2611_s7  ;;  %p2618_p1 = scmp.lt.u32.totalorder %s2611_s7, %s3599_s1 }
  0x1a   : > { %p2613_p8 = pneg %p2877_p2 }
  0x1c   : > { %p2614_p9 = pnand %p2613_p8, %p2612_p7 }
  0x1e   : > { %p2615_p10 = pneg %p2614_p9 }
  0x20   : > { %p2620_p0 = pnand %p2618_p1, %p2615_p10 }
  0x22   : > { %2623 = shalt.err (!%p2620_p0)
}
  0x23   : > { %s2624_s17 = scalar_lea.vmem %s132_s28, 4608  ;;  %p2632_p11 = scmp.lt.s32.totalorder %s132_s28, %s132_s28 }
  0x24   : > { %p2625_p4 = scmp.ne.s32.totalorder %s132_s28, %s2624_s17  ;;  %p2633_p6 = scmp.lt.s32.totalorder %s2624_s17, %s2624_s17 }
  0x26   : > { %p2627_p3 = pnand %p2625_p4, %p2613_p8  ;;  %p2634_p13 = por %p2633_p6, %p2632_p11 }
  0x28   : > { %p2628_p12 = pneg %p2627_p3 }
  0x2a   : > { %p2635_p5 = pnand %p2634_p13, %p2628_p12 }
  0x2c   : > { %2638 = shalt.err (!%p2635_p5)
}
  0x2d   : > { %s2771_s19 = smov 64   ;;  %s2772_s20 = smov 4  }
  0x2e   : > { %2341 = dma.hbm_to_vmem [thread:$0]  (!%p2877_p2), %s3599_s1, 4608, %s132_s28, [#allocation6], %s2771_s19, %s2771_s19, %s2772_s20  }
  0x2f   : > { %p3613_p0 = scmp.ne.s32.totalorder %s3607_s22, 0  ;;  %p3614_p4 = scmp.lt.s32.totalorder %s2767_s15, 2 }
  0x30   : > { %s158_s6 = sand.u32 1, %s2763_s14   ;;  %s2639_s9 = scalar_lea.hbm %s3600_s2, 1024 }
  0x31   : > { %p2909_p3 = pnand %p3614_p4, %p3613_p0  ;;  %p2640_p5 = scmp.ne.s32.totalorder %s3600_s2, %s2639_s9 }
  0x32   : > { %p2646_p12 = scmp.lt.u32.totalorder %s2639_s9, %s3600_s2 }
  0x33   : > { %s3615_s5 = scalar_select %p2909_p3, 1, 0 }
  0x34   : > { %p2642_p6 = pnand %p2640_p5, %p2613_p8 }
  0x36   : > { %p2643_p11 = pneg %p2642_p6 }
  0x38   : > { %p2648_p13 = pnand %p2646_p12, %p2643_p11 }
  0x3a   : > { %2651 = shalt.err (!%p2648_p13)
}
  0x3b   : > { %s2652_s17 = scalar_lea.vmem %s145_s4, 1024  ;;  %p2660_p1 = scmp.lt.s32.totalorder %s145_s4, %s145_s4 }
  0x3c   : > { %p2653_p7 = scmp.ne.s32.totalorder %s145_s4, %s2652_s17  ;;  %p2661_p0 = scmp.lt.s32.totalorder %s2652_s17, %s2652_s17 }
  0x3e   : > { %p2655_p9 = pnand %p2653_p7, %p2613_p8  ;;  %p2662_p4 = por %p2661_p0, %p2660_p1 }
  0x40   : > { %p2656_p10 = pneg %p2655_p9 }
  0x42   : > { %p2663_p3 = pnand %p2662_p4, %p2656_p10 }
  0x44   : > { %2666 = shalt.err (!%p2663_p3)
}
  0x45   : > { %s2773_s19 = smov 128   ;;  %s2774_s20 = smov 8  }
  0x46   : > { %2344 = dma.hbm_to_vmem [thread:$0]  (!%p2877_p2), %s3600_s2, 1024, %s145_s4, [#allocation6], %s2773_s19, %s2773_s19, %s2774_s20  }
  0x47   : > { %s1991_s7 = sshll.u32 %s158_s6, 5  ;;  %s2184_s8 = sshll.u32 %s2767_s15, 7 }
  0x48   : > { %s2941_s11 = scalar_lea.hbm %s3598_s0, %s2184_s8  ;;  %s162_s22 = scalar_lea.vmem [#allocation2], %s1991_s7 }
  0x49   : > { %s169_s29 = sshll.u32 %s162_s22, 4  ;;  %s2945_s28 = scalar_lea.sflag [#allocation3], %s158_s6  ;;  %s2943_s29 = int_to_ptr.vmem [resolvable:$true] %s169_s29 }
  0x4a   : > { %s2667_s17 = scalar_lea.hbm %s2941_s11, 512  ;;  %p3616_p2 = scmp.ne.s32.totalorder %s3615_s5, 0 }
  0x4b   : > { %p2668_p8 = scmp.ne.s32.totalorder %s2941_s11, %s2667_s17  ;;  %s2672_s30 = scalar_lea.hbm %s3598_s0, 1024 }
  0x4c   : > { %p2669_p3 = pneg %p3616_p2  ;;  %p2673_p11 = scmp.lt.u32.totalorder %s2941_s11, %s3598_s0 }
  0x4d   : > { %p2674_p12 = scmp.lt.u32.totalorder %s2672_s30, %s2667_s17  ;;  %p2676_p7 = scmp.lt.u32.totalorder %s2667_s17, %s2941_s11 }
  0x4e   : > { %p2670_p5 = pnand %p2669_p3, %p2668_p8 }
  0x4f   : > { %p2675_p13 = por %p2674_p12, %p2673_p11 }
  0x50   : > { %p2671_p6 = pneg %p2670_p5 }
  0x51   : > { %p2677_p9 = por %p2676_p7, %p2675_p13 }
  0x53   : > { %p2678_p10 = pnand %p2677_p9, %p2671_p6 }
  0x55   : > { %2681 = shalt.err (!%p2678_p10)
}
  0x56   : > { %s2682_s6 = scalar_lea.vmem %s2943_s29, 512  ;;  %s2775_s7 = smov [#allocation2]  }
  0x57   : > { %p2683_p1 = scmp.ne.s32.totalorder %s2943_s29, %s2682_s6  ;;  %s2687_s10 = sshll.u32 %s2775_s7, 4  ;;  %s2688_s10 = int_to_ptr.vmem [resolvable:$false] %s2687_s10 }
  0x58   : > { %s2689_s22 = scalar_lea.vmem %s2688_s10, 1024  ;;  %p2690_p8 = scmp.lt.s32.totalorder %s2943_s29, %s2688_s10 }
  0x59   : > { %p2685_p0 = pnand %p2683_p1, %p2669_p3  ;;  %p2691_p5 = scmp.lt.s32.totalorder %s2689_s22, %s2682_s6 }
  0x5b   : > { %p2686_p4 = pneg %p2685_p0  ;;  %p2692_p11 = por %p2691_p5, %p2690_p8 }
  0x5d   : > { %p2693_p12 = pnand %p2692_p11, %p2686_p4 }
  0x5f   : > { %2696 = shalt.err (!%p2693_p12)
}
  0x60   : > { %s2776_s17 = smov 256   ;;  %p3617_p3 = scmp.ne.s32.totalorder %s3611_s26, 0 }
  0x61   : > { %2348 = dma.hbm_to_vmem [thread:$0]  (!%p3616_p2), %s2941_s11, 512, %s2943_s29, %s2945_s28, %s2776_s17, %s2773_s19, %s2774_s20  }
  0x62   : > { %181 = sbr.rel (%p3617_p3) target bundleno = 622 (0x26e), region = 32  ;;  %s2978_s4 = sand.u32 (!%p3617_p3), 1, %s2759_s13  }
  0x63   : > { %s1995_s27 = sshll.u32 (!%p3617_p3), %s2978_s4, 5  ;;  %s184_s30 = scalar_lea.sflag (!%p3617_p3), [#allocation3], %s2978_s4 }
  0x64   : > { %s187_s8 = scalar_lea.vmem (!%p3617_p3), [#allocation2], %s1995_s27  ;;  %p3618_p6 = scmp.ne.s32.totalorder (!%p3617_p3), %s3608_s23, 0 }
  0x69   : > { %2742 = dma.done.wait (%p3618_p6), %s184_s30, 512  }
  0x6a   : > { %2744 = vsyncadd (%p3618_p6), %s184_s30, 4294966784  ;;  %p3619_p13 = scmp.eq.s32.totalorder %s2830_s16, 0 }
  0x6c   : > { %2746 = dma.done.wait (%p3619_p13), [#allocation6], 5632   ;;  %p3620_p2 = pmov %p3619_p13 }
  0x6d   : > { %v2777_v0 = vmov 0   ;;  %v223_v1 = vld [vmem:[%s187_s8 + $0x10] sm:$0xff]  ;;  %v224_v2 = vld [vmem:[%s187_s8 + $0x18] sm:$0xff]  ;;  %v221_v3 = vld [vmem:[%s187_s8] sm:$0xff]  ;;  %s2778_s23 = smov 8   ;;  %s2779_s26 = smov 127   ;;  %v233_v23 = vlaneseq }
  0x6e   : > { %2748 = vsyncadd (%p3620_p2), [#allocation6], 4294961664  ;;  %999 = vmatprep.mubr.bf16.mxu0 %v2777_v0  ;;  %416 = vmatprep.mubr.bf16.mxu1 %v2777_v0  ;;  %v229_v4 = vunpack.c.l.bf16 %v223_v1  ;;  %v231_v5 = vunpack.c.l.bf16 %v224_v2  ;;  %v222_v6 = vld [vmem:[%s187_s8 + $0x8] sm:$0xff]  ;;  %v225_v7 = vunpack.c.l.bf16 %v221_v3  ;;  %v230_v8 = vunpack.c.h.bf16 %v223_v1  ;;  %v2575_v21 = vld [vmem:[#allocation5 + $0x80] sm:$0xff]   ;;  %s2780_s5 = smov 9   ;;  %s2781_s19 = smov 121  }
  0x6f   : > { %2569 = vset.pattern.permute.xlu0 %v2777_v0  ;;  %2570 = vset.pattern.permute.xlu1 %v2777_v0  ;;  %v227_v9 = vunpack.c.l.bf16 %v222_v6  ;;  %v232_v10 = vunpack.c.h.bf16 %v224_v2  ;;  %v226_v11 = vunpack.c.h.bf16 %v221_v3  ;;  %v228_v12 = vunpack.c.h.bf16 %v222_v6  ;;  %v2576_v22 = vld [vmem:[#allocation5 + $0x88] sm:$0xff]   ;;  %s2782_s20 = smov 7   ;;  %s2783_s11 = smov 120  }
  0x70   : > { %v2419_v13 = vpack.i.bf16 %v231_v5, %v229_v4  ;;  %v2998_v17 = vcombine.high %v221_v3, %v222_v6  ;;  %v3000_v18 = vcombine.low %v221_v3, %v222_v6  ;;  %v3002_v19 = vcombine.high %v223_v1, %v224_v2  ;;  %s2784_s29 = smov 1   ;;  %s2785_s28 = smov 119  }
  0x71   : > { %v2409_v14 = vpack.i.bf16 %v227_v9, %v225_v7  ;;  %v2424_v15 = vpack.i.bf16 %v232_v10, %v230_v8  ;;  %v2414_v16 = vpack.i.bf16 %v228_v12, %v226_v11  ;;  %v3006_v20 = vcombine.low %v223_v1, %v224_v2  ;;  %s1998_s9 = sshll.u32 %s2978_s4, 6  ;;  %s2193_s10 = sshll.u32 %s2830_s16, 7 }
  0x72   : > { %2420 = vrot.lane.b32.xlu1 %v2419_v13, %s2778_s23  ;;  %967 = vmatprep.subr.bf16.mxu0 %v2998_v17  ;;  %vm371_vm0 = vcmask 261120   ;;  %v3014_v24 = vand.u32 127, %v233_v23  ;;  %s3536_s6 = scalar_lea.vmem [#allocation8], %s1998_s9  ;;  %s3551_s27 = scalar_lea.hbm %s3601_s3, %s2193_s10 }
  0x73   : > { %2410 = vrot.lane.b32.xlu0 %v2409_v14, %s2778_s23  ;;  %968 = vmatpush1.bf16.msra.mxu0 %v3000_v18  ;;  %s1894_s7 = sshll.u32 %s3536_s6, 4  ;;  %s1881_s30 = scalar_lea.sflag [#allocation4], %s2978_s4  ;;  %s3546_s7 = int_to_ptr.vmem [resolvable:$true] %s1894_s7 }
  0x74   : > { %969 = vmatprep.subr.bf16.mxu0 %v3002_v19  ;;  %v235_v25 = vadd.s32 128, %v3014_v24  ;;  %v238_v27 = vshra.s32 %v3014_v24, 3  ;;  %vm317_vm1 = vcmp.lt.s32.totalorder %v3014_v24, 8  ;;  %v236_v39 = vand.u32 7, %v3014_v24  ;;  %s2697_s8 = scalar_lea.vmem %s3546_s7, 1024  ;;  %p3653_p9 = scmp.ne.s32.totalorder %s3609_s24, 0 }
  0x75   : > { %vm1072_vm3 = vcmp.lt.s32.totalorder %v3014_v24, 127  ;;  %vm266_vm12 = vcmp.lt.s32.totalorder %v3014_v24, 9  ;;  %p2698_p7 = scmp.ne.s32.totalorder %s3546_s7, %s2697_s8  ;;  %s2786_s16 = smov [#allocation8]  }
  0x76   : > { %2425 = vrot.lane.b32.xlu1 %v2424_v15, %s2778_s23  ;;  %v239_v26 = vshra.s32 %v235_v25, 3  ;;  %v3020_v31 = vand.u32 7, %v238_v27  ;;  %v237_v32 = vand.u32 7, %v235_v25  ;;  %vm3057_vm8 = vcmp.ne.s32.totalorder %v236_v39, 7  ;;  %v2577_v27 = vld [vmem:[#allocation5 + $0x20] sm:$0xff]  }
  0x77   : > { %2415 = vrot.lane.b32.xlu0 %v2414_v16, %s2778_s23  ;;  %970 = vmatpush1.bf16.msra.mxu0 %v3006_v20  ;;  %vm2098_vm10 = vmpackc.low %vm3057_vm8, %vm3057_vm8  ;;  %vm3095_vm13 = vcmp.ne.s32.totalorder %v236_v39, 0  ;;  %p2699_p10 = pnand %p2698_p7, %p3653_p9 }
  0x78   : > { %v3018_v30 = vand.u32 7, %v239_v26  ;;  %vm242_vm4 = vcmp.ne.s32.totalorder %v3020_v31, 0  ;;  %vm3027_vm5 = vcmp.ne.s32.totalorder %v237_v32, 7  ;;  %vm3085_vm11 = vcmp.ne.s32.totalorder %v237_v32, 0 }
  0x79   : > { %vm3053_vm7 = vmpackc.low %vm242_vm4, %vm242_vm4  ;;  %p2700_p1 = pneg %p2699_p10 }
  0x7a   : > { %2435 = vrot.lane.b32.xlu1 %v2414_v16, %s2779_s26  ;;  %2087 = vmatmul.mubr.msk.bf16.vlgmr.msra.gmra.mrb[0].mxu0 %vm371_vm0, %v2575_v21  ;;  %vm243_vm2 = vcmp.ne.s32.totalorder %v3018_v30, 0  ;;  %vm2095_vm9 = vmpackc.low %vm3027_vm5, %vm3027_vm5 }
  0x7b   : > { %2430 = vrot.lane.b32.xlu0 %v2409_v14, %s2779_s26  ;;  %1009 = vmatprep.mubr.bf16.mxu0 %v2777_v0  ;;  %vm3042_vm6 = vmpackc.low %vm243_vm2, %vm243_vm2 }
  0x7c   : > { %vm3118_vm14 = vmand %vm243_vm2, %vm3085_vm11 }
  0x7d   : > { %vm3126_vm15 = vmand %vm242_vm4, %vm3095_vm13 }
  0x7e   : > { %2445 = vrot.lane.b32.xlu1 %v2424_v15, %s2779_s26 }
  0x7f   : > { %2440 = vrot.lane.b32.xlu0 %v2419_v13, %s2779_s26  ;;  %s2701_s26 = sshll.u32 %s2786_s16, 4  ;;  %s2702_s26 = int_to_ptr.vmem [resolvable:$false] %s2701_s26 }
  0x80   : > { %p2704_p0 = scmp.lt.s32.totalorder %s3546_s7, %s2702_s26 }
  0x82   : > { %2455 = vrot.lane.b32.xlu1 %v2414_v16, %s2780_s5  ;;  %2088 = vmatmul.mubr.msk.bf16.gmra.mrb[4].mxu0 %vm371_vm0, %v2576_v22 }
  0x83   : > { %2450 = vrot.lane.b32.xlu0 %v2409_v14, %s2780_s5  ;;  %1170 = vmatprep.mubr.bf16.mxu0 %v2777_v0 }
  0x86   : > { %2465 = vrot.lane.b32.xlu1 %v2424_v15, %s2780_s5 }
  0x87   : > { %2460 = vrot.lane.b32.xlu0 %v2419_v13, %s2780_s5  ;;  %s2703_s5 = scalar_lea.vmem %s2702_s26, 2048 }
  0x88   : > { %p2705_p4 = scmp.lt.s32.totalorder %s2703_s5, %s2697_s8 }
  0x8a   : > { %2475 = vrot.lane.b32.xlu1 %v2414_v16, %s2781_s19  ;;  %p2706_p8 = por %p2705_p4, %p2704_p0 }
  0x8b   : > { %2470 = vrot.lane.b32.xlu0 %v2409_v14, %s2781_s19 }
  0x8c   : > { %p2707_p5 = pnand %p2706_p8, %p2700_p1 }
  0x8e   : > { %2485 = vrot.lane.b32.xlu1 %v2424_v15, %s2781_s19 }
  0x8f   : > { %2480 = vrot.lane.b32.xlu0 %v2419_v13, %s2781_s19 }
  0x92   : > { %2495 = vrot.lane.b32.xlu1 %v2414_v16, %s2782_s20 }
  0x93   : > { %2490 = vrot.lane.b32.xlu0 %v2409_v14, %s2782_s20 }
  0x96   : > { %2505 = vrot.lane.b32.xlu1 %v2424_v15, %s2782_s20 }
  0x97   : > { %2500 = vrot.lane.b32.xlu0 %v2419_v13, %s2782_s20 }
  0x9a   : > { %2515 = vrot.lane.b32.xlu1 %v2414_v16, %s2783_s11 }
  0x9b   : > { %2510 = vrot.lane.b32.xlu0 %v2409_v14, %s2783_s11 }
  0x9e   : > { %2525 = vrot.lane.b32.xlu1 %v2424_v15, %s2783_s11 }
  0x9f   : > { %2520 = vrot.lane.b32.xlu0 %v2419_v13, %s2783_s11 }
  0xa2   : > { %2535 = vrot.lane.b32.xlu1 %v2414_v16, %s2784_s29 }
  0xa3   : > { %2530 = vrot.lane.b32.xlu0 %v2409_v14, %s2784_s29 }
  0xa6   : > { %2545 = vrot.lane.b32.xlu1 %v2424_v15, %s2784_s29 }
  0xa7   : > { %2540 = vrot.lane.b32.xlu0 %v2419_v13, %s2784_s29 }
  0xaa   : > { %2555 = vrot.lane.b32.xlu1 %v2414_v16, %s2785_s28  ;;  %v2597_v16 = vld [vmem:[#allocation5 + $0x50] sm:$0xff]  }
  0xab   : > { %2550 = vrot.lane.b32.xlu0 %v2409_v14, %s2785_s28 }
  0xae   : > { %2565 = vrot.lane.b32.xlu1 %v2424_v15, %s2785_s28 }
  0xaf   : > { %2560 = vrot.lane.b32.xlu0 %v2419_v13, %s2785_s28 }
  0xe4   : > { %v2421_v28 = vpop.permute.xlu1 %2420 }
  0xe5   : > { %v2411_v29 = vpop.permute.xlu0 %2410  ;;  %v2423_v33 = vunpack.i.h.bf16 %v2421_v28  ;;  %v2422_v34 = vunpack.i.l.bf16 %v2421_v28 }
  0xe6   : > { %v2413_v40 = vunpack.i.h.bf16 %v2411_v29  ;;  %v2412_v41 = vunpack.i.l.bf16 %v2411_v29 }
  0xe8   : > { %v2426_v35 = vpop.permute.xlu1 %2425 }
  0xe9   : > { %v2428_v36 = vunpack.i.h.bf16 %v2426_v35  ;;  %v2427_v37 = vunpack.i.l.bf16 %v2426_v35  ;;  %v2416_v38 = vpop.permute.xlu0 %2415 }
  0xea   : > { %v2418_v42 = vunpack.i.h.bf16 %v2416_v38  ;;  %v2417_v43 = vunpack.i.l.bf16 %v2416_v38 }
  0xeb   : > { %v320_v45 = vsel %vm317_vm1, %v2422_v34, %v2427_v37  ;;  %v321_v46 = vsel %vm317_vm1, %v2423_v33, %v2428_v36  ;;  %v324_v61 = vsel %vm317_vm1, %v2427_v37, %v2422_v34  ;;  %v325_v62 = vsel %vm317_vm1, %v2428_v36, %v2423_v33 }
  0xec   : > { %v2436_v47 = vpop.permute.xlu1 %2435  ;;  %v318_v48 = vsel %vm317_vm1, %v2412_v41, %v2417_v43  ;;  %v319_v49 = vsel %vm317_vm1, %v2413_v40, %v2418_v42  ;;  %v322_v55 = vsel %vm317_vm1, %v2417_v43, %v2412_v41  ;;  %v323_v58 = vsel %vm317_vm1, %v2418_v42, %v2413_v40  ;;  %vm2023_vm1 = vmpackc.low %vm3118_vm14, %vm3118_vm14  ;;  %v2578_v43 = vld [vmem:[#allocation5 + $0xa0] sm:$0xff]  }
  0xed   : > { %v2438_v51 = vunpack.i.h.bf16 %v2436_v47  ;;  %v2437_v52 = vunpack.i.l.bf16 %v2436_v47  ;;  %v2431_v53 = vpop.permute.xlu0 %2430  ;;  %v2004_v54 = vpack.c.bf16 %v319_v49, %v318_v48  ;;  %v2010_v63 = vpack.c.bf16 %v321_v46, %v320_v45 }
  0xee   : > { %v2433_v56 = vunpack.i.h.bf16 %v2431_v53  ;;  %v2432_v57 = vunpack.i.l.bf16 %v2431_v53  ;;  %v2007_v1 = vpack.c.bf16 %v323_v58, %v322_v55  ;;  %v2013_v15 = vpack.c.bf16 %v325_v62, %v324_v61  ;;  %v2579_v53 = vld [vmem:[#allocation5 + $0x28] sm:$0xff]  }
  0xef   : > { %2005 = vmatprep.subr.msk.bf16.mxu1 %vm3042_vm6, %v2004_v54 }
  0xf0   : > { %v1074_v2 = vsel %vm1072_vm3, %v2433_v56, %v2438_v51  ;;  %v1078_v3 = vsel %vm1072_vm3, %v2438_v51, %v2433_v56  ;;  %v1073_v4 = vsel %vm1072_vm3, %v2432_v57, %v2437_v52  ;;  %v1077_v5 = vsel %vm1072_vm3, %v2437_v52, %v2432_v57  ;;  %v2446_v6 = vpop.permute.xlu1 %2445  ;;  %2008 = vmatpush1.bf16.msk.msra.mxu1 %vm3053_vm7, %v2007_v1 }
  0xf1   : > { %v2096_v7 = vpack.c.bf16 %v1078_v3, %v1077_v5  ;;  %v2099_v8 = vpack.c.bf16 %v1074_v2, %v1073_v4  ;;  %v2448_v9 = vunpack.i.h.bf16 %v2446_v6  ;;  %v2447_v10 = vunpack.i.l.bf16 %v2446_v6  ;;  %v2441_v11 = vpop.permute.xlu0 %2440  ;;  %2011 = vmatprep.subr.msk.bf16.mxu1 %vm3042_vm6, %v2010_v63  ;;  %v2580_v5 = vld [vmem:[#allocation5 + $0xa8] sm:$0xff]   ;;  %v2584_v6 = vld [vmem:[#allocation5 + $0xb8] sm:$0xff]  }
  0xf2   : > { %v2443_v12 = vunpack.i.h.bf16 %v2441_v11  ;;  %v2442_v13 = vunpack.i.l.bf16 %v2441_v11  ;;  %vm245_vm6 = vcmp.ne.s32.totalorder %v3018_v30, 7  ;;  %v2588_v30 = vld [vmem:[#allocation5 + $0xc8] sm:$0xff]  }
  0xf3   : > { %2097 = vmatprep.subr.msk.bf16.mxu0 %vm2095_vm9, %v2096_v7 }
  0xf4   : > { %v1076_v21 = vsel %vm1072_vm3, %v2443_v12, %v2448_v9  ;;  %v1080_v22 = vsel %vm1072_vm3, %v2448_v9, %v2443_v12  ;;  %v1075_v23 = vsel %vm1072_vm3, %v2442_v13, %v2447_v10  ;;  %v1079_v25 = vsel %vm1072_vm3, %v2447_v10, %v2442_v13  ;;  %2100 = vmatpush1.bf16.msk.msra.mxu0 %vm2098_vm10, %v2099_v8  ;;  %v2456_v26 = vpop.permute.xlu1 %2455  ;;  %vm2026_vm3 = vmpackc.low %vm3126_vm15, %vm3126_vm15  ;;  %v1744_v12 = vld [vmem:[#allocation7] sm:$0xff]  ;;  %v1745_v13 = vld [vmem:[#allocation7 + $0x8] sm:$0xff] }
  0xf5   : > { %v2102_v28 = vpack.c.bf16 %v1080_v22, %v1079_v25  ;;  %v2105_v29 = vpack.c.bf16 %v1076_v21, %v1075_v23  ;;  %2014 = vmatpush1.bf16.msk.msra.mxu1 %vm3053_vm7, %v2013_v15  ;;  %v2458_v32 = vunpack.i.h.bf16 %v2456_v26  ;;  %v2457_v33 = vunpack.i.l.bf16 %v2456_v26  ;;  %v2451_v34 = vpop.permute.xlu0 %2450  ;;  %1754 = vperm.xlu0 %2569, %v1744_v12  }
  0xf6   : > { %v2453_v36 = vunpack.i.h.bf16 %v2451_v34  ;;  %v2452_v37 = vunpack.i.l.bf16 %v2451_v34  ;;  %vm244_vm7 = vcmp.ne.s32.totalorder %v3020_v31, 7  ;;  %1759 = vperm.xlu1 %2570, %v1745_v13   ;;  %vm578_vm15 = vcmp.lt.s32.totalorder %v3014_v24, 7 }
  0xf7   : > { %2103 = vmatprep.subr.msk.bf16.mxu0 %vm2095_vm9, %v2102_v28  ;;  %vm1243_vm9 = vcmp.lt.s32.totalorder %v3014_v24, 121  ;;  %v1746_v28 = vld [vmem:[#allocation7 + $0x10] sm:$0xff] }
  0xf8   : > { %v268_v39 = vsel %vm266_vm12, %v2453_v36, %v2458_v32  ;;  %v272_v40 = vsel %vm266_vm12, %v2458_v32, %v2453_v36  ;;  %v267_v41 = vsel %vm266_vm12, %v2452_v37, %v2457_v33  ;;  %v271_v42 = vsel %vm266_vm12, %v2457_v33, %v2452_v37  ;;  %2015 = vmatmul.mubr.msk.bf16.vlgmr.msra.gmra.mrb[0].mxu1 %vm371_vm0, %v2577_v27  ;;  %v2466_v45 = vpop.permute.xlu1 %2465  ;;  %v2581_v32 = vld [vmem:[#allocation5 + $0x30] sm:$0xff]  }
  0xf9   : > { %v2024_v46 = vpack.c.bf16 %v268_v39, %v267_v41  ;;  %v2027_v47 = vpack.c.bf16 %v272_v40, %v271_v42  ;;  %2106 = vmatpush1.bf16.msk.msra.mxu0 %vm2098_vm10, %v2105_v29  ;;  %426 = vmatprep.mubr.bf16.mxu1 %v2777_v0  ;;  %v2468_v48 = vunpack.i.h.bf16 %v2466_v45  ;;  %v2467_v49 = vunpack.i.l.bf16 %v2466_v45  ;;  %v2461_v50 = vpop.permute.xlu0 %2460  ;;  %vm3183_vm10 = vmand %vm245_vm6, %vm3085_vm11  ;;  %v1747_v29 = vld [vmem:[#allocation7 + $0x18] sm:$0xff] }
  0xfa   : > { %v2463_v51 = vunpack.i.h.bf16 %v2461_v50  ;;  %v2462_v52 = vunpack.i.l.bf16 %v2461_v50  ;;  %vm2115_vm14 = vmpackc.low %vm3183_vm10, %vm3183_vm10  ;;  %1764 = vperm.xlu1 %2570, %v1746_v28   ;;  %1769 = vperm.xlu0 %2569, %v1747_v29  }
  0xfb   : > { %2025 = vmatprep.subr.msk.bf16.mxu1 %vm2023_vm1, %v2024_v46  ;;  %vm3285_vm10 = vmpackc.low %vm245_vm6, %vm245_vm6 }
  0xfc   : > { %2107 = vmatmul.mubr.msk.bf16.vlgmr.msra.gmra.mrb[0].mxu0 %vm371_vm0, %v2578_v43  ;;  %2028 = vmatpush1.bf16.msk.msra.mxu1 %vm2026_vm3, %v2027_v47  ;;  %v270_v54 = vsel %vm266_vm12, %v2463_v51, %v2468_v48  ;;  %v274_v55 = vsel %vm266_vm12, %v2468_v48, %v2463_v51  ;;  %v269_v56 = vsel %vm266_vm12, %v2462_v52, %v2467_v49  ;;  %v2476_v57 = vpop.permute.xlu1 %2475  ;;  %v1748_v47 = vld [vmem:[#allocation7 + $0x20] sm:$0xff]  ;;  %v1749_v48 = vld [vmem:[#allocation7 + $0x28] sm:$0xff] }
  0xfd   : > { %v273_v58 = vsel %vm266_vm12, %v2467_v49, %v2462_v52  ;;  %v2030_v59 = vpack.c.bf16 %v270_v54, %v269_v56  ;;  %1180 = vmatprep.mubr.bf16.mxu0 %v2777_v0  ;;  %v2478_v61 = vunpack.i.h.bf16 %v2476_v57  ;;  %v2477_v62 = vunpack.i.l.bf16 %v2476_v57  ;;  %v2471_v63 = vpop.permute.xlu0 %2470  ;;  %vm3196_vm12 = vmand %vm244_vm7, %vm3095_vm13  ;;  %v2582_v49 = vld [vmem:[#allocation5 + $0xb0] sm:$0xff]   ;;  %v1751_v56 = vld [vmem:[#allocation7 + $0x38] sm:$0xff] }
  0xfe   : > { %v2033_v2 = vpack.c.bf16 %v274_v55, %v273_v58  ;;  %v2473_v3 = vunpack.i.h.bf16 %v2471_v63  ;;  %v2472_v4 = vunpack.i.l.bf16 %v2471_v63  ;;  %1774 = vperm.xlu1 %2570, %v1748_v47   ;;  %1779 = vperm.xlu0 %2569, %v1749_v48   ;;  %v1750_v55 = vld [vmem:[#allocation7 + $0x30] sm:$0xff]  ;;  %v2583_v57 = vld [vmem:[#allocation5 + $0x38] sm:$0xff]   ;;  %v2587_v43 = vld [vmem:[#allocation5 + $0x8] sm:$0xff]  }
  0xff   : > { %2031 = vmatprep.subr.msk.bf16.mxu1 %vm2023_vm1, %v2030_v59  ;;  %vm2118_vm1 = vmpackc.low %vm3196_vm12, %vm3196_vm12 }
 0x100   : > { %2016 = vmatmul.mubr.msk.bf16.gmra.mrb[4].mxu1 %vm371_vm0, %v2579_v53  ;;  %v1245_v7 = vsel %vm1243_vm9, %v2473_v3, %v2478_v61  ;;  %v1249_v8 = vsel %vm1243_vm9, %v2478_v61, %v2473_v3  ;;  %v1244_v9 = vsel %vm1243_vm9, %v2472_v4, %v2477_v62  ;;  %v1248_v10 = vsel %vm1243_vm9, %v2477_v62, %v2472_v4  ;;  %v2486_v11 = vpop.permute.xlu1 %2485  ;;  %vm3298_vm12 = vmand %vm242_vm4, %vm3057_vm8 }
 0x101   : > { %v2116_v15 = vpack.c.bf16 %v1249_v8, %v1248_v10  ;;  %v2119_v21 = vpack.c.bf16 %v1245_v7, %v1244_v9  ;;  %436 = vmatprep.mubr.bf16.mxu1 %v2777_v0  ;;  %2034 = vmatpush1.bf16.msk.msra.mxu1 %vm2026_vm3, %v2033_v2  ;;  %v2488_v22 = vunpack.i.h.bf16 %v2486_v11  ;;  %v2487_v23 = vunpack.i.l.bf16 %v2486_v11  ;;  %v2481_v25 = vpop.permute.xlu0 %2480  ;;  %vm3246_vm3 = vmand %vm243_vm2, %vm3027_vm5  ;;  %v2590_v9 = vld [vmem:[#allocation5 + $0xd0] sm:$0xff]  }
 0x102   : > { %v2483_v26 = vunpack.i.h.bf16 %v2481_v25  ;;  %v2482_v27 = vunpack.i.l.bf16 %v2481_v25  ;;  %vm2043_vm2 = vmpackc.low %vm3246_vm3, %vm3246_vm3  ;;  %1784 = vperm.xlu1 %2570, %v1750_v55   ;;  %1789 = vperm.xlu0 %2569, %v1751_v56   ;;  %v2585_v25 = vld [vmem:[#allocation5] sm:$0xff]   ;;  %vm1587_vm3 = vcmp.lt.s32.totalorder %v3014_v24, 119 }
 0x103   : > { %2117 = vmatprep.subr.msk.bf16.mxu0 %vm2115_vm14, %v2116_v15  ;;  %vm2046_vm4 = vmpackc.low %vm3298_vm12, %vm3298_vm12  ;;  %v2602_v55 = vld [vmem:[#allocation5 + $0x100] sm:$0xff]  }
 0x104   : > { %2108 = vmatmul.mubr.msk.bf16.gmra.mrb[4].mxu0 %vm371_vm0, %v2580_v5  ;;  %v1247_v33 = vsel %vm1243_vm9, %v2483_v26, %v2488_v22  ;;  %v1251_v34 = vsel %vm1243_vm9, %v2488_v22, %v2483_v26  ;;  %v1246_v35 = vsel %vm1243_vm9, %v2482_v27, %v2487_v23  ;;  %v1250_v36 = vsel %vm1243_vm9, %v2487_v23, %v2482_v27  ;;  %v2496_v37 = vpop.permute.xlu1 %2495 }
 0x105   : > { %1190 = vmatprep.mubr.bf16.mxu0 %v2777_v0  ;;  %2120 = vmatpush1.bf16.msk.msra.mxu0 %vm2118_vm1, %v2119_v21  ;;  %v2122_v38 = vpack.c.bf16 %v1251_v34, %v1250_v36  ;;  %v2125_v39 = vpack.c.bf16 %v1247_v33, %v1246_v35  ;;  %v2498_v40 = vunpack.i.h.bf16 %v2496_v37  ;;  %v2497_v41 = vunpack.i.l.bf16 %v2496_v37  ;;  %v2491_v42 = vpop.permute.xlu0 %2490  ;;  %v2592_v21 = vld [vmem:[#allocation5 + $0xd8] sm:$0xff]  }
 0x106   : > { %v2493_v45 = vunpack.i.h.bf16 %v2491_v42  ;;  %v2492_v46 = vunpack.i.l.bf16 %v2491_v42  ;;  %vm1416_vm9 = vcmp.lt.s32.totalorder %v3014_v24, 120 }
 0x107   : > { %2123 = vmatprep.subr.msk.bf16.mxu0 %vm2115_vm14, %v2122_v38  ;;  %vm751_vm14 = vcmp.lt.s32.totalorder %v3014_v24, 1  ;;  %v2596_v24 = vld [vmem:[#allocation5 + $0xe8] sm:$0xff]  }
 0x108   : > { %2017 = vmatmul.mubr.msk.bf16.gmra.mrb[8].mxu1 %vm371_vm0, %v2581_v32  ;;  %v580_v50 = vsel %vm578_vm15, %v2493_v45, %v2498_v40  ;;  %v579_v51 = vsel %vm578_vm15, %v2492_v46, %v2497_v41  ;;  %v2506_v52 = vpop.permute.xlu1 %2505  ;;  %v584_v13 = vsel %vm578_vm15, %v2498_v40, %v2493_v45  ;;  %v583_v15 = vsel %vm578_vm15, %v2497_v41, %v2492_v46  ;;  %v2586_v46 = vld [vmem:[#allocation5 + $0xc0] sm:$0xff]  }
 0x109   : > { %446 = vmatprep.mubr.bf16.mxu1 %v2777_v0  ;;  %v2044_v53 = vpack.c.bf16 %v580_v50, %v579_v51  ;;  %2126 = vmatpush1.bf16.msk.msra.mxu0 %vm2118_vm1, %v2125_v39  ;;  %v2501_v54 = vpop.permute.xlu0 %2500  ;;  %v2508_v2 = vunpack.i.h.bf16 %v2506_v52  ;;  %v2507_v3 = vunpack.i.l.bf16 %v2506_v52  ;;  %v2047_v33 = vpack.c.bf16 %v584_v13, %v583_v15  ;;  %vm3365_vm1 = vmpackc.low %vm244_vm7, %vm244_vm7 }
 0x10a   : > { %v2503_v4 = vunpack.i.h.bf16 %v2501_v54  ;;  %v2502_v5 = vunpack.i.l.bf16 %v2501_v54 }
 0x10b   : > { %2045 = vmatprep.subr.msk.bf16.mxu1 %vm2043_vm2, %v2044_v53 }
 0x10c   : > { %2109 = vmatmul.mubr.msk.bf16.gmra.mrb[8].mxu0 %vm371_vm0, %v2582_v49  ;;  %v2516_v58 = vpop.permute.xlu1 %2515  ;;  %v582_v22 = vsel %vm578_vm15, %v2503_v4, %v2508_v2  ;;  %v581_v23 = vsel %vm578_vm15, %v2502_v5, %v2507_v3  ;;  %v586_v34 = vsel %vm578_vm15, %v2508_v2, %v2503_v4  ;;  %v585_v38 = vsel %vm578_vm15, %v2507_v3, %v2502_v5  ;;  %vm2063_vm15 = vmpackc.low %vm3085_vm11, %vm3085_vm11 }
 0x10d   : > { %1200 = vmatprep.mubr.bf16.mxu0 %v2777_v0  ;;  %v2518_v59 = vunpack.i.h.bf16 %v2516_v58  ;;  %v2517_v61 = vunpack.i.l.bf16 %v2516_v58  ;;  %v2511_v62 = vpop.permute.xlu0 %2510  ;;  %v2050_v39 = vpack.c.bf16 %v582_v22, %v581_v23  ;;  %v2053_v52 = vpack.c.bf16 %v586_v34, %v585_v38 }
 0x10e   : > { %v2513_v63 = vunpack.i.h.bf16 %v2511_v62  ;;  %v2512_v1 = vunpack.i.l.bf16 %v2511_v62 }
 0x110   : > { %2018 = vmatmul.mubr.msk.bf16.gmra.mrb[12].mxu1 %vm371_vm0, %v2583_v57  ;;  %v1422_v7 = vsel %vm1416_vm9, %v2518_v59, %v2513_v63  ;;  %v1421_v8 = vsel %vm1416_vm9, %v2517_v61, %v2512_v1  ;;  %v2526_v10 = vpop.permute.xlu1 %2525  ;;  %v1418_v42 = vsel %vm1416_vm9, %v2513_v63, %v2518_v59  ;;  %v1417_v45 = vsel %vm1416_vm9, %v2512_v1, %v2517_v61 }
 0x111   : > { %521 = vmatprep.mubr.bf16.mxu1 %v2777_v0  ;;  %v2136_v11 = vpack.c.bf16 %v1422_v7, %v1421_v8  ;;  %v2521_v12 = vpop.permute.xlu0 %2520  ;;  %v2528_v26 = vunpack.i.h.bf16 %v2526_v10  ;;  %v2527_v27 = vunpack.i.l.bf16 %v2526_v10  ;;  %v2139_v54 = vpack.c.bf16 %v1418_v42, %v1417_v45  ;;  %v2589_v8 = vld [vmem:[#allocation5 + $0x10] sm:$0xff]   ;;  %v2591_v10 = vld [vmem:[#allocation5 + $0x18] sm:$0xff]   ;;  %v2594_v42 = vld [vmem:[#allocation5 + $0xe0] sm:$0xff]  }
 0x112   : > { %v2523_v28 = vunpack.i.h.bf16 %v2521_v12  ;;  %v2522_v29 = vunpack.i.l.bf16 %v2521_v12 }
 0x113   : > { %2137 = vmatprep.subr.msk.bf16.mxu0 %vm3285_vm10, %v2136_v11 }
 0x114   : > { %2110 = vmatmul.mubr.msk.bf16.gmra.mrb[12].mxu0 %vm371_vm0, %v2584_v6  ;;  %v3310_v32 = vpop.permute.xlu1 %2535  ;;  %v1424_v47 = vsel %vm1416_vm9, %v2528_v26, %v2523_v28  ;;  %v1423_v48 = vsel %vm1416_vm9, %v2527_v27, %v2522_v29  ;;  %v1420_v57 = vsel %vm1416_vm9, %v2523_v28, %v2528_v26  ;;  %v1419_v58 = vsel %vm1416_vm9, %v2522_v29, %v2527_v27  ;;  %v2593_v29 = vld [vmem:[#allocation5 + $0x40] sm:$0xff]   ;;  %vm3463_vm9 = vmand %vm244_vm7, %vm3057_vm8 }
 0x115   : > { %1343 = vmatprep.mubr.bf16.mxu0 %v2777_v0  ;;  %v2538_v35 = vunpack.i.h.bf16 %v3310_v32  ;;  %v2537_v36 = vunpack.i.l.bf16 %v3310_v32  ;;  %v3317_v37 = vpop.permute.xlu0 %2530  ;;  %v2142_v59 = vpack.c.bf16 %v1424_v47, %v1423_v48  ;;  %v2145_v3 = vpack.c.bf16 %v1420_v57, %v1419_v58  ;;  %vm2158_vm8 = vmpackc.low %vm3463_vm9, %vm3463_vm9  ;;  %v2604_v57 = vld [vmem:[#allocation5 + $0x108] sm:$0xff]   ;;  %v2605_v58 = vld [vmem:[#allocation5 + $0x70] sm:$0xff]  }
 0x116   : > { %v2533_v40 = vunpack.i.h.bf16 %v3317_v37  ;;  %v2532_v41 = vunpack.i.l.bf16 %v3317_v37 }
 0x118   : > { %2035 = vmatmul.mubr.msk.bf16.vlgmr.msra.gmra.mrb[0].mxu1 %vm371_vm0, %v2585_v25  ;;  %v753_v49 = vsel %vm751_vm14, %v2533_v40, %v2538_v35  ;;  %v752_v50 = vsel %vm751_vm14, %v2532_v41, %v2537_v36  ;;  %v3347_v51 = vpop.permute.xlu1 %2545  ;;  %v757_v25 = vsel %vm751_vm14, %v2538_v35, %v2533_v40  ;;  %v756_v26 = vsel %vm751_vm14, %v2537_v36, %v2532_v41 }
 0x119   : > { %2048 = vmatpush1.bf16.msk.msra.mxu1 %vm2046_vm4, %v2047_v33  ;;  %531 = vmatprep.mubr.bf16.mxu1 %v2777_v0  ;;  %v3355_v53 = vpop.permute.xlu0 %2540  ;;  %v2064_v56 = vpack.c.bf16 %v753_v49, %v752_v50  ;;  %v2548_v11 = vunpack.i.h.bf16 %v3347_v51  ;;  %v2547_v12 = vunpack.i.l.bf16 %v3347_v51  ;;  %v2595_v51 = vld [vmem:[#allocation5 + $0x48] sm:$0xff]  }
 0x11a   : > { %2051 = vmatprep.subr.msk.bf16.mxu1 %vm2043_vm2, %v2050_v39  ;;  %vm3388_vm2 = vmand %vm245_vm6, %vm3027_vm5  ;;  %v2543_v13 = vunpack.i.h.bf16 %v3355_v53  ;;  %v2542_v15 = vunpack.i.l.bf16 %v3355_v53  ;;  %v2067_v39 = vpack.c.bf16 %v757_v25, %v756_v26  ;;  %v2600_v53 = vld [vmem:[#allocation5 + $0xf8] sm:$0xff]  }
 0x11b   : > { %vm2155_vm5 = vmpackc.low %vm3388_vm2, %vm3388_vm2 }
 0x11c   : > { %2127 = vmatmul.mubr.msk.bf16.vlgmr.msra.gmra.mrb[0].mxu0 %vm371_vm0, %v2586_v46  ;;  %v2556_v61 = vpop.permute.xlu1 %2555  ;;  %v755_v27 = vsel %vm751_vm14, %v2543_v13, %v2548_v11  ;;  %v754_v28 = vsel %vm751_vm14, %v2542_v15, %v2547_v12  ;;  %vm2066_vm6 = vmpackc.low %vm3095_vm13, %vm3095_vm13  ;;  %v759_v32 = vsel %vm751_vm14, %v2548_v11, %v2543_v13  ;;  %v758_v36 = vsel %vm751_vm14, %v2547_v12, %v2542_v15 }
 0x11d   : > { %1353 = vmatprep.mubr.bf16.mxu0 %v2777_v0  ;;  %2054 = vmatpush1.bf16.msk.msra.mxu1 %vm2046_vm4, %v2053_v52  ;;  %v2558_v62 = vunpack.i.h.bf16 %v2556_v61  ;;  %v2557_v63 = vunpack.i.l.bf16 %v2556_v61  ;;  %v2551_v1 = vpop.permute.xlu0 %2550  ;;  %v2070_v37 = vpack.c.bf16 %v755_v27, %v754_v28  ;;  %v2073_v60 = vpack.c.bf16 %v759_v32, %v758_v36  ;;  %v2599_v52 = vld [vmem:[#allocation5 + $0x58] sm:$0xff]  }
 0x11e   : > { %2140 = vmatpush1.bf16.msk.msra.mxu0 %vm3365_vm1, %v2139_v54  ;;  %2065 = vmatprep.subr.msk.bf16.mxu1 %vm2063_vm15, %v2064_v56  ;;  %v2553_v4 = vunpack.i.h.bf16 %v2551_v1  ;;  %v2552_v5 = vunpack.i.l.bf16 %v2551_v1  ;;  %v2601_v54 = vld [vmem:[#allocation5 + $0x60] sm:$0xff]   ;;  %v2603_v56 = vld [vmem:[#allocation5 + $0x68] sm:$0xff]  }
 0x11f   : > { %2143 = vmatprep.subr.msk.bf16.mxu0 %vm3285_vm10, %v2142_v59  ;;  %v2609_v59 = vld [vmem:[#allocation5 + $0x90] sm:$0xff]  }
 0x120   : > { %2036 = vmatmul.mubr.msk.bf16.gmra.mrb[4].mxu1 %vm371_vm0, %v2587_v43  ;;  %v1593_v44 = vsel %vm1587_vm3, %v2558_v62, %v2553_v4  ;;  %v1592_v6 = vsel %vm1587_vm3, %v2557_v63, %v2552_v5  ;;  %v2566_v22 = vpop.permute.xlu1 %2565  ;;  %v1589_v40 = vsel %vm1587_vm3, %v2553_v4, %v2558_v62  ;;  %v1588_v41 = vsel %vm1587_vm3, %v2552_v5, %v2557_v63  ;;  %v2610_v43 = vld [vmem:[#allocation5 + $0x98] sm:$0xff]  }
 0x121   : > { %541 = vmatprep.mubr.bf16.mxu1 %v2777_v0  ;;  %v2156_v7 = vpack.c.bf16 %v1593_v44, %v1592_v6  ;;  %v2561_v23 = vpop.permute.xlu0 %2560  ;;  %v2568_v33 = vunpack.i.h.bf16 %v2566_v22  ;;  %v2567_v34 = vunpack.i.l.bf16 %v2566_v22  ;;  %v2159_v31 = vpack.c.bf16 %v1589_v40, %v1588_v41 }
 0x122   : > { %2146 = vmatpush1.bf16.msk.msra.mxu0 %vm3365_vm1, %v2145_v3  ;;  %v2563_v38 = vunpack.i.h.bf16 %v2561_v23  ;;  %v2562_v35 = vunpack.i.l.bf16 %v2561_v23 }
 0x123   : > { %2157 = vmatprep.subr.msk.bf16.mxu0 %vm2155_vm5, %v2156_v7 }
 0x124   : > { %2128 = vmatmul.mubr.msk.bf16.gmra.mrb[4].mxu0 %vm371_vm0, %v2588_v30  ;;  %v1595_v46 = vsel %vm1587_vm3, %v2568_v33, %v2563_v38  ;;  %v1594_v47 = vsel %vm1587_vm3, %v2567_v34, %v2562_v35  ;;  %v1591_v48 = vsel %vm1587_vm3, %v2563_v38, %v2568_v33  ;;  %v1590_v49 = vsel %vm1587_vm3, %v2562_v35, %v2567_v34 }
 0x125   : > { %1363 = vmatprep.mubr.bf16.mxu0 %v2777_v0  ;;  %v2162_v50 = vpack.c.bf16 %v1595_v46, %v1594_v47  ;;  %v2165_v14 = vpack.c.bf16 %v1591_v48, %v1590_v49 }
 0x128   : > { %2037 = vmatmul.mubr.msk.bf16.gmra.mrb[8].mxu1 %vm371_vm0, %v2589_v8 }
 0x129   : > { %551 = vmatprep.mubr.bf16.mxu1 %v2777_v0 }
 0x12c   : > { %2129 = vmatmul.mubr.msk.bf16.gmra.mrb[8].mxu0 %vm371_vm0, %v2590_v9 }
 0x12d   : > { %1373 = vmatprep.mubr.bf16.mxu0 %v2777_v0 }
 0x130   : > { %2038 = vmatmul.mubr.msk.bf16.gmra.mrb[12].mxu1 %vm371_vm0, %v2591_v10 }
 0x131   : > { %678 = vmatprep.mubr.bf16.mxu1 %v2777_v0 }
 0x134   : > { %2130 = vmatmul.mubr.msk.bf16.gmra.mrb[12].mxu0 %vm371_vm0, %v2592_v21 }
 0x135   : > { %1514 = vmatprep.mubr.bf16.mxu0 %v2777_v0 }
 0x138   : > { %2055 = vmatmul.mubr.msk.bf16.vlgmr.msra.gmra.mrb[0].mxu1 %vm371_vm0, %v2593_v29 }
 0x139   : > { %2068 = vmatpush1.bf16.msk.msra.mxu1 %vm2066_vm6, %v2067_v39  ;;  %688 = vmatprep.mubr.bf16.mxu1 %v2777_v0 }
 0x13a   : > { %2071 = vmatprep.subr.msk.bf16.mxu1 %vm2063_vm15, %v2070_v37 }
 0x13c   : > { %2147 = vmatmul.mubr.msk.bf16.vlgmr.msra.gmra.mrb[0].mxu0 %vm371_vm0, %v2594_v42 }
 0x13d   : > { %1524 = vmatprep.mubr.bf16.mxu0 %v2777_v0  ;;  %2074 = vmatpush1.bf16.msk.msra.mxu1 %vm2066_vm6, %v2073_v60 }
 0x13e   : > { %2160 = vmatpush1.bf16.msk.msra.mxu0 %vm2158_vm8, %v2159_v31  ;;  %2194 = vmatprep.subr.bf16.mxu1 %v2998_v17  ;;  %v2598_v17 = vld [vmem:[#allocation5 + $0xf0] sm:$0xff]  }
 0x13f   : > { %2163 = vmatprep.subr.msk.bf16.mxu0 %vm2155_vm5, %v2162_v50 }
 0x140   : > { %2056 = vmatmul.mubr.msk.bf16.gmra.mrb[4].mxu1 %vm371_vm0, %v2595_v51 }
 0x141   : > { %698 = vmatprep.mubr.bf16.mxu1 %v2777_v0 }
 0x142   : > { %2166 = vmatpush1.bf16.msk.msra.mxu0 %vm2158_vm8, %v2165_v14 }
 0x144   : > { %2148 = vmatmul.mubr.msk.bf16.gmra.mrb[4].mxu0 %vm371_vm0, %v2596_v24 }
 0x145   : > { %1534 = vmatprep.mubr.bf16.mxu0 %v2777_v0 }
 0x148   : > { %2057 = vmatmul.mubr.msk.bf16.gmra.mrb[8].mxu1 %vm371_vm0, %v2597_v16 }
 0x149   : > { %708 = vmatprep.mubr.bf16.mxu1 %v2777_v0 }
 0x14c   : > { %2149 = vmatmul.mubr.msk.bf16.gmra.mrb[8].mxu0 %vm371_vm0, %v2598_v17 }
 0x14d   : > { %1544 = vmatprep.mubr.bf16.mxu0 %v2777_v0 }
 0x150   : > { %2058 = vmatmul.mubr.msk.bf16.gmra.mrb[12].mxu1 %vm371_vm0, %v2599_v52 }
 0x151   : > { %849 = vmatprep.mubr.bf16.mxu1 %v2777_v0 }
 0x154   : > { %2150 = vmatmul.mubr.msk.bf16.gmra.mrb[12].mxu0 %vm371_vm0, %v2600_v53 }
 0x155   : > { %1687 = vmatprep.mubr.bf16.mxu0 %v2777_v0 }
 0x158   : > { %2075 = vmatmul.mubr.msk.bf16.vlgmr.msra.gmra.mrb[0].mxu1 %vm371_vm0, %v2601_v54 }
 0x159   : > { %2196 = vmatpush1.bf16.msra.mxu1 %v3000_v18  ;;  %859 = vmatprep.mubr.bf16.mxu1 %v2777_v0  ;;  %v2606_v18 = vld [vmem:[#allocation5 + $0x110] sm:$0xff]  }
 0x15a   : > { %2195 = vmatprep.subr.bf16.mxu1 %v3002_v19  ;;  %v2607_v19 = vld [vmem:[#allocation5 + $0x78] sm:$0xff]  }
 0x15c   : > { %2167 = vmatmul.mubr.msk.bf16.vlgmr.msra.gmra.mrb[0].mxu0 %vm371_vm0, %v2602_v55 }
 0x15d   : > { %1697 = vmatprep.mubr.bf16.mxu0 %v2777_v0  ;;  %2197 = vmatpush1.bf16.msra.mxu1 %v3006_v20  ;;  %v2608_v20 = vld [vmem:[#allocation5 + $0x118] sm:$0xff]  }
 0x160   : > { %2076 = vmatmul.mubr.msk.bf16.gmra.mrb[4].mxu1 %vm371_vm0, %v2603_v56 }
 0x161   : > { %869 = vmatprep.mubr.bf16.mxu1 %v2777_v0 }
 0x164   : > { %2168 = vmatmul.mubr.msk.bf16.gmra.mrb[4].mxu0 %vm371_vm0, %v2604_v57 }
 0x165   : > { %1707 = vmatprep.mubr.bf16.mxu0 %v2777_v0 }
 0x168   : > { %2077 = vmatmul.mubr.msk.bf16.gmra.mrb[8].mxu1 %vm371_vm0, %v2605_v58 }
 0x169   : > { %879 = vmatprep.mubr.bf16.mxu1 %v2777_v0 }
 0x16c   : > { %2169 = vmatmul.mubr.msk.bf16.gmra.mrb[8].mxu0 %vm371_vm0, %v2606_v18 }
 0x16d   : > { %1717 = vmatprep.mubr.bf16.mxu0 %v2777_v0 }
 0x170   : > { %2078 = vmatmul.mubr.msk.bf16.gmra.mrb[12].mxu1 %vm371_vm0, %v2607_v19 }
 0x171   : > { %1019 = vmatprep.mubr.bf16.mxu1 %v2777_v0 }
 0x174   : > { %2170 = vmatmul.mubr.msk.bf16.gmra.mrb[12].mxu0 %vm371_vm0, %v2608_v20  ;;  %v1755_v3 = vpop.permute.xlu0 %1754 }
 0x175   : > { %v1760_v6 = vpop.permute.xlu1 %1759 }
 0x178   : > { %2089 = vmatmul.mubr.msk.bf16.vlgmr.msra.gmra.mrb[8].mxu1 %vm371_vm0, %v2609_v59 }
 0x179   : > { %1029 = vmatprep.mubr.bf16.mxu1 %v2777_v0  ;;  %v1765_v33 = vpop.permute.xlu1 %1764  ;;  %v1770_v36 = vpop.permute.xlu0 %1769 }
 0x17d   : > { %v1775_v19 = vpop.permute.xlu1 %1774 }
 0x180   : > { %2090 = vmatmul.mubr.msk.bf16.gmra.mrb[12].mxu1 %vm371_vm0, %v2610_v43 }
 0x22b   : > { %v851_v61 = vpop.f32.mrb[0].mxu1 }
 0x22c   : > { %v853_v62 = vpop.f32.mrb[1].mxu1 }
 0x22d   : > { %v855_v63 = vpop.f32.mrb[2].mxu1 }
 0x22e   : > { %v857_v1 = vpop.f32.mrb[3].mxu1 }
 0x22f   : > { %v1689_v2 = vpop.f32.mrb[0].mxu0 }
 0x230   : > { %v2198_v4 = vadd.f32 %v1689_v2, %v851_v61  ;;  %v1691_v5 = vpop.f32.mrb[1].mxu0 }
 0x231   : > { %v2199_v30 = vadd.f32 %v1691_v5, %v853_v62  ;;  %v1693_v44 = vpop.f32.mrb[2].mxu0 }
 0x232   : > { %v1792_v7 = vadd.f32 %v2198_v4, %v1755_v3  ;;  %v2200_v8 = vadd.f32 %v1693_v44, %v855_v63  ;;  %v1695_v9 = vpop.f32.mrb[3].mxu0  ;;  %v1780_v63 = vpop.permute.xlu0 %1779 }
 0x233   : > { %v1793_v0 = vadd.f32 %v2199_v30, %v1755_v3  ;;  %v2201_v10 = vadd.f32 %v1695_v9, %v857_v1  ;;  %v861_v11 = vpop.f32.mrb[4].mxu1 }
 0x234   : > { %v1808_v12 = vmax.f32 %v1792_v7, 0.0  ;;  %v1794_v13 = vadd.f32 %v2200_v8, %v1760_v6  ;;  %v863_v15 = vpop.f32.mrb[5].mxu1 }
 0x235   : > { %v1809_v21 = vmax.f32 %v1793_v0, 0.0  ;;  %v1795_v22 = vadd.f32 %v2201_v10, %v1760_v6  ;;  %v865_v23 = vpop.f32.mrb[6].mxu1  ;;  %v1785_v10 = vpop.permute.xlu1 %1784 }
 0x236   : > { %v1810_v25 = vmax.f32 %v1794_v13, 0.0  ;;  %v867_v26 = vpop.f32.mrb[7].mxu1 }
 0x237   : > { %v2185_v27 = vpack.c.bf16 %v1809_v21, %v1808_v12  ;;  %v1811_v28 = vmax.f32 %v1795_v22, 0.0  ;;  %v1699_v29 = vpop.f32.mrb[4].mxu0  ;;  %v1790_v22 = vpop.permute.xlu0 %1789 }
 0x238   : > { %v2202_v34 = vadd.f32 %v1699_v29, %v861_v11  ;;  %v1701_v38 = vpop.f32.mrb[5].mxu0 }
 0x239   : > { %1872 = vst [vmem:[%s3536_s6] sm:$0xff] %v2185_v27  ;;  %v2186_v35 = vpack.c.bf16 %v1811_v28, %v1810_v25  ;;  %v2203_v39 = vadd.f32 %v1701_v38, %v863_v15  ;;  %v1703_v32 = vpop.f32.mrb[6].mxu0 }
 0x23a   : > { %v1796_v37 = vadd.f32 %v2202_v34, %v1765_v33  ;;  %v2204_v40 = vadd.f32 %v1703_v32, %v865_v23  ;;  %v1705_v41 = vpop.f32.mrb[7].mxu0 }
 0x23b   : > { %1873 = vst [vmem:[%s3536_s6 + $0x8] sm:$0xff] %v2186_v35  ;;  %v1797_v42 = vadd.f32 %v2203_v39, %v1765_v33  ;;  %v2205_v45 = vadd.f32 %v1705_v41, %v867_v26 }
 0x23c   : > { %v1812_v46 = vmax.f32 %v1796_v37, 0.0  ;;  %v1798_v47 = vadd.f32 %v2204_v40, %v1770_v36 }
 0x23d   : > { %v1813_v60 = vmax.f32 %v1797_v42, 0.0  ;;  %v1799_v31 = vadd.f32 %v2205_v45, %v1770_v36 }
 0x23e   : > { %v1814_v48 = vmax.f32 %v1798_v47, 0.0 }
 0x23f   : > { %v2187_v49 = vpack.c.bf16 %v1813_v60, %v1812_v46  ;;  %v1815_v50 = vmax.f32 %v1799_v31, 0.0  ;;  %v1709_v51 = vpop.f32.mrb[8].mxu0 }
 0x240   : > { %v1711_v14 = vpop.f32.mrb[9].mxu0 }
 0x241   : > { %1874 = vst [vmem:[%s3536_s6 + $0x10] sm:$0xff] %v2187_v49  ;;  %v2188_v24 = vpack.c.bf16 %v1815_v50, %v1814_v48  ;;  %v1713_v16 = vpop.f32.mrb[10].mxu0 }
 0x242   : > { %v1715_v17 = vpop.f32.mrb[11].mxu0 }
 0x243   : > { %1875 = vst [vmem:[%s3536_s6 + $0x18] sm:$0xff] %v2188_v24 }
 0x247   : > { %v1719_v52 = vpop.f32.mrb[12].mxu0 }
 0x248   : > { %v1721_v53 = vpop.f32.mrb[13].mxu0 }
 0x249   : > { %v1723_v54 = vpop.f32.mrb[14].mxu0 }
 0x24a   : > { %v1725_v55 = vpop.f32.mrb[15].mxu0 }
 0x24b   : > { %v1021_v56 = vpop.f32.mrb[8].mxu1 }
 0x24c   : > { %v2206_v57 = vadd.f32 %v1709_v51, %v1021_v56  ;;  %v1023_v58 = vpop.f32.mrb[9].mxu1 }
 0x24d   : > { %v2207_v18 = vadd.f32 %v1711_v14, %v1023_v58  ;;  %v1025_v20 = vpop.f32.mrb[10].mxu1 }
 0x24e   : > { %v1800_v59 = vadd.f32 %v2206_v57, %v1775_v19  ;;  %v2208_v43 = vadd.f32 %v1713_v16, %v1025_v20  ;;  %v1027_v61 = vpop.f32.mrb[11].mxu1 }
 0x24f   : > { %v1801_v62 = vadd.f32 %v2207_v18, %v1775_v19  ;;  %v2209_v1 = vadd.f32 %v1715_v17, %v1027_v61 }
 0x250   : > { %v1816_v2 = vmax.f32 %v1800_v59, 0.0  ;;  %v1802_v3 = vadd.f32 %v2208_v43, %v1780_v63 }
 0x251   : > { %v1817_v4 = vmax.f32 %v1801_v62, 0.0  ;;  %v1803_v5 = vadd.f32 %v2209_v1, %v1780_v63 }
 0x252   : > { %v1818_v30 = vmax.f32 %v1802_v3, 0.0 }
 0x253   : > { %v2189_v44 = vpack.c.bf16 %v1817_v4, %v1816_v2  ;;  %v1819_v6 = vmax.f32 %v1803_v5, 0.0  ;;  %v1031_v7 = vpop.f32.mrb[12].mxu1 }
 0x254   : > { %v2210_v8 = vadd.f32 %v1719_v52, %v1031_v7  ;;  %v1033_v9 = vpop.f32.mrb[13].mxu1 }
 0x255   : > { %1876 = vst [vmem:[%s3536_s6 + $0x20] sm:$0xff] %v2189_v44  ;;  %v2190_v0 = vpack.c.bf16 %v1819_v6, %v1818_v30  ;;  %v2211_v11 = vadd.f32 %v1721_v53, %v1033_v9  ;;  %v1035_v12 = vpop.f32.mrb[14].mxu1 }
 0x256   : > { %v1804_v13 = vadd.f32 %v2210_v8, %v1785_v10  ;;  %v2212_v15 = vadd.f32 %v1723_v54, %v1035_v12  ;;  %v1037_v21 = vpop.f32.mrb[15].mxu1 }
 0x257   : > { %1877 = vst [vmem:[%s3536_s6 + $0x28] sm:$0xff] %v2190_v0  ;;  %v1805_v23 = vadd.f32 %v2211_v11, %v1785_v10  ;;  %v2213_v25 = vadd.f32 %v1725_v55, %v1037_v21 }
 0x258   : > { %v1820_v26 = vmax.f32 %v1804_v13, 0.0  ;;  %v1806_v27 = vadd.f32 %v2212_v15, %v1790_v22 }
 0x259   : > { %v1821_v28 = vmax.f32 %v1805_v23, 0.0  ;;  %v1807_v29 = vadd.f32 %v2213_v25, %v1790_v22 }
 0x25a   : > { %v1822_v33 = vmax.f32 %v1806_v27, 0.0 }
 0x25b   : > { %v2191_v34 = vpack.c.bf16 %v1821_v28, %v1820_v26  ;;  %v1823_v38 = vmax.f32 %v1807_v29, 0.0 }
 0x25d   : > { %1878 = vst [vmem:[%s3536_s6 + $0x30] sm:$0xff] %v2191_v34  ;;  %v2192_v35 = vpack.c.bf16 %v1823_v38, %v1822_v33 }
 0x25f   : > { %1879 = vst [vmem:[%s3536_s6 + $0x38] sm:$0xff] %v2192_v35 }
 0x260   : > { %2710 = shalt.err (!%p2707_p5)
}
 0x261   : > { %s2711_s19 = scalar_lea.hbm %s3551_s27, 1024  ;;  %s2715_s29 = scalar_lea.hbm %s3601_s3, 2048 }
 0x262   : > { %p2712_p11 = scmp.ne.s32.totalorder %s3551_s27, %s2711_s19  ;;  %p2716_p6 = scmp.lt.u32.totalorder %s3551_s27, %s3601_s3 }
 0x263   : > { %p2717_p13 = scmp.lt.u32.totalorder %s2715_s29, %s2711_s19  ;;  %p2719_p7 = scmp.lt.u32.totalorder %s2711_s19, %s3551_s27 }
 0x264   : > { %p2713_p12 = pnand %p2712_p11, %p3653_p9 }
 0x265   : > { %p2718_p2 = por %p2717_p13, %p2716_p6 }
 0x266   : > { %p2714_p3 = pneg %p2713_p12 }
 0x267   : > { %p2720_p10 = por %p2719_p7, %p2718_p2 }
 0x269   : > { %p2721_p1 = pnand %p2720_p10, %p2714_p3 }
 0x26b   : > { %2724 = shalt.err (!%p2721_p1)
}
 0x26c   : > { %s2787_s6 = smov 128   ;;  %s2788_s10 = smov 256  }
 0x26d   : > { %2336 = dma.vmem_to_hbm [thread:$0]  (%p3653_p9), %s3546_s7, 1024, %s3551_s27, %s1881_s30, %s2787_s6, %s2788_s10, %s2778_s23  }
 0x26e PF: > { %s1909_s22 = sand.u32 1, %s2755_s12   ;;  %p3654_p0 = scmp.ne.s32.totalorder %s3610_s25, 0 }
 0x26f   : > { %p3655_p4 = scmp.ge.s32.totalorder %s2767_s15, 2  ;;  %s1910_s17 = scalar_lea.sflag [#allocation4], %s1909_s22 }
 0x271   : > { %p2350_p8 = pnand %p3655_p4, %p3654_p0 }
 0x273   : > { %2750 = dma.done.wait (!%p2350_p8), %s1910_s17, 1024  }
 0x274   : > { %2752 = vsyncadd (!%p2350_p8), %s1910_s17, 4294966272  ;;  %p17_p5 = scmp.ge.s32.totalorder %s2834_s18, 4   ;;  %s3656_s12 = smov %s2759_s13 }
 0x275   : > { %s3657_s13 = smov %s2763_s14  ;;  %s3658_s14 = smov %s2846_s21 }
 0x276   : > { %s3659_s15 = smov %s2834_s18  ;;  %19 = sbr.rel (!%p17_p5) target bundleno = 6 (0x6), region = 93 }
 0x27d   :  { %1915 = vsyncpa [#allocation3], 1 }
 0x27e   :  { %1917 = vsyncpa [#allocation3 + $0x1], 1 }
 0x27f   :  { %1918 = vsyncpa [#allocation6], 1 }
 0x280   :  { %1919 = vsyncpa [#allocation4], 1 }
 0x281   :  { %1921 = vsyncpa [#allocation4 + $0x1], 1 }

// kernel: _lambda_.8
= control target key start
LH: loop header
LB: loop body
LE: loop exit
PB: predicated region body
PF: predicated region fallthrough
CT: control target
= control target key end

     0   :  { %8 = vsyncpa [#allocation3], 0  ;;  %s6634_s0 = inlined_call_operand.hbm [shape: bf16[16,2048], index: 0, kind: input, shape index: {}]   ;;  %s6635_s1 = inlined_call_operand.hbm [shape: bf16[9,32,16], index: 1, kind: input, shape index: {}]   ;;  %s6636_s2 = inlined_call_operand.hbm [shape: f32[32,1], index: 2, kind: input, shape index: {}]   ;;  %s6637_s3 = inlined_call_operand.hbm [shape: bf16[32,2048], index: 3, kind: output, shape index: {}]  }
   0x1   :  { %10 = vsyncpa [#allocation3 + $0x1], 0 }
   0x2   :  { %11 = vsyncpa [#allocation6], 0 }
   0x3   :  { %12 = vsyncpa [#allocation4], 0 }
   0x4   :  { %14 = vsyncpa [#allocation4 + $0x1], 0  ;;  %s4954_s12 = smov 0   ;;  %s4956_s13 = smov 0  }
   0x5   :  { %s4958_s14 = smov 0   ;;  %s4960_s15 = smov 0  }
   0x6 LB: > { %s4975_s16 = sadd.s32 4294967295, %s4909_s15   ;;  %s3721_s17 = sadd.s32 4294967294, %s4909_s15   ;;  %s4909_s15 = sphi %s4960_s15, %s6942_s15   ;;  %s4905_s14 = sphi %s4958_s14, %s6941_s14   ;;  %s4901_s13 = sphi %s4956_s13, %s6940_s13   ;;  %s4897_s12 = sphi %s4954_s12, %s6939_s12  }
   0x7   : > { %s4979_s18 = sadd.s32 1, %s4909_s15   ;;  %s27_s19 = sadd.s32 1, %s4905_s14 }
   0x8   : > { %s24_s20 = ssub.s32 %s4909_s15, %s4979_s18  ;;  %p34_p0 = scmp.ne.s32.totalorder %s4905_s14, %s4901_s13 }
   0x9   : > { %p25_p1 = scmp.eq.s32.totalorder %s24_s20, 0  ;;  %p35_p2 = scmp.eq.s32.totalorder %s4909_s15, 0 }
   0xa   : > { %p40_p3 = scmp.ne.s32.totalorder %s4901_s13, %s4897_s12  ;;  %p6638_p4 = scmp.eq.s32.totalorder %s4975_s16, 0 }
   0xb   : > { %s4991_s21 = scalar_select %p25_p1, %s4905_s14, %s27_s19  }
   0xc   : > { %p4993_p5 = por %p35_p2, %p34_p0  ;;  %p4999_p6 = por %p6638_p4, %p40_p3 }
   0xd   : > { %p106_p7 = scmp.eq.s32.totalorder %s4975_s16, 1  ;;  %p112_p8 = scmp.eq.s32.totalorder %s3721_s17, 1 }
   0xe   : > { %s6680_s22 = scalar_select %p4993_p5, 1, 0 }
   0xf   : > { %s6681_s23 = scalar_select %p4999_p6, 1, 0 }
  0x10   : > { %p3722_p9 = scmp.ge.s32.totalorder %s4909_s15, 1  ;;  %p119_p10 = scmp.lt.s32.totalorder %s4909_s15, 3 }
  0x11   : > { %p5006_p11 = por %p106_p7, %p34_p0  ;;  %p5010_p12 = por %p112_p8, %p40_p3 }
  0x12   : > { %p5014_p13 = pnand %p3722_p9, %p119_p10  ;;  %s4911_s27 = smov [#allocation5]  }
  0x13   : > { %s6682_s24 = scalar_select %p5006_p11, 1, 0 }
  0x14   : > { %s6683_s25 = scalar_select %p5010_p12, 1, 0 }
  0x15   : > { %s6684_s26 = scalar_select %p5014_p13, 1, 0 }
  0x16   : > { %p4331_p1 = pneg %p5014_p13  ;;  %s131_s28 = sshll.u32 %s4911_s27, 4  ;;  %s132_s28 = int_to_ptr.vmem [resolvable:$true] %s131_s28 }
  0x17   : > { %s4912_s30 = smov [#allocation7]   ;;  %s4753_s7 = scalar_lea.hbm %s6635_s1, 2304 }
  0x18   : > { %p5022_p2 = pnand %p4331_p1, %p6638_p4  ;;  %s144_s4 = sshll.u32 %s4912_s30, 4  ;;  %s145_s4 = int_to_ptr.vmem [resolvable:$true] %s144_s4 }
  0x19   : > { %p4754_p7 = scmp.ne.s32.totalorder %s6635_s1, %s4753_s7  ;;  %p4760_p1 = scmp.lt.u32.totalorder %s4753_s7, %s6635_s1 }
  0x1a   : > { %p4755_p8 = pneg %p5022_p2 }
  0x1c   : > { %p4756_p9 = pnand %p4755_p8, %p4754_p7 }
  0x1e   : > { %p4757_p10 = pneg %p4756_p9 }
  0x20   : > { %p4762_p0 = pnand %p4760_p1, %p4757_p10 }
  0x22   : > { %4765 = shalt.err (!%p4762_p0)
}
  0x23   : > { %s4766_s17 = scalar_lea.vmem %s132_s28, 2304  ;;  %p4774_p11 = scmp.lt.s32.totalorder %s132_s28, %s132_s28 }
  0x24   : > { %p4767_p4 = scmp.ne.s32.totalorder %s132_s28, %s4766_s17  ;;  %p4775_p6 = scmp.lt.s32.totalorder %s4766_s17, %s4766_s17 }
  0x26   : > { %p4769_p3 = pnand %p4767_p4, %p4755_p8  ;;  %p4776_p13 = por %p4775_p6, %p4774_p11 }
  0x28   : > { %p4770_p12 = pneg %p4769_p3 }
  0x2a   : > { %p4777_p5 = pnand %p4776_p13, %p4770_p12 }
  0x2c   : > { %4780 = shalt.err (!%p4777_p5)
}
  0x2d   : > { %s4913_s19 = smov 64   ;;  %s4914_s20 = smov 4  }
  0x2e   : > { %4334 = dma.hbm_to_vmem [thread:$0]  (!%p5022_p2), %s6635_s1, 2304, %s132_s28, [#allocation6], %s4913_s19, %s4913_s19, %s4914_s20  }
  0x2f   : > { %p6686_p0 = scmp.ne.s32.totalorder %s6680_s22, 0  ;;  %p6687_p4 = scmp.lt.s32.totalorder %s4909_s15, 2 }
  0x30   : > { %s158_s6 = sand.u32 1, %s4905_s14   ;;  %s4781_s9 = scalar_lea.hbm %s6636_s2, 512 }
  0x31   : > { %p5054_p3 = pnand %p6687_p4, %p6686_p0  ;;  %p4782_p5 = scmp.ne.s32.totalorder %s6636_s2, %s4781_s9 }
  0x32   : > { %p4788_p12 = scmp.lt.u32.totalorder %s4781_s9, %s6636_s2 }
  0x33   : > { %s6688_s5 = scalar_select %p5054_p3, 1, 0 }
  0x34   : > { %p4784_p6 = pnand %p4782_p5, %p4755_p8 }
  0x36   : > { %p4785_p11 = pneg %p4784_p6 }
  0x38   : > { %p4790_p13 = pnand %p4788_p12, %p4785_p11 }
  0x3a   : > { %4793 = shalt.err (!%p4790_p13)
}
  0x3b   : > { %s4794_s17 = scalar_lea.vmem %s145_s4, 512  ;;  %p4802_p1 = scmp.lt.s32.totalorder %s145_s4, %s145_s4 }
  0x3c   : > { %p4795_p7 = scmp.ne.s32.totalorder %s145_s4, %s4794_s17  ;;  %p4803_p0 = scmp.lt.s32.totalorder %s4794_s17, %s4794_s17 }
  0x3e   : > { %p4797_p9 = pnand %p4795_p7, %p4755_p8  ;;  %p4804_p4 = por %p4803_p0, %p4802_p1 }
  0x40   : > { %p4798_p10 = pneg %p4797_p9 }
  0x42   : > { %p4805_p3 = pnand %p4804_p4, %p4798_p10 }
  0x44   : > { %4808 = shalt.err (!%p4805_p3)
}
  0x45   : > { %s4915_s19 = smov 128   ;;  %s4916_s20 = smov 8  }
  0x46   : > { %4337 = dma.hbm_to_vmem [thread:$0]  (!%p5022_p2), %s6636_s2, 512, %s145_s4, [#allocation6], %s4915_s19, %s4915_s19, %s4916_s20  }
  0x47   : > { %s3726_s7 = sshll.u32 %s158_s6, 6  ;;  %s4045_s8 = sshll.u32 %s4909_s15, 9 }
  0x48   : > { %s5083_s11 = scalar_lea.hbm %s6634_s0, %s4045_s8  ;;  %s162_s22 = scalar_lea.vmem [#allocation2], %s3726_s7 }
  0x49   : > { %s169_s28 = sshll.u32 %s162_s22, 4  ;;  %s5087_s29 = scalar_lea.sflag [#allocation3], %s158_s6  ;;  %s5085_s28 = int_to_ptr.vmem [resolvable:$true] %s169_s28 }
  0x4a   : > { %s4809_s17 = scalar_lea.hbm %s5083_s11, 1024  ;;  %p6689_p2 = scmp.ne.s32.totalorder %s6688_s5, 0 }
  0x4b   : > { %p4810_p8 = scmp.ne.s32.totalorder %s5083_s11, %s4809_s17  ;;  %s4814_s20 = scalar_lea.hbm %s6634_s0, 2048 }
  0x4c   : > { %p4811_p3 = pneg %p6689_p2  ;;  %p4815_p11 = scmp.lt.u32.totalorder %s5083_s11, %s6634_s0 }
  0x4d   : > { %p4816_p12 = scmp.lt.u32.totalorder %s4814_s20, %s4809_s17  ;;  %p4818_p7 = scmp.lt.u32.totalorder %s4809_s17, %s5083_s11 }
  0x4e   : > { %p4812_p5 = pnand %p4811_p3, %p4810_p8 }
  0x4f   : > { %p4817_p13 = por %p4816_p12, %p4815_p11 }
  0x50   : > { %p4813_p6 = pneg %p4812_p5 }
  0x51   : > { %p4819_p9 = por %p4818_p7, %p4817_p13 }
  0x53   : > { %p4820_p10 = pnand %p4819_p9, %p4813_p6 }
  0x55   : > { %4823 = shalt.err (!%p4820_p10)
}
  0x56   : > { %s4824_s6 = scalar_lea.vmem %s5085_s28, 1024  ;;  %s4917_s7 = smov [#allocation2]  }
  0x57   : > { %p4825_p1 = scmp.ne.s32.totalorder %s5085_s28, %s4824_s6  ;;  %s4829_s8 = sshll.u32 %s4917_s7, 4  ;;  %s4830_s8 = int_to_ptr.vmem [resolvable:$false] %s4829_s8 }
  0x58   : > { %s4831_s9 = scalar_lea.vmem %s4830_s8, 2048  ;;  %p4832_p8 = scmp.lt.s32.totalorder %s5085_s28, %s4830_s8 }
  0x59   : > { %p4827_p0 = pnand %p4825_p1, %p4811_p3  ;;  %p4833_p5 = scmp.lt.s32.totalorder %s4831_s9, %s4824_s6 }
  0x5b   : > { %p4828_p4 = pneg %p4827_p0  ;;  %p4834_p11 = por %p4833_p5, %p4832_p8 }
  0x5d   : > { %p4835_p12 = pnand %p4834_p11, %p4828_p4 }
  0x5f   : > { %4838 = shalt.err (!%p4835_p12)
}
  0x60   : > { %s4918_s10 = smov 1024   ;;  %s4919_s22 = smov 512  }
  0x61   : > { %s4920_s17 = smov 32   ;;  %p6690_p3 = scmp.ne.s32.totalorder %s6684_s26, 0 }
  0x62   : > { %4341 = dma.hbm_to_vmem [thread:$0]  (!%p6689_p2), %s5083_s11, 1024, %s5085_s28, %s5087_s29, %s4918_s10, %s4919_s22, %s4920_s17  }
  0x63   : > { %181 = sbr.rel (%p6690_p3) target bundleno = 764 (0x2fc), region = 32  ;;  %s5118_s4 = sand.u32 (!%p6690_p3), 1, %s4901_s13  }
  0x64   : > { %s3730_s19 = sshll.u32 (!%p6690_p3), %s5118_s4, 6  ;;  %s184_s20 = scalar_lea.sflag (!%p6690_p3), [#allocation3], %s5118_s4 }
  0x65   : > { %s5122_s27 = scalar_lea.vmem (!%p6690_p3), [#allocation2], %s3730_s19  ;;  %p6691_p6 = scmp.ne.s32.totalorder (!%p6690_p3), %s6681_s23, 0 }
  0x6a   : > { %4884 = dma.done.wait (%p6691_p6), %s184_s20, 1024  }
  0x6b   : > { %4886 = vsyncadd (%p6691_p6), %s184_s20, 4294966272  ;;  %p6692_p2 = scmp.eq.s32.totalorder %s4975_s16, 0 }
  0x6d   : > { %4888 = dma.done.wait (%p6692_p2), [#allocation6], 2816   ;;  %p6693_p13 = pmov %p6692_p2 }
  0x6e   : > { %v222_v0 = vld [vmem:[%s5122_s27 + $0x8] sm:$0xff]  ;;  %v221_v2 = vld [vmem:[%s5122_s27] sm:$0xff]  ;;  %v223_v8 = vld [vmem:[%s5122_s27 + $0x10] sm:$0xff]  ;;  %s4921_s23 = smov 16   ;;  %v4922_v32 = vmov 0   ;;  %s4923_s26 = smov 17   ;;  %v245_v33 = vlaneseq }
  0x6f   : > { %4890 = vsyncadd (%p6693_p13), [#allocation6], 4294964480  ;;  %v226_v1 = vld [vmem:[%s5122_s27 + $0x28] sm:$0xff]  ;;  %v231_v3 = vunpack.c.l.bf16 %v222_v0  ;;  %v225_v5 = vld [vmem:[%s5122_s27 + $0x20] sm:$0xff]  ;;  %v229_v6 = vunpack.c.l.bf16 %v221_v2  ;;  %v232_v7 = vunpack.c.h.bf16 %v222_v0  ;;  %v230_v12 = vunpack.c.h.bf16 %v221_v2  ;;  %607 = vmatprep.mubr.bf16.mxu1 %v4922_v32  ;;  %554 = vmatprep.mubr.bf16.mxu0 %v4922_v32  ;;  %s4924_s5 = smov 15   ;;  %s4925_s11 = smov 1  }
  0x70   : > { %v239_v4 = vunpack.c.l.bf16 %v226_v1  ;;  %v227_v9 = vld [vmem:[%s5122_s27 + $0x30] sm:$0xff]  ;;  %v237_v10 = vunpack.c.l.bf16 %v225_v5  ;;  %v240_v11 = vunpack.c.h.bf16 %v226_v1  ;;  %v238_v13 = vunpack.c.h.bf16 %v225_v5  ;;  %v224_v14 = vld [vmem:[%s5122_s27 + $0x18] sm:$0xff]  ;;  %4725 = vset.pattern.permute.xlu0 %v4922_v32  ;;  %4726 = vset.pattern.permute.xlu1 %v4922_v32  ;;  %s4926_s28 = smov 127   ;;  %s4927_s29 = smov 113  }
  0x71   : > { %v228_v15 = vld [vmem:[%s5122_s27 + $0x38] sm:$0xff]  ;;  %v233_v19 = vunpack.c.l.bf16 %v223_v8  ;;  %v241_v20 = vunpack.c.l.bf16 %v227_v9  ;;  %v236_v22 = vunpack.c.h.bf16 %v224_v14  ;;  %v235_v25 = vunpack.c.l.bf16 %v224_v14  ;;  %s4928_s30 = smov 112   ;;  %s4929_s6 = smov 111  }
  0x72   : > { %v5140_v16 = vpack.i.bf16 %v239_v4, %v231_v3  ;;  %v5142_v17 = vpack.i.bf16 %v237_v10, %v229_v6  ;;  %v5145_v18 = vpack.i.bf16 %v240_v11, %v232_v7  ;;  %v5148_v21 = vpack.i.bf16 %v238_v13, %v230_v12  ;;  %s3733_s7 = sshll.u32 %s5118_s4, 7  ;;  %s4062_s9 = sshll.u32 %s4975_s16, 9 }
  0x73   : > { %v244_v23 = vunpack.c.h.bf16 %v228_v15  ;;  %v5151_v24 = vpack.i.bf16 %v241_v20, %v233_v19  ;;  %v243_v26 = vunpack.c.l.bf16 %v228_v15  ;;  %v234_v28 = vunpack.c.h.bf16 %v223_v8  ;;  %s6539_s8 = scalar_lea.vmem [#allocation8], %s3733_s7  ;;  %s6585_s19 = scalar_lea.hbm %s6637_s3, %s4062_s9 }
  0x74   : > { %4416 = vrot.lane.b32.xlu1 %v5140_v16, %s4921_s23  ;;  %4406 = vrot.lane.b32.xlu0 %v5142_v17, %s4921_s23  ;;  %v242_v29 = vunpack.c.h.bf16 %v227_v9  ;;  %v5210_v34 = vand.u32 127, %v245_v33  ;;  %vm6651_vm5 = vcmask 130048   ;;  %v3417_v33 = vld [vmem:[#allocation7 + $0x10] sm:$0xff]  ;;  %s3629_s10 = sshll.u32 %s6539_s8, 4  ;;  %s3616_s16 = scalar_lea.sflag [#allocation4], %s5118_s4  ;;  %s6588_s10 = int_to_ptr.vmem [resolvable:$true] %s3629_s10 }
  0x75   : > { %v5154_v27 = vpack.i.bf16 %v244_v23, %v236_v22  ;;  %v5157_v30 = vpack.i.bf16 %v243_v26, %v235_v25  ;;  %s4839_s20 = scalar_lea.vmem %s6588_s10, 2048  ;;  %p6936_p9 = scmp.ne.s32.totalorder %s6682_s24, 0 }
  0x76   : > { %v5160_v31 = vpack.i.bf16 %v242_v29, %v234_v28  ;;  %v5215_v35 = vadd.s32 128, %v5210_v34  ;;  %v5218_v36 = vadd.s32 384, %v5210_v34  ;;  %v5223_v37 = vadd.s32 256, %v5210_v34  ;;  %p4840_p7 = scmp.ne.s32.totalorder %s6588_s10, %s4839_s20 }
  0x77   : > { %v262_v41 = vshra.s32 %v5210_v34, 4  ;;  %v5232_v42 = vadd.s32 640, %v5210_v34  ;;  %v5235_v43 = vadd.s32 896, %v5210_v34  ;;  %v5242_v46 = vadd.s32 768, %v5210_v34 }
  0x78   : > { %4421 = vrot.lane.b32.xlu1 %v5145_v18, %s4921_s23  ;;  %4411 = vrot.lane.b32.xlu0 %v5148_v21, %s4921_s23  ;;  %v263_v38 = vshra.s32 %v5215_v35, 4  ;;  %v265_v39 = vshra.s32 %v5218_v36, 4  ;;  %v264_v40 = vshra.s32 %v5223_v37, 4  ;;  %v5252_v51 = vadd.s32 512, %v5210_v34  ;;  %p4841_p10 = pnand %p4840_p7, %p6936_p9 }
  0x79   : > { %v5248_v49 = vand.u32 15, %v262_v41  ;;  %v267_v50 = vshra.s32 %v5232_v42, 4  ;;  %v269_v53 = vshra.s32 %v5235_v43, 4  ;;  %vm443_vm0 = vcmp.lt.s32.totalorder %v5210_v34, 16 }
  0x7a   : > { %v5237_v44 = vand.u32 15, %v263_v38  ;;  %v5239_v45 = vand.u32 15, %v265_v39  ;;  %v5246_v48 = vand.u32 15, %v264_v40  ;;  %v268_v54 = vshra.s32 %v5242_v46, 4  ;;  %p4842_p1 = pneg %p4841_p10 }
  0x7b   : > { %vm6648_vm4 = vcmp.ne.s32.totalorder %v5248_v49, 0  ;;  %v5267_v58 = vand.u32 15, %v267_v50  ;;  %v266_v59 = vshra.s32 %v5252_v51, 4  ;;  %v5272_v63 = vand.u32 15, %v269_v53 }
  0x7c   : > { %4431 = vrot.lane.b32.xlu1 %v5151_v24, %s4921_s23  ;;  %4426 = vrot.lane.b32.xlu0 %v5154_v27, %s4921_s23  ;;  %vm6644_vm1 = vcmp.ne.s32.totalorder %v5237_v44, 0  ;;  %vm6646_vm2 = vcmp.ne.s32.totalorder %v5239_v45, 0  ;;  %vm6645_vm3 = vcmp.ne.s32.totalorder %v5246_v48, 0  ;;  %v255_v0 = vand.u32 15, %v5215_v35  ;;  %vm5331_vm12 = vmpackc.low %vm6648_vm4, %vm6648_vm4 }
  0x7d   : > { %vm5284_vm6 = vmpackc.low %vm6646_vm2, %vm6646_vm2  ;;  %v5288_v8 = vand.u32 15, %v268_v54  ;;  %vm6652_vm9 = vcmp.lt.s32.totalorder %v5210_v34, 17  ;;  %v5311_v19 = vand.u32 15, %v266_v59  ;;  %vm6649_vm10 = vcmp.ne.s32.totalorder %v5267_v58, 0 }
  0x7e   : > { %vm5299_vm7 = vmpackc.low %vm6644_vm1, %vm6644_vm1  ;;  %vm6647_vm11 = vcmp.ne.s32.totalorder %v5272_v63, 0  ;;  %v257_v25 = vand.u32 15, %v5218_v36  ;;  %vm5338_vm14 = vcmp.ne.s32.totalorder %v255_v0, 0  ;;  %v256_v54 = vand.u32 15, %v5223_v37 }
  0x7f   : > { %vm3747_vm8 = vmpackc.low %vm6645_vm3, %vm6645_vm3  ;;  %vm6643_vm13 = vcmp.ne.s32.totalorder %v5288_v8, 0  ;;  %vm6650_vm15 = vcmp.ne.s32.totalorder %v5311_v19, 0  ;;  %v6786_v37 = vmov 0 }
  0x80   : > { %4441 = vrot.lane.b32.xlu1 %v5157_v30, %s4921_s23  ;;  %4436 = vrot.lane.b32.xlu0 %v5160_v31, %s4921_s23 }
  0x84   : > { %4451 = vrot.lane.b32.xlu1 %v5148_v21, %s4923_s26  ;;  %4446 = vrot.lane.b32.xlu0 %v5142_v17, %s4923_s26 }
  0x88   : > { %4461 = vrot.lane.b32.xlu1 %v5145_v18, %s4923_s26  ;;  %4456 = vrot.lane.b32.xlu0 %v5140_v16, %s4923_s26 }
  0x8c   : > { %4471 = vrot.lane.b32.xlu1 %v5151_v24, %s4923_s26  ;;  %4466 = vrot.lane.b32.xlu0 %v5154_v27, %s4923_s26 }
  0x90   : > { %4481 = vrot.lane.b32.xlu1 %v5157_v30, %s4923_s26  ;;  %4476 = vrot.lane.b32.xlu0 %v5160_v31, %s4923_s26 }
  0x94   : > { %4491 = vrot.lane.b32.xlu1 %v5148_v21, %s4924_s5  ;;  %4486 = vrot.lane.b32.xlu0 %v5142_v17, %s4924_s5 }
  0x98   : > { %4501 = vrot.lane.b32.xlu1 %v5145_v18, %s4924_s5  ;;  %4496 = vrot.lane.b32.xlu0 %v5140_v16, %s4924_s5 }
  0x9c   : > { %4511 = vrot.lane.b32.xlu1 %v5151_v24, %s4924_s5  ;;  %4506 = vrot.lane.b32.xlu0 %v5154_v27, %s4924_s5 }
  0xa0   : > { %4521 = vrot.lane.b32.xlu1 %v5157_v30, %s4924_s5  ;;  %4516 = vrot.lane.b32.xlu0 %v5160_v31, %s4924_s5 }
  0xa4   : > { %4531 = vrot.lane.b32.xlu1 %v5148_v21, %s4925_s11  ;;  %4526 = vrot.lane.b32.xlu0 %v5142_v17, %s4925_s11 }
  0xa8   : > { %4541 = vrot.lane.b32.xlu1 %v5145_v18, %s4925_s11  ;;  %4536 = vrot.lane.b32.xlu0 %v5140_v16, %s4925_s11 }
  0xac   : > { %4551 = vrot.lane.b32.xlu1 %v5151_v24, %s4925_s11  ;;  %4546 = vrot.lane.b32.xlu0 %v5154_v27, %s4925_s11 }
  0xb0   : > { %4561 = vrot.lane.b32.xlu1 %v5157_v30, %s4925_s11  ;;  %4556 = vrot.lane.b32.xlu0 %v5160_v31, %s4925_s11 }
  0xb4   : > { %4571 = vrot.lane.b32.xlu1 %v5140_v16, %s4926_s28  ;;  %4566 = vrot.lane.b32.xlu0 %v5148_v21, %s4926_s28 }
  0xb8   : > { %4581 = vrot.lane.b32.xlu1 %v5151_v24, %s4926_s28  ;;  %4576 = vrot.lane.b32.xlu0 %v5145_v18, %s4926_s28 }
  0xbc   : > { %4591 = vrot.lane.b32.xlu1 %v5160_v31, %s4926_s28  ;;  %4586 = vrot.lane.b32.xlu0 %v5142_v17, %s4926_s28 }
  0xc0   : > { %4601 = vrot.lane.b32.xlu1 %v5154_v27, %s4926_s28  ;;  %4596 = vrot.lane.b32.xlu0 %v5157_v30, %s4926_s28 }
  0xc4   : > { %4611 = vrot.lane.b32.xlu1 %v5140_v16, %s4927_s29  ;;  %4606 = vrot.lane.b32.xlu0 %v5148_v21, %s4927_s29 }
  0xc8   : > { %4621 = vrot.lane.b32.xlu1 %v5151_v24, %s4927_s29  ;;  %4616 = vrot.lane.b32.xlu0 %v5145_v18, %s4927_s29 }
  0xcc   : > { %4631 = vrot.lane.b32.xlu1 %v5160_v31, %s4927_s29  ;;  %4626 = vrot.lane.b32.xlu0 %v5142_v17, %s4927_s29 }
  0xd0   : > { %4641 = vrot.lane.b32.xlu1 %v5154_v27, %s4927_s29  ;;  %4636 = vrot.lane.b32.xlu0 %v5157_v30, %s4927_s29 }
  0xd4   : > { %4651 = vrot.lane.b32.xlu1 %v5140_v16, %s4928_s30  ;;  %4646 = vrot.lane.b32.xlu0 %v5148_v21, %s4928_s30 }
  0xd8   : > { %4661 = vrot.lane.b32.xlu1 %v5151_v24, %s4928_s30  ;;  %4656 = vrot.lane.b32.xlu0 %v5145_v18, %s4928_s30 }
  0xdc   : > { %4671 = vrot.lane.b32.xlu1 %v5160_v31, %s4928_s30  ;;  %4666 = vrot.lane.b32.xlu0 %v5142_v17, %s4928_s30 }
  0xe0   : > { %4681 = vrot.lane.b32.xlu1 %v5154_v27, %s4928_s30  ;;  %4676 = vrot.lane.b32.xlu0 %v5157_v30, %s4928_s30 }
  0xe4   : > { %4686 = vrot.lane.b32.xlu0 %v5148_v21, %s4929_s6  ;;  %4691 = vrot.lane.b32.xlu1 %v5140_v16, %s4929_s6 }
  0xe6   : > { %v4417_v47 = vpop.permute.xlu1 %4416  ;;  %v4407_v52 = vpop.permute.xlu0 %4406 }
  0xe7   : > { %v4419_v55 = vunpack.i.h.bf16 %v4417_v47  ;;  %v4418_v56 = vunpack.i.l.bf16 %v4417_v47  ;;  %v4409_v1 = vunpack.i.h.bf16 %v4407_v52  ;;  %v4408_v2 = vunpack.i.l.bf16 %v4407_v52 }
  0xe8   : > { %4696 = vrot.lane.b32.xlu0 %v5145_v18, %s4929_s6  ;;  %4701 = vrot.lane.b32.xlu1 %v5151_v24, %s4929_s6  ;;  %v5319_v24 = vld [vmem:[#allocation5 + $0x10] sm:$0xff]  }
  0xea   : > { %v5263_v57 = vpop.permute.xlu1 %4421  ;;  %v4412_v62 = vpop.permute.xlu0 %4411 }
  0xeb   : > { %v4424_v60 = vunpack.i.h.bf16 %v5263_v57  ;;  %v4423_v61 = vunpack.i.l.bf16 %v5263_v57  ;;  %v4414_v3 = vunpack.i.h.bf16 %v4412_v62  ;;  %v4413_v4 = vunpack.i.l.bf16 %v4412_v62 }
  0xec   : > { %4706 = vrot.lane.b32.xlu0 %v5142_v17, %s4929_s6  ;;  %4711 = vrot.lane.b32.xlu1 %v5160_v31, %s4929_s6 }
  0xed   : > { %v452_v5 = vsel %vm443_vm0, %v4418_v56, %v4423_v61  ;;  %v453_v6 = vsel %vm443_vm0, %v4419_v55, %v4424_v60  ;;  %v456_v10 = vsel %vm443_vm0, %v4408_v2, %v4413_v4  ;;  %v457_v11 = vsel %vm443_vm0, %v4409_v1, %v4414_v3 }
  0xee   : > { %v4432_v9 = vpop.permute.xlu1 %4431  ;;  %v3745_v13 = vpack.c.bf16 %v453_v6, %v452_v5  ;;  %v454_v14 = vsel %vm443_vm0, %v4413_v4, %v4418_v56  ;;  %v4427_v16 = vpop.permute.xlu0 %4426  ;;  %v3737_v17 = vpack.c.bf16 %v457_v11, %v456_v10  ;;  %v455_v18 = vsel %vm443_vm0, %v4414_v3, %v4419_v55 }
  0xef   : > { %v4433_v15 = vunpack.i.l.bf16 %v4432_v9  ;;  %v4429_v20 = vunpack.i.h.bf16 %v4427_v16  ;;  %v4428_v21 = vunpack.i.l.bf16 %v4427_v16  ;;  %v3748_v22 = vpack.c.bf16 %v455_v18, %v454_v14  ;;  %v5407_v14 = vld [vmem:[#allocation5 + $0x18] sm:$0xff]  }
  0xf0   : > { %3746 = vmatprep.subr.msk.bf16.mxu1 %vm5284_vm6, %v3745_v13  ;;  %v4434_v23 = vunpack.i.h.bf16 %v4432_v9  ;;  %3738 = vmatprep.subr.msk.bf16.mxu0 %vm5299_vm7, %v3737_v17  ;;  %vm5350_vm6 = vmpackc.low %vm6647_vm11, %vm6647_vm11 }
  0xf1   : > { %3749 = vmatpush1.bf16.msk.msra.mxu1 %vm3747_vm8, %v3748_v22  ;;  %v458_v28 = vsel %vm443_vm0, %v4428_v21, %v4408_v2  ;;  %v459_v29 = vsel %vm443_vm0, %v4429_v20, %v4409_v1  ;;  %4721 = vrot.lane.b32.xlu1 %v5154_v27, %s4929_s6  ;;  %v450_v47 = vsel %vm443_vm0, %v4423_v61, %v4433_v15  ;;  %vm5368_vm7 = vmpackc.low %vm6643_vm13, %vm6643_vm13  ;;  %vm5374_vm8 = vcmp.ne.s32.totalorder %v257_v25, 0 }
  0xf2   : > { %v4442_v26 = vpop.permute.xlu1 %4441  ;;  %v4437_v40 = vpop.permute.xlu0 %4436  ;;  %v3740_v41 = vpack.c.bf16 %v459_v29, %v458_v28  ;;  %v451_v55 = vsel %vm443_vm0, %v4424_v60, %v4434_v23  ;;  %vm3752_vm13 = vmpackc.low %vm6649_vm10, %vm6649_vm10  ;;  %v261_v28 = vand.u32 15, %v5235_v43  ;;  %4716 = vrot.lane.b32.xlu0 %v5157_v30, %s4929_s6 }
  0xf3   : > { %v4444_v38 = vunpack.i.h.bf16 %v4442_v26  ;;  %v4443_v39 = vunpack.i.l.bf16 %v4442_v26  ;;  %v4439_v50 = vunpack.i.h.bf16 %v4437_v40  ;;  %v4438_v52 = vunpack.i.l.bf16 %v4437_v40 }
  0xf4   : > { %3741 = vmatpush1.bf16.msk.msra.mxu0 %vm5331_vm12, %v3740_v41  ;;  %3750 = vmatmul.mubr.msk.bf16.vlgmr.msra.gmra.mrb[0].mxu1 %vm6651_vm5, %v5319_v24  ;;  %vm5389_vm12 = vmand %vm6644_vm1, %vm5338_vm14  ;;  %v3756_v13 = vpack.c.bf16 %v451_v55, %v450_v47  ;;  %v260_v47 = vand.u32 15, %v5242_v46 }
  0xf5   : > { %v444_v27 = vsel %vm443_vm0, %v4443_v39, %v4428_v21  ;;  %v445_v56 = vsel %vm443_vm0, %v4444_v38, %v4429_v20  ;;  %v447_v61 = vsel %vm443_vm0, %v4439_v50, %v4444_v38  ;;  %v449_v62 = vsel %vm443_vm0, %v4434_v23, %v4439_v50  ;;  %617 = vmatprep.mubr.bf16.mxu1 %v4922_v32  ;;  %vm3770_vm1 = vmpackc.low %vm5389_vm12, %vm5389_vm12 }
  0xf6   : > { %v3761_v60 = vpack.c.bf16 %v445_v56, %v444_v27  ;;  %v446_v1 = vsel %vm443_vm0, %v4438_v52, %v4443_v39  ;;  %v4452_v2 = vpop.permute.xlu1 %4451  ;;  %v448_v4 = vsel %vm443_vm0, %v4433_v15, %v4438_v52  ;;  %v4447_v6 = vpop.permute.xlu0 %4446  ;;  %vm3755_vm0 = vmpackc.low %vm6650_vm15, %vm6650_vm15  ;;  %v254_v38 = vand.u32 15, %v5210_v34 }
  0xf7   : > { %v3764_v5 = vpack.c.bf16 %v447_v61, %v446_v1  ;;  %v4454_v7 = vunpack.i.h.bf16 %v4452_v2  ;;  %v4453_v9 = vunpack.i.l.bf16 %v4452_v2  ;;  %v3753_v10 = vpack.c.bf16 %v449_v62, %v448_v4  ;;  %3742 = vmatmul.mubr.msk.bf16.vlgmr.msra.gmra.mrb[0].mxu0 %vm6651_vm5, %v5319_v24 }
  0xf8   : > { %v4449_v11 = vunpack.i.h.bf16 %v4447_v6  ;;  %v4448_v12 = vunpack.i.l.bf16 %v4447_v6  ;;  %3762 = vmatprep.subr.msk.bf16.mxu1 %vm5350_vm6, %v3761_v60  ;;  %564 = vmatprep.mubr.bf16.mxu0 %v4922_v32  ;;  %vm5423_vm6 = vmand %vm6646_vm2, %vm5374_vm8  ;;  %v259_v39 = vand.u32 15, %v5232_v42  ;;  %vm5475_vm12 = vcmp.ne.s32.totalorder %v261_v28, 0 }
  0xf9   : > { %3765 = vmatpush1.bf16.msk.msra.mxu1 %vm5368_vm7, %v3764_v5  ;;  %3754 = vmatprep.subr.msk.bf16.mxu0 %vm3752_vm13, %v3753_v10  ;;  %vm5429_vm7 = vcmp.ne.s32.totalorder %v256_v54, 0  ;;  %vm3778_vm13 = vmpackc.low %vm5423_vm6, %vm5423_vm6  ;;  %v6718_v60 = vmov 0  ;;  %v6720_v61 = vmov 0 }
  0xfa   : > { %v355_v15 = vsel %vm6652_vm9, %v4448_v12, %v4453_v9  ;;  %v356_v16 = vsel %vm6652_vm9, %v4449_v11, %v4454_v7  ;;  %v5417_v17 = vpop.permute.xlu1 %4461  ;;  %3757 = vmatpush1.bf16.msk.msra.mxu0 %vm3755_vm0, %v3756_v13  ;;  %v4457_v22 = vpop.permute.xlu0 %4456  ;;  %vm5483_vm0 = vcmp.ne.s32.totalorder %v254_v38, 0  ;;  %vm5498_vm2 = vcmp.ne.s32.totalorder %v259_v39, 0  ;;  %vm5510_vm6 = vmand %vm6647_vm11, %vm5475_vm12 }
  0xfb   : > { %v3771_v21 = vpack.c.bf16 %v356_v16, %v355_v15  ;;  %v4464_v23 = vunpack.i.h.bf16 %v5417_v17  ;;  %v4463_v26 = vunpack.i.l.bf16 %v5417_v17  ;;  %v4459_v29 = vunpack.i.h.bf16 %v4457_v22  ;;  %vm5527_vm11 = vmand %vm6649_vm10, %vm5498_vm2 }
  0xfc   : > { %v4458_v31 = vunpack.i.l.bf16 %v4457_v22  ;;  %3751 = vmatmul.mubr.msk.bf16.gmra.mrb[4].mxu1 %vm6651_vm5, %v5407_v14  ;;  %v6719_v60 = vsel %vm5483_vm0, 4294967295, %v6718_v60  ;;  %v6721_v61 = vsel %vm5498_vm2, 4294967295, %v6720_v61 }
  0xfd   : > { %3772 = vmatprep.subr.msk.bf16.mxu0 %vm3770_vm1, %v3771_v21  ;;  %v352_v40 = vsel %vm6652_vm9, %v4459_v29, %v4464_v23  ;;  %713 = vmatprep.mubr.bf16.mxu1 %v4922_v32  ;;  %vm5465_vm1 = vmand %vm6645_vm3, %vm5429_vm7  ;;  %v354_v50 = vsel %vm6652_vm9, %v4454_v7, %v4459_v29  ;;  %v6732_v7 = vmov 0 }
  0xfe   : > { %v351_v30 = vsel %vm6652_vm9, %v4458_v31, %v4463_v26  ;;  %v5458_v41 = vpop.permute.xlu1 %4471  ;;  %v353_v52 = vsel %vm6652_vm9, %v4453_v9, %v4458_v31  ;;  %v4467_v55 = vpop.permute.xlu0 %4466  ;;  %vm3781_vm3 = vmpackc.low %vm5465_vm1, %vm5465_vm1  ;;  %vm5572_vm1 = vcmp.ne.s32.totalorder %v260_v47, 0 }
  0xff   : > { %v3779_v53 = vpack.c.bf16 %v352_v40, %v351_v30  ;;  %v4469_v56 = vunpack.i.h.bf16 %v4467_v55  ;;  %v4468_v57 = vunpack.i.l.bf16 %v4467_v55  ;;  %3743 = vmatmul.mubr.msk.bf16.gmra.mrb[4].mxu0 %vm6651_vm5, %v5407_v14  ;;  %v3782_v62 = vpack.c.bf16 %v354_v50, %v353_v52 }
 0x100   : > { %660 = vmatprep.mubr.bf16.mxu0 %v4922_v32  ;;  %v4474_v10 = vunpack.i.h.bf16 %v5458_v41  ;;  %v4473_v16 = vunpack.i.l.bf16 %v5458_v41  ;;  %v258_v52 = vand.u32 15, %v5252_v51  ;;  %v6728_v55 = vmov 0 }
 0x101   : > { %3780 = vmatprep.subr.msk.bf16.mxu1 %vm3778_vm13, %v3779_v53  ;;  %v357_v1 = vsel %vm6652_vm9, %v4468_v57, %v4448_v12  ;;  %v358_v2 = vsel %vm6652_vm9, %v4469_v56, %v4449_v11  ;;  %vm5518_vm13 = vmand %vm6648_vm4, %vm5483_vm0  ;;  %v6729_v55 = vsel %vm5572_vm1, 4294967295, %v6728_v55 }
 0x102   : > { %v4482_v3 = vpop.permute.xlu1 %4481  ;;  %v4477_v9 = vpop.permute.xlu0 %4476  ;;  %v3774_v15 = vpack.c.bf16 %v358_v2, %v357_v1  ;;  %vm3794_vm4 = vmpackc.low %vm5510_vm6, %vm5510_vm6  ;;  %v6730_v2 = vmov 0  ;;  %vm6734_vm6 = vcmp.ne.s32.totalorder %v5288_v8, 0 }
 0x103   : > { %v4484_v5 = vunpack.i.h.bf16 %v4482_v3  ;;  %v4483_v6 = vunpack.i.l.bf16 %v4482_v3  ;;  %v4479_v11 = vunpack.i.h.bf16 %v4477_v9  ;;  %v4478_v12 = vunpack.i.l.bf16 %v4477_v9  ;;  %vm3773_vm10 = vmpackc.low %vm5518_vm13, %vm5518_vm13 }
 0x104   : > { %3766 = vmatmul.mubr.msk.bf16.vlgmr.msra.gmra.mrb[8].mxu1 %vm6651_vm5, %v5319_v24  ;;  %vm5610_vm13 = vmand %vm6734_vm6, %vm5572_vm1  ;;  %vm5634_vm6 = vcmp.ne.s32.totalorder %v255_v0, 15 }
 0x105   : > { %v343_v18 = vsel %vm6652_vm9, %v4483_v6, %v4468_v57  ;;  %v344_v21 = vsel %vm6652_vm9, %v4484_v5, %v4469_v56  ;;  %3783 = vmatpush1.bf16.msk.msra.mxu1 %vm3781_vm3, %v3782_v62  ;;  %723 = vmatprep.mubr.bf16.mxu1 %v4922_v32  ;;  %v348_v29 = vsel %vm6652_vm9, %v4474_v10, %v4479_v11  ;;  %vm3786_vm3 = vmpackc.low %vm5527_vm11, %vm5527_vm11  ;;  %vm5598_vm11 = vcmp.ne.s32.totalorder %v257_v25, 15 }
 0x106   : > { %v3795_v22 = vpack.c.bf16 %v344_v21, %v343_v18  ;;  %v5554_v31 = vpop.permute.xlu1 %4491  ;;  %v347_v30 = vsel %vm6652_vm9, %v4473_v16, %v4478_v12  ;;  %v5558_v40 = vpop.permute.xlu0 %4486  ;;  %v346_v3 = vsel %vm6652_vm9, %v4479_v11, %v4484_v5  ;;  %v345_v4 = vsel %vm6652_vm9, %v4478_v12, %v4483_v6  ;;  %v5638_v12 = vld [vmem:[#allocation5] sm:$0xff]   ;;  %vm3797_vm9 = vmpackc.low %vm5610_vm13, %vm5610_vm13 }
 0x107   : > { %3758 = vmatmul.mubr.msk.bf16.vlgmr.msra.gmra.mrb[8].mxu0 %vm6651_vm5, %v5319_v24  ;;  %v3787_v50 = vpack.c.bf16 %v348_v29, %v347_v30  ;;  %v6733_v7 = vsel %vm5598_vm11, 4294967295, %v6732_v7  ;;  %v4489_v9 = vunpack.i.h.bf16 %v5558_v40  ;;  %v4488_v13 = vunpack.i.l.bf16 %v5558_v40 }
 0x108   : > { %3796 = vmatprep.subr.msk.bf16.mxu1 %vm3794_vm4, %v3795_v22  ;;  %3775 = vmatpush1.bf16.msk.msra.mxu0 %vm3773_vm10, %v3774_v15  ;;  %vm5586_vm4 = vcmp.ne.s32.totalorder %v258_v52, 0  ;;  %vm6655_vm10 = vcmp.lt.s32.totalorder %v5210_v34, 15  ;;  %v4494_v15 = vunpack.i.h.bf16 %v5554_v31  ;;  %v4493_v5 = vunpack.i.l.bf16 %v5554_v31 }
 0x109   : > { %670 = vmatprep.mubr.bf16.mxu0 %v4922_v32  ;;  %3788 = vmatprep.subr.msk.bf16.mxu0 %vm3786_vm3, %v3787_v50  ;;  %v6731_v2 = vsel %vm5586_vm4, 4294967295, %v6730_v2  ;;  %vm5620_vm3 = vmand %vm6650_vm15, %vm5586_vm4  ;;  %vm6741_vm15 = vcmp.ne.s32.totalorder %v5239_v45, 0  ;;  %v3798_v21 = vpack.c.bf16 %v346_v3, %v345_v4  ;;  %vm6747_vm13 = vcmp.lt.s32.totalorder %v5210_v34, 17 }
 0x10a   : > { %v5568_v53 = vpop.permute.xlu0 %4496  ;;  %v5576_v56 = vpop.permute.xlu1 %4501  ;;  %v1007_v35 = vsel %vm6655_vm10, %v4488_v13, %v4493_v5  ;;  %v1008_v0 = vsel %vm6655_vm10, %v4489_v9, %v4494_v15  ;;  %v349_v30 = vsel %vm6747_vm13, %v4463_v26, %v4473_v16  ;;  %v6754_v6 = vmov 0 }
 0x10b   : > { %v4499_v24 = vunpack.i.h.bf16 %v5568_v53  ;;  %v4498_v57 = vunpack.i.l.bf16 %v5568_v53  ;;  %v4504_v62 = vunpack.i.h.bf16 %v5576_v56  ;;  %v4503_v1 = vunpack.i.l.bf16 %v5576_v56 }
 0x10c   : > { %3767 = vmatmul.mubr.msk.bf16.gmra.mrb[12].mxu1 %vm6651_vm5, %v5407_v14  ;;  %v3805_v53 = vpack.c.bf16 %v1008_v0, %v1007_v35 }
 0x10d   : > { %835 = vmatprep.mubr.bf16.mxu1 %v4922_v32  ;;  %v1003_v25 = vsel %vm6655_vm10, %v4498_v57, %v4503_v1  ;;  %v1004_v11 = vsel %vm6655_vm10, %v4499_v24, %v4504_v62  ;;  %vm6748_vm10 = vmmov %vm6747_vm13 }
 0x10e   : > { %v3813_v22 = vpack.c.bf16 %v1004_v11, %v1003_v25  ;;  %v5660_v29 = vpop.permute.xlu1 %4511  ;;  %v350_v50 = vsel %vm6748_vm10, %v4464_v23, %v4474_v10  ;;  %v4507_v17 = vpop.permute.xlu0 %4506  ;;  %v5694_v23 = vld [vmem:[#allocation5 + $0x8] sm:$0xff]   ;;  %v6751_v10 = vmov 0 }
 0x10f   : > { %3759 = vmatmul.mubr.msk.bf16.gmra.mrb[12].mxu0 %vm6651_vm5, %v5407_v14  ;;  %v6739_v14 = vmov 0  ;;  %vm5645_vm5 = vmand %vm6741_vm15, %vm5598_vm11  ;;  %vm6744_vm15 = vcmp.ne.s32.totalorder %v5237_v44, 0  ;;  %v3790_v26 = vpack.c.bf16 %v350_v50, %v349_v30  ;;  %v4509_v36 = vunpack.i.h.bf16 %v4507_v17 }
 0x110   : > { %v6740_v14 = vsel %vm5634_vm6, 4294967295, %v6739_v14  ;;  %782 = vmatprep.mubr.bf16.mxu0 %v4922_v32  ;;  %vm5666_vm11 = vmand %vm6744_vm15, %vm5634_vm6  ;;  %vm6749_vm15 = vcmask 130048   ;;  %v4508_v25 = vunpack.i.l.bf16 %v4507_v17 }
 0x111   : > { %vm3812_vm4 = vmpackc.low %vm5645_vm5, %vm5645_vm5  ;;  %vm5699_vm5 = vcmp.ne.s32.totalorder %v256_v54, 15 }
 0x112   : > { %vm3789_vm6 = vmpackc.low %vm5620_vm3, %vm5620_vm3  ;;  %v4522_v41 = vpop.permute.xlu1 %4521  ;;  %v6752_v10 = vsel %vm5699_vm5, 4294967295, %v6751_v10  ;;  %v4517_v4 = vpop.permute.xlu0 %4516 }
 0x113   : > { %vm3804_vm10 = vmpackc.low %vm5666_vm11, %vm5666_vm11  ;;  %v4524_v16 = vunpack.i.h.bf16 %v4522_v41  ;;  %v4523_v3 = vunpack.i.l.bf16 %v4522_v41  ;;  %vm6756_vm11 = vcmp.ne.s32.totalorder %v5246_v48, 0  ;;  %v4519_v11 = vunpack.i.h.bf16 %v4517_v4 }
 0x114   : > { %3784 = vmatmul.mubr.msk.bf16.vlgmr.msra.gmra.mrb[0].mxu1 %vm6749_vm15, %v5638_v12  ;;  %vm6750_vm13 = vmmov %vm6749_vm15  ;;  %vm6761_vm15 = vcmp.lt.s32.totalorder %v5210_v34, 15  ;;  %v4518_v18 = vunpack.i.l.bf16 %v4517_v4 }
 0x115   : > { %3799 = vmatpush1.bf16.msk.msra.mxu1 %vm3797_vm9, %v3798_v21  ;;  %845 = vmatprep.mubr.bf16.mxu1 %v4922_v32  ;;  %vm6753_vm9 = vmmov %vm6750_vm13  ;;  %v1006_v54 = vsel %vm6761_vm15, %v4494_v15, %v4499_v24  ;;  %v4513_v15 = vunpack.i.l.bf16 %v5660_v29 }
 0x116   : > { %3814 = vmatprep.subr.msk.bf16.mxu1 %vm3812_vm4, %v3813_v22  ;;  %vm5707_vm4 = vcmp.ne.s32.totalorder %v261_v28, 15  ;;  %vm5716_vm3 = vmand %vm6756_vm11, %vm5699_vm5  ;;  %vm6766_vm5 = vcmp.ne.s32.totalorder %v5272_v63, 0  ;;  %v5787_v31 = vpop.permute.xlu1 %4531 }
 0x117   : > { %3776 = vmatmul.mubr.msk.bf16.vlgmr.msra.gmra.mrb[0].mxu0 %vm6750_vm13, %v5638_v12  ;;  %v6755_v6 = vsel %vm5707_vm4, 4294967295, %v6754_v6  ;;  %vm6763_vm13 = vmmov %vm6753_vm9 }
 0x118   : > { %3791 = vmatpush1.bf16.msk.msra.mxu0 %vm3789_vm6, %v3790_v26  ;;  %792 = vmatprep.mubr.bf16.mxu0 %v4922_v32  ;;  %vm5722_vm6 = vcmp.ne.s32.totalorder %v254_v38, 15  ;;  %vm5740_vm1 = vmand %vm6766_vm5, %vm5707_vm4 }
 0x119   : > { %3806 = vmatprep.subr.msk.bf16.mxu0 %vm3804_vm10, %v3805_v53  ;;  %vm6762_vm10 = vmmov %vm6761_vm15 }
 0x11a   : > { %v1005_v28 = vsel %vm6762_vm10, %v4493_v5, %v4498_v57  ;;  %v4514_v57 = vunpack.i.h.bf16 %v5660_v29  ;;  %vm3828_vm15 = vmpackc.low %vm5740_vm1, %vm5740_vm1  ;;  %v5785_v29 = vpop.permute.xlu0 %4526  ;;  %v5801_v53 = vpop.permute.xlu1 %4541 }
 0x11b   : > { %v3816_v35 = vpack.c.bf16 %v1006_v54, %v1005_v28  ;;  %vm6779_vm1 = vmpackc.low %vm5716_vm3, %vm5716_vm3  ;;  %v4544_v41 = vunpack.i.h.bf16 %v5801_v53  ;;  %v4543_v4 = vunpack.i.l.bf16 %v5801_v53  ;;  %v4529_v46 = vunpack.i.h.bf16 %v5785_v29  ;;  %v4731_v28 = vld [vmem:[#allocation5 + $0x20] sm:$0xff]   ;;  %v4734_v53 = vld [vmem:[#allocation5 + $0x38] sm:$0xff]  }
 0x11c   : > { %3785 = vmatmul.mubr.msk.bf16.gmra.mrb[4].mxu1 %vm6753_vm9, %v5694_v23  ;;  %vm6764_vm9 = vmmov %vm6762_vm10  ;;  %vm5752_vm10 = vcmp.ne.s32.totalorder %v259_v39, 15  ;;  %v4534_v54 = vunpack.i.h.bf16 %v5787_v31 }
 0x11d   : > { %941 = vmatprep.mubr.bf16.mxu1 %v4922_v32  ;;  %v995_v21 = vsel %vm6764_vm9, %v4523_v3, %v4508_v25  ;;  %vm6765_vm11 = vmmov %vm6764_vm9 }
 0x11e   : > { %v996_v38 = vsel %vm6765_vm11, %v4524_v16, %v4509_v36  ;;  %vm6771_vm5 = vmmov %vm6764_vm9  ;;  %vm6773_vm9 = vcmp.ne.s32.totalorder %v5248_v49, 0  ;;  %v4537_v50 = vpop.permute.xlu0 %4536  ;;  %v5863_v24 = vpop.permute.xlu1 %4551 }
 0x11f   : > { %3777 = vmatmul.mubr.msk.bf16.gmra.mrb[4].mxu0 %vm6763_vm13, %v5694_v23  ;;  %v1009_v0 = vsel %vm6771_vm5, %v4508_v25, %v4488_v13  ;;  %vm6772_vm13 = vmmov %vm6771_vm5  ;;  %v3829_v39 = vpack.c.bf16 %v996_v38, %v995_v21  ;;  %v1000_v13 = vsel %vm6771_vm5, %v4514_v57, %v4519_v11  ;;  %v4539_v26 = vunpack.i.h.bf16 %v4537_v50 }
 0x120   : > { %888 = vmatprep.mubr.bf16.mxu0 %v4922_v32  ;;  %v1010_v22 = vsel %vm6772_vm13, %v4509_v36, %v4489_v9  ;;  %vm5768_vm11 = vmand %vm6773_vm9, %vm5722_vm6  ;;  %vm6777_vm13 = vcmp.ne.s32.totalorder %v5267_v58, 0  ;;  %vm6778_vm9 = vcmask 130048   ;;  %v4538_v17 = vunpack.i.l.bf16 %v4537_v50 }
 0x121   : > { %vm6776_vm4 = vmmov %vm6771_vm5  ;;  %v3808_v9 = vpack.c.bf16 %v1010_v22, %v1009_v0  ;;  %v4553_v51 = vunpack.i.l.bf16 %v5863_v24 }
 0x122   : > { %v999_v40 = vsel %vm6776_vm4, %v4513_v15, %v4518_v18  ;;  %vm1016_vm2 = vmand %vm6777_vm13, %vm5752_vm10  ;;  %v4547_v56 = vpop.permute.xlu0 %4546 }
 0x123   : > { %vm3807_vm4 = vmpackc.low %vm5768_vm11, %vm5768_vm11  ;;  %v3821_v30 = vpack.c.bf16 %v1000_v13, %v999_v40  ;;  %v4549_v13 = vunpack.i.h.bf16 %v4547_v56  ;;  %v4548_v40 = vunpack.i.l.bf16 %v4547_v56 }
 0x124   : > { %3800 = vmatmul.mubr.msk.bf16.vlgmr.msra.gmra.mrb[8].mxu1 %vm6778_vm9, %v5638_v12  ;;  %vm3820_vm5 = vmpackc.low %vm1016_vm2, %vm1016_vm2  ;;  %vm5809_vm2 = vcmp.ne.s32.totalorder %v260_v47, 15  ;;  %v4528_v47 = vunpack.i.l.bf16 %v5785_v29 }
 0x125   : > { %3817 = vmatpush1.bf16.msk.msra.mxu1 %vm6779_vm1, %v3816_v35  ;;  %951 = vmatprep.mubr.bf16.mxu1 %v4922_v32  ;;  %vm6780_vm13 = vmmov %vm6778_vm9  ;;  %vm5821_vm1 = vcmp.ne.s32.totalorder %v258_v52, 15 }
 0x126   : > { %3830 = vmatprep.subr.msk.bf16.mxu1 %vm3828_vm15, %v3829_v39  ;;  %vm6781_vm3 = vmmov %vm6778_vm9  ;;  %vm6784_vm15 = vcmp.lt.s32.totalorder %v5210_v34, 15  ;;  %vm6668_vm9 = vcmp.lt.s32.totalorder %v5210_v34, 1  ;;  %v6787_v37 = vsel %vm5821_vm1, 4294967295, %v6786_v37  ;;  %v4557_v39 = vpop.permute.xlu0 %4556 }
 0x127   : > { %3792 = vmatmul.mubr.msk.bf16.vlgmr.msra.gmra.mrb[8].mxu0 %vm6780_vm13, %v5638_v12  ;;  %v998_v36 = vsel %vm6784_vm15, %v4519_v11, %v4524_v16  ;;  %vm6785_vm11 = vmmov %vm6784_vm15  ;;  %v4533_v16 = vunpack.i.l.bf16 %v5787_v31  ;;  %v1365_v52 = vsel %vm6668_vm9, %v4538_v17, %v4543_v4  ;;  %v1370_v21 = vsel %vm6668_vm9, %v4529_v46, %v4534_v54 }
 0x128   : > { %3809 = vmatpush1.bf16.msk.msra.mxu0 %vm3807_vm4, %v3808_v9  ;;  %898 = vmatprep.mubr.bf16.mxu0 %v4922_v32  ;;  %v997_v25 = vsel %vm6785_vm11, %v4518_v18, %v4523_v3  ;;  %vm6788_vm4 = vmmov %vm6781_vm3  ;;  %v1366_v3 = vsel %vm6668_vm9, %v4539_v26, %v4544_v41  ;;  %v4559_v31 = vunpack.i.h.bf16 %v4557_v39 }
 0x129   : > { %3822 = vmatprep.subr.msk.bf16.mxu0 %vm3820_vm5, %v3821_v30  ;;  %vm6789_vm5 = vcmp.ne.s32.totalorder %v5288_v8, 0  ;;  %v1369_v18 = vsel %vm6668_vm9, %v4528_v47, %v4533_v16  ;;  %v3847_v38 = vpack.c.bf16 %v1366_v3, %v1365_v52  ;;  %vm6797_vm9 = vcmask 130048  }
 0x12a   : > { %vm5835_vm13 = vmand %vm6789_vm5, %vm5809_vm2  ;;  %v3839_v22 = vpack.c.bf16 %v1370_v21, %v1369_v18  ;;  %v4558_v30 = vunpack.i.l.bf16 %v4557_v39  ;;  %v4733_v18 = vld [vmem:[#allocation5 + $0x30] sm:$0xff]   ;;  %v4745_v21 = vld [vmem:[%s5122_s27 + $0x8] sm:$0xff]  ;;  %v5961_v39 = vpop.permute.xlu0 %4566 }
 0x12b   : > { %vm3831_vm11 = vmpackc.low %vm5835_vm13, %vm5835_vm13 }
 0x12c   : > { %3801 = vmatmul.mubr.msk.bf16.gmra.mrb[12].mxu1 %vm6781_vm3, %v5694_v23  ;;  %vm6792_vm3 = vcmp.ne.s32.totalorder %v5311_v19, 0 }
 0x12d   : > { %1165 = vmatprep.mubr.bf16.mxu1 %v4922_v32  ;;  %vm5852_vm15 = vmand %vm6792_vm3, %vm5821_vm1 }
 0x12e   : > { %vm3846_vm3 = vmpackc.low %vm5374_vm8, %vm5374_vm8 }
 0x12f   : > { %3793 = vmatmul.mubr.msk.bf16.gmra.mrb[12].mxu0 %vm6788_vm4, %v5694_v23  ;;  %v3832_v23 = vpack.c.bf16 %v998_v36, %v997_v25  ;;  %vm6795_vm4 = vcmp.lt.s32.totalorder %v5210_v34, 15  ;;  %vm3823_vm13 = vmpackc.low %vm5852_vm15, %vm5852_vm15  ;;  %vm6800_vm15 = vcmp.lt.s32.totalorder %v5210_v34, 1  ;;  %v4554_v25 = vunpack.i.h.bf16 %v5863_v24 }
 0x130   : > { %1112 = vmatprep.mubr.bf16.mxu0 %v4922_v32  ;;  %v1001_v35 = vsel %vm6795_vm4, %v4503_v1, %v4513_v15  ;;  %vm6796_vm5 = vmmov %vm6795_vm4  ;;  %v1368_v9 = vsel %vm6800_vm15, %v4534_v54, %v4539_v26 }
 0x131   : > { %v1002_v0 = vsel %vm6796_vm5, %v4504_v62, %v4514_v57  ;;  %vm3838_vm4 = vmpackc.low %vm5338_vm14, %vm5338_vm14  ;;  %v4732_v62 = vld [vmem:[#allocation5 + $0x28] sm:$0xff]   ;;  %v4562_v57 = vpop.permute.xlu1 %4561 }
 0x132   : > { %v3824_v1 = vpack.c.bf16 %v1002_v0, %v1001_v35  ;;  %vm6798_vm5 = vmmov %vm6797_vm9  ;;  %v4564_v15 = vunpack.i.h.bf16 %v4562_v57  ;;  %v4563_v42 = vunpack.i.l.bf16 %v4562_v57  ;;  %v4750_v57 = vld [vmem:[%s5122_s27 + $0x38] sm:$0xff] }
 0x134   : > { %3818 = vmatmul.mubr.msk.bf16.vlgmr.msra.gmra.mrb[0].mxu1 %vm6797_vm9, %v4731_v28  ;;  %vm6799_vm9 = vmmov %vm6798_vm5 }
 0x135   : > { %3833 = vmatpush1.bf16.msk.msra.mxu1 %vm3831_vm11, %v3832_v23  ;;  %1175 = vmatprep.mubr.bf16.mxu1 %v4922_v32  ;;  %vm6801_vm11 = vmmov %vm6800_vm15 }
 0x136   : > { %3848 = vmatprep.subr.msk.bf16.mxu1 %vm3846_vm3, %v3847_v38  ;;  %v1367_v29 = vsel %vm6801_vm11, %v4533_v16, %v4538_v17  ;;  %vm6802_vm3 = vmmov %vm6798_vm5  ;;  %v4746_v38 = vld [vmem:[%s5122_s27 + $0x28] sm:$0xff] }
 0x137   : > { %3810 = vmatmul.mubr.msk.bf16.vlgmr.msra.gmra.mrb[0].mxu0 %vm6798_vm5, %v4731_v28  ;;  %v3850_v26 = vpack.c.bf16 %v1368_v9, %v1367_v29  ;;  %vm3849_vm15 = vmpackc.low %vm5429_vm7, %vm5429_vm7  ;;  %v3875_v24 = vcombine.high %v4745_v21, %v4746_v38  ;;  %v4752_v9 = vld [vmem:[%s5122_s27 + $0x30] sm:$0xff] }
 0x138   : > { %3825 = vmatpush1.bf16.msk.msra.mxu0 %vm3823_vm13, %v3824_v1  ;;  %1122 = vmatprep.mubr.bf16.mxu0 %v4922_v32  ;;  %vm6803_vm13 = vmmov %vm6801_vm11  ;;  %v4748_v1 = vld [vmem:[%s5122_s27 + $0x20] sm:$0xff] }
 0x139   : > { %3840 = vmatprep.subr.msk.bf16.mxu0 %vm3838_vm4, %v3839_v22  ;;  %v1357_v50 = vsel %vm6803_vm13, %v4563_v42, %v4548_v40  ;;  %vm6804_vm4 = vmmov %vm6801_vm11  ;;  %v4747_v22 = vld [vmem:[%s5122_s27] sm:$0xff] }
 0x13a   : > { %v1358_v36 = vsel %vm6804_vm4, %v4564_v15, %v4549_v13  ;;  %vm6805_vm5 = vmmov %vm6804_vm4  ;;  %v3873_v56 = vcombine.high %v4747_v22, %v4748_v1 }
 0x13b   : > { %v1371_v17 = vsel %vm6805_vm5, %v4548_v40, %v4528_v47  ;;  %v3863_v16 = vpack.c.bf16 %v1358_v36, %v1357_v50  ;;  %vm6807_vm11 = vmmov %vm6804_vm4  ;;  %v4751_v40 = vld [vmem:[%s5122_s27 + $0x10] sm:$0xff] }
 0x13c   : > { %3819 = vmatmul.mubr.msk.bf16.gmra.mrb[4].mxu1 %vm6799_vm9, %v4732_v62  ;;  %vm6806_vm9 = vmmov %vm6804_vm4  ;;  %v1362_v52 = vsel %vm6807_vm11, %v4554_v25, %v4559_v31  ;;  %v3877_v29 = vcombine.high %v4751_v40, %v4752_v9 }
 0x13d   : > { %1271 = vmatprep.mubr.bf16.mxu1 %v4922_v32  ;;  %v1372_v54 = vsel %vm6806_vm9, %v4549_v13, %v4529_v46  ;;  %vm3862_vm13 = vmpackc.low %vm5475_vm12, %vm5475_vm12  ;;  %vm6810_vm9 = vnez %v6721_v61  ;;  %v4572_v13 = vpop.permute.xlu1 %4571 }
 0x13e   : > { %v3842_v23 = vpack.c.bf16 %v1372_v54, %v1371_v17  ;;  %vm3841_vm5 = vmpackc.low %vm5483_vm0, %vm5483_vm0  ;;  %v4568_v17 = vunpack.i.l.bf16 %v5961_v39  ;;  %v4574_v54 = vunpack.i.h.bf16 %v4572_v13 }
 0x13f   : > { %3811 = vmatmul.mubr.msk.bf16.gmra.mrb[4].mxu0 %vm6802_vm3, %v4732_v62  ;;  %vm6808_vm3 = vmmov %vm6804_vm4  ;;  %vm6809_vm4 = vcmask 130048  }
 0x140   : > { %1218 = vmatprep.mubr.bf16.mxu0 %v4922_v32  ;;  %v1361_v3 = vsel %vm6808_vm3, %v4553_v51, %v4558_v30  ;;  %vm3854_vm11 = vmpackc.low %vm6810_vm9, %vm6810_vm9 }
 0x141   : > { %v3855_v46 = vpack.c.bf16 %v1362_v52, %v1361_v3  ;;  %vm6811_vm3 = vmmov %vm6809_vm4 }
 0x142   : > { %vm6815_vm0 = vmmov %vm6811_vm3 }
 0x144   : > { %3834 = vmatmul.mubr.msk.bf16.vlgmr.msra.gmra.mrb[8].mxu1 %vm6809_vm4, %v4731_v28  ;;  %vm6813_vm4 = vcmp.lt.s32.totalorder %v5210_v34, 1 }
 0x145   : > { %3851 = vmatpush1.bf16.msk.msra.mxu1 %vm3849_vm15, %v3850_v26  ;;  %1281 = vmatprep.mubr.bf16.mxu1 %v4922_v32  ;;  %vm6812_vm15 = vmmov %vm6811_vm3  ;;  %v1360_v47 = vsel %vm6813_vm4, %v4559_v31, %v4564_v15  ;;  %v4577_v31 = vpop.permute.xlu0 %4576  ;;  %v4569_v26 = vunpack.i.h.bf16 %v5961_v39 }
 0x146   : > { %3864 = vmatprep.subr.msk.bf16.mxu1 %vm3862_vm13, %v3863_v16  ;;  %vm6814_vm13 = vmmov %vm6813_vm4  ;;  %v4579_v50 = vunpack.i.h.bf16 %v4577_v31  ;;  %v4578_v36 = vunpack.i.l.bf16 %v4577_v31  ;;  %v4573_v16 = vunpack.i.l.bf16 %v4572_v13 }
 0x147   : > { %3826 = vmatmul.mubr.msk.bf16.vlgmr.msra.gmra.mrb[8].mxu0 %vm6811_vm3, %v4731_v28  ;;  %v1359_v11 = vsel %vm6814_vm13, %v4558_v30, %v4563_v42  ;;  %vm6817_vm3 = vmmov %vm6813_vm4  ;;  %vm6819_vm4 = vnez %v6731_v2  ;;  %v3872_v42 = vcombine.low %v4747_v22, %v4748_v1  ;;  %v5968_v30 = vpop.permute.xlu1 %4581 }
 0x148   : > { %3843 = vmatpush1.bf16.msk.msra.mxu0 %vm3841_vm5, %v3842_v23  ;;  %1228 = vmatprep.mubr.bf16.mxu0 %v4922_v32  ;;  %v3866_v28 = vpack.c.bf16 %v1360_v47, %v1359_v11  ;;  %vm6816_vm5 = vnez %v6729_v55  ;;  %v1363_v35 = vsel %vm6817_vm3, %v4543_v4, %v4553_v51  ;;  %vm3857_vm13 = vmpackc.low %vm6819_vm4, %vm6819_vm4  ;;  %v4583_v51 = vunpack.i.l.bf16 %v5968_v30  ;;  %v4735_v23 = vld [vmem:[#allocation5 + $0x40] sm:$0xff]  }
 0x149   : > { %3856 = vmatprep.subr.msk.bf16.mxu0 %vm3854_vm11, %v3855_v46  ;;  %vm3865_vm11 = vmpackc.low %vm6816_vm5, %vm6816_vm5  ;;  %vm6841_vm5 = vnez %v6755_v6 }
 0x14a   : > { %vm3914_vm9 = vmpackc.low %vm6841_vm5, %vm6841_vm5 }
 0x14c   : > { %3835 = vmatmul.mubr.msk.bf16.gmra.mrb[12].mxu1 %vm6812_vm15, %v4732_v62 }
 0x14d   : > { %1519 = vmatprep.mubr.bf16.mxu1 %v4922_v32 }
 0x14f   : > { %3827 = vmatmul.mubr.msk.bf16.gmra.mrb[12].mxu0 %vm6815_vm0, %v4732_v62  ;;  %vm6818_vm0 = vmmov %vm6817_vm3  ;;  %v4749_v62 = vld [vmem:[%s5122_s27 + $0x18] sm:$0xff]  ;;  %s4930_s27 = smov [#allocation8]  }
 0x150   : > { %1466 = vmatprep.mubr.bf16.mxu0 %v4922_v32  ;;  %v1364_v0 = vsel %vm6818_vm0, %v4544_v41, %v4554_v25  ;;  %vm6820_vm3 = vmmov %vm6812_vm15  ;;  %v3874_v41 = vcombine.low %v4745_v21, %v4746_v38  ;;  %v3879_v15 = vcombine.high %v4749_v62, %v4750_v57  ;;  %v4584_v25 = vunpack.i.h.bf16 %v5968_v30  ;;  %s4843_s23 = sshll.u32 %s4930_s27, 4  ;;  %s4844_s23 = int_to_ptr.vmem [resolvable:$false] %s4843_s23 }
 0x151   : > { %v3858_v4 = vpack.c.bf16 %v1364_v0, %v1363_v35  ;;  %vm6821_vm0 = vmmov %vm6820_vm3  ;;  %v3878_v46 = vcombine.low %v4749_v62, %v4750_v57  ;;  %v3876_v21 = vcombine.low %v4751_v40, %v4752_v9  ;;  %v4736_v35 = vld [vmem:[#allocation5 + $0x48] sm:$0xff]   ;;  %s4845_s26 = scalar_lea.vmem %s4844_s23, 4096  ;;  %p4846_p0 = scmp.lt.s32.totalorder %s6588_s10, %s4844_s23 }
 0x152   : > { %p4847_p4 = scmp.lt.s32.totalorder %s4845_s26, %s4839_s20 }
 0x154   : > { %3852 = vmatmul.mubr.msk.bf16.vlgmr.msra.gmra.mrb[0].mxu1 %vm6812_vm15, %v4733_v18  ;;  %vm6823_vm15 = vmmov %vm6821_vm0  ;;  %p4848_p8 = por %p4847_p4, %p4846_p0 }
 0x155   : > { %3867 = vmatpush1.bf16.msk.msra.mxu1 %vm3865_vm11, %v3866_v28  ;;  %1529 = vmatprep.mubr.bf16.mxu1 %v4922_v32  ;;  %vm6822_vm11 = vmmov %vm6821_vm0  ;;  %v5991_v28 = vpop.permute.xlu1 %4591 }
 0x156   : > { %1792 = vmatprep.subr.bf16.mxu1 %v3875_v24  ;;  %v4587_v24 = vpop.permute.xlu0 %4586  ;;  %v4594_v13 = vunpack.i.h.bf16 %v5991_v28  ;;  %v4593_v40 = vunpack.i.l.bf16 %v5991_v28  ;;  %p4849_p5 = pnand %p4848_p8, %p4842_p1 }
 0x157   : > { %3844 = vmatmul.mubr.msk.bf16.vlgmr.msra.gmra.mrb[0].mxu0 %vm6820_vm3, %v4733_v18  ;;  %vm6825_vm3 = vmmov %vm6821_vm0 }
 0x158   : > { %3859 = vmatpush1.bf16.msk.msra.mxu0 %vm3857_vm13, %v3858_v4  ;;  %1476 = vmatprep.mubr.bf16.mxu0 %v4922_v32  ;;  %vm6824_vm13 = vmmov %vm6821_vm0  ;;  %v4589_v4 = vunpack.i.h.bf16 %v4587_v24 }
 0x159   : > { %1739 = vmatprep.subr.bf16.mxu0 %v3873_v56  ;;  %v4602_v0 = vpop.permute.xlu1 %4601 }
 0x15a   : > { %v4604_v22 = vunpack.i.h.bf16 %v4602_v0  ;;  %v4603_v1 = vunpack.i.l.bf16 %v4602_v0  ;;  %v4597_v56 = vpop.permute.xlu0 %4596 }
 0x15b   : > { %v4599_v57 = vunpack.i.h.bf16 %v4597_v56 }
 0x15c   : > { %3853 = vmatmul.mubr.msk.bf16.gmra.mrb[4].mxu1 %vm6821_vm0, %v4734_v53  ;;  %vm6670_vm0 = vcmp.lt.s32.totalorder %v5210_v34, 127 }
 0x15d   : > { %1625 = vmatprep.mubr.bf16.mxu1 %v4922_v32  ;;  %v2022_v52 = vsel %vm6670_vm0, %v4578_v36, %v4583_v51  ;;  %v2023_v3 = vsel %vm6670_vm0, %v4579_v50, %v4584_v25  ;;  %v2026_v47 = vsel %vm6670_vm0, %v4568_v17, %v4573_v16  ;;  %v2027_v11 = vsel %vm6670_vm0, %v4569_v26, %v4574_v54  ;;  %vm6829_vm0 = vmmov %vm6825_vm3 }
 0x15e   : > { %v3891_v38 = vpack.c.bf16 %v2027_v11, %v2026_v47 }
 0x15f   : > { %3845 = vmatmul.mubr.msk.bf16.gmra.mrb[4].mxu0 %vm6822_vm11, %v4734_v53  ;;  %vm6826_vm11 = vmmov %vm6825_vm3 }
 0x160   : > { %1572 = vmatprep.mubr.bf16.mxu0 %v4922_v32 }
 0x164   : > { %3868 = vmatmul.mubr.msk.bf16.vlgmr.msra.gmra.mrb[8].mxu1 %vm6823_vm15, %v4733_v18  ;;  %vm6827_vm15 = vnez %v6733_v7 }
 0x165   : > { %1793 = vmatpush1.bf16.msra.mxu1 %v3874_v41  ;;  %1635 = vmatprep.mubr.bf16.mxu1 %v4922_v32 }
 0x166   : > { %1898 = vmatprep.subr.bf16.mxu1 %v3879_v15  ;;  %v4598_v15 = vunpack.i.l.bf16 %v4597_v56 }
 0x167   : > { %3860 = vmatmul.mubr.msk.bf16.vlgmr.msra.gmra.mrb[8].mxu0 %vm6824_vm13, %v4733_v18  ;;  %v3899_v18 = vpack.c.bf16 %v2023_v3, %v2022_v52  ;;  %vm3898_vm13 = vmpackc.low %vm6827_vm15, %vm6827_vm15 }
 0x168   : > { %1740 = vmatpush1.bf16.msra.mxu0 %v3872_v42  ;;  %1582 = vmatprep.mubr.bf16.mxu0 %v4922_v32 }
 0x169   : > { %1845 = vmatprep.subr.bf16.mxu0 %v3877_v29 }
 0x16c   : > { %3869 = vmatmul.mubr.msk.bf16.gmra.mrb[12].mxu1 %vm6825_vm3, %v4734_v53 }
 0x16d   : > { %1824 = vmatprep.mubr.bf16.mxu1 %v4922_v32 }
 0x16f   : > { %3861 = vmatmul.mubr.msk.bf16.gmra.mrb[12].mxu0 %vm6826_vm11, %v4734_v53  ;;  %vm6828_vm11 = vnez %v6740_v14  ;;  %v4588_v53 = vunpack.i.l.bf16 %v4587_v24 }
 0x170   : > { %1771 = vmatprep.mubr.bf16.mxu0 %v4922_v32  ;;  %vm3890_vm4 = vmpackc.low %vm6828_vm11, %vm6828_vm11 }
 0x174   : > { %3882 = vmatmul.mubr.msk.bf16.vlgmr.msra.gmra.mrb[0].mxu1 %vm6825_vm3, %v4735_v23  ;;  %vm6830_vm3 = vmmov %vm6829_vm0 }
 0x175   : > { %1899 = vmatpush1.bf16.msra.mxu1 %v3878_v46  ;;  %1834 = vmatprep.mubr.bf16.mxu1 %v4922_v32  ;;  %vm6833_vm11 = vmmov %vm6830_vm3 }
 0x176   : > { %3900 = vmatprep.subr.msk.bf16.mxu1 %vm3898_vm13, %v3899_v18  ;;  %vm6831_vm13 = vcmp.lt.s32.totalorder %v5210_v34, 127 }
 0x177   : > { %3880 = vmatmul.mubr.msk.bf16.vlgmr.msra.gmra.mrb[0].mxu0 %vm6829_vm0, %v4735_v23  ;;  %v2025_v41 = vsel %vm6831_vm13, %v4574_v54, %v4579_v50  ;;  %vm6832_vm0 = vmmov %vm6831_vm13 }
 0x178   : > { %1846 = vmatpush1.bf16.msra.mxu0 %v3876_v21  ;;  %1781 = vmatprep.mubr.bf16.mxu0 %v4922_v32  ;;  %v2024_v62 = vsel %vm6832_vm0, %v4573_v16, %v4578_v36  ;;  %vm6835_vm15 = vmmov %vm6832_vm0 }
 0x179   : > { %3892 = vmatprep.subr.msk.bf16.mxu0 %vm3890_vm4, %v3891_v38  ;;  %vm6834_vm4 = vmmov %vm6832_vm0  ;;  %v2031_v39 = vsel %vm6835_vm15, %v4604_v22, %v4589_v4  ;;  %v3902_v9 = vpack.c.bf16 %v2025_v41, %v2024_v62  ;;  %v6079_v41 = vld [vmem:[#allocation5 + $0x50] sm:$0xff]  }
 0x17a   : > { %v2030_v42 = vsel %vm6834_vm4, %v4603_v1, %v4588_v53  ;;  %vm6837_vm13 = vmmov %vm6832_vm0 }
 0x17b   : > { %v2029_v31 = vsel %vm6837_vm13, %v4589_v4, %v4569_v26  ;;  %v3915_v50 = vpack.c.bf16 %v2031_v39, %v2030_v42  ;;  %v6034_v26 = vpop.permute.xlu1 %4611  ;;  %vm3893_vm13 = vmpackc.low %vm5722_vm6, %vm5722_vm6  ;;  %v3415_v4 = vld [vmem:[#allocation7] sm:$0xff] }
 0x17c   : > { %3883 = vmatmul.mubr.msk.bf16.gmra.mrb[4].mxu1 %vm6830_vm3, %v4736_v35  ;;  %vm6836_vm3 = vmmov %vm6832_vm0  ;;  %v4614_v0 = vunpack.i.h.bf16 %v6034_v26  ;;  %v4613_v56 = vunpack.i.l.bf16 %v6034_v26  ;;  %3421 = vperm.xlu0 %4725, %v3415_v4  }
 0x17d   : > { %1930 = vmatprep.mubr.bf16.mxu1 %v4922_v32  ;;  %v2028_v29 = vsel %vm6836_vm3, %v4588_v53, %v4568_v17  ;;  %vm6839_vm15 = vmmov %vm6836_vm3  ;;  %v6032_v17 = vpop.permute.xlu0 %4606  ;;  %v3416_v53 = vld [vmem:[#allocation7 + $0x8] sm:$0xff] }
 0x17e   : > { %v2019_v36 = vsel %vm6839_vm15, %v4594_v13, %v4599_v57  ;;  %vm6840_vm4 = vmmov %vm6836_vm3  ;;  %v3894_v16 = vpack.c.bf16 %v2029_v31, %v2028_v29  ;;  %vm6842_vm3 = vcmask 130048   ;;  %v4609_v38 = vunpack.i.h.bf16 %v6032_v17  ;;  %3426 = vperm.xlu1 %4726, %v3416_v53  }
 0x17f   : > { %3881 = vmatmul.mubr.msk.bf16.gmra.mrb[4].mxu0 %vm6833_vm11, %v4736_v35  ;;  %vm6838_vm11 = vnez %v6752_v10  ;;  %v2018_v54 = vsel %vm6840_vm4, %v4593_v40, %v4598_v15  ;;  %vm3906_vm15 = vmpackc.low %vm5752_vm10, %vm5752_vm10  ;;  %v6047_v46 = vpop.permute.xlu1 %4621  ;;  %v4608_v24 = vunpack.i.l.bf16 %v6032_v17 }
 0x180   : > { %1877 = vmatprep.mubr.bf16.mxu0 %v4922_v32  ;;  %vm3901_vm0 = vmpackc.low %vm6838_vm11, %vm6838_vm11  ;;  %v3907_v52 = vpack.c.bf16 %v2019_v36, %v2018_v54  ;;  %v4624_v18 = vunpack.i.h.bf16 %v6047_v46  ;;  %v4623_v28 = vunpack.i.l.bf16 %v6047_v46 }
 0x181   : > { %vm6843_vm4 = vmmov %vm6842_vm3  ;;  %v6045_v3 = vpop.permute.xlu0 %4616 }
 0x182   : > { %v4619_v47 = vunpack.i.h.bf16 %v6045_v3  ;;  %v4618_v11 = vunpack.i.l.bf16 %v6045_v3  ;;  %3431 = vperm.xlu1 %4726, %v3417_v33  }
 0x183   : > { %v6101_v39 = vpop.permute.xlu1 %4631 }
 0x184   : > { %3886 = vmatmul.mubr.msk.bf16.vlgmr.msra.gmra.mrb[8].mxu1 %vm6842_vm3, %v4735_v23 }
 0x185   : > { %3903 = vmatpush1.bf16.msk.msra.mxu1 %vm3901_vm0, %v3902_v9  ;;  %1940 = vmatprep.mubr.bf16.mxu1 %v4922_v32  ;;  %vm6845_vm0 = vcmp.lt.s32.totalorder %v5210_v34, 127 }
 0x186   : > { %3916 = vmatprep.subr.msk.bf16.mxu1 %vm3914_vm9, %v3915_v50  ;;  %vm6844_vm9 = vmmov %vm6842_vm3 }
 0x187   : > { %3884 = vmatmul.mubr.msk.bf16.vlgmr.msra.gmra.mrb[8].mxu0 %vm6843_vm4, %v4735_v23  ;;  %v2017_v23 = vsel %vm6845_vm0, %v4599_v57, %v4604_v22  ;;  %vm6846_vm3 = vmmov %vm6845_vm0  ;;  %v3418_v57 = vld [vmem:[#allocation7 + $0x18] sm:$0xff] }
 0x188   : > { %3895 = vmatpush1.bf16.msk.msra.mxu0 %vm3893_vm13, %v3894_v16  ;;  %1887 = vmatprep.mubr.bf16.mxu0 %v4922_v32  ;;  %v2016_v21 = vsel %vm6846_vm3, %v4598_v15, %v4603_v1  ;;  %vm6672_vm13 = vcmp.lt.s32.totalorder %v5210_v34, 113  ;;  %vm3917_vm3 = vmpackc.low %vm5809_vm2, %vm5809_vm2 }
 0x189   : > { %3908 = vmatprep.subr.msk.bf16.mxu0 %vm3906_vm15, %v3907_v52  ;;  %vm6671_vm15 = vcmp.ne.s32.totalorder %v5239_v45, 15  ;;  %v2376_v22 = vsel %vm6672_vm13, %v4618_v11, %v4623_v28  ;;  %v2377_v1 = vsel %vm6672_vm13, %v4619_v47, %v4624_v18  ;;  %v3918_v62 = vpack.c.bf16 %v2017_v23, %v2016_v21  ;;  %3436 = vperm.xlu0 %4725, %v3418_v57  }
 0x18a   : > { %vm6086_vm0 = vmand %vm6671_vm15, %vm5374_vm8  ;;  %v2380_v15 = vsel %vm6672_vm13, %v4608_v24, %v4613_v56  ;;  %v2381_v59 = vsel %vm6672_vm13, %v4609_v38, %v4614_v0  ;;  %v3933_v42 = vpack.c.bf16 %v2377_v1, %v2376_v22 }
 0x18b   : > { %vm3932_vm13 = vmpackc.low %vm6086_vm0, %vm6086_vm0  ;;  %v3925_v50 = vpack.c.bf16 %v2381_v59, %v2380_v15 }
 0x18c   : > { %3887 = vmatmul.mubr.msk.bf16.gmra.mrb[12].mxu1 %vm6844_vm9, %v4736_v35  ;;  %vm6673_vm9 = vcmp.ne.s32.totalorder %v5237_v44, 15 }
 0x18d   : > { %2178 = vmatprep.mubr.bf16.mxu1 %v4922_v32  ;;  %vm6107_vm8 = vmand %vm6673_vm9, %vm5338_vm14  ;;  %vm6853_vm14 = vcmask 130048  }
 0x18e   : > { %vm3909_vm9 = vmpackc.low %vm5821_vm1, %vm5821_vm1 }
 0x18f   : > { %3885 = vmatmul.mubr.msk.bf16.gmra.mrb[12].mxu0 %vm6843_vm4, %v4736_v35  ;;  %vm6851_vm4 = vcmp.lt.s32.totalorder %v5210_v34, 127  ;;  %vm6854_vm0 = vmmov %vm6853_vm14 }
 0x190   : > { %2125 = vmatprep.mubr.bf16.mxu0 %v4922_v32  ;;  %v2020_v29 = vsel %vm6851_vm4, %v4583_v51, %v4593_v40  ;;  %vm6852_vm15 = vmmov %vm6851_vm4  ;;  %v6138_v51 = vld [vmem:[#allocation5 + $0x58] sm:$0xff]   ;;  %vm286_vm4 = vcmp.ne.s32.totalorder %v5248_v49, 15 }
 0x191   : > { %v2021_v31 = vsel %vm6852_vm15, %v4584_v25, %v4594_v13  ;;  %vm3924_vm15 = vmpackc.low %vm6107_vm8, %vm6107_vm8  ;;  %v4627_v25 = vpop.permute.xlu0 %4626  ;;  %v4642_v13 = vpop.permute.xlu1 %4641 }
 0x192   : > { %v3910_v30 = vpack.c.bf16 %v2021_v31, %v2020_v29  ;;  %v4644_v40 = vunpack.i.h.bf16 %v4642_v13  ;;  %v4643_v36 = vunpack.i.l.bf16 %v4642_v13  ;;  %vm6855_vm8 = vmmov %vm6854_vm0  ;;  %v4629_v16 = vunpack.i.h.bf16 %v4627_v25 }
 0x193   : > { %v4628_v26 = vunpack.i.l.bf16 %v4627_v25 }
 0x194   : > { %3904 = vmatmul.mubr.msk.bf16.vlgmr.msra.gmra.mrb[0].mxu1 %vm6853_vm14, %v6079_v41  ;;  %vm6858_vm14 = vcmp.lt.s32.totalorder %v5210_v34, 113 }
 0x195   : > { %3919 = vmatpush1.bf16.msk.msra.mxu1 %vm3917_vm3, %v3918_v62  ;;  %2188 = vmatprep.mubr.bf16.mxu1 %v4922_v32  ;;  %vm6675_vm3 = vcmp.ne.s32.totalorder %v5246_v48, 15  ;;  %v4637_v54 = vpop.permute.xlu0 %4636  ;;  %v2379_v23 = vsel %vm6858_vm14, %v4614_v0, %v4619_v47  ;;  %v4634_v47 = vunpack.i.h.bf16 %v6101_v39  ;;  %v6215_v62 = vpop.permute.xlu1 %4651 }
 0x196   : > { %3934 = vmatprep.subr.msk.bf16.mxu1 %vm3932_vm13, %v3933_v42  ;;  %vm6674_vm13 = vcmp.ne.s32.totalorder %v5272_v63, 15  ;;  %v4639_v22 = vunpack.i.h.bf16 %v4637_v54  ;;  %v4638_v1 = vunpack.i.l.bf16 %v4637_v54 }
 0x197   : > { %3896 = vmatmul.mubr.msk.bf16.vlgmr.msra.gmra.mrb[0].mxu0 %vm6854_vm0, %v6079_v41 }
 0x198   : > { %3911 = vmatpush1.bf16.msk.msra.mxu0 %vm3909_vm9, %v3910_v30  ;;  %2135 = vmatprep.mubr.bf16.mxu0 %v4922_v32  ;;  %vm6151_vm9 = vmand %vm6675_vm3, %vm5429_vm7  ;;  %v4653_v30 = vunpack.i.l.bf16 %v6215_v62 }
 0x199   : > { %3926 = vmatprep.subr.msk.bf16.mxu0 %vm3924_vm15, %v3925_v50  ;;  %vm6859_vm15 = vmmov %vm6858_vm14  ;;  %v6229_v15 = vpop.permute.xlu1 %4661  ;;  %v4654_v50 = vunpack.i.h.bf16 %v6215_v62 }
 0x19a   : > { %v2378_v21 = vsel %vm6859_vm15, %v4613_v56, %v4618_v11  ;;  %vm6860_vm7 = vmmov %vm6858_vm14  ;;  %v4633_v11 = vunpack.i.l.bf16 %v6101_v39  ;;  %v4664_v39 = vunpack.i.h.bf16 %v6229_v15  ;;  %v4663_v9 = vunpack.i.l.bf16 %v6229_v15 }
 0x19b   : > { %v2384_v20 = vsel %vm6860_vm7, %v4643_v36, %v4628_v26  ;;  %vm6173_vm14 = vmand %vm6674_vm13, %vm5475_vm12  ;;  %v3936_v0 = vpack.c.bf16 %v2379_v23, %v2378_v21  ;;  %v2383_v56 = vsel %vm6860_vm7, %v4629_v16, %v4609_v38  ;;  %v6213_v38 = vpop.permute.xlu0 %4646 }
 0x19c   : > { %3905 = vmatmul.mubr.msk.bf16.gmra.mrb[4].mxu1 %vm6855_vm8, %v6138_v51  ;;  %vm6861_vm8 = vmmov %vm6860_vm7  ;;  %v4649_v31 = vunpack.i.h.bf16 %v6213_v38  ;;  %v4648_v33 = vunpack.i.l.bf16 %v6213_v38 }
 0x19d   : > { %2284 = vmatprep.mubr.bf16.mxu1 %v4922_v32  ;;  %v2385_v4 = vsel %vm6861_vm8, %v4644_v40, %v4629_v16  ;;  %vm6864_vm12 = vmmov %vm6860_vm7  ;;  %vm6865_vm8 = vnez %v6719_v60  ;;  %v6281_v52 = vpop.permute.xlu1 %4671 }
 0x19e   : > { %v2382_v27 = vsel %vm6864_vm12, %v4628_v26, %v4608_v24  ;;  %vm6196_vm13 = vmand %vm286_vm4, %vm6865_vm8  ;;  %v3949_v35 = vpack.c.bf16 %v2385_v4, %v2384_v20  ;;  %vm6871_vm8 = vcmask 130048  }
 0x19f   : > { %3897 = vmatmul.mubr.msk.bf16.gmra.mrb[4].mxu0 %vm6854_vm0, %v6138_v51  ;;  %vm6679_vm0 = vcmp.ne.s32.totalorder %v5267_v58, 15  ;;  %vm3948_vm3 = vmpackc.low %vm6173_vm14, %vm6173_vm14  ;;  %v3928_v60 = vpack.c.bf16 %v2383_v56, %v2382_v27  ;;  %v4657_v57 = vpop.permute.xlu0 %4656 }
 0x1a0   : > { %2231 = vmatprep.mubr.bf16.mxu0 %v4922_v32  ;;  %vm6868_vm12 = vmmov %vm6860_vm7  ;;  %v4659_v59 = vunpack.i.h.bf16 %v4657_v57  ;;  %v4658_v42 = vunpack.i.l.bf16 %v4657_v57 }
 0x1a1   : > { %v2373_v24 = vsel %vm6868_vm12, %v4634_v47, %v4639_v22  ;;  %vm6869_vm15 = vmmov %vm6860_vm7  ;;  %vm6870_vm7 = vnez %v6721_v61 }
 0x1a2   : > { %v2372_v17 = vsel %vm6869_vm15, %v4633_v11, %v4638_v1  ;;  %vm2391_vm1 = vmand %vm6679_vm0, %vm6870_vm7 }
 0x1a3   : > { %vm6872_vm14 = vmpackc.low %vm6151_vm9, %vm6151_vm9  ;;  %v3941_v61 = vpack.c.bf16 %v2373_v24, %v2372_v17  ;;  %v4667_v46 = vpop.permute.xlu0 %4666  ;;  %v4674_v24 = vunpack.i.h.bf16 %v6281_v52  ;;  %v4673_v17 = vunpack.i.l.bf16 %v6281_v52 }
 0x1a4   : > { %3920 = vmatmul.mubr.msk.bf16.vlgmr.msra.gmra.mrb[8].mxu1 %vm6871_vm8, %v6079_v41  ;;  %vm3927_vm15 = vmpackc.low %vm6196_vm13, %vm6196_vm13  ;;  %v4669_v3 = vunpack.i.h.bf16 %v4667_v46 }
 0x1a5   : > { %3937 = vmatpush1.bf16.msk.msra.mxu1 %vm6872_vm14, %v3936_v0  ;;  %2294 = vmatprep.mubr.bf16.mxu1 %v4922_v32  ;;  %vm3940_vm12 = vmpackc.low %vm2391_vm1, %vm2391_vm1  ;;  %vm6678_vm1 = vcmp.ne.s32.totalorder %v5288_v8, 15  ;;  %vm6677_vm14 = vcmp.ne.s32.totalorder %v5311_v19, 15 }
 0x1a6   : > { %3950 = vmatprep.subr.msk.bf16.mxu1 %vm3948_vm3, %v3949_v35  ;;  %vm6873_vm7 = vmmov %vm6871_vm8  ;;  %vm6875_vm3 = vcmp.lt.s32.totalorder %v5210_v34, 113  ;;  %vm2731_vm8 = vcmp.lt.s32.totalorder %v5210_v34, 112 }
 0x1a7   : > { %3912 = vmatmul.mubr.msk.bf16.vlgmr.msra.gmra.mrb[8].mxu0 %vm6873_vm7, %v6079_v41  ;;  %vm6874_vm13 = vmmov %vm6873_vm7  ;;  %v2371_v41 = vsel %vm6875_vm3, %v4639_v22, %v4644_v40  ;;  %v2738_v13 = vsel %vm2731_vm8, %v4658_v42, %v4663_v9  ;;  %v2739_v40 = vsel %vm2731_vm8, %v4659_v59, %v4664_v39  ;;  %v2742_v54 = vsel %vm2731_vm8, %v4648_v33, %v4653_v30  ;;  %v4682_v22 = vpop.permute.xlu1 %4681  ;;  %v4677_v4 = vpop.permute.xlu0 %4676 }
 0x1a8   : > { %3929 = vmatpush1.bf16.msk.msra.mxu0 %vm3927_vm15, %v3928_v60  ;;  %2241 = vmatprep.mubr.bf16.mxu0 %v4922_v32  ;;  %vm6876_vm9 = vmmov %vm6875_vm3  ;;  %v2743_v16 = vsel %vm2731_vm8, %v4649_v31, %v4654_v50  ;;  %v3967_v26 = vpack.c.bf16 %v2739_v40, %v2738_v13  ;;  %v4683_v20 = vunpack.i.l.bf16 %v4682_v22  ;;  %v2740_v0 = vsel %vm2731_vm8, %v4653_v30, %v4658_v42 }
 0x1a9   : > { %3942 = vmatprep.subr.msk.bf16.mxu0 %vm3940_vm12, %v3941_v61  ;;  %v2370_v29 = vsel %vm6876_vm9, %v4638_v1, %v4643_v36  ;;  %vm6877_vm15 = vmmov %vm6873_vm7  ;;  %vm6878_vm12 = vnez %v6729_v55  ;;  %v4739_v36 = vld [vmem:[#allocation5 + $0x60] sm:$0xff]   ;;  %v3959_v21 = vpack.c.bf16 %v2743_v16, %v2742_v54  ;;  %v4684_v1 = vunpack.i.h.bf16 %v4682_v22 }
 0x1aa   : > { %vm6253_vm7 = vmand %vm6678_vm1, %vm6878_vm12  ;;  %v3952_v55 = vpack.c.bf16 %v2371_v41, %v2370_v29  ;;  %vm6887_vm1 = vcmask 130048   ;;  %v4679_v27 = vunpack.i.h.bf16 %v4677_v4  ;;  %v4678_v56 = vunpack.i.l.bf16 %v4677_v4 }
 0x1ab   : > { %vm3951_vm9 = vmpackc.low %vm6253_vm7, %vm6253_vm7  ;;  %v2747_v35 = vsel %vm2731_vm8, %v4684_v1, %v4669_v3  ;;  %v2745_v62 = vsel %vm2731_vm8, %v4669_v3, %v4649_v31  ;;  %v6333_v41 = vpop.permute.xlu0 %4686  ;;  %v6335_v29 = vpop.permute.xlu1 %4691 }
 0x1ac   : > { %3921 = vmatmul.mubr.msk.bf16.gmra.mrb[12].mxu1 %vm6874_vm13, %v6138_v51  ;;  %vm6881_vm13 = vnez %v6731_v2  ;;  %v2735_v57 = vsel %vm2731_vm8, %v4674_v24, %v4679_v27  ;;  %v4688_v54 = vunpack.i.l.bf16 %v6333_v41  ;;  %v4694_v16 = vunpack.i.h.bf16 %v6335_v29 }
 0x1ad   : > { %2540 = vmatprep.mubr.bf16.mxu1 %v4922_v32  ;;  %vm6270_vm3 = vmand %vm6677_vm14, %vm6881_vm13  ;;  %vm6886_vm13 = vcmp.ne.s32.totalorder %v5239_v45, 15 }
 0x1ae   : > { %vm3966_vm14 = vmpackc.low %vm6886_vm13, %vm6886_vm13 }
 0x1af   : > { %3913 = vmatmul.mubr.msk.bf16.gmra.mrb[12].mxu0 %vm6877_vm15, %v6138_v51  ;;  %vm6884_vm15 = vcmp.lt.s32.totalorder %v5210_v34, 113  ;;  %vm3943_vm7 = vmpackc.low %vm6270_vm3, %vm6270_vm3  ;;  %v4689_v51 = vunpack.i.h.bf16 %v6333_v41  ;;  %v4743_v41 = vld [vmem:[#allocation5 + $0x80] sm:$0xff]  }
 0x1b0   : > { %2487 = vmatprep.mubr.bf16.mxu0 %v4922_v32  ;;  %v2374_v2 = vsel %vm6884_vm15, %v4623_v28, %v4633_v11  ;;  %vm6885_vm12 = vmmov %vm6884_vm15  ;;  %vm6888_vm15 = vcmp.ne.s32.totalorder %v5237_v44, 15  ;;  %v2741_v11 = vsel %vm2731_vm8, %v4654_v50, %v4659_v59  ;;  %v2734_v59 = vsel %vm2731_vm8, %v4673_v17, %v4678_v56  ;;  %v6346_v50 = vpop.permute.xlu1 %4701 }
 0x1b1   : > { %v2375_v23 = vsel %vm6885_vm12, %v4624_v18, %v4634_v47  ;;  %vm3958_vm0 = vmpackc.low %vm6888_vm15, %vm6888_vm15  ;;  %v4740_v18 = vld [vmem:[#allocation5 + $0x68] sm:$0xff]   ;;  %v4668_v47 = vunpack.i.l.bf16 %v4667_v46  ;;  %v3970_v60 = vpack.c.bf16 %v2741_v11, %v2740_v0  ;;  %v3975_v31 = vpack.c.bf16 %v2735_v57, %v2734_v59 }
 0x1b2   : > { %v3944_v28 = vpack.c.bf16 %v2375_v23, %v2374_v2  ;;  %vm6889_vm12 = vmmov %vm6887_vm1  ;;  %v4704_v13 = vunpack.i.h.bf16 %v6346_v50  ;;  %v4703_v40 = vunpack.i.l.bf16 %v6346_v50  ;;  %v6370_v23 = vld [vmem:[#allocation5 + $0x70] sm:$0xff]  }
 0x1b3   : > { %v2746_v53 = vsel %vm2731_vm8, %v4683_v20, %v4668_v47  ;;  %v2744_v38 = vsel %vm2731_vm8, %v4668_v47, %v4648_v33  ;;  %vm3961_vm15 = vmpackc.low %vm286_vm4, %vm286_vm4  ;;  %v4697_v33 = vpop.permute.xlu0 %4696 }
 0x1b4   : > { %3938 = vmatmul.mubr.msk.bf16.vlgmr.msra.gmra.mrb[0].mxu1 %vm6887_vm1, %v4739_v36  ;;  %v3983_v61 = vpack.c.bf16 %v2747_v35, %v2746_v53  ;;  %v3962_v42 = vpack.c.bf16 %v2745_v62, %v2744_v38  ;;  %v4699_v30 = vunpack.i.h.bf16 %v4697_v33  ;;  %v4698_v25 = vunpack.i.l.bf16 %v4697_v33 }
 0x1b5   : > { %3953 = vmatpush1.bf16.msk.msra.mxu1 %vm3951_vm9, %v3952_v55  ;;  %2550 = vmatprep.mubr.bf16.mxu1 %v4922_v32  ;;  %vm6892_vm9 = vcmp.ne.s32.totalorder %v5272_v63, 15  ;;  %v2733_v55 = vsel %vm2731_vm8, %v4679_v27, %v4684_v1  ;;  %v6388_v1 = vpop.permute.xlu1 %4711 }
 0x1b6   : > { %3968 = vmatprep.subr.msk.bf16.mxu1 %vm3966_vm14, %v3967_v26  ;;  %vm6890_vm14 = vmmov %vm6887_vm1  ;;  %v4693_v26 = vunpack.i.l.bf16 %v6335_v29  ;;  %v4713_v38 = vunpack.i.l.bf16 %v6388_v1 }
 0x1b7   : > { %3930 = vmatmul.mubr.msk.bf16.vlgmr.msra.gmra.mrb[0].mxu0 %vm6889_vm12, %v4739_v36  ;;  %vm3982_vm13 = vmpackc.low %vm6892_vm9, %vm6892_vm9  ;;  %vm6894_vm12 = vcmp.ne.s32.totalorder %v5267_v58, 15  ;;  %v4707_v15 = vpop.permute.xlu0 %4706 }
 0x1b8   : > { %3945 = vmatpush1.bf16.msk.msra.mxu0 %vm3943_vm7, %v3944_v28  ;;  %2497 = vmatprep.mubr.bf16.mxu0 %v4922_v32  ;;  %vm6893_vm7 = vmmov %vm6887_vm1  ;;  %v4709_v11 = vunpack.i.h.bf16 %v4707_v15  ;;  %v4708_v0 = vunpack.i.l.bf16 %v4707_v15 }
 0x1b9   : > { %3960 = vmatprep.subr.msk.bf16.mxu0 %vm3958_vm0, %v3959_v21  ;;  %vm6891_vm0 = vcmp.ne.s32.totalorder %v5246_v48, 15 }
 0x1ba   : > { %vm3969_vm3 = vmpackc.low %vm6891_vm0, %vm6891_vm0 }
 0x1bb   : > { %vm6896_vm0 = vmmov %vm6893_vm7  ;;  %v4717_v47 = vpop.permute.xlu0 %4716 }
 0x1bc   : > { %3939 = vmatmul.mubr.msk.bf16.gmra.mrb[4].mxu1 %vm6887_vm1, %v4740_v18  ;;  %vm3974_vm1 = vmpackc.low %vm6894_vm12, %vm6894_vm12  ;;  %vm6902_vm12 = vcmp.ne.s32.totalorder %v5288_v8, 15  ;;  %v4719_v35 = vunpack.i.h.bf16 %v4717_v47 }
 0x1bd   : > { %2646 = vmatprep.mubr.bf16.mxu1 %v4922_v32  ;;  %vm6897_vm9 = vmmov %vm6896_vm0 }
 0x1bf   : > { %3931 = vmatmul.mubr.msk.bf16.gmra.mrb[4].mxu0 %vm6890_vm14, %v4740_v18  ;;  %vm6895_vm14 = vmmov %vm6893_vm7 }
 0x1c0   : > { %2593 = vmatprep.mubr.bf16.mxu0 %v4922_v32 }
 0x1c4   : > { %3954 = vmatmul.mubr.msk.bf16.vlgmr.msra.gmra.mrb[8].mxu1 %vm6893_vm7, %v4739_v36  ;;  %vm6899_vm7 = vcmp.ne.s32.totalorder %v5239_v45, 15 }
 0x1c5   : > { %3971 = vmatpush1.bf16.msk.msra.mxu1 %vm3969_vm3, %v3970_v60  ;;  %2656 = vmatprep.mubr.bf16.mxu1 %v4922_v32  ;;  %vm3085_vm3 = vcmp.lt.s32.totalorder %v5210_v34, 111  ;;  %v4714_v60 = vunpack.i.h.bf16 %v6388_v1 }
 0x1c6   : > { %3984 = vmatprep.subr.msk.bf16.mxu1 %vm3982_vm13, %v3983_v61  ;;  %v3092_v52 = vsel %vm3085_vm3, %v4698_v25, %v4703_v40  ;;  %v3093_v2 = vsel %vm3085_vm3, %v4699_v30, %v4704_v13  ;;  %vm6898_vm13 = vnez %v6733_v7  ;;  %v3096_v46 = vsel %vm3085_vm3, %v4688_v54, %v4693_v26 }
 0x1c7   : > { %3946 = vmatmul.mubr.msk.bf16.vlgmr.msra.gmra.mrb[8].mxu0 %vm6895_vm14, %v4739_v36  ;;  %v2732_v36 = vsel %vm2731_vm8, %v4678_v56, %v4683_v20  ;;  %v4001_v22 = vpack.c.bf16 %v3093_v2, %v3092_v52  ;;  %vm6903_vm14 = vnez %v6740_v14  ;;  %v2736_v7 = vsel %vm2731_vm8, %v4663_v9, %v4673_v17  ;;  %v4722_v9 = vpop.permute.xlu1 %4721 }
 0x1c8   : > { %3963 = vmatpush1.bf16.msk.msra.mxu0 %vm3961_vm15, %v3962_v42  ;;  %2603 = vmatprep.mubr.bf16.mxu0 %v4922_v32  ;;  %vm6377_vm15 = vmand %vm6899_vm7, %vm6898_vm13  ;;  %v3986_v28 = vpack.c.bf16 %v2733_v55, %v2732_v36  ;;  %v2737_v20 = vsel %vm2731_vm8, %v4664_v39, %v4674_v24  ;;  %vm6907_vm7 = vcmask 130048   ;;  %v4742_v39 = vld [vmem:[#allocation5 + $0x78] sm:$0xff]   ;;  %v4724_v4 = vunpack.i.h.bf16 %v4722_v9 }
 0x1c9   : > { %3976 = vmatprep.subr.msk.bf16.mxu0 %vm3974_vm1, %v3975_v31  ;;  %vm3985_vm1 = vmpackc.low %vm6902_vm12, %vm6902_vm12  ;;  %vm6908_vm12 = vcmp.ne.s32.totalorder %v5311_v19, 15  ;;  %v3978_v14 = vpack.c.bf16 %v2737_v20, %v2736_v7  ;;  %v4723_v3 = vunpack.i.l.bf16 %v4722_v9  ;;  %v3095_v56 = vsel %vm3085_vm3, %v4694_v16, %v4699_v30 }
 0x1ca   : > { %vm4000_vm13 = vmpackc.low %vm6377_vm15, %vm6377_vm15  ;;  %v3094_v53 = vsel %vm3085_vm3, %v4693_v26, %v4698_v25  ;;  %v4718_v24 = vunpack.i.l.bf16 %v4717_v47  ;;  %v3098_v6 = vsel %vm3085_vm3, %v4708_v0, %v4688_v54  ;;  %v3089_v59 = vsel %vm3085_vm3, %v4714_v60, %v4719_v35 }
 0x1cb   : > { %v3100_v17 = vsel %vm3085_vm3, %v4723_v3, %v4708_v0  ;;  %v4004_v62 = vpack.c.bf16 %v3095_v56, %v3094_v53  ;;  %v3090_v31 = vsel %vm3085_vm3, %v4703_v40, %v4713_v38 }
 0x1cc   : > { %3955 = vmatmul.mubr.msk.bf16.gmra.mrb[12].mxu1 %vm6896_vm0, %v4740_v18  ;;  %vm6904_vm0 = vcmp.ne.s32.totalorder %v5237_v44, 15  ;;  %v3088_v42 = vsel %vm3085_vm3, %v4713_v38, %v4718_v24  ;;  %v3086_v5 = vsel %vm3085_vm3, %v4718_v24, %v4723_v3 }
 0x1cd   : > { %2894 = vmatprep.mubr.bf16.mxu1 %v4922_v32  ;;  %v4009_v43 = vpack.c.bf16 %v3089_v59, %v3088_v42 }
 0x1cf   : > { %3947 = vmatmul.mubr.msk.bf16.gmra.mrb[12].mxu0 %vm6897_vm9, %v4740_v18  ;;  %v3097_v18 = vsel %vm3085_vm3, %v4689_v51, %v4694_v16  ;;  %vm6394_vm9 = vmand %vm6904_vm0, %vm6903_vm14 }
 0x1d0   : > { %2841 = vmatprep.mubr.bf16.mxu0 %v4922_v32  ;;  %v3993_v44 = vpack.c.bf16 %v3097_v18, %v3096_v46  ;;  %vm3977_vm14 = vmpackc.low %vm6908_vm12, %vm6908_vm12 }
 0x1d1   : > { %vm3992_vm8 = vmpackc.low %vm6394_vm9, %vm6394_vm9 }
 0x1d2   : > { %vm6909_vm0 = vmmov %vm6907_vm7 }
 0x1d3   : > { %vm6910_vm15 = vmmov %vm6909_vm0 }
 0x1d4   : > { %3972 = vmatmul.mubr.msk.bf16.vlgmr.msra.gmra.mrb[0].mxu1 %vm6907_vm7, %v6370_v23 }
 0x1d5   : > { %3987 = vmatpush1.bf16.msk.msra.mxu1 %vm3985_vm1, %v3986_v28  ;;  %2904 = vmatprep.mubr.bf16.mxu1 %v4922_v32  ;;  %vm6911_vm1 = vcmp.ne.s32.totalorder %v5246_v48, 15  ;;  %v3101_v48 = vsel %vm3085_vm3, %v4724_v4, %v4709_v11 }
 0x1d6   : > { %4002 = vmatprep.subr.msk.bf16.mxu1 %vm4000_vm13, %v4001_v22  ;;  %vm6427_vm9 = vmand %vm6911_vm1, %vm6838_vm11  ;;  %vm6915_vm11 = vcmp.ne.s32.totalorder %v5272_v63, 15  ;;  %v3099_v63 = vsel %vm3085_vm3, %v4709_v11, %v4689_v51  ;;  %v4017_v57 = vpack.c.bf16 %v3101_v48, %v3100_v17 }
 0x1d7   : > { %3964 = vmatmul.mubr.msk.bf16.vlgmr.msra.gmra.mrb[0].mxu0 %vm6909_vm0, %v6370_v23  ;;  %vm6914_vm13 = vmmov %vm6909_vm0  ;;  %v3996_v49 = vpack.c.bf16 %v3099_v63, %v3098_v6 }
 0x1d8   : > { %3979 = vmatpush1.bf16.msk.msra.mxu0 %vm3977_vm14, %v3978_v14  ;;  %2851 = vmatprep.mubr.bf16.mxu0 %v4922_v32  ;;  %vm6444_vm7 = vmand %vm6915_vm11, %vm6841_vm5 }
 0x1d9   : > { %3994 = vmatprep.subr.msk.bf16.mxu0 %vm3992_vm8, %v3993_v44  ;;  %vm4003_vm12 = vmpackc.low %vm6427_vm9, %vm6427_vm9  ;;  %vm6920_vm8 = vcmp.ne.s32.totalorder %v5267_v58, 15  ;;  %v3087_v58 = vsel %vm3085_vm3, %v4719_v35, %v4724_v4 }
 0x1da   : > { %vm6462_vm5 = vmand %vm286_vm4, %vm5722_vm6  ;;  %v4020_v29 = vpack.c.bf16 %v3087_v58, %v3086_v5 }
 0x1db   : > { %vm4016_vm14 = vmpackc.low %vm6444_vm7, %vm6444_vm7  ;;  %vm6926_vm7 = vnez %v6787_v37 }
 0x1dc   : > { %3973 = vmatmul.mubr.msk.bf16.gmra.mrb[4].mxu1 %vm6910_vm15, %v4742_v39  ;;  %vm3107_vm0 = vmand %vm6920_vm8, %vm5752_vm10 }
 0x1dd   : > { %3000 = vmatprep.mubr.bf16.mxu1 %v4922_v32  ;;  %vm6921_vm6 = vmmov %vm6914_vm13 }
 0x1de   : > { %vm3995_vm4 = vmpackc.low %vm6462_vm5, %vm6462_vm5 }
 0x1df   : > { %3965 = vmatmul.mubr.msk.bf16.gmra.mrb[4].mxu0 %vm6914_vm13, %v4742_v39  ;;  %vm4008_vm15 = vmpackc.low %vm3107_vm0, %vm3107_vm0  ;;  %vm6925_vm13 = vcmp.ne.s32.totalorder %v5288_v8, 15  ;;  %v3091_v8 = vsel %vm3085_vm3, %v4704_v13, %v4714_v60 }
 0x1e0   : > { %2947 = vmatprep.mubr.bf16.mxu0 %v4922_v32  ;;  %vm6922_vm1 = vmmov %vm6921_vm6  ;;  %v4012_v12 = vpack.c.bf16 %v3091_v8, %v3090_v31 }
 0x1e1   : > { %vm6923_vm10 = vmmov %vm6922_vm1 }
 0x1e2   : > { %vm6924_vm9 = vmmov %vm6922_vm1 }
 0x1e3   : > { %vm3108_vm11 = vmand %vm6925_vm13, %vm5809_vm2 }
 0x1e4   : > { %3988 = vmatmul.mubr.msk.bf16.vlgmr.msra.gmra.mrb[8].mxu1 %vm6921_vm6, %v6370_v23  ;;  %vm6928_vm2 = vmmov %vm6922_vm1 }
 0x1e5   : > { %4005 = vmatpush1.bf16.msk.msra.mxu1 %vm4003_vm12, %v4004_v62  ;;  %3010 = vmatprep.mubr.bf16.mxu1 %v4922_v32  ;;  %vm6927_vm12 = vcmp.ne.s32.totalorder %v5311_v19, 15  ;;  %vm6929_vm0 = vmmov %vm6922_vm1  ;;  %v4744_v19 = vld [vmem:[#allocation5 + $0x88] sm:$0xff]  }
 0x1e6   : > { %4018 = vmatprep.subr.msk.bf16.mxu1 %vm4016_vm14, %v4017_v57  ;;  %vm3106_vm5 = vmand %vm6927_vm12, %vm6926_vm7 }
 0x1e7   : > { %3980 = vmatmul.mubr.msk.bf16.vlgmr.msra.gmra.mrb[8].mxu0 %vm6922_vm1, %v6370_v23  ;;  %vm4019_vm14 = vmpackc.low %vm3108_vm11, %vm3108_vm11 }
 0x1e8   : > { %3997 = vmatpush1.bf16.msk.msra.mxu0 %vm3995_vm4, %v3996_v49  ;;  %2957 = vmatprep.mubr.bf16.mxu0 %v4922_v32  ;;  %vm4011_vm8 = vmpackc.low %vm3106_vm5, %vm3106_vm5 }
 0x1e9   : > { %4010 = vmatprep.subr.msk.bf16.mxu0 %vm4008_vm15, %v4009_v43  ;;  %vm6930_vm6 = vmmov %vm6929_vm0 }
 0x1ea   : > { %vm6931_vm4 = vmmov %vm6929_vm0 }
 0x1eb   : > { %vm6932_vm3 = vmmov %vm6929_vm0 }
 0x1ec   : > { %3989 = vmatmul.mubr.msk.bf16.gmra.mrb[12].mxu1 %vm6923_vm10, %v4742_v39  ;;  %vm6933_vm15 = vmmov %vm6929_vm0 }
 0x1ed   : > { %3256 = vmatprep.mubr.bf16.mxu1 %v4922_v32  ;;  %vm6934_vm1 = vmmov %vm6929_vm0 }
 0x1ee   : > { %vm6935_vm10 = vmmov %vm6929_vm0 }
 0x1ef   : > { %3981 = vmatmul.mubr.msk.bf16.gmra.mrb[12].mxu0 %vm6924_vm9, %v4742_v39 }
 0x1f0   : > { %3203 = vmatprep.mubr.bf16.mxu0 %v4922_v32 }
 0x1f4   : > { %4006 = vmatmul.mubr.msk.bf16.vlgmr.msra.gmra.mrb[0].mxu1 %vm6928_vm2, %v4743_v41 }
 0x1f5   : > { %4021 = vmatpush1.bf16.msk.msra.mxu1 %vm4019_vm14, %v4020_v29  ;;  %3266 = vmatprep.mubr.bf16.mxu1 %v4922_v32 }
 0x1f7   : > { %3998 = vmatmul.mubr.msk.bf16.vlgmr.msra.gmra.mrb[0].mxu0 %vm6929_vm0, %v4743_v41 }
 0x1f8   : > { %4013 = vmatpush1.bf16.msk.msra.mxu0 %vm4011_vm8, %v4012_v12  ;;  %3213 = vmatprep.mubr.bf16.mxu0 %v4922_v32 }
 0x1fb   : > { %v6524_v34 = vpop.permute.xlu0 %3421 }
 0x1fc   : > { %4007 = vmatmul.mubr.msk.bf16.gmra.mrb[4].mxu1 %vm6930_vm6, %v4744_v19 }
 0x1fd   : > { %3362 = vmatprep.mubr.bf16.mxu1 %v4922_v32  ;;  %v6526_v33 = vpop.permute.xlu1 %3426 }
 0x1ff   : > { %3999 = vmatmul.mubr.msk.bf16.gmra.mrb[4].mxu0 %vm6931_vm4, %v4744_v19 }
 0x200   : > { %3309 = vmatprep.mubr.bf16.mxu0 %v4922_v32 }
 0x201   : > { %v6536_v1 = vpop.permute.xlu1 %3431 }
 0x204   : > { %4022 = vmatmul.mubr.msk.bf16.vlgmr.msra.gmra.mrb[8].mxu1 %vm6932_vm3, %v4743_v41 }
 0x205   : > { %3372 = vmatprep.mubr.bf16.mxu1 %v4922_v32 }
 0x207   : > { %4014 = vmatmul.mubr.msk.bf16.vlgmr.msra.gmra.mrb[8].mxu0 %vm6933_vm15, %v4743_v41 }
 0x208   : > { %3319 = vmatprep.mubr.bf16.mxu0 %v4922_v32  ;;  %v6542_v15 = vpop.permute.xlu0 %3436 }
 0x20c   : > { %4023 = vmatmul.mubr.msk.bf16.gmra.mrb[12].mxu1 %vm6934_vm1, %v4744_v19 }
 0x20f   : > { %4015 = vmatmul.mubr.msk.bf16.gmra.mrb[12].mxu0 %vm6935_vm10, %v4744_v19 }
 0x2c7   : > { %v3258_v37 = vpop.f32.mrb[0].mxu1 }
 0x2c8   : > { %v3441_v50 = vadd.f32 %v6524_v34, %v3258_v37  ;;  %v3260_v30 = vpop.f32.mrb[1].mxu1 }
 0x2c9   : > { %v3442_v25 = vadd.f32 %v6524_v34, %v3260_v30  ;;  %v3262_v13 = vpop.f32.mrb[2].mxu1 }
 0x2ca   : > { %v3473_v40 = vmax.f32 %v3441_v50, 0.0  ;;  %v3449_v55 = vadd.f32 %v6526_v33, %v3262_v13  ;;  %v3205_v32 = vpop.f32.mrb[0].mxu0  ;;  %v3264_v36 = vpop.f32.mrb[3].mxu1 }
 0x2cb   : > { %v3474_v51 = vmax.f32 %v3442_v25, 0.0  ;;  %v3439_v54 = vadd.f32 %v6524_v34, %v3205_v32  ;;  %v3450_v16 = vadd.f32 %v6526_v33, %v3264_v36  ;;  %v3207_v26 = vpop.f32.mrb[1].mxu0 }
 0x2cc   : > { %v3481_v52 = vmax.f32 %v3449_v55, 0.0  ;;  %v3440_v2 = vadd.f32 %v6524_v34, %v3207_v26  ;;  %v3209_v23 = vpop.f32.mrb[2].mxu0 }
 0x2cd   : > { %v4047_v21 = vpack.c.bf16 %v3474_v51, %v3473_v40  ;;  %v3471_v28 = vmax.f32 %v3439_v54, 0.0  ;;  %v3482_v46 = vmax.f32 %v3450_v16, 0.0  ;;  %v3447_v18 = vadd.f32 %v6526_v33, %v3209_v23  ;;  %v3211_v22 = vpop.f32.mrb[3].mxu0 }
 0x2ce   : > { %v3472_v45 = vmax.f32 %v3440_v2, 0.0  ;;  %v3448_v7 = vadd.f32 %v6526_v33, %v3211_v22 }
 0x2cf   : > { %3600 = vst [vmem:[%s6539_s8 + $0x8] sm:$0xff] %v4047_v21  ;;  %v4051_v20 = vpack.c.bf16 %v3482_v46, %v3481_v52  ;;  %v3479_v44 = vmax.f32 %v3447_v18, 0.0  ;;  %v3268_v14 = vpop.f32.mrb[4].mxu1 }
 0x2d0   : > { %v4046_v39 = vpack.c.bf16 %v3472_v45, %v3471_v28  ;;  %v3480_v9 = vmax.f32 %v3448_v7, 0.0  ;;  %v3457_v4 = vadd.f32 %v6536_v1, %v3268_v14  ;;  %v3270_v3 = vpop.f32.mrb[5].mxu1 }
 0x2d1   : > { %3604 = vst [vmem:[%s6539_s8 + $0x28] sm:$0xff] %v4051_v20  ;;  %v3458_v47 = vadd.f32 %v6536_v1, %v3270_v3  ;;  %v3272_v11 = vpop.f32.mrb[6].mxu1 }
 0x2d2   : > { %3599 = vst [vmem:[%s6539_s8] sm:$0xff] %v4046_v39  ;;  %v4050_v0 = vpack.c.bf16 %v3480_v9, %v3479_v44  ;;  %v3489_v27 = vmax.f32 %v3457_v4, 0.0  ;;  %v3465_v56 = vadd.f32 %v6542_v15, %v3272_v11  ;;  %v3215_v53 = vpop.f32.mrb[4].mxu0  ;;  %v3274_v35 = vpop.f32.mrb[7].mxu1 }
 0x2d3   : > { %v3490_v24 = vmax.f32 %v3458_v47, 0.0  ;;  %v3455_v17 = vadd.f32 %v6536_v1, %v3215_v53  ;;  %v3466_v48 = vadd.f32 %v6542_v15, %v3274_v35  ;;  %v3217_v10 = vpop.f32.mrb[5].mxu0 }
 0x2d4   : > { %3603 = vst [vmem:[%s6539_s8 + $0x20] sm:$0xff] %v4050_v0  ;;  %v3497_v60 = vmax.f32 %v3465_v56, 0.0  ;;  %v3456_v38 = vadd.f32 %v6536_v1, %v3217_v10  ;;  %v3219_v62 = vpop.f32.mrb[6].mxu0 }
 0x2d5   : > { %v4055_v6 = vpack.c.bf16 %v3490_v24, %v3489_v27  ;;  %v3487_v63 = vmax.f32 %v3455_v17, 0.0  ;;  %v3498_v61 = vmax.f32 %v3466_v48, 0.0  ;;  %v3463_v57 = vadd.f32 %v6542_v15, %v3219_v62  ;;  %v3221_v59 = vpop.f32.mrb[7].mxu0 }
 0x2d6   : > { %v3488_v42 = vmax.f32 %v3456_v38, 0.0  ;;  %v3464_v49 = vadd.f32 %v6542_v15, %v3221_v59 }
 0x2d7   : > { %3608 = vst [vmem:[%s6539_s8 + $0x48] sm:$0xff] %v4055_v6  ;;  %v4059_v43 = vpack.c.bf16 %v3498_v61, %v3497_v60  ;;  %v3495_v58 = vmax.f32 %v3463_v57, 0.0  ;;  %v3364_v5 = vpop.f32.mrb[8].mxu1 }
 0x2d8   : > { %v4054_v41 = vpack.c.bf16 %v3488_v42, %v3487_v63  ;;  %v3496_v29 = vmax.f32 %v3464_v49, 0.0  ;;  %v3445_v31 = vadd.f32 %v6524_v34, %v3364_v5  ;;  %v3366_v8 = vpop.f32.mrb[9].mxu1 }
 0x2d9   : > { %3612 = vst [vmem:[%s6539_s8 + $0x68] sm:$0xff] %v4059_v43  ;;  %v3446_v12 = vadd.f32 %v6524_v34, %v3366_v8  ;;  %v3368_v19 = vpop.f32.mrb[10].mxu1 }
 0x2da   : > { %3607 = vst [vmem:[%s6539_s8 + $0x40] sm:$0xff] %v4054_v41  ;;  %v4058_v37 = vpack.c.bf16 %v3496_v29, %v3495_v58  ;;  %v3477_v50 = vmax.f32 %v3445_v31, 0.0  ;;  %v3453_v30 = vadd.f32 %v6526_v33, %v3368_v19  ;;  %v3311_v25 = vpop.f32.mrb[8].mxu0  ;;  %v3370_v13 = vpop.f32.mrb[11].mxu1 }
 0x2db   : > { %v3478_v40 = vmax.f32 %v3446_v12, 0.0  ;;  %v3443_v55 = vadd.f32 %v6524_v34, %v3311_v25  ;;  %v3454_v32 = vadd.f32 %v6526_v33, %v3370_v13  ;;  %v3313_v36 = vpop.f32.mrb[9].mxu0 }
 0x2dc   : > { %3611 = vst [vmem:[%s6539_s8 + $0x60] sm:$0xff] %v4058_v37  ;;  %v3485_v51 = vmax.f32 %v3453_v30, 0.0  ;;  %v3444_v54 = vadd.f32 %v6524_v34, %v3313_v36  ;;  %v3315_v16 = vpop.f32.mrb[10].mxu0 }
 0x2dd   : > { %v4049_v26 = vpack.c.bf16 %v3478_v40, %v3477_v50  ;;  %v3475_v52 = vmax.f32 %v3443_v55, 0.0  ;;  %v3486_v2 = vmax.f32 %v3454_v32, 0.0  ;;  %v3451_v23 = vadd.f32 %v6526_v33, %v3315_v16  ;;  %v3317_v21 = vpop.f32.mrb[11].mxu0 }
 0x2de   : > { %v3476_v28 = vmax.f32 %v3444_v54, 0.0  ;;  %v3452_v46 = vadd.f32 %v6526_v33, %v3317_v21 }
 0x2df   : > { %3602 = vst [vmem:[%s6539_s8 + $0x18] sm:$0xff] %v4049_v26  ;;  %v4053_v18 = vpack.c.bf16 %v3486_v2, %v3485_v51  ;;  %v3483_v22 = vmax.f32 %v3451_v23, 0.0  ;;  %v3374_v45 = vpop.f32.mrb[12].mxu1 }
 0x2e0   : > { %v4048_v7 = vpack.c.bf16 %v3476_v28, %v3475_v52  ;;  %v3484_v20 = vmax.f32 %v3452_v46, 0.0  ;;  %v3461_v34 = vadd.f32 %v6536_v1, %v3374_v45  ;;  %v3376_v44 = vpop.f32.mrb[13].mxu1 }
 0x2e1   : > { %3606 = vst [vmem:[%s6539_s8 + $0x38] sm:$0xff] %v4053_v18  ;;  %v3462_v14 = vadd.f32 %v6536_v1, %v3376_v44  ;;  %v3378_v39 = vpop.f32.mrb[14].mxu1 }
 0x2e2   : > { %3601 = vst [vmem:[%s6539_s8 + $0x10] sm:$0xff] %v4048_v7  ;;  %v4052_v9 = vpack.c.bf16 %v3484_v20, %v3483_v22  ;;  %v3493_v4 = vmax.f32 %v3461_v34, 0.0  ;;  %v3469_v3 = vadd.f32 %v6542_v15, %v3378_v39  ;;  %v3321_v33 = vpop.f32.mrb[12].mxu0  ;;  %v3380_v47 = vpop.f32.mrb[15].mxu1 }
 0x2e3   : > { %v3494_v11 = vmax.f32 %v3462_v14, 0.0  ;;  %v3459_v0 = vadd.f32 %v6536_v1, %v3321_v33  ;;  %v3470_v27 = vadd.f32 %v6542_v15, %v3380_v47  ;;  %v3323_v56 = vpop.f32.mrb[13].mxu0 }
 0x2e4   : > { %3605 = vst [vmem:[%s6539_s8 + $0x30] sm:$0xff] %v4052_v9  ;;  %v3501_v53 = vmax.f32 %v3469_v3, 0.0  ;;  %v3460_v35 = vadd.f32 %v6536_v1, %v3323_v56  ;;  %v3325_v24 = vpop.f32.mrb[14].mxu0 }
 0x2e5   : > { %v4057_v17 = vpack.c.bf16 %v3494_v11, %v3493_v4  ;;  %v3491_v48 = vmax.f32 %v3459_v0, 0.0  ;;  %v3502_v10 = vmax.f32 %v3470_v27, 0.0  ;;  %v3467_v60 = vadd.f32 %v6542_v15, %v3325_v24  ;;  %v3327_v38 = vpop.f32.mrb[15].mxu0 }
 0x2e6   : > { %v3492_v62 = vmax.f32 %v3460_v35, 0.0  ;;  %v3468_v6 = vadd.f32 %v6542_v15, %v3327_v38 }
 0x2e7   : > { %3610 = vst [vmem:[%s6539_s8 + $0x58] sm:$0xff] %v4057_v17  ;;  %v4061_v63 = vpack.c.bf16 %v3502_v10, %v3501_v53  ;;  %v3499_v1 = vmax.f32 %v3467_v60, 0.0 }
 0x2e8   : > { %v4056_v61 = vpack.c.bf16 %v3492_v62, %v3491_v48  ;;  %v3500_v57 = vmax.f32 %v3468_v6, 0.0 }
 0x2e9   : > { %3614 = vst [vmem:[%s6539_s8 + $0x78] sm:$0xff] %v4061_v63 }
 0x2ea   : > { %3609 = vst [vmem:[%s6539_s8 + $0x50] sm:$0xff] %v4056_v61  ;;  %v4060_v15 = vpack.c.bf16 %v3500_v57, %v3499_v1 }
 0x2ec   : > { %3613 = vst [vmem:[%s6539_s8 + $0x70] sm:$0xff] %v4060_v15 }
 0x2ed   : > { %4852 = shalt.err (!%p4849_p5)
}
 0x2ee   : > { %s4853_s5 = scalar_lea.hbm %s6585_s19, 2048  ;;  %s4857_s29 = scalar_lea.hbm %s6637_s3, 4096 }
 0x2ef   : > { %p4854_p11 = scmp.ne.s32.totalorder %s6585_s19, %s4853_s5  ;;  %p4858_p6 = scmp.lt.u32.totalorder %s6585_s19, %s6637_s3 }
 0x2f0   : > { %p4859_p2 = scmp.lt.u32.totalorder %s4857_s29, %s4853_s5  ;;  %p4861_p7 = scmp.lt.u32.totalorder %s4853_s5, %s6585_s19 }
 0x2f1   : > { %p4855_p12 = pnand %p4854_p11, %p6936_p9 }
 0x2f2   : > { %p4860_p13 = por %p4859_p2, %p4858_p6 }
 0x2f3   : > { %p4856_p3 = pneg %p4855_p12 }
 0x2f4   : > { %p4862_p10 = por %p4861_p7, %p4860_p13 }
 0x2f6   : > { %p4863_p1 = pnand %p4862_p10, %p4856_p3 }
 0x2f8   : > { %4866 = shalt.err (!%p4863_p1)
}
 0x2f9   : > { %s4931_s7 = smov 512   ;;  %s4932_s8 = smov 1024  }
 0x2fa   : > { %s4933_s9 = smov 32  }
 0x2fb   : > { %4329 = dma.vmem_to_hbm [thread:$0]  (%p6936_p9), %s6588_s10, 2048, %s6585_s19, %s3616_s16, %s4931_s7, %s4932_s8, %s4933_s9  }
 0x2fc PF: > { %s3644_s22 = sand.u32 1, %s4897_s12   ;;  %p6937_p0 = scmp.ne.s32.totalorder %s6683_s25, 0 }
 0x2fd   : > { %p6938_p4 = scmp.ge.s32.totalorder %s4909_s15, 2  ;;  %s3645_s17 = scalar_lea.sflag [#allocation4], %s3644_s22 }
 0x2ff   : > { %p4343_p8 = pnand %p6938_p4, %p6937_p0 }
 0x301   : > { %4892 = dma.done.wait (!%p4343_p8), %s3645_s17, 2048  }
 0x302   : > { %4894 = vsyncadd (!%p4343_p8), %s3645_s17, 4294965248  ;;  %p17_p5 = scmp.ge.s32.totalorder %s4979_s18, 4   ;;  %s6939_s12 = smov %s4901_s13 }
 0x303   : > { %s6940_s13 = smov %s4905_s14  ;;  %s6941_s14 = smov %s4991_s21 }
 0x304   : > { %s6942_s15 = smov %s4979_s18  ;;  %19 = sbr.rel (!%p17_p5) target bundleno = 6 (0x6), region = 93 }
 0x30b   :  { %3650 = vsyncpa [#allocation3], 1 }
 0x30c   :  { %3652 = vsyncpa [#allocation3 + $0x1], 1 }
 0x30d   :  { %3653 = vsyncpa [#allocation6], 1 }
 0x30e   :  { %3654 = vsyncpa [#allocation4], 1 }
 0x30f   :  { %3656 = vsyncpa [#allocation4 + $0x1], 1 }

// kernel: _lambda_.9
= control target key start
LH: loop header
LB: loop body
LE: loop exit
PB: predicated region body
PF: predicated region fallthrough
CT: control target
= control target key end

     0   :  { %8 = vsyncpa [#allocation3], 0  ;;  %s10815_s0 = inlined_call_operand.hbm [shape: bf16[16,8192], index: 0, kind: input, shape index: {}]   ;;  %s10816_s1 = inlined_call_operand.hbm [shape: bf16[9,16,16], index: 1, kind: input, shape index: {}]   ;;  %s10817_s2 = inlined_call_operand.hbm [shape: f32[16,1], index: 2, kind: input, shape index: {}]   ;;  %s10818_s3 = inlined_call_operand.hbm [shape: f32[16,8192], index: 3, kind: output, shape index: {}]  }
   0x1   :  { %10 = vsyncpa [#allocation3 + $0x1], 0 }
   0x2   :  { %11 = vsyncpa [#allocation6], 0 }
   0x3   :  { %12 = vsyncpa [#allocation4], 0 }
   0x4   :  { %14 = vsyncpa [#allocation4 + $0x1], 0  ;;  %s7364_s12 = smov 0   ;;  %s7366_s13 = smov 0  }
   0x5   :  { %s7368_s14 = smov 0   ;;  %s7370_s15 = smov 0  }
   0x6 LB: > { %s7385_s16 = sadd.s32 4294967295, %s7320_s15   ;;  %s5591_s17 = sadd.s32 4294967294, %s7320_s15   ;;  %s7320_s15 = sphi %s7370_s15, %s11787_s15   ;;  %s7316_s14 = sphi %s7368_s14, %s11786_s14   ;;  %s7312_s13 = sphi %s7366_s13, %s11785_s13   ;;  %s7308_s12 = sphi %s7364_s12, %s11784_s12  }
   0x7   : > { %s7389_s18 = sadd.s32 1, %s7320_s15   ;;  %s27_s19 = sadd.s32 1, %s7316_s14 }
   0x8   : > { %s24_s20 = ssub.s32 %s7320_s15, %s7389_s18  ;;  %p34_p0 = scmp.ne.s32.totalorder %s7316_s14, %s7312_s13 }
   0x9   : > { %p25_p1 = scmp.eq.s32.totalorder %s24_s20, 0  ;;  %p35_p2 = scmp.eq.s32.totalorder %s7320_s15, 0 }
   0xa   : > { %p40_p3 = scmp.ne.s32.totalorder %s7312_s13, %s7308_s12  ;;  %p10819_p4 = scmp.eq.s32.totalorder %s7385_s16, 0 }
   0xb   : > { %s7401_s21 = scalar_select %p25_p1, %s7316_s14, %s27_s19  }
   0xc   : > { %p7403_p5 = por %p35_p2, %p34_p0  ;;  %p7409_p6 = por %p10819_p4, %p40_p3 }
   0xd   : > { %p106_p7 = scmp.eq.s32.totalorder %s7385_s16, 3  ;;  %p112_p8 = scmp.eq.s32.totalorder %s5591_s17, 3 }
   0xe   : > { %s11037_s22 = scalar_select %p7403_p5, 1, 0 }
   0xf   : > { %s11038_s23 = scalar_select %p7409_p6, 1, 0 }
  0x10   : > { %p5592_p9 = scmp.ge.s32.totalorder %s7320_s15, 1  ;;  %p119_p10 = scmp.lt.s32.totalorder %s7320_s15, 5 }
  0x11   : > { %p7416_p11 = por %p106_p7, %p34_p0  ;;  %p7420_p12 = por %p112_p8, %p40_p3 }
  0x12   : > { %p7424_p13 = pnand %p5592_p9, %p119_p10  ;;  %s7322_s27 = smov [#allocation5]  }
  0x13   : > { %s11039_s24 = scalar_select %p7416_p11, 1, 0 }
  0x14   : > { %s11040_s25 = scalar_select %p7420_p12, 1, 0 }
  0x15   : > { %s11041_s26 = scalar_select %p7424_p13, 1, 0 }
  0x16   : > { %p6360_p1 = pneg %p7424_p13  ;;  %s131_s28 = sshll.u32 %s7322_s27, 4  ;;  %s132_s28 = int_to_ptr.vmem [resolvable:$true] %s131_s28 }
  0x17   : > { %s7323_s30 = smov [#allocation7]   ;;  %s7164_s7 = scalar_lea.hbm %s10816_s1, 1152 }
  0x18   : > { %p7432_p2 = pnand %p6360_p1, %p10819_p4  ;;  %s144_s4 = sshll.u32 %s7323_s30, 4  ;;  %s145_s4 = int_to_ptr.vmem [resolvable:$true] %s144_s4 }
  0x19   : > { %p7165_p3 = scmp.ne.s32.totalorder %s10816_s1, %s7164_s7  ;;  %p7171_p10 = scmp.lt.u32.totalorder %s7164_s7, %s10816_s1 }
  0x1a   : > { %p7166_p7 = pneg %p7432_p2 }
  0x1c   : > { %p7167_p8 = pnand %p7166_p7, %p7165_p3 }
  0x1e   : > { %p7168_p9 = pneg %p7167_p8 }
  0x20   : > { %p7173_p1 = pnand %p7171_p10, %p7168_p9 }
  0x22   : > { %7176 = shalt.err (!%p7173_p1)
}
  0x23   : > { %s7177_s17 = scalar_lea.vmem %s132_s28, 1152  ;;  %p7185_p11 = scmp.lt.s32.totalorder %s132_s28, %s132_s28 }
  0x24   : > { %p7178_p4 = scmp.ne.s32.totalorder %s132_s28, %s7177_s17  ;;  %p7186_p6 = scmp.lt.s32.totalorder %s7177_s17, %s7177_s17 }
  0x26   : > { %p7180_p0 = pnand %p7178_p4, %p7166_p7  ;;  %p7187_p13 = por %p7186_p6, %p7185_p11 }
  0x28   : > { %p7181_p12 = pneg %p7180_p0 }
  0x2a   : > { %p7188_p5 = pnand %p7187_p13, %p7181_p12 }
  0x2c   : > { %7191 = shalt.err (!%p7188_p5)
}
  0x2d   : > { %s10824_s19 = smov 64   ;;  %s7325_s20 = smov 4  }
  0x2e   : > { %6363 = dma.hbm_to_vmem [thread:$0]  (!%p7432_p2), %s10816_s1, 1152, %s132_s28, [#allocation6], %s10824_s19, %s10824_s19, %s7325_s20  }
  0x2f   : > { %p11043_p4 = scmp.ne.s32.totalorder %s11037_s22, 0  ;;  %p11044_p0 = scmp.lt.s32.totalorder %s7320_s15, 4 }
  0x30   : > { %s158_s6 = sand.u32 1, %s7316_s14   ;;  %s7192_s9 = scalar_lea.hbm %s10817_s2, 256 }
  0x31   : > { %p7465_p3 = pnand %p11044_p0, %p11043_p4  ;;  %p7193_p5 = scmp.ne.s32.totalorder %s10817_s2, %s7192_s9 }
  0x32   : > { %p7199_p12 = scmp.lt.u32.totalorder %s7192_s9, %s10817_s2 }
  0x33   : > { %s11045_s5 = scalar_select %p7465_p3, 1, 0 }
  0x34   : > { %p7195_p6 = pnand %p7193_p5, %p7166_p7 }
  0x36   : > { %p7196_p11 = pneg %p7195_p6 }
  0x38   : > { %p7201_p13 = pnand %p7199_p12, %p7196_p11 }
  0x3a   : > { %7204 = shalt.err (!%p7201_p13)
}
  0x3b   : > { %s7205_s17 = scalar_lea.vmem %s145_s4, 256  ;;  %p7213_p1 = scmp.lt.s32.totalorder %s145_s4, %s145_s4 }
  0x3c   : > { %p7206_p8 = scmp.ne.s32.totalorder %s145_s4, %s7205_s17  ;;  %p7214_p4 = scmp.lt.s32.totalorder %s7205_s17, %s7205_s17 }
  0x3e   : > { %p7208_p9 = pnand %p7206_p8, %p7166_p7  ;;  %p7215_p0 = por %p7214_p4, %p7213_p1 }
  0x40   : > { %p7209_p10 = pneg %p7208_p9 }
  0x42   : > { %p7216_p3 = pnand %p7215_p0, %p7209_p10 }
  0x44   : > { %7219 = shalt.err (!%p7216_p3)
}
  0x45   : > { %s7326_s20 = smov 128   ;;  %s7327_s27 = smov 8  }
  0x46   : > { %6366 = dma.hbm_to_vmem [thread:$0]  (!%p7432_p2), %s10817_s2, 256, %s145_s4, [#allocation6], %s7326_s20, %s7326_s20, %s7327_s27  }
  0x47   : > { %s5596_s8 = sshll.u32 %s158_s6, 7  ;;  %s6090_s9 = sshll.u32 %s7320_s15, 10 }
  0x48   : > { %s7494_s22 = scalar_lea.hbm %s10815_s0, %s6090_s9  ;;  %s162_s28 = scalar_lea.vmem [#allocation2], %s5596_s8 }
  0x49   : > { %s169_s17 = sshll.u32 %s162_s28, 4  ;;  %s7498_s29 = scalar_lea.sflag [#allocation3], %s158_s6  ;;  %s7496_s17 = int_to_ptr.vmem [resolvable:$true] %s169_s17 }
  0x4a   : > { %s7220_s19 = scalar_lea.hbm %s7494_s22, 2048  ;;  %p11046_p2 = scmp.ne.s32.totalorder %s11045_s5, 0 }
  0x4b   : > { %p7221_p7 = scmp.ne.s32.totalorder %s7494_s22, %s7220_s19  ;;  %s7225_s27 = scalar_lea.hbm %s10815_s0, 8192 }
  0x4c   : > { %p7222_p3 = pneg %p11046_p2  ;;  %p7226_p11 = scmp.lt.u32.totalorder %s7494_s22, %s10815_s0 }
  0x4d   : > { %p7227_p12 = scmp.lt.u32.totalorder %s7225_s27, %s7220_s19  ;;  %p7229_p8 = scmp.lt.u32.totalorder %s7220_s19, %s7494_s22 }
  0x4e   : > { %p7223_p5 = pnand %p7222_p3, %p7221_p7 }
  0x4f   : > { %p7228_p13 = por %p7227_p12, %p7226_p11 }
  0x50   : > { %p7224_p6 = pneg %p7223_p5 }
  0x51   : > { %p7230_p9 = por %p7229_p8, %p7228_p13 }
  0x53   : > { %p7231_p10 = pnand %p7230_p9, %p7224_p6 }
  0x55   : > { %7234 = shalt.err (!%p7231_p10)
}
  0x56   : > { %s7235_s6 = scalar_lea.vmem %s7496_s17, 2048  ;;  %s7328_s8 = smov [#allocation2]  }
  0x57   : > { %p7236_p1 = scmp.ne.s32.totalorder %s7496_s17, %s7235_s6  ;;  %s7240_s9 = sshll.u32 %s7328_s8, 4  ;;  %s7241_s9 = int_to_ptr.vmem [resolvable:$false] %s7240_s9 }
  0x58   : > { %s7242_s10 = scalar_lea.vmem %s7241_s9, 4096  ;;  %p7243_p7 = scmp.lt.s32.totalorder %s7496_s17, %s7241_s9 }
  0x59   : > { %p7238_p4 = pnand %p7236_p1, %p7222_p3  ;;  %p7244_p5 = scmp.lt.s32.totalorder %s7242_s10, %s7235_s6 }
  0x5b   : > { %p7239_p0 = pneg %p7238_p4  ;;  %p7245_p11 = por %p7244_p5, %p7243_p7 }
  0x5d   : > { %p7246_p12 = pnand %p7245_p11, %p7239_p0 }
  0x5f   : > { %7249 = shalt.err (!%p7246_p12)
}
  0x60   : > { %s7329_s19 = smov 4096   ;;  %s7330_s11 = smov 1024  }
  0x61   : > { %s11047_s28 = smov 64   ;;  %p11048_p3 = scmp.ne.s32.totalorder %s11041_s26, 0 }
  0x62   : > { %6370 = dma.hbm_to_vmem [thread:$0]  (!%p11046_p2), %s7494_s22, 2048, %s7496_s17, %s7498_s29, %s7329_s19, %s7330_s11, %s11047_s28  }
  0x63   : > { %181 = sbr.rel (%p11048_p3) target bundleno = 871 (0x367), region = 32 }
  0x6a   : > { %s7530_s4 = sand.u32 1, %s7312_s13   ;;  %p11049_p6 = scmp.ne.s32.totalorder %s11038_s23, 0 }
  0x6b   : > { %s5600_s20 = sshll.u32 %s7530_s4, 7  ;;  %s184_s27 = scalar_lea.sflag [#allocation3], %s7530_s4 }
  0x6c   : > { %s7534_s30 = scalar_lea.vmem [#allocation2], %s5600_s20 }
  0x6d   : > { %7295 = dma.done.wait (%p11049_p6), %s184_s27, 2048  }
  0x6e   : > { %7297 = vsyncadd (%p11049_p6), %s184_s27, 4294965248  ;;  %p11050_p2 = scmp.eq.s32.totalorder %s7385_s16, 0 }
  0x70   : > { %7299 = dma.done.wait (%p11050_p2), [#allocation6], 1408   ;;  %p11051_p13 = pmov %p11050_p2 }
  0x71   : > { %v222_v0 = vld [vmem:[%s7534_s30 + $0x8] sm:$0xff]  ;;  %v221_v2 = vld [vmem:[%s7534_s30] sm:$0xff]  ;;  %v223_v12 = vld [vmem:[%s7534_s30 + $0x10] sm:$0xff]  ;;  %s7331_s23 = smov 32   ;;  %v10827_v62 = vmov 0   ;;  %s7333_s26 = smov 33  }
  0x72   : > { %7301 = vsyncadd (%p11051_p13), [#allocation6], 4294965888  ;;  %v230_v1 = vld [vmem:[%s7534_s30 + $0x48] sm:$0xff]  ;;  %v239_v3 = vunpack.c.l.bf16 %v222_v0  ;;  %v229_v5 = vld [vmem:[%s7534_s30 + $0x40] sm:$0xff]  ;;  %v237_v6 = vunpack.c.l.bf16 %v221_v2  ;;  %v240_v7 = vunpack.c.h.bf16 %v222_v0  ;;  %v238_v10 = vunpack.c.h.bf16 %v221_v2  ;;  %814 = vmatprep.mubr.bf16.mxu0 %v10827_v62  ;;  %857 = vmatprep.mubr.bf16.mxu1 %v10827_v62  ;;  %s7334_s5 = smov 31   ;;  %s7335_s22 = smov 1  }
  0x73   : > { %v255_v4 = vunpack.c.l.bf16 %v230_v1  ;;  %v253_v8 = vunpack.c.l.bf16 %v229_v5  ;;  %v256_v9 = vunpack.c.h.bf16 %v230_v1  ;;  %v254_v11 = vunpack.c.h.bf16 %v229_v5  ;;  %v231_v13 = vld [vmem:[%s7534_s30 + $0x50] sm:$0xff]  ;;  %v7553_v15 = vld [vmem:[%s7534_s30 + $0x38] sm:$0xff]  ;;  %v225_v26 = vld [vmem:[%s7534_s30 + $0x20] sm:$0xff]  ;;  %7073 = vset.pattern.permute.xlu0 %v10827_v62  ;;  %7074 = vset.pattern.permute.xlu1 %v10827_v62  ;;  %s7336_s17 = smov 127   ;;  %s7337_s29 = smov 97  }
  0x74   : > { %v7556_v16 = vld [vmem:[%s7534_s30 + $0x78] sm:$0xff]  ;;  %v241_v20 = vunpack.c.l.bf16 %v223_v12  ;;  %v257_v21 = vunpack.c.l.bf16 %v231_v13  ;;  %v252_v24 = vunpack.c.h.bf16 %v7553_v15  ;;  %v233_v27 = vld [vmem:[%s7534_s30 + $0x60] sm:$0xff]  ;;  %v242_v32 = vunpack.c.h.bf16 %v223_v12  ;;  %v226_v40 = vld [vmem:[%s7534_s30 + $0x28] sm:$0xff]  ;;  %s7338_s7 = smov 96   ;;  %s7339_s6 = smov 95  }
  0x75   : > { %v7550_v14 = vpack.i.bf16 %v255_v4, %v239_v3  ;;  %v7558_v17 = vpack.i.bf16 %v253_v8, %v237_v6  ;;  %v224_v18 = vld [vmem:[%s7534_s30 + $0x18] sm:$0xff]  ;;  %v7563_v19 = vpack.i.bf16 %v256_v9, %v240_v7  ;;  %v7568_v23 = vpack.i.bf16 %v254_v11, %v238_v10  ;;  %v234_v41 = vld [vmem:[%s7534_s30 + $0x68] sm:$0xff]  ;;  %v227_v48 = vld [vmem:[%s7534_s30 + $0x30] sm:$0xff]  ;;  %s5603_s8 = sshll.u32 %s7530_s4, 8  ;;  %s6091_s10 = sshll.u32 %s7385_s16, 11 }
  0x76   : > { %v232_v22 = vld [vmem:[%s7534_s30 + $0x58] sm:$0xff]  ;;  %v268_v25 = vunpack.c.h.bf16 %v7556_v16  ;;  %v7576_v28 = vpack.i.bf16 %v257_v21, %v241_v20  ;;  %v243_v29 = vunpack.c.l.bf16 %v224_v18  ;;  %v258_v33 = vunpack.c.h.bf16 %v231_v13  ;;  %v235_v49 = vld [vmem:[%s7534_s30 + $0x70] sm:$0xff]  ;;  %s10714_s9 = scalar_lea.vmem [#allocation8], %s5603_s8  ;;  %s10766_s20 = scalar_lea.hbm %s10818_s3, %s6091_s10 }
  0x77   : > { %11052 = vst [vmem:[#allocation12_spill] sm:$0xff] %v7550_v14  ;;  %11053 = vst [vmem:[#allocation13_spill] sm:$0xff] %v7558_v17  ;;  %6444 = vrot.lane.b32.xlu1 %v7550_v14, %s7331_s23  ;;  %6434 = vrot.lane.b32.xlu0 %v7558_v17, %s7331_s23  ;;  %v259_v30 = vunpack.c.l.bf16 %v232_v22  ;;  %v245_v35 = vunpack.c.l.bf16 %v225_v26  ;;  %v261_v36 = vunpack.c.l.bf16 %v233_v27  ;;  %v244_v38 = vunpack.c.h.bf16 %v224_v18  ;;  %s5499_s19 = sshll.u32 %s10714_s9, 4  ;;  %s5486_s16 = scalar_lea.sflag [#allocation4], %s7530_s4  ;;  %s10769_s19 = int_to_ptr.vmem [resolvable:$true] %s5499_s19 }
  0x78   : > { %11054 = vst [vmem:[#allocation14_spill] sm:$0xff] %v7563_v19  ;;  %11055 = vst [vmem:[#allocation15_spill] sm:$0xff] %v7568_v23  ;;  %v7580_v31 = vpack.i.bf16 %v268_v25, %v252_v24  ;;  %v7588_v37 = vpack.i.bf16 %v258_v33, %v242_v32  ;;  %v260_v39 = vunpack.c.h.bf16 %v232_v22  ;;  %v247_v43 = vunpack.c.l.bf16 %v226_v40  ;;  %s7250_s27 = scalar_lea.vmem %s10769_s19, 4096  ;;  %p11782_p9 = scmp.ne.s32.totalorder %s11039_s24, 0 }
  0x79   : > { %v7584_v34 = vpack.i.bf16 %v259_v30, %v243_v29  ;;  %v7594_v42 = vpack.i.bf16 %v261_v36, %v245_v35  ;;  %v263_v44 = vunpack.c.l.bf16 %v234_v41  ;;  %v246_v46 = vunpack.c.h.bf16 %v225_v26  ;;  %p7251_p8 = scmp.ne.s32.totalorder %s10769_s19, %s7250_s27 }
  0x7a   : > { %v7598_v45 = vpack.i.bf16 %v260_v39, %v244_v38  ;;  %v262_v47 = vunpack.c.h.bf16 %v233_v27  ;;  %v249_v51 = vunpack.c.l.bf16 %v227_v48  ;;  %v265_v52 = vunpack.c.l.bf16 %v235_v49 }
  0x7b   : > { %6449 = vrot.lane.b32.xlu1 %v7563_v19, %s7331_s23  ;;  %6439 = vrot.lane.b32.xlu0 %v7568_v23, %s7331_s23  ;;  %11056 = vst [vmem:[#allocation16_spill] sm:$0xff] %v7594_v42  ;;  %v7604_v50 = vpack.i.bf16 %v263_v44, %v247_v43  ;;  %v248_v54 = vunpack.c.h.bf16 %v226_v40  ;;  %v264_v55 = vunpack.c.h.bf16 %v234_v41  ;;  %v251_v57 = vunpack.c.l.bf16 %v7553_v15  ;;  %p7252_p10 = pnand %p7251_p8, %p11782_p9 }
  0x7c   : > { %11057 = vst [vmem:[#allocation17_spill] sm:$0xff] %v7598_v45  ;;  %v7608_v53 = vpack.i.bf16 %v262_v47, %v246_v46  ;;  %v7612_v56 = vpack.i.bf16 %v265_v52, %v249_v51  ;;  %v267_v58 = vunpack.c.l.bf16 %v7556_v16  ;;  %v250_v60 = vunpack.c.h.bf16 %v227_v48 }
  0x7d   : > { %11058 = vst [vmem:[#allocation18_spill] sm:$0xff] %v7604_v50  ;;  %v7618_v59 = vpack.i.bf16 %v264_v55, %v248_v54  ;;  %v266_v61 = vunpack.c.h.bf16 %v235_v49  ;;  %v269_v1 = vlaneseq  ;;  %vm10874_vm5 = vcmask 130048   ;;  %p7253_p1 = pneg %p7252_p10 }
  0x7e   : > { %11059 = vst [vmem:[#allocation19_spill] sm:$0xff] %v7612_v56  ;;  %v7626_v63 = vpack.i.bf16 %v267_v58, %v251_v57 }
  0x7f   : > { %6459 = vrot.lane.b32.xlu1 %v7576_v28, %s7331_s23  ;;  %6454 = vrot.lane.b32.xlu0 %v7580_v31, %s7331_s23  ;;  %v7630_v0 = vpack.i.bf16 %v266_v61, %v250_v60  ;;  %v7672_v2 = vand.u32 127, %v269_v1 }
  0x80   : > { %11060 = vst [vmem:[#allocation20_spill] sm:$0xff] %v7626_v63 }
  0x81   : > { %v7679_v3 = vadd.s32 384, %v7672_v2  ;;  %v7682_v4 = vadd.s32 128, %v7672_v2  ;;  %v7687_v5 = vadd.s32 256, %v7672_v2  ;;  %v7694_v8 = vadd.s32 640, %v7672_v2 }
  0x82   : > { %v302_v10 = vshra.s32 %v7672_v2, 5  ;;  %v7701_v11 = vadd.s32 512, %v7672_v2  ;;  %vm657_vm0 = vcmp.lt.s32.totalorder %v7672_v2, 32  ;;  %v7707_v12 = vadd.s32 896, %v7672_v2 }
  0x83   : > { %6469 = vrot.lane.b32.xlu1 %v7584_v34, %s7331_s23  ;;  %6464 = vrot.lane.b32.xlu0 %v7588_v37, %s7331_s23  ;;  %v305_v6 = vshra.s32 %v7679_v3, 5  ;;  %v303_v7 = vshra.s32 %v7682_v4, 5  ;;  %v304_v9 = vshra.s32 %v7687_v5, 5  ;;  %v7710_v13 = vadd.s32 768, %v7672_v2 }
  0x84   : > { %v307_v16 = vshra.s32 %v7694_v8, 5  ;;  %v7716_v18 = vadd.s32 1152, %v7672_v2  ;;  %v7724_v22 = vand.u32 31, %v302_v10  ;;  %v306_v24 = vshra.s32 %v7701_v11, 5 }
  0x85   : > { %v7712_v15 = vand.u32 31, %v305_v6  ;;  %v7720_v20 = vand.u32 31, %v303_v7  ;;  %v7722_v21 = vand.u32 31, %v304_v9  ;;  %v7730_v25 = vadd.s32 1024, %v7672_v2 }
  0x86   : > { %v309_v27 = vshra.s32 %v7707_v12, 5  ;;  %v308_v29 = vshra.s32 %v7710_v13, 5  ;;  %v7737_v32 = vand.u32 31, %v307_v16  ;;  %v311_v33 = vshra.s32 %v7716_v18, 5 }
  0x87   : > { %6479 = vrot.lane.b32.xlu1 %v7594_v42, %s7331_s23  ;;  %6474 = vrot.lane.b32.xlu0 %v7598_v45, %s7331_s23  ;;  %11061 = vst [vmem:[#allocation21_spill] sm:$0xff] %v7720_v20  ;;  %11062 = vst [vmem:[#allocation22_spill] sm:$0xff] %v7722_v21  ;;  %vm10861_vm1 = vcmp.ne.s32.totalorder %v7712_v15, 0  ;;  %v7741_v35 = vadd.s32 1408, %v7672_v2  ;;  %vm10859_vm2 = vcmp.ne.s32.totalorder %v7720_v20, 0  ;;  %vm10849_vm3 = vcmp.ne.s32.totalorder %v7722_v21, 0 }
  0x88   : > { %11063 = vst [vmem:[#allocation23_spill] sm:$0xff] %v7730_v25  ;;  %11064 = vst [vmem:[#allocation24_spill] sm:$0xff] %v7737_v32  ;;  %vm10847_vm4 = vcmp.ne.s32.totalorder %v7724_v22, 0  ;;  %v7748_v36 = vand.u32 31, %v306_v24  ;;  %v310_v40 = vshra.s32 %v7730_v25, 5  ;;  %v7754_v41 = vadd.s32 1280, %v7672_v2 }
  0x89   : > { %11065 = vst [vmem:[#allocation25_spill] sm:$0xff] %v7741_v35  ;;  %v7758_v44 = vand.u32 31, %v309_v27  ;;  %v7760_v46 = vand.u32 31, %v308_v29  ;;  %vm10846_vm6 = vcmp.ne.s32.totalorder %v7737_v32, 0  ;;  %v7765_v51 = vand.u32 31, %v311_v33  ;;  %vm7784_vm8 = vmpackc.low %vm10861_vm1, %vm10861_vm1 }
  0x8a   : > { %11066 = vst [vmem:[#allocation26_spill] sm:$0xff] %v7748_v36  ;;  %v313_v52 = vshra.s32 %v7741_v35, 5  ;;  %vm10841_vm7 = vcmp.ne.s32.totalorder %v7748_v36, 0  ;;  %v7788_v6 = vand.u32 31, %v310_v40  ;;  %v312_v7 = vshra.s32 %v7754_v41, 5  ;;  %vm7798_vm9 = vmpackc.low %vm10859_vm2, %vm10859_vm2 }
  0x8b   : > { %6489 = vrot.lane.b32.xlu1 %v7604_v50, %s7331_s23  ;;  %6484 = vrot.lane.b32.xlu0 %v7608_v53, %s7331_s23  ;;  %11067 = vst [vmem:[#allocation27_spill] sm:$0xff] %v7758_v44  ;;  %11068 = vst [vmem:[#allocation28_spill] sm:$0xff] %v7760_v46  ;;  %vm10845_vm11 = vcmp.ne.s32.totalorder %v7758_v44, 0  ;;  %vm10842_vm12 = vcmp.ne.s32.totalorder %v7760_v46, 0  ;;  %vm10848_vm14 = vcmp.ne.s32.totalorder %v7765_v51, 0 }
  0x8c   : > { %11069 = vst [vmem:[#allocation29_spill] sm:$0xff] %v7765_v51  ;;  %11072 = vst [vmem:[#allocation30_spill] sm:$0xff] %v7788_v6  ;;  %v7838_v1 = vand.u32 31, %v313_v52  ;;  %vm10851_vm15 = vcmp.ne.s32.totalorder %v7788_v6, 0 }
  0x8d   : > { %vm7811_vm10 = vmpackc.low %vm10849_vm3, %vm10849_vm3 }
  0x8e   : > { %11080 = vst [vmem:[#allocation34_spill] sm:$0xff] %v7838_v1  ;;  %vm7853_vm13 = vmpackc.low %vm10847_vm4, %vm10847_vm4 }
  0x8f   : > { %6499 = vrot.lane.b32.xlu1 %v7612_v56, %s7331_s23  ;;  %6494 = vrot.lane.b32.xlu0 %v7618_v59, %s7331_s23  ;;  %vm7979_vm4 = vmpackc.low %vm10851_vm15, %vm10851_vm15 }
  0x93   : > { %6509 = vrot.lane.b32.xlu1 %v7626_v63, %s7331_s23  ;;  %6504 = vrot.lane.b32.xlu0 %v7630_v0, %s7331_s23 }
  0x97   : > { %6519 = vrot.lane.b32.xlu1 %v7568_v23, %s7333_s26  ;;  %6514 = vrot.lane.b32.xlu0 %v7558_v17, %s7333_s26 }
  0x9b   : > { %6529 = vrot.lane.b32.xlu1 %v7563_v19, %s7333_s26  ;;  %6524 = vrot.lane.b32.xlu0 %v7550_v14, %s7333_s26 }
  0x9f   : > { %6539 = vrot.lane.b32.xlu1 %v7576_v28, %s7333_s26  ;;  %6534 = vrot.lane.b32.xlu0 %v7580_v31, %s7333_s26 }
  0xa3   : > { %6549 = vrot.lane.b32.xlu1 %v7584_v34, %s7333_s26  ;;  %6544 = vrot.lane.b32.xlu0 %v7588_v37, %s7333_s26 }
  0xa7   : > { %6559 = vrot.lane.b32.xlu1 %v7594_v42, %s7333_s26  ;;  %6554 = vrot.lane.b32.xlu0 %v7598_v45, %s7333_s26 }
  0xab   : > { %6569 = vrot.lane.b32.xlu1 %v7604_v50, %s7333_s26  ;;  %6564 = vrot.lane.b32.xlu0 %v7608_v53, %s7333_s26 }
  0xaf   : > { %6579 = vrot.lane.b32.xlu1 %v7612_v56, %s7333_s26  ;;  %6574 = vrot.lane.b32.xlu0 %v7618_v59, %s7333_s26 }
  0xb3   : > { %6589 = vrot.lane.b32.xlu1 %v7626_v63, %s7333_s26  ;;  %6584 = vrot.lane.b32.xlu0 %v7630_v0, %s7333_s26 }
  0xb7   : > { %6599 = vrot.lane.b32.xlu1 %v7568_v23, %s7334_s5  ;;  %6594 = vrot.lane.b32.xlu0 %v7558_v17, %s7334_s5 }
  0xbb   : > { %6609 = vrot.lane.b32.xlu1 %v7563_v19, %s7334_s5  ;;  %6604 = vrot.lane.b32.xlu0 %v7550_v14, %s7334_s5 }
  0xbf   : > { %6619 = vrot.lane.b32.xlu1 %v7576_v28, %s7334_s5  ;;  %6614 = vrot.lane.b32.xlu0 %v7580_v31, %s7334_s5 }
  0xc3   : > { %6629 = vrot.lane.b32.xlu1 %v7584_v34, %s7334_s5  ;;  %6624 = vrot.lane.b32.xlu0 %v7588_v37, %s7334_s5 }
  0xc7   : > { %6639 = vrot.lane.b32.xlu1 %v7594_v42, %s7334_s5  ;;  %6634 = vrot.lane.b32.xlu0 %v7598_v45, %s7334_s5 }
  0xcb   : > { %6649 = vrot.lane.b32.xlu1 %v7604_v50, %s7334_s5  ;;  %6644 = vrot.lane.b32.xlu0 %v7608_v53, %s7334_s5 }
  0xcf   : > { %6659 = vrot.lane.b32.xlu1 %v7612_v56, %s7334_s5  ;;  %6654 = vrot.lane.b32.xlu0 %v7618_v59, %s7334_s5 }
  0xd3   : > { %6669 = vrot.lane.b32.xlu1 %v7626_v63, %s7334_s5  ;;  %6664 = vrot.lane.b32.xlu0 %v7630_v0, %s7334_s5 }
  0xd7   : > { %6679 = vrot.lane.b32.xlu1 %v7568_v23, %s7335_s22  ;;  %6674 = vrot.lane.b32.xlu0 %v7558_v17, %s7335_s22 }
  0xdb   : > { %6689 = vrot.lane.b32.xlu1 %v7563_v19, %s7335_s22  ;;  %6684 = vrot.lane.b32.xlu0 %v7550_v14, %s7335_s22 }
  0xdf   : > { %6699 = vrot.lane.b32.xlu1 %v7576_v28, %s7335_s22  ;;  %6694 = vrot.lane.b32.xlu0 %v7580_v31, %s7335_s22 }
  0xe3   : > { %6709 = vrot.lane.b32.xlu1 %v7584_v34, %s7335_s22  ;;  %6704 = vrot.lane.b32.xlu0 %v7588_v37, %s7335_s22 }
  0xe7   : > { %6719 = vrot.lane.b32.xlu1 %v7594_v42, %s7335_s22  ;;  %6714 = vrot.lane.b32.xlu0 %v7598_v45, %s7335_s22 }
  0xe9   : > { %v6445_v26 = vpop.permute.xlu1 %6444  ;;  %v7734_v30 = vpop.permute.xlu0 %6434 }
  0xea   : > { %v6447_v38 = vunpack.i.h.bf16 %v6445_v26  ;;  %v6446_v39 = vunpack.i.l.bf16 %v6445_v26  ;;  %v6437_v54 = vunpack.i.h.bf16 %v7734_v30  ;;  %v6436_v55 = vunpack.i.l.bf16 %v7734_v30 }
  0xeb   : > { %6729 = vrot.lane.b32.xlu1 %v7604_v50, %s7335_s22  ;;  %6724 = vrot.lane.b32.xlu0 %v7608_v53, %s7335_s22  ;;  %v7857_v26 = vand.u32 31, %v312_v7 }
  0xed   : > { %v7756_v43 = vpop.permute.xlu1 %6449  ;;  %v6440_v49 = vpop.permute.xlu0 %6439  ;;  %11083 = vst [vmem:[#allocation35_spill] sm:$0xff] %v7857_v26 }
  0xee   : > { %v6452_v47 = vunpack.i.h.bf16 %v7756_v43  ;;  %v6451_v48 = vunpack.i.l.bf16 %v7756_v43  ;;  %v6442_v57 = vunpack.i.h.bf16 %v6440_v49  ;;  %v6441_v58 = vunpack.i.l.bf16 %v6440_v49 }
  0xef   : > { %6739 = vrot.lane.b32.xlu1 %v7612_v56, %s7335_s22  ;;  %6734 = vrot.lane.b32.xlu0 %v7618_v59, %s7335_s22  ;;  %v7817_v49 = vadd.s32 1664, %v7672_v2 }
  0xf0   : > { %v682_v60 = vsel %vm657_vm0, %v6446_v39, %v6451_v48  ;;  %v683_v61 = vsel %vm657_vm0, %v6447_v38, %v6452_v47  ;;  %v686_v16 = vsel %vm657_vm0, %v6436_v55, %v6441_v58  ;;  %v687_v24 = vsel %vm657_vm0, %v6437_v54, %v6442_v57 }
  0xf1   : > { %v6460_v9 = vpop.permute.xlu1 %6459  ;;  %v5613_v10 = vpack.c.bf16 %v683_v61, %v682_v60  ;;  %v684_v27 = vsel %vm657_vm0, %v6441_v58, %v6446_v39  ;;  %v7804_v29 = vpop.permute.xlu0 %6454  ;;  %v5606_v30 = vpack.c.bf16 %v687_v24, %v686_v16  ;;  %v685_v33 = vsel %vm657_vm0, %v6442_v57, %v6447_v38  ;;  %11077 = vst [vmem:[#allocation31_spill] sm:$0xff] %v7817_v49  ;;  %v7836_v24 = vld [vmem:[#allocation5 + $0x8] sm:$0xff]  }
  0xf2   : > { %v7820_v39 = vadd.s32 1920, %v7672_v2  ;;  %v10825_v58 = vunpack.i.h.bf16 %v7804_v29  ;;  %v10826_v60 = vunpack.i.l.bf16 %v7804_v29  ;;  %v5616_v38 = vpack.c.bf16 %v685_v33, %v684_v27 }
  0xf3   : > { %5614 = vmatprep.subr.msk.bf16.mxu1 %vm7784_vm8, %v5613_v10  ;;  %6749 = vrot.lane.b32.xlu1 %v7626_v63, %s7335_s22  ;;  %v7830_v57 = vadd.s32 1536, %v7672_v2  ;;  %v6462_v61 = vunpack.i.h.bf16 %v6460_v9  ;;  %v6461_v16 = vunpack.i.l.bf16 %v6460_v9  ;;  %vm7886_vm8 = vmpackc.low %vm10846_vm6, %vm10846_vm6 }
  0xf4   : > { %11078 = vst [vmem:[#allocation32_spill] sm:$0xff] %v7820_v39  ;;  %6744 = vrot.lane.b32.xlu0 %v7630_v0, %s7335_s22  ;;  %5607 = vmatprep.subr.msk.bf16.mxu0 %vm7798_vm9, %v5606_v30  ;;  %v688_v27 = vsel %vm657_vm0, %v10826_v60, %v6436_v55  ;;  %v689_v9 = vsel %vm657_vm0, %v10825_v58, %v6437_v54  ;;  %v7860_v30 = vadd.s32 1792, %v7672_v2  ;;  %v315_v55 = vshra.s32 %v7817_v49, 5 }
  0xf5   : > { %11079 = vst [vmem:[#allocation33_spill] sm:$0xff] %v7830_v57  ;;  %5617 = vmatpush1.bf16.msk.msra.mxu1 %vm7811_vm10, %v5616_v38  ;;  %v6470_v10 = vpop.permute.xlu1 %6469  ;;  %v6465_v33 = vpop.permute.xlu0 %6464  ;;  %v5609_v40 = vpack.c.bf16 %v689_v9, %v688_v27  ;;  %v317_v54 = vshra.s32 %v7820_v39, 5  ;;  %v314_v7 = vshra.s32 %v7830_v57, 5  ;;  %v680_v60 = vsel %vm657_vm0, %v6451_v48, %v6461_v16  ;;  %vm7897_vm10 = vmpackc.low %vm10841_vm7, %vm10841_vm7 }
  0xf6   : > { %11084 = vst [vmem:[#allocation36_spill] sm:$0xff] %v7860_v30  ;;  %v6467_v38 = vunpack.i.h.bf16 %v6465_v33  ;;  %v6466_v58 = vunpack.i.l.bf16 %v6465_v33  ;;  %v681_v27 = vsel %vm657_vm0, %v6452_v47, %v6462_v61  ;;  %v6472_v9 = vunpack.i.h.bf16 %v6470_v10  ;;  %vm7930_vm7 = vmpackc.low %vm10845_vm11, %vm10845_vm11 }
  0xf7   : > { %6759 = vrot.lane.b32.xlu1 %v7550_v14, %s7336_s17  ;;  %v6471_v62 = vunpack.i.l.bf16 %v6470_v10  ;;  %5610 = vmatpush1.bf16.msk.msra.mxu0 %vm7853_vm13, %v5609_v40  ;;  %v11087_v47 = vmov 0   ;;  %vm10871_vm9 = vcmp.ne.s32.totalorder %v7838_v1, 0  ;;  %v316_v10 = vshra.s32 %v7860_v30, 5  ;;  %vm7970_vm11 = vmpackc.low %vm10848_vm14, %vm10848_vm14 }
  0xf8   : > { %5618 = vmatmul.mubr.msk.bf16.vlgmr.msra.gmra.mrb[0].mxu1 %vm10874_vm5, %v7836_v24  ;;  %v679_v33 = vsel %vm657_vm0, %v6462_v61, %v6467_v38  ;;  %v678_v63 = vsel %vm657_vm0, %v6461_v16, %v6466_v58  ;;  %vm10856_vm13 = vcmp.ne.s32.totalorder %v7857_v26, 0  ;;  %v7902_v57 = vand.u32 31, %v315_v55  ;;  %6754 = vrot.lane.b32.xlu0 %v7568_v23, %s7336_s17  ;;  %vm8009_vm15 = vmpackc.low %vm10871_vm9, %vm10871_vm9 }
  0xf9   : > { %v6480_v48 = vpop.permute.xlu1 %6479  ;;  %943 = vmatprep.mubr.bf16.mxu1 %v11087_v47  ;;  %v6475_v61 = vpop.permute.xlu0 %6474  ;;  %v5620_v40 = vpack.c.bf16 %v679_v33, %v678_v63  ;;  %v7904_v39 = vand.u32 31, %v317_v54  ;;  %v5623_v30 = vpack.c.bf16 %v681_v27, %v680_v60  ;;  %v7912_v63 = vand.u32 31, %v314_v7 }
  0xfa   : > { %11090 = vst [vmem:[#allocation37_spill] sm:$0xff] %v7902_v57  ;;  %v6477_v52 = vunpack.i.h.bf16 %v6475_v61  ;;  %v6476_v49 = vunpack.i.l.bf16 %v6475_v61  ;;  %5611 = vmatmul.mubr.msk.bf16.vlgmr.msra.gmra.mrb[0].mxu0 %vm10874_vm5, %v7836_v24  ;;  %v677_v55 = vsel %vm657_vm0, %v6467_v38, %v6472_v9  ;;  %v676_v54 = vsel %vm657_vm0, %v6466_v58, %v6471_v62 }
  0xfb   : > { %11091 = vst [vmem:[#allocation38_spill] sm:$0xff] %v7904_v39  ;;  %6769 = vrot.lane.b32.xlu1 %v7576_v28, %s7336_s17  ;;  %11092 = vst [vmem:[#allocation39_spill] sm:$0xff] %v7912_v63  ;;  %v6482_v33 = vunpack.i.h.bf16 %v6480_v48  ;;  %v6481_v56 = vunpack.i.l.bf16 %v6480_v48  ;;  %5621 = vmatprep.subr.msk.bf16.mxu0 %vm7886_vm8, %v5620_v40  ;;  %v7934_v27 = vand.u32 31, %v316_v10  ;;  %v10850_v10 = vand.u32 31, %v7679_v3 }
  0xfc   : > { %900 = vmatprep.mubr.bf16.mxu0 %v11087_v47  ;;  %v675_v60 = vsel %vm657_vm0, %v6472_v9, %v6477_v52  ;;  %v674_v7 = vsel %vm657_vm0, %v6471_v62, %v6476_v49  ;;  %5624 = vmatpush1.bf16.msk.msra.mxu0 %vm7897_vm10, %v5623_v30  ;;  %vm7939_vm8 = vmpackc.low %vm10842_vm12, %vm10842_vm12  ;;  %v11098_v30 = vand.u32 31, %v7682_v4  ;;  %v11099_v9 = vmov 0 }
  0xfd   : > { %v6490_v38 = vpop.permute.xlu1 %6489  ;;  %11095 = vst [vmem:[#allocation40_spill] sm:$0xff] %v7934_v27  ;;  %v6485_v48 = vpop.permute.xlu0 %6484  ;;  %v5627_v43 = vpack.c.bf16 %v675_v60, %v674_v7  ;;  %6764 = vrot.lane.b32.xlu0 %v7563_v19, %s7336_s17  ;;  %v5630_v61 = vpack.c.bf16 %v677_v55, %v676_v54  ;;  %vm10864_vm12 = vcmp.ne.s32.totalorder %v7902_v57, 0  ;;  %v673_v60 = vsel %vm657_vm0, %v6477_v52, %v6482_v33 }
  0xfe   : > { %vm7945_vm10 = vcmp.ne.s32.totalorder %v11098_v30, 0  ;;  %v6487_v40 = vunpack.i.h.bf16 %v6485_v48  ;;  %v6486_v16 = vunpack.i.l.bf16 %v6485_v48  ;;  %v672_v7 = vsel %vm657_vm0, %v6476_v49, %v6481_v56 }
  0xff   : > { %v11100_v9 = vsel %vm7945_vm10, 4294967295, %v11099_v9  ;;  %6779 = vrot.lane.b32.xlu1 %v7588_v37, %s7336_s17  ;;  %v6492_v30 = vunpack.i.h.bf16 %v6490_v38  ;;  %v6491_v23 = vunpack.i.l.bf16 %v6490_v38  ;;  %5628 = vmatprep.subr.msk.bf16.mxu1 %vm7930_vm7, %v5627_v43  ;;  %vm10863_vm6 = vcmp.ne.s32.totalorder %v7904_v39, 0 }
 0x100   : > { %11101 = vst [vmem:[#allocation41_spill] sm:$0xff] %v11100_v9  ;;  %v671_v55 = vsel %vm657_vm0, %v6482_v33, %v6487_v40  ;;  %v670_v54 = vsel %vm657_vm0, %v6481_v56, %v6486_v16  ;;  %5631 = vmatpush1.bf16.msk.msra.mxu1 %vm7939_vm8, %v5630_v61  ;;  %vm10862_vm7 = vcmp.ne.s32.totalorder %v7912_v63, 0  ;;  %vm10875_vm8 = vcmp.lt.s32.totalorder %v7672_v2, 33 }
 0x101   : > { %v6500_v48 = vpop.permute.xlu1 %6499  ;;  %v6495_v52 = vpop.permute.xlu0 %6494  ;;  %v5634_v33 = vpack.c.bf16 %v671_v55, %v670_v54  ;;  %vm10860_vm14 = vcmp.ne.s32.totalorder %v7934_v27, 0  ;;  %vm7987_vm3 = vcmp.ne.s32.totalorder %v10850_v10, 0  ;;  %v11106_v38 = vmov 0  ;;  %6774 = vrot.lane.b32.xlu0 %v7558_v17, %s7336_s17 }
 0x102   : > { %v11107_v38 = vsel %vm7987_vm3, 4294967295, %v11106_v38  ;;  %v5637_v43 = vpack.c.bf16 %v673_v60, %v672_v7  ;;  %v6497_v62 = vunpack.i.h.bf16 %v6495_v52  ;;  %v6496_v61 = vunpack.i.l.bf16 %v6495_v52  ;;  %5625 = vmatmul.mubr.msk.bf16.vlgmr.msra.gmra.mrb[4].mxu0 %vm10874_vm5, %v7836_v24 }
 0x103   : > { %11108 = vst [vmem:[#allocation42_spill] sm:$0xff] %v11107_v38  ;;  %6789 = vrot.lane.b32.xlu1 %v7598_v45, %s7336_s17  ;;  %v669_v55 = vsel %vm657_vm0, %v6487_v40, %v6492_v30  ;;  %v668_v54 = vsel %vm657_vm0, %v6486_v16, %v6491_v23  ;;  %v6502_v10 = vunpack.i.h.bf16 %v6500_v48  ;;  %v6501_v58 = vunpack.i.l.bf16 %v6500_v48  ;;  %5632 = vmatmul.mubr.msk.bf16.vlgmr.msra.gmra.mrb[4].mxu1 %vm10874_vm5, %v7836_v24 }
 0x104   : > { %5635 = vmatprep.subr.msk.bf16.mxu0 %vm7970_vm11, %v5634_v33  ;;  %v667_v40 = vsel %vm657_vm0, %v6492_v30, %v6497_v62  ;;  %v666_v16 = vsel %vm657_vm0, %v6491_v23, %v6496_v61  ;;  %vm8022_vm11 = vmpackc.low %vm10856_vm13, %vm10856_vm13  ;;  %986 = vmatprep.mubr.bf16.mxu0 %v11087_v47  ;;  %v5644_v56 = vpack.c.bf16 %v669_v55, %v668_v54  ;;  %v11117_v54 = vunpack.i.l.bf16 %v7804_v29 }
 0x105   : > { %5638 = vmatpush1.bf16.msk.msra.mxu0 %vm7979_vm4, %v5637_v43  ;;  %v6510_v7 = vpop.permute.xlu1 %6509  ;;  %v6505_v17 = vpop.permute.xlu0 %6504  ;;  %v5641_v30 = vpack.c.bf16 %v667_v40, %v666_v16  ;;  %1029 = vmatprep.mubr.bf16.mxu1 %v11087_v47  ;;  %vm8033_vm4 = vmand %vm10859_vm2, %vm7945_vm10  ;;  %v665_v55 = vsel %vm657_vm0, %v6497_v62, %v6502_v10  ;;  %v11118_v49 = vunpack.i.h.bf16 %v7804_v29 }
 0x106   : > { %v6512_v52 = vunpack.i.h.bf16 %v6510_v7  ;;  %v6511_v33 = vunpack.i.l.bf16 %v6510_v7  ;;  %v6507_v43 = vunpack.i.h.bf16 %v6505_v17  ;;  %v6506_v19 = vunpack.i.l.bf16 %v6505_v17  ;;  %vm8040_vm13 = vmpackc.low %vm10864_vm12, %vm10864_vm12  ;;  %6784 = vrot.lane.b32.xlu0 %v7584_v34, %s7336_s17 }
 0x107   : > { %6799 = vrot.lane.b32.xlu1 %v7608_v53, %s7336_s17  ;;  %v664_v17 = vsel %vm657_vm0, %v6496_v61, %v6501_v58  ;;  %5642 = vmatprep.subr.msk.bf16.mxu1 %vm8009_vm15, %v5641_v30  ;;  %vm8066_vm2 = vmpackc.low %vm10863_vm6, %vm10863_vm6  ;;  %vm11142_vm6 = vcmp.ne.s32.totalorder %v7724_v22, 0 }
 0x108   : > { %v658_v7 = vsel %vm657_vm0, %v6511_v33, %v11117_v54  ;;  %v659_v9 = vsel %vm657_vm0, %v6512_v52, %v11118_v49  ;;  %v661_v61 = vsel %vm657_vm0, %v6507_v43, %v6512_v52  ;;  %v663_v54 = vsel %vm657_vm0, %v6502_v10, %v6507_v43  ;;  %5645 = vmatpush1.bf16.msk.msra.mxu1 %vm8022_vm11, %v5644_v56  ;;  %vm8083_vm15 = vmpackc.low %vm10862_vm7, %vm10862_vm7 }
 0x109   : > { %v660_v29 = vsel %vm657_vm0, %v6506_v19, %v6511_v33  ;;  %v662_v60 = vsel %vm657_vm0, %v6501_v58, %v6506_v19  ;;  %v6520_v49 = vpop.permute.xlu1 %6519  ;;  %v8087_v43 = vpop.permute.xlu0 %6514  ;;  %vm8092_vm0 = vmpackc.low %vm10860_vm14, %vm10860_vm14  ;;  %v5651_v58 = vpack.c.bf16 %v665_v55, %v664_v17  ;;  %v11127_v55 = vand.u32 31, %v7687_v5 }
 0x10a   : > { %v5658_v52 = vpack.c.bf16 %v661_v61, %v660_v29  ;;  %v6522_v16 = vunpack.i.h.bf16 %v6520_v49  ;;  %v6521_v10 = vunpack.i.l.bf16 %v6520_v49  ;;  %v5648_v33 = vpack.c.bf16 %v663_v54, %v662_v60  ;;  %5639 = vmatmul.mubr.msk.bf16.vlgmr.msra.gmra.mrb[8].mxu0 %vm10874_vm5, %v7836_v24  ;;  %vm8104_vm11 = vmand %vm10861_vm1, %vm7987_vm3  ;;  %6794 = vrot.lane.b32.xlu0 %v7594_v42, %s7336_s17 }
 0x10b   : > { %v6517_v48 = vunpack.i.h.bf16 %v8087_v43  ;;  %v6516_v56 = vunpack.i.l.bf16 %v8087_v43  ;;  %v5655_v61 = vpack.c.bf16 %v659_v9, %v658_v7  ;;  %6809 = vrot.lane.b32.xlu1 %v7618_v59, %s7336_s17  ;;  %5646 = vmatmul.mubr.msk.bf16.vlgmr.msra.gmra.mrb[8].mxu1 %vm10874_vm5, %v7836_v24  ;;  %vm8116_vm14 = vcmp.ne.s32.totalorder %v11127_v55, 0 }
 0x10c   : > { %5649 = vmatprep.subr.msk.bf16.mxu0 %vm8040_vm13, %v5648_v33  ;;  %v11128_v9 = vmov 0  ;;  %v10865_v17 = vand.u32 31, %v7701_v11  ;;  %vm5662_vm13 = vmpackc.low %vm8033_vm4, %vm8033_vm4  ;;  %v11131_v60 = vand.u32 31, %v7672_v2  ;;  %v11132_v49 = vmov 0  ;;  %1072 = vmatprep.mubr.bf16.mxu0 %v11087_v47 }
 0x10d   : > { %v11129_v9 = vsel %vm8116_vm14, 4294967295, %v11128_v9  ;;  %v492_v7 = vsel %vm10875_vm8, %v6517_v48, %v6522_v16  ;;  %v491_v29 = vsel %vm10875_vm8, %v6516_v56, %v6521_v10  ;;  %5656 = vmatprep.subr.msk.bf16.mxu1 %vm8066_vm2, %v5655_v61  ;;  %5652 = vmatpush1.bf16.msk.msra.mxu0 %vm8083_vm15, %v5651_v58  ;;  %v8129_v40 = vpop.permute.xlu1 %6529  ;;  %v6525_v43 = vpop.permute.xlu0 %6524  ;;  %vm5669_vm2 = vmpackc.low %vm8104_vm11, %vm8104_vm11  ;;  %v11135_v58 = vand.u32 31, %v7694_v8 }
 0x10e   : > { %11130 = vst [vmem:[#allocation43_spill] sm:$0xff] %v11129_v9  ;;  %vm8136_vm1 = vcmp.ne.s32.totalorder %v11131_v60, 0  ;;  %5659 = vmatpush1.bf16.msk.msra.mxu1 %vm8092_vm0, %v5658_v52  ;;  %v10868_v62 = vunpack.i.h.bf16 %v8129_v40  ;;  %v6531_v30 = vunpack.i.l.bf16 %v8129_v40  ;;  %v5663_v33 = vpack.c.bf16 %v492_v7, %v491_v29  ;;  %1115 = vmatprep.mubr.bf16.mxu1 %v11087_v47 }
 0x10f   : > { %v11133_v49 = vsel %vm8136_vm1, 4294967295, %v11132_v49  ;;  %vm8150_vm15 = vcmp.ne.s32.totalorder %v11135_v58, 0  ;;  %v11136_v61 = vmov 0  ;;  %v6527_v19 = vunpack.i.h.bf16 %v6525_v43  ;;  %6819 = vrot.lane.b32.xlu1 %v7630_v0, %s7336_s17  ;;  %vm8175_vm12 = vmand %vm11142_vm6, %vm8136_vm1  ;;  %6804 = vrot.lane.b32.xlu0 %v7604_v50, %s7336_s17 }
 0x110   : > { %11134 = vst [vmem:[#allocation44_spill] sm:$0xff] %v11133_v49  ;;  %v11137_v61 = vsel %vm8150_vm15, 4294967295, %v11136_v61  ;;  %v6526_v52 = vunpack.i.l.bf16 %v6525_v43  ;;  %vm11139_vm0 = vcmp.ne.s32.totalorder %v7722_v21, 0  ;;  %5664 = vmatprep.subr.msk.bf16.mxu0 %vm5662_vm13, %v5663_v33  ;;  %v11145_v60 = vmov 0 }
 0x111   : > { %11138 = vst [vmem:[#allocation45_spill] sm:$0xff] %v11137_v61  ;;  %vm8159_vm7 = vmand %vm11139_vm0, %vm8116_vm14  ;;  %vm8181_vm0 = vcmp.ne.s32.totalorder %v10865_v17, 0  ;;  %v488_v33 = vsel %vm10875_vm8, %v6527_v19, %v10868_v62  ;;  %v490_v58 = vsel %vm10875_vm8, %v6522_v16, %v6527_v19  ;;  %v6540_v49 = vpop.permute.xlu1 %6539  ;;  %vm11148_vm6 = vcmp.ne.s32.totalorder %v7737_v32, 0  ;;  %v8207_v62 = vpop.permute.xlu0 %6534 }
 0x112   : > { %v11146_v60 = vsel %vm8181_vm0, 4294967295, %v11145_v60  ;;  %v487_v17 = vsel %vm10875_vm8, %v6526_v52, %v6531_v30  ;;  %v489_v7 = vsel %vm10875_vm8, %v6521_v10, %v6526_v52  ;;  %vm8203_vm4 = vmand %vm11148_vm6, %vm8150_vm15  ;;  %v10892_v16 = vand.u32 31, %v7730_v25  ;;  %5653 = vmatmul.mubr.msk.bf16.vlgmr.msra.gmra.mrb[12].mxu0 %vm10874_vm5, %v7836_v24 }
 0x113   : > { %11147 = vst [vmem:[#allocation46_spill] sm:$0xff] %v11146_v60  ;;  %v5673_v23 = vpack.c.bf16 %v490_v58, %v489_v7  ;;  %v5670_v9 = vpack.c.bf16 %v488_v33, %v487_v17  ;;  %v10872_v10 = vunpack.i.h.bf16 %v8207_v62  ;;  %v10873_v19 = vunpack.i.l.bf16 %v8207_v62  ;;  %6829 = vrot.lane.b32.xlu1 %v7580_v31, %s7336_s17  ;;  %5660 = vmatmul.mubr.msk.bf16.vlgmr.msra.gmra.mrb[12].mxu1 %vm10874_vm5, %v7836_v24  ;;  %vm11159_vm11 = vmpackc.low %vm8159_vm7, %vm8159_vm7 }
 0x114   : > { %v11151_v17 = vand.u32 31, %v7707_v12  ;;  %v11152_v52 = vmov 0  ;;  %v6542_v7 = vunpack.i.h.bf16 %v6540_v49  ;;  %v6541_v33 = vunpack.i.l.bf16 %v6540_v49  ;;  %1166 = vmatprep.mubr.bf16.mxu0 %v11087_v47  ;;  %1209 = vmatprep.mubr.bf16.mxu1 %v11087_v47 }
 0x115   : > { %5671 = vmatprep.subr.msk.bf16.mxu1 %vm5669_vm2, %v5670_v9  ;;  %v11155_v58 = vand.u32 31, %v7710_v13  ;;  %v493_v24 = vsel %vm10875_vm8, %v10873_v19, %v6516_v56  ;;  %v494_v54 = vsel %vm10875_vm8, %v10872_v10, %v6517_v48  ;;  %v6550_v9 = vpop.permute.xlu1 %6549  ;;  %vm11160_vm2 = vcmp.ne.s32.totalorder %v7748_v36, 0  ;;  %v8284_v19 = vld [vmem:[#allocation5] sm:$0xff]  }
 0x116   : > { %vm8224_vm9 = vcmp.ne.s32.totalorder %v11151_v17, 0  ;;  %v11156_v17 = vmov 0  ;;  %5674 = vmatpush1.bf16.msk.msra.mxu1 %vm11159_vm11, %v5673_v23  ;;  %vm8262_vm6 = vmand %vm11160_vm2, %vm8181_vm0  ;;  %v5666_v48 = vpack.c.bf16 %v494_v54, %v493_v24  ;;  %vm11163_vm7 = vcmp.ne.s32.totalorder %v7758_v44, 0 }
 0x117   : > { %v11153_v52 = vsel %vm8224_vm9, 4294967295, %v11152_v52  ;;  %vm8240_vm13 = vcmp.ne.s32.totalorder %v11155_v58, 0  ;;  %v6545_v58 = vpop.permute.xlu0 %6544  ;;  %vm8272_vm11 = vmand %vm11163_vm7, %vm8224_vm9  ;;  %v11166_v23 = vand.u32 31, %v7716_v18  ;;  %v11167_v10 = vmov 0  ;;  %6839 = vrot.lane.b32.xlu1 %v7550_v14, %s7337_s29  ;;  %v11188_v14 = vld [vmem:[#allocation32_spill] sm:$0xff] }
 0x118   : > { %11154 = vst [vmem:[#allocation47_spill] sm:$0xff] %v11153_v52  ;;  %v11157_v17 = vsel %vm8240_vm13, 4294967295, %v11156_v17  ;;  %v6547_v24 = vunpack.i.h.bf16 %v6545_v58  ;;  %v6546_v54 = vunpack.i.l.bf16 %v6545_v58  ;;  %vm11170_vm7 = vcmp.ne.s32.totalorder %v7760_v46, 0 }
 0x119   : > { %11158 = vst [vmem:[#allocation48_spill] sm:$0xff] %v11157_v17  ;;  %vm8280_vm2 = vcmp.ne.s32.totalorder %v11166_v23, 0  ;;  %vm8290_vm5 = vmand %vm11170_vm7, %vm8240_vm13  ;;  %vm8298_vm8 = vcmp.ne.s32.totalorder %v10892_v16, 0  ;;  %v11173_v23 = vmov 0  ;;  %vm11176_vm9 = vcmp.lt.s32.totalorder %v7672_v2, 33  ;;  %v6560_v16 = vpop.permute.xlu1 %6559 }
 0x11a   : > { %v11168_v10 = vsel %vm8280_vm2, 4294967295, %v11167_v10  ;;  %v11174_v23 = vsel %vm8298_vm8, 4294967295, %v11173_v23  ;;  %v485_v58 = vsel %vm11176_vm9, %v6531_v30, %v6541_v33  ;;  %v11177_v17 = vunpack.i.h.bf16 %v8129_v40  ;;  %vm11178_vm7 = vmmov %vm11176_vm9 }
 0x11b   : > { %11169 = vst [vmem:[#allocation49_spill] sm:$0xff] %v11168_v10  ;;  %11175 = vst [vmem:[#allocation50_spill] sm:$0xff] %v11174_v23  ;;  %v6552_v60 = vunpack.i.h.bf16 %v6550_v9  ;;  %v6551_v61 = vunpack.i.l.bf16 %v6550_v9  ;;  %v11183_v29 = vmov 0  ;;  %v10909_v9 = vand.u32 31, %v7754_v41  ;;  %6849 = vrot.lane.b32.xlu1 %v7576_v28, %s7337_s29 }
 0x11c   : > { %v486_v52 = vsel %vm11178_vm7, %v11177_v17, %v6542_v7  ;;  %vm11179_vm13 = vmpackc.low %vm8175_vm12, %vm8175_vm12  ;;  %v11182_v17 = vand.u32 31, %v7741_v35  ;;  %vm11195_vm0 = vcmp.ne.s32.totalorder %v7788_v6, 0  ;;  %v11212_v25 = vmov 0 }
 0x11d   : > { %5667 = vmatpush1.bf16.msk.msra.mxu0 %vm11179_vm13, %v5666_v48  ;;  %vm11180_vm15 = vmmov %vm11178_vm7  ;;  %v6555_v48 = vpop.permute.xlu0 %6554  ;;  %v5680_v35 = vpack.c.bf16 %v486_v52, %v485_v58  ;;  %vm11190_vm13 = vcmp.ne.s32.totalorder %v7765_v51, 0  ;;  %v481_v52 = vsel %vm11178_vm7, %v6546_v54, %v6551_v61  ;;  %v6562_v58 = vunpack.i.h.bf16 %v6560_v16 }
 0x11e   : > { %v484_v30 = vsel %vm11180_vm15, %v6542_v7, %v6547_v24  ;;  %vm11181_vm9 = vmmov %vm11178_vm7  ;;  %vm8325_vm1 = vcmp.ne.s32.totalorder %v11182_v17, 0  ;;  %v11186_v7 = vld [vmem:[#allocation19_spill] sm:$0xff]  ;;  %v6557_v17 = vunpack.i.h.bf16 %v6555_v48  ;;  %v6556_v42 = vunpack.i.l.bf16 %v6555_v48 }
 0x11f   : > { %v483_v40 = vsel %vm11181_vm9, %v6541_v33, %v6546_v54  ;;  %v11184_v29 = vsel %vm8325_vm1, 4294967295, %v11183_v29  ;;  %6814 = vrot.lane.b32.xlu0 %v11186_v7, %s7336_s17  ;;  %v11187_v33 = vld [vmem:[#allocation31_spill] sm:$0xff]  ;;  %vm11189_vm15 = vcmask 130048   ;;  %vm8343_vm9 = vmand %vm11190_vm13, %vm8280_vm2  ;;  %v6561_v48 = vunpack.i.l.bf16 %v6560_v16  ;;  %6859 = vrot.lane.b32.xlu1 %v7588_v37, %s7337_s29 }
 0x120   : > { %11185 = vst [vmem:[#allocation51_spill] sm:$0xff] %v11184_v29  ;;  %v5677_v38 = vpack.c.bf16 %v484_v30, %v483_v40  ;;  %5668 = vmatmul.mubr.msk.bf16.vlgmr.msra.gmra.mrb[0].mxu0 %vm11189_vm15, %v8284_v19  ;;  %vm11193_vm12 = vmmov %vm11178_vm7  ;;  %5675 = vmatmul.mubr.msk.bf16.vlgmr.msra.gmra.mrb[0].mxu1 %vm11189_vm15, %v8284_v19  ;;  %v480_v16 = vsel %vm11178_vm7, %v6552_v60, %v6557_v17  ;;  %v11208_v29 = vmov 0  ;;  %v11245_v30 = vand.u32 31, %v7682_v4 }
 0x121   : > { %v482_v40 = vsel %vm11193_vm12, %v6547_v24, %v6552_v60  ;;  %vm11194_vm13 = vmpackc.low %vm8203_vm4, %vm8203_vm4  ;;  %v11203_v60 = vmov 0  ;;  %v6565_v56 = vpop.permute.xlu0 %6564  ;;  %1252 = vmatprep.mubr.bf16.mxu0 %v11087_v47  ;;  %1295 = vmatprep.mubr.bf16.mxu1 %v11087_v47 }
 0x122   : > { %5678 = vmatprep.subr.msk.bf16.mxu0 %vm11194_vm13, %v5677_v38  ;;  %vm8364_vm2 = vmand %vm11195_vm0, %vm8298_vm8  ;;  %v6570_v38 = vpop.permute.xlu1 %6569  ;;  %vm11200_vm0 = vcmp.ne.s32.totalorder %v7838_v1, 0  ;;  %vm8387_vm13 = vcmp.ne.s32.totalorder %v10909_v9, 0  ;;  %v11211_v9 = vand.u32 31, %v11188_v14  ;;  %v5687_v23 = vpack.c.bf16 %v482_v40, %v481_v52 }
 0x123   : > { %vm11198_vm12 = vmmov %vm11178_vm7  ;;  %v11204_v60 = vsel %vm8387_vm13, 4294967295, %v11203_v60  ;;  %v6567_v10 = vunpack.i.h.bf16 %v6565_v56  ;;  %v6566_v7 = vunpack.i.l.bf16 %v6565_v56  ;;  %v6571_v40 = vunpack.i.l.bf16 %v6570_v38  ;;  %6869 = vrot.lane.b32.xlu1 %v7598_v45, %s7337_s29 }
 0x124   : > { %v479_v54 = vsel %vm11198_vm12, %v6551_v61, %v6556_v42  ;;  %vm11199_vm4 = vmpackc.low %vm8262_vm6, %vm8262_vm6  ;;  %11205 = vst [vmem:[#allocation32_spill] sm:$0xff] %v11204_v60  ;;  %v11206_v61 = vld [vmem:[#allocation33_spill] sm:$0xff]  ;;  %vm8405_vm12 = vcmp.ne.s32.totalorder %v11211_v9, 0  ;;  %v11233_v56 = vmov 0 }
 0x125   : > { %5681 = vmatpush1.bf16.msk.msra.mxu0 %vm11199_vm4, %v5680_v35  ;;  %vm8381_vm15 = vmand %vm11200_vm0, %vm8325_vm1  ;;  %v5684_v50 = vpack.c.bf16 %v480_v16, %v479_v54  ;;  %v11207_v35 = vand.u32 31, %v11187_v33  ;;  %v11213_v25 = vsel %vm8405_vm12, 4294967295, %v11212_v25  ;;  %v11215_v16 = vld [vmem:[#allocation36_spill] sm:$0xff]  ;;  %vm11217_vm0 = vcmp.lt.s32.totalorder %v7672_v2, 33  ;;  %v6575_v55 = vpop.permute.xlu0 %6574 }
 0x126   : > { %11214 = vst [vmem:[#allocation52_spill] sm:$0xff] %v11213_v25  ;;  %v478_v9 = vsel %vm11217_vm0, %v6557_v17, %v6562_v58  ;;  %vm11218_vm6 = vmmov %vm11217_vm0  ;;  %v6572_v54 = vunpack.i.h.bf16 %v6570_v38  ;;  %v475_v17 = vsel %vm11217_vm0, %v6561_v48, %v6566_v7  ;;  %v11232_v38 = vand.u32 31, %v11215_v16 }
 0x127   : > { %vm8399_vm7 = vcmp.ne.s32.totalorder %v11207_v35, 0  ;;  %v11216_v35 = vld [vmem:[#allocation20_spill] sm:$0xff]  ;;  %v477_v33 = vsel %vm11218_vm6, %v6556_v42, %v6561_v48  ;;  %vm11219_vm1 = vmpackc.low %vm8272_vm11, %vm8272_vm11  ;;  %v6580_v42 = vpop.permute.xlu1 %6579  ;;  %v11229_v48 = vmov 0  ;;  %6879 = vrot.lane.b32.xlu1 %v7608_v53, %s7337_s29 }
 0x128   : > { %v11209_v29 = vsel %vm8399_vm7, 4294967295, %v11208_v29  ;;  %6824 = vrot.lane.b32.xlu0 %v11216_v35, %s7336_s17  ;;  %5685 = vmatprep.subr.msk.bf16.mxu1 %vm11219_vm1, %v5684_v50  ;;  %vm11220_vm8 = vmmov %vm11217_vm0  ;;  %vm11222_vm1 = vcmp.ne.s32.totalorder %v7857_v26, 0  ;;  %vm11225_vm0 = vcmp.ne.s32.totalorder %v7902_v57, 0 }
 0x129   : > { %11210 = vst [vmem:[#allocation33_spill] sm:$0xff] %v11209_v29  ;;  %v476_v52 = vsel %vm11220_vm8, %v6562_v58, %v6567_v10  ;;  %vm11221_vm6 = vmpackc.low %vm8290_vm5, %vm8290_vm5  ;;  %v6576_v29 = vunpack.i.l.bf16 %v6575_v55 }
 0x12a   : > { %5688 = vmatpush1.bf16.msk.msra.mxu1 %vm11221_vm6, %v5687_v23  ;;  %vm8442_vm11 = vmand %vm11222_vm1, %vm8387_vm13  ;;  %v5691_v58 = vpack.c.bf16 %v476_v52, %v475_v17  ;;  %v11228_v23 = vand.u32 31, %v11206_v61  ;;  %vm8463_vm6 = vcmp.ne.s32.totalorder %v11232_v38, 0  ;;  %v5694_v52 = vpack.c.bf16 %v478_v9, %v477_v33 }
 0x12b   : > { %vm8451_vm4 = vmand %vm11225_vm0, %vm8399_vm7  ;;  %v11234_v56 = vsel %vm8463_vm6, 4294967295, %v11233_v56  ;;  %v6577_v17 = vunpack.i.h.bf16 %v6575_v55  ;;  %vm11236_vm1 = vcmask 130048   ;;  %vm11237_vm0 = vcmp.ne.s32.totalorder %v7904_v39, 0  ;;  %6889 = vrot.lane.b32.xlu1 %v7618_v59, %s7337_s29 }
 0x12c   : > { %vm8457_vm5 = vcmp.ne.s32.totalorder %v11228_v23, 0  ;;  %11235 = vst [vmem:[#allocation20_spill] sm:$0xff] %v11234_v56  ;;  %5682 = vmatmul.mubr.msk.bf16.vlgmr.msra.gmra.mrb[4].mxu0 %vm11236_vm1, %v8284_v19  ;;  %vm8473_vm8 = vmand %vm11237_vm0, %vm8405_vm12  ;;  %vm11240_vm7 = vcmp.lt.s32.totalorder %v7672_v2, 33  ;;  %v6582_v9 = vunpack.i.h.bf16 %v6580_v42  ;;  %v6581_v55 = vunpack.i.l.bf16 %v6580_v42  ;;  %v6590_v42 = vpop.permute.xlu1 %6589 }
 0x12d   : > { %v11230_v48 = vsel %vm8457_vm5, 4294967295, %v11229_v48  ;;  %v474_v38 = vsel %vm11240_vm7, %v6567_v10, %v6572_v54  ;;  %vm11241_vm13 = vmmov %vm11240_vm7  ;;  %5689 = vmatmul.mubr.msk.bf16.vlgmr.msra.gmra.mrb[4].mxu1 %vm11236_vm1, %v8284_v19  ;;  %v472_v10 = vsel %vm11240_vm7, %v6572_v54, %v6577_v17  ;;  %v11248_v54 = vand.u32 31, %v7679_v3  ;;  %1338 = vmatprep.mubr.bf16.mxu0 %v11087_v47 }
 0x12e   : > { %11231 = vst [vmem:[#allocation36_spill] sm:$0xff] %v11230_v48  ;;  %v473_v33 = vsel %vm11241_vm13, %v6566_v7, %v6571_v40  ;;  %vm11242_vm0 = vmpackc.low %vm8343_vm9, %vm8343_vm9  ;;  %v6592_v24 = vunpack.i.h.bf16 %v6590_v42  ;;  %v6591_v25 = vunpack.i.l.bf16 %v6590_v42  ;;  %1381 = vmatprep.mubr.bf16.mxu1 %v11087_v47  ;;  %vm11255_vm9 = vcmp.lt.s32.totalorder %v7672_v2, 33 }
 0x12f   : > { %5692 = vmatprep.subr.msk.bf16.mxu0 %vm11242_vm0, %v5691_v58  ;;  %vm11243_vm13 = vmmov %vm11240_vm7  ;;  %vm8507_vm0 = vcmp.ne.s32.totalorder %v11245_v30, 31  ;;  %v11246_v58 = vmov 0  ;;  %vm8513_vm7 = vcmp.ne.s32.totalorder %v11248_v54, 31  ;;  %v5701_v4 = vpack.c.bf16 %v474_v38, %v473_v33  ;;  %6899 = vrot.lane.b32.xlu1 %v7630_v0, %s7337_s29 }
 0x130   : > { %v471_v7 = vsel %vm11243_vm13, %v6571_v40, %v6576_v29  ;;  %vm11244_vm1 = vmpackc.low %vm8364_vm2, %vm8364_vm2  ;;  %v11247_v58 = vsel %vm8507_vm0, 4294967295, %v11246_v58  ;;  %v11249_v40 = vmov 0  ;;  %vm11251_vm13 = vcmp.ne.s32.totalorder %v7912_v63, 0 }
 0x131   : > { %5695 = vmatpush1.bf16.msk.msra.mxu0 %vm11244_vm1, %v5694_v52  ;;  %v11250_v40 = vsel %vm8513_vm7, 4294967295, %v11249_v40  ;;  %v6585_v52 = vpop.permute.xlu0 %6584  ;;  %v5698_v60 = vpack.c.bf16 %v472_v10, %v471_v7  ;;  %vm8526_vm1 = vmand %vm11251_vm13, %vm8457_vm5  ;;  %v11254_v10 = vld [vmem:[#allocation15_spill] sm:$0xff]  ;;  %v470_v7 = vsel %vm11255_vm9, %v6577_v17, %v6582_v9  ;;  %v11257_v33 = vunpack.i.l.bf16 %v8207_v62 }
 0x132   : > { %v6587_v30 = vunpack.i.h.bf16 %v6585_v52  ;;  %v6586_v45 = vunpack.i.l.bf16 %v6585_v52  ;;  %6834 = vrot.lane.b32.xlu0 %v11254_v10, %s7337_s29  ;;  %vm11256_vm2 = vmmov %vm11255_vm9  ;;  %v11259_v54 = vunpack.i.h.bf16 %v8207_v62  ;;  %vm11262_vm9 = vcmp.ne.s32.totalorder %v7934_v27, 0 }
 0x133   : > { %v469_v38 = vsel %vm11256_vm2, %v6576_v29, %v6581_v55  ;;  %vm11258_vm12 = vmmov %vm11256_vm2  ;;  %v11276_v3 = vand.u32 31, %v7687_v5  ;;  %v11285_v23 = vand.u32 31, %v7672_v2  ;;  %6909 = vrot.lane.b32.xlu1 %v7580_v31, %s7337_s29 }
 0x134   : > { %v463_v42 = vsel %vm11258_vm12, %v6591_v25, %v11257_v33  ;;  %vm11260_vm13 = vmmov %vm11256_vm2  ;;  %v466_v62 = vsel %vm11258_vm12, %v6587_v30, %v6592_v24  ;;  %v5708_v50 = vpack.c.bf16 %v470_v7, %v469_v38  ;;  %v11277_v7 = vmov 0 }
 0x135   : > { %v464_v52 = vsel %vm11260_vm13, %v6592_v24, %v11259_v54  ;;  %vm11261_vm5 = vmpackc.low %vm8381_vm15, %vm8381_vm15  ;;  %v6595_v54 = vpop.permute.xlu0 %6594 }
 0x136   : > { %5699 = vmatprep.subr.msk.bf16.mxu1 %vm11261_vm5, %v5698_v60  ;;  %vm8555_vm2 = vmand %vm11262_vm9, %vm8463_vm6  ;;  %v6600_v60 = vpop.permute.xlu1 %6599  ;;  %vm11269_vm9 = vcmp.ne.s32.totalorder %v7720_v20, 0  ;;  %v5712_v20 = vpack.c.bf16 %v464_v52, %v463_v42 }
 0x137   : > { %vm11265_vm14 = vmmov %vm11258_vm12 }
 0x138   : > { %v468_v17 = vsel %vm11265_vm14, %v6582_v9, %v6587_v30  ;;  %vm11266_vm13 = vmmov %vm11258_vm12  ;;  %v6601_v30 = vunpack.i.l.bf16 %v6600_v60 }
 0x139   : > { %v465_v33 = vsel %vm11266_vm13, %v6586_v45, %v6591_v25  ;;  %vm11267_vm15 = vmmov %vm11258_vm12  ;;  %v6602_v25 = vunpack.i.h.bf16 %v6600_v60 }
 0x13a   : > { %v467_v43 = vsel %vm11267_vm15, %v6581_v55, %v6586_v45  ;;  %vm11268_vm5 = vmpackc.low %vm8442_vm11, %vm8442_vm11  ;;  %v5715_v9 = vpack.c.bf16 %v466_v62, %v465_v33  ;;  %v6597_v55 = vunpack.i.h.bf16 %v6595_v54  ;;  %vm11272_vm11 = vcmask 130048   ;;  %v11273_v62 = vld [vmem:[#allocation14_spill] sm:$0xff]  ;;  %v6610_v49 = vpop.permute.xlu1 %6609  ;;  %v6605_v33 = vpop.permute.xlu0 %6604 }
 0x13b   : > { %5702 = vmatpush1.bf16.msk.msra.mxu1 %vm11268_vm5, %v5701_v4  ;;  %vm8576_vm12 = vmand %vm11269_vm9, %vm8507_vm0  ;;  %v5705_v45 = vpack.c.bf16 %v468_v17, %v467_v43  ;;  %v6596_v4 = vunpack.i.l.bf16 %v6595_v54  ;;  %5696 = vmatmul.mubr.msk.bf16.vlgmr.msra.gmra.mrb[8].mxu0 %vm11272_vm11, %v8284_v19  ;;  %vm8602_vm9 = vcmp.ne.s32.totalorder %v11276_v3, 31  ;;  %v6612_v29 = vunpack.i.h.bf16 %v6610_v49  ;;  %v11291_v54 = vld [vmem:[#allocation13_spill] sm:$0xff] }
 0x13c   : > { %vm5707_vm14 = vmpackc.low %vm8526_vm1, %vm8526_vm1  ;;  %6844 = vrot.lane.b32.xlu0 %v11273_v62, %s7337_s29  ;;  %v11278_v7 = vsel %vm8602_vm9, 4294967295, %v11277_v7  ;;  %v6611_v17 = vunpack.i.l.bf16 %v6610_v49  ;;  %1424 = vmatprep.mubr.bf16.mxu0 %v11087_v47  ;;  %v6607_v43 = vunpack.i.h.bf16 %v6605_v33  ;;  %v6606_v60 = vunpack.i.l.bf16 %v6605_v33 }
 0x13d   : > { %vm5714_vm13 = vmpackc.low %vm8555_vm2, %vm8555_vm2  ;;  %vm11279_vm2 = vcmp.lt.s32.totalorder %v7672_v2, 31 }
 0x13e   : > { %vm11274_vm15 = vmmov %vm11272_vm11  ;;  %v1572_v38 = vsel %vm11279_vm2, %v6597_v55, %v6602_v25  ;;  %v6620_v49 = vpop.permute.xlu1 %6619 }
 0x13f   : > { %5703 = vmatmul.mubr.msk.bf16.vlgmr.msra.gmra.mrb[8].mxu1 %vm11274_vm15, %v8284_v19  ;;  %vm11275_vm1 = vmpackc.low %vm8451_vm4, %vm8451_vm4  ;;  %vm11282_vm15 = vcmp.ne.s32.totalorder %v7712_v15, 0 }
 0x140   : > { %5706 = vmatprep.subr.msk.bf16.mxu0 %vm11275_vm1, %v5705_v45  ;;  %vm5719_vm5 = vmpackc.low %vm8576_vm12, %vm8576_vm12  ;;  %1467 = vmatprep.mubr.bf16.mxu1 %v11087_v47  ;;  %v11292_v45 = vand.u32 31, %v7694_v8 }
 0x141   : > { %vm11280_vm11 = vmmov %vm11279_vm2  ;;  %5709 = vmatpush1.bf16.msk.msra.mxu0 %vm5707_vm14, %v5708_v50  ;;  %vm11288_vm14 = vcmp.ne.s32.totalorder %v7722_v21, 0  ;;  %6854 = vrot.lane.b32.xlu0 %v11291_v54, %s7337_s29  ;;  %v11293_v50 = vmov 0  ;;  %v11346_v21 = vld [vmem:[#allocation12_spill] sm:$0xff] }
 0x142   : > { %v1571_v42 = vsel %vm11280_vm11, %v6596_v4, %v6601_v30  ;;  %vm11281_vm4 = vmpackc.low %vm8473_vm8, %vm8473_vm8  ;;  %vm8626_vm8 = vcmp.ne.s32.totalorder %v11285_v23, 31  ;;  %vm8653_vm11 = vcmp.ne.s32.totalorder %v11292_v45, 31  ;;  %v8673_v23 = vpop.permute.xlu0 %6614  ;;  %v6621_v45 = vunpack.i.l.bf16 %v6620_v49  ;;  %6919 = vrot.lane.b32.xlu1 %v11346_v21, %s7338_s7 }
 0x143   : > { %5713 = vmatprep.subr.msk.bf16.mxu1 %vm11281_vm4, %v5712_v20  ;;  %vm8619_vm1 = vmand %vm11282_vm15, %vm8513_vm7  ;;  %v5720_v52 = vpack.c.bf16 %v1572_v38, %v1571_v42  ;;  %v11286_v20 = vmov 0  ;;  %v11294_v50 = vsel %vm8653_vm11, 4294967295, %v11293_v50 }
 0x144   : > { %5716 = vmatpush1.bf16.msk.msra.mxu1 %vm5714_vm13, %v5715_v9  ;;  %v11287_v20 = vsel %vm8626_vm8, 4294967295, %v11286_v20  ;;  %vm8635_vm13 = vmand %vm11288_vm14, %vm8602_vm9  ;;  %vm11299_vm14 = vcmp.ne.s32.totalorder %v7724_v22, 0  ;;  %v6622_v9 = vunpack.i.h.bf16 %v6620_v49 }
 0x145   : > { %5721 = vmatprep.subr.msk.bf16.mxu0 %vm5719_vm5, %v5720_v52  ;;  %vm11295_vm4 = vmmov %vm11279_vm2  ;;  %6864 = vrot.lane.b32.xlu0 %v7584_v34, %s7337_s29 }
 0x146   : > { %v1568_v3 = vsel %vm11295_vm4, %v6607_v43, %v6612_v29  ;;  %vm11296_vm15 = vmmov %vm11279_vm2  ;;  %v6625_v49 = vpop.permute.xlu0 %6624  ;;  %6929 = vrot.lane.b32.xlu1 %v7576_v28, %s7338_s7 }
 0x147   : > { %v1570_v24 = vsel %vm11296_vm15, %v6602_v25, %v6607_v43  ;;  %vm11297_vm12 = vmmov %vm11279_vm2  ;;  %v11302_v25 = vand.u32 31, %v7701_v11  ;;  %v10945_v43 = vunpack.i.h.bf16 %v8673_v23 }
 0x148   : > { %v1567_v38 = vsel %vm11297_vm12, %v6606_v60, %v6611_v17  ;;  %vm11298_vm5 = vmmov %vm11279_vm2  ;;  %vm11305_vm12 = vcmask 130048  }
 0x149   : > { %v1569_v42 = vsel %vm11298_vm5, %v6601_v30, %v6606_v60  ;;  %vm8669_vm2 = vmand %vm11299_vm14, %vm8626_vm8  ;;  %v5727_v52 = vpack.c.bf16 %v1568_v3, %v1567_v38  ;;  %vm8680_vm15 = vcmp.ne.s32.totalorder %v11302_v25, 31  ;;  %v11303_v30 = vmov 0  ;;  %5710 = vmatmul.mubr.msk.bf16.vlgmr.msra.gmra.mrb[12].mxu0 %vm11305_vm12, %v8284_v19  ;;  %v6630_v38 = vpop.permute.xlu1 %6629  ;;  %v8743_v25 = vld [vmem:[#allocation5 + $0x10] sm:$0xff]  }
 0x14a   : > { %v5730_v33 = vpack.c.bf16 %v1570_v24, %v1569_v42  ;;  %vm5729_vm4 = vmpackc.low %vm8635_vm13, %vm8635_vm13  ;;  %v11304_v30 = vsel %vm8680_vm15, 4294967295, %v11303_v30  ;;  %v10952_v60 = vunpack.i.l.bf16 %v8673_v23  ;;  %vm11306_vm13 = vcmp.ne.s32.totalorder %v7737_v32, 0  ;;  %1714 = vmatprep.mubr.bf16.mxu0 %v11087_v47  ;;  %6939 = vrot.lane.b32.xlu1 %v7588_v37, %s7338_s7 }
 0x14b   : > { %vm8694_vm5 = vmand %vm11306_vm13, %vm8653_vm11  ;;  %v11311_v3 = vand.u32 31, %v7707_v12  ;;  %v11312_v24 = vmov 0  ;;  %v11359_v12 = vmov 0 }
 0x14c   : > { %vm11309_vm14 = vmmov %vm11305_vm12 }
 0x14d   : > { %5717 = vmatmul.mubr.msk.bf16.vlgmr.msra.gmra.mrb[12].mxu1 %vm11309_vm14, %v8284_v19  ;;  %vm11310_vm12 = vmpackc.low %vm8619_vm1, %vm8619_vm1  ;;  %vm8710_vm13 = vcmp.ne.s32.totalorder %v11311_v3, 31  ;;  %vm11314_vm14 = vcmp.lt.s32.totalorder %v7672_v2, 31 }
 0x14e   : > { %5728 = vmatprep.subr.msk.bf16.mxu1 %vm11310_vm12, %v5727_v52  ;;  %v11313_v24 = vsel %vm8710_vm13, 4294967295, %v11312_v24  ;;  %v1573_v19 = vsel %vm11314_vm14, %v10952_v60, %v6596_v4  ;;  %vm11315_vm1 = vmmov %vm11314_vm14  ;;  %vm11316_vm12 = vcmp.ne.s32.totalorder %v7748_v36, 0  ;;  %1757 = vmatprep.mubr.bf16.mxu1 %v11087_v47  ;;  %v11320_v4 = vmov 0 }
 0x14f   : > { %v1574_v5 = vsel %vm11315_vm1, %v10945_v43, %v6597_v55  ;;  %5731 = vmatpush1.bf16.msk.msra.mxu1 %vm5729_vm4, %v5730_v33  ;;  %vm8727_vm9 = vmand %vm11316_vm12, %vm8680_vm15  ;;  %v11319_v55 = vand.u32 31, %v7710_v13  ;;  %v6627_v52 = vunpack.i.h.bf16 %v6625_v49  ;;  %v6626_v33 = vunpack.i.l.bf16 %v6625_v49 }
 0x150   : > { %v5723_v42 = vpack.c.bf16 %v1574_v5, %v1573_v19  ;;  %vm11322_vm1 = vcmp.ne.s32.totalorder %v7758_v44, 0  ;;  %v11325_v13 = vand.u32 31, %v7716_v18  ;;  %v11326_v19 = vmov 0  ;;  %vm11352_vm0 = vmpackc.low %vm8694_vm5, %vm8694_vm5 }
 0x151   : > { %vm8739_vm14 = vcmp.ne.s32.totalorder %v11319_v55, 31  ;;  %vm8751_vm12 = vmand %vm11322_vm1, %vm8710_vm13  ;;  %vm11328_vm15 = vcmp.lt.s32.totalorder %v7672_v2, 31  ;;  %v6632_v55 = vunpack.i.h.bf16 %v6630_v38  ;;  %v6631_v43 = vunpack.i.l.bf16 %v6630_v38  ;;  %v6635_v38 = vpop.permute.xlu0 %6634 }
 0x152   : > { %v11321_v4 = vsel %vm8739_vm14, 4294967295, %v11320_v4  ;;  %vm8757_vm4 = vcmp.ne.s32.totalorder %v11325_v13, 31  ;;  %v1565_v5 = vsel %vm11328_vm15, %v6611_v17, %v6621_v45  ;;  %vm11329_vm11 = vmmov %vm11328_vm15  ;;  %v6640_v13 = vpop.permute.xlu1 %6639  ;;  %v11339_v60 = vmov 0 }
 0x153   : > { %v11327_v19 = vsel %vm8757_vm4, 4294967295, %v11326_v19  ;;  %v1566_v49 = vsel %vm11329_vm11, %v6612_v29, %v6622_v9  ;;  %vm11330_vm1 = vmpackc.low %vm8669_vm2, %vm8669_vm2  ;;  %v11343_v44 = vmov 0  ;;  %v6636_v32 = vunpack.i.l.bf16 %v6635_v38 }
 0x154   : > { %5724 = vmatpush1.bf16.msk.msra.mxu0 %vm11330_vm1, %v5723_v42  ;;  %vm11331_vm8 = vmmov %vm11329_vm11  ;;  %vm11333_vm11 = vcmp.ne.s32.totalorder %v7760_v46, 0  ;;  %v11336_v42 = vld [vmem:[#allocation16_spill] sm:$0xff]  ;;  %v11341_v46 = vld [vmem:[#allocation25_spill] sm:$0xff]  ;;  %vm11350_vm13 = vcmp.lt.s32.totalorder %v7672_v2, 31  ;;  %v11380_v29 = vmov 0 }
 0x155   : > { %v1564_v18 = vsel %vm11331_vm8, %v6622_v9, %v6627_v52  ;;  %vm11332_vm15 = vmmov %vm11331_vm8  ;;  %6874 = vrot.lane.b32.xlu0 %v11336_v42, %s7337_s29  ;;  %v11337_v9 = vld [vmem:[#allocation23_spill] sm:$0xff]  ;;  %v11342_v36 = vand.u32 31, %v11341_v46 }
 0x156   : > { %v1563_v17 = vsel %vm11332_vm15, %v6621_v45, %v6626_v33  ;;  %vm8781_vm7 = vmand %vm11333_vm11, %vm8739_vm14  ;;  %v11338_v45 = vand.u32 31, %v11337_v9  ;;  %vm11345_vm15 = vcmask 130048   ;;  %vm11347_vm11 = vcmp.ne.s32.totalorder %v7765_v51, 0 }
 0x157   : > { %v5734_v8 = vpack.c.bf16 %v1564_v18, %v1563_v17  ;;  %vm8798_vm1 = vcmp.ne.s32.totalorder %v11342_v36, 31  ;;  %v5737_v18 = vpack.c.bf16 %v1566_v49, %v1565_v5  ;;  %v6637_v17 = vunpack.i.h.bf16 %v6635_v38  ;;  %5725 = vmatmul.mubr.msk.bf16.vlgmr.msra.gmra.mrb[0].mxu0 %vm11345_vm15, %v8743_v25  ;;  %vm8810_vm8 = vmand %vm11347_vm11, %vm8757_vm4  ;;  %5732 = vmatmul.mubr.msk.bf16.vlgmr.msra.gmra.mrb[0].mxu1 %vm11345_vm15, %v8743_v25 }
 0x158   : > { %vm8792_vm2 = vcmp.ne.s32.totalorder %v11338_v45, 31  ;;  %v11344_v44 = vsel %vm8798_vm1, 4294967295, %v11343_v44  ;;  %v1562_v36 = vsel %vm11350_vm13, %v6627_v52, %v6632_v55  ;;  %vm11351_vm14 = vmmov %vm11350_vm13  ;;  %v6642_v49 = vunpack.i.h.bf16 %v6640_v13  ;;  %1800 = vmatprep.mubr.bf16.mxu0 %v11087_v47  ;;  %1843 = vmatprep.mubr.bf16.mxu1 %v11087_v47 }
 0x159   : > { %v11340_v60 = vsel %vm8792_vm2, 4294967295, %v11339_v60  ;;  %v1561_v5 = vsel %vm11351_vm14, %v6626_v33, %v6631_v43  ;;  %v6641_v38 = vunpack.i.l.bf16 %v6640_v13  ;;  %5735 = vmatprep.subr.msk.bf16.mxu0 %vm11352_vm0, %v5734_v8  ;;  %v1560_v52 = vsel %vm11350_vm13, %v6632_v55, %v6637_v17  ;;  %vm11353_vm14 = vmmov %vm11350_vm13  ;;  %v6650_v13 = vpop.permute.xlu1 %6649  ;;  %v6645_v55 = vpop.permute.xlu0 %6644 }
 0x15a   : > { %v1559_v33 = vsel %vm11353_vm14, %v6631_v43, %v6636_v32  ;;  %vm11354_vm15 = vmpackc.low %vm8727_vm9, %vm8727_vm9  ;;  %vm11355_vm0 = vcmp.ne.s32.totalorder %v7788_v6, 0  ;;  %v11358_v43 = vand.u32 31, %v7754_v41  ;;  %v5744_v9 = vpack.c.bf16 %v1562_v36, %v1561_v5 }
 0x15b   : > { %5738 = vmatpush1.bf16.msk.msra.mxu0 %vm11354_vm15, %v5737_v18  ;;  %vm8841_vm5 = vmand %vm11355_vm0, %vm8792_vm2  ;;  %v5741_v8 = vpack.c.bf16 %v1560_v52, %v1559_v33  ;;  %v6647_v45 = vunpack.i.h.bf16 %v6645_v55  ;;  %v6646_v18 = vunpack.i.l.bf16 %v6645_v55  ;;  %v11361_v52 = vld [vmem:[#allocation18_spill] sm:$0xff]  ;;  %vm11362_vm14 = vcmp.ne.s32.totalorder %v7838_v1, 0 }
 0x15c   : > { %vm8852_vm13 = vcmp.ne.s32.totalorder %v11358_v43, 31  ;;  %6884 = vrot.lane.b32.xlu0 %v11361_v52, %s7337_s29  ;;  %vm8864_vm15 = vmand %vm11362_vm14, %vm8798_vm1  ;;  %v11365_v41 = vand.u32 31, %v11188_v14  ;;  %v11366_v36 = vmov 0  ;;  %vm11369_vm9 = vcmp.lt.s32.totalorder %v7672_v2, 31 }
 0x15d   : > { %v11360_v12 = vsel %vm8852_vm13, 4294967295, %v11359_v12  ;;  %v1558_v5 = vsel %vm11369_vm9, %v6637_v17, %v6642_v49  ;;  %vm11370_vm11 = vmmov %vm11369_vm9  ;;  %v6652_v43 = vunpack.i.h.bf16 %v6650_v13  ;;  %v6651_v6 = vunpack.i.l.bf16 %v6650_v13 }
 0x15e   : > { %vm8870_vm0 = vcmp.ne.s32.totalorder %v11365_v41, 31  ;;  %v1557_v55 = vsel %vm11370_vm11, %v6636_v32, %v6641_v38  ;;  %vm11371_vm14 = vmpackc.low %vm8751_vm12, %vm8751_vm12  ;;  %v6660_v32 = vpop.permute.xlu1 %6659  ;;  %vm11375_vm12 = vcmp.ne.s32.totalorder %v7857_v26, 0  ;;  %v11383_v26 = vld [vmem:[#allocation19_spill] sm:$0xff]  ;;  %vm11391_vm2 = vcmp.lt.s32.totalorder %v7672_v2, 31 }
 0x15f   : > { %v11367_v36 = vsel %vm8870_vm0, 4294967295, %v11366_v36  ;;  %5742 = vmatprep.subr.msk.bf16.mxu1 %vm11371_vm14, %v5741_v8  ;;  %vm11372_vm1 = vmmov %vm11369_vm9 }
 0x160   : > { %11368 = vst [vmem:[#allocation15_spill] sm:$0xff] %v11367_v36  ;;  %v1556_v14 = vsel %vm11372_vm1, %v6642_v49, %v6647_v45  ;;  %vm11373_vm9 = vmmov %vm11372_vm1  ;;  %v6655_v49 = vpop.permute.xlu0 %6654  ;;  %6894 = vrot.lane.b32.xlu0 %v11383_v26, %s7337_s29 }
 0x161   : > { %v1555_v17 = vsel %vm11373_vm9, %v6641_v38, %v6646_v18  ;;  %vm11374_vm11 = vmpackc.low %vm8781_vm7, %vm8781_vm7  ;;  %v11378_v38 = vld [vmem:[#allocation31_spill] sm:$0xff]  ;;  %v6657_v41 = vunpack.i.h.bf16 %v6655_v49  ;;  %v6656_v1 = vunpack.i.l.bf16 %v6655_v49  ;;  %vm11382_vm7 = vcmask 130048  }
 0x162   : > { %5745 = vmatpush1.bf16.msk.msra.mxu1 %vm11374_vm11, %v5744_v9  ;;  %vm8899_vm14 = vmand %vm11375_vm12, %vm8852_vm13  ;;  %v5748_v13 = vpack.c.bf16 %v1556_v14, %v1555_v17  ;;  %v11379_v8 = vand.u32 31, %v11378_v38  ;;  %v5751_v9 = vpack.c.bf16 %v1558_v5, %v1557_v55  ;;  %5739 = vmatmul.mubr.msk.bf16.vlgmr.msra.gmra.mrb[4].mxu0 %vm11382_vm7, %v8743_v25  ;;  %vm11384_vm11 = vcmp.ne.s32.totalorder %v7904_v39, 0 }
 0x163   : > { %vm8920_vm12 = vmand %vm11384_vm11, %vm8870_vm0  ;;  %v11387_v17 = vand.u32 31, %v11215_v16  ;;  %v11388_v5 = vmov 0  ;;  %v1554_v55 = vsel %vm11391_vm2, %v6647_v45, %v6652_v43  ;;  %v6662_v38 = vunpack.i.h.bf16 %v6660_v32  ;;  %1886 = vmatprep.mubr.bf16.mxu0 %v11087_v47 }
 0x164   : > { %vm8908_vm9 = vcmp.ne.s32.totalorder %v11379_v8, 31  ;;  %vm11392_vm7 = vmmov %vm11391_vm2  ;;  %v6661_v8 = vunpack.i.l.bf16 %v6660_v32  ;;  %vm11393_vm13 = vcmask 130048   ;;  %v1552_v16 = vsel %vm11391_vm2, %v6652_v43, %v6657_v41  ;;  %6904 = vrot.lane.b32.xlu0 %v11216_v35, %s7337_s29 }
 0x165   : > { %v11381_v29 = vsel %vm8908_vm9, 4294967295, %v11380_v29  ;;  %vm8926_vm1 = vcmp.ne.s32.totalorder %v11387_v17, 31  ;;  %v1553_v49 = vsel %vm11392_vm7, %v6646_v18, %v6651_v6  ;;  %5746 = vmatmul.mubr.msk.bf16.vlgmr.msra.gmra.mrb[4].mxu1 %vm11393_vm13, %v8743_v25  ;;  %vm11394_vm11 = vmpackc.low %vm8810_vm8, %vm8810_vm8  ;;  %v6670_v18 = vpop.permute.xlu1 %6669  ;;  %v11400_v43 = vand.u32 31, %v11206_v61 }
 0x166   : > { %v11389_v5 = vsel %vm8926_vm1, 4294967295, %v11388_v5  ;;  %5749 = vmatprep.subr.msk.bf16.mxu0 %vm11394_vm11, %v5748_v13  ;;  %vm11395_vm7 = vmmov %vm11391_vm2  ;;  %vm11397_vm11 = vcmp.ne.s32.totalorder %v7902_v57, 0  ;;  %v6672_v32 = vunpack.i.h.bf16 %v6670_v18  ;;  %v6671_v13 = vunpack.i.l.bf16 %v6670_v18  ;;  %1929 = vmatprep.mubr.bf16.mxu1 %v11087_v47 }
 0x167   : > { %11390 = vst [vmem:[#allocation14_spill] sm:$0xff] %v11389_v5  ;;  %v1551_v45 = vsel %vm11395_vm7, %v6651_v6, %v6656_v1  ;;  %vm11396_vm13 = vmpackc.low %vm8841_vm5, %vm8841_vm5  ;;  %vm8964_vm2 = vcmp.ne.s32.totalorder %v11400_v43, 31  ;;  %v11401_v6 = vmov 0  ;;  %v5758_v17 = vpack.c.bf16 %v1554_v55, %v1553_v49 }
 0x168   : > { %5752 = vmatpush1.bf16.msk.msra.mxu0 %vm11396_vm13, %v5751_v9  ;;  %vm8958_vm0 = vmand %vm11397_vm11, %vm8908_vm9  ;;  %v11402_v6 = vsel %vm8964_vm2, 4294967295, %v11401_v6  ;;  %v5755_v11 = vpack.c.bf16 %v1552_v16, %v1551_v45  ;;  %v6665_v9 = vpop.permute.xlu0 %6664  ;;  %vm11404_vm7 = vcmp.ne.s32.totalorder %v7934_v27, 0  ;;  %vm11407_vm11 = vcmp.lt.s32.totalorder %v7672_v2, 31  ;;  %6914 = vrot.lane.b32.xlu0 %v11254_v10, %s7338_s7 }
 0x169   : > { %11403 = vst [vmem:[#allocation13_spill] sm:$0xff] %v11402_v6  ;;  %v6667_v57 = vunpack.i.h.bf16 %v6665_v9  ;;  %v6666_v39 = vunpack.i.l.bf16 %v6665_v9  ;;  %vm8981_vm13 = vmand %vm11404_vm7, %vm8926_vm1  ;;  %v1550_v16 = vsel %vm11407_vm11, %v6657_v41, %v6662_v38  ;;  %v11409_v49 = vunpack.i.l.bf16 %v8673_v23 }
 0x16a   : > { %vm11408_vm8 = vmmov %vm11407_vm11  ;;  %v11411_v18 = vunpack.i.h.bf16 %v8673_v23 }
 0x16b   : > { %v1549_v55 = vsel %vm11408_vm8, %v6656_v1, %v6661_v8  ;;  %vm11410_vm5 = vmmov %vm11408_vm8  ;;  %vm11414_vm8 = vcmp.ne.s32.totalorder %v7912_v63, 0  ;;  %v11452_v63 = vld [vmem:[#allocation47_spill] sm:$0xff] }
 0x16c   : > { %v1543_v45 = vsel %vm11410_vm5, %v6671_v13, %v11409_v49  ;;  %vm11412_vm9 = vmmov %vm11410_vm5  ;;  %v1546_v23 = vsel %vm11410_vm5, %v6667_v57, %v6672_v32  ;;  %6924 = vrot.lane.b32.xlu0 %v11273_v62, %s7338_s7 }
 0x16d   : > { %v1544_v43 = vsel %vm11412_vm9, %v6672_v32, %v11411_v18  ;;  %vm11413_vm7 = vmpackc.low %vm8864_vm15, %vm8864_vm15 }
 0x16e   : > { %5756 = vmatprep.subr.msk.bf16.mxu1 %vm11413_vm7, %v5755_v11  ;;  %vm9006_vm11 = vmand %vm11414_vm8, %vm8964_vm2  ;;  %v5769_v41 = vpack.c.bf16 %v1544_v43, %v1543_v45  ;;  %v6680_v11 = vpop.permute.xlu1 %6679 }
 0x16f   : > { %vm11417_vm9 = vmmov %vm11410_vm5  ;;  %v6682_v45 = vunpack.i.h.bf16 %v6680_v11 }
 0x170   : > { %v1548_v9 = vsel %vm11417_vm9, %v6662_v38, %v6667_v57  ;;  %vm11418_vm1 = vmmov %vm11410_vm5  ;;  %v6681_v57 = vunpack.i.l.bf16 %v6680_v11  ;;  %v6675_v38 = vpop.permute.xlu0 %6674  ;;  %6934 = vrot.lane.b32.xlu0 %v11291_v54, %s7338_s7 }
 0x171   : > { %v1545_v33 = vsel %vm11418_vm1, %v6666_v39, %v6671_v13  ;;  %vm11419_vm15 = vmpackc.low %vm8899_vm14, %vm8899_vm14  ;;  %v6677_v3 = vunpack.i.h.bf16 %v6675_v38  ;;  %v6676_v18 = vunpack.i.l.bf16 %v6675_v38  ;;  %vm11421_vm14 = vcmask 130048   ;;  %v11608_v38 = vld [vmem:[#allocation30_spill] sm:$0xff] }
 0x172   : > { %5759 = vmatpush1.bf16.msk.msra.mxu1 %vm11419_vm15, %v5758_v17  ;;  %vm5761_vm7 = vmpackc.low %vm8958_vm0, %vm8958_vm0  ;;  %v5772_v49 = vpack.c.bf16 %v1546_v23, %v1545_v33  ;;  %5753 = vmatmul.mubr.msk.bf16.vlgmr.msra.gmra.mrb[8].mxu0 %vm11421_vm14, %v8743_v25  ;;  %v6690_v14 = vpop.permute.xlu1 %6689 }
 0x173   : > { %vm11420_vm8 = vmmov %vm11418_vm1  ;;  %v6692_v43 = vunpack.i.h.bf16 %v6690_v14  ;;  %v6691_v1 = vunpack.i.l.bf16 %v6690_v14  ;;  %1972 = vmatprep.mubr.bf16.mxu0 %v11087_v47 }
 0x174   : > { %v1547_v32 = vsel %vm11420_vm8, %v6661_v8, %v6666_v39  ;;  %vm5771_vm1 = vmpackc.low %vm8981_vm13, %vm8981_vm13  ;;  %v5765_v39 = vpack.c.bf16 %v1550_v16, %v1549_v55  ;;  %v11424_v8 = vld [vmem:[#allocation17_spill] sm:$0xff]  ;;  %vm11425_vm13 = vcmp.lt.s32.totalorder %v7672_v2, 1  ;;  %6944 = vrot.lane.b32.xlu0 %v7584_v34, %s7338_s7 }
 0x175   : > { %v5762_v13 = vpack.c.bf16 %v1548_v9, %v1547_v32  ;;  %vm11422_vm5 = vmpackc.low %vm8920_vm12, %vm8920_vm12  ;;  %6949 = vrot.lane.b32.xlu1 %v11424_v8, %s7338_s7  ;;  %v2152_v17 = vsel %vm11425_vm13, %v6677_v3, %v6682_v45 }
 0x176   : > { %5770 = vmatprep.subr.msk.bf16.mxu1 %vm11422_vm5, %v5769_v41  ;;  %vm5764_vm9 = vmpackc.low %vm9006_vm11, %vm9006_vm11  ;;  %v6685_v41 = vpop.permute.xlu0 %6684 }
 0x177   : > { %vm11423_vm15 = vmmov %vm11421_vm14  ;;  %5763 = vmatprep.subr.msk.bf16.mxu0 %vm5761_vm7, %v5762_v13  ;;  %v6687_v23 = vunpack.i.h.bf16 %v6685_v41  ;;  %v6686_v9 = vunpack.i.l.bf16 %v6685_v41 }
 0x178   : > { %5760 = vmatmul.mubr.msk.bf16.vlgmr.msra.gmra.mrb[8].mxu1 %vm11423_vm15, %v8743_v25  ;;  %vm11426_vm8 = vmmov %vm11425_vm13  ;;  %5766 = vmatpush1.bf16.msk.msra.mxu0 %vm5764_vm9, %v5765_v39 }
 0x179   : > { %v2151_v61 = vsel %vm11426_vm8, %v6676_v18, %v6681_v57  ;;  %5773 = vmatpush1.bf16.msk.msra.mxu1 %vm5771_vm1, %v5772_v49  ;;  %vm5776_vm12 = vmpackc.low %vm7945_vm10, %vm7945_vm10  ;;  %2015 = vmatprep.mubr.bf16.mxu1 %v11087_v47  ;;  %v6700_v49 = vpop.permute.xlu1 %6699 }
 0x17a   : > { %v5777_v55 = vpack.c.bf16 %v2152_v17, %v2151_v61  ;;  %6959 = vrot.lane.b32.xlu1 %v7608_v53, %s7338_s7  ;;  %vm11428_vm0 = vmmov %vm11426_vm8  ;;  %v9072_v17 = vpop.permute.xlu0 %6694  ;;  %v11433_v61 = vld [vmem:[#allocation43_spill] sm:$0xff]  ;;  %v6702_v14 = vunpack.i.h.bf16 %v6700_v49  ;;  %6954 = vrot.lane.b32.xlu0 %v11336_v42, %s7338_s7 }
 0x17b   : > { %v2148_v46 = vsel %vm11428_vm0, %v6687_v23, %v6692_v43  ;;  %vm11429_vm11 = vmmov %vm11428_vm0  ;;  %vm11434_vm5 = vnez %v11433_v61  ;;  %5767 = vmatmul.mubr.msk.bf16.vlgmr.msra.gmra.mrb[12].mxu0 %vm11423_vm15, %v8743_v25 }
 0x17c   : > { %5778 = vmatprep.subr.msk.bf16.mxu0 %vm5776_vm12, %v5777_v55  ;;  %v2150_v33 = vsel %vm11429_vm11, %v6682_v45, %v6687_v23  ;;  %vm11430_vm7 = vmmov %vm11428_vm0  ;;  %v10989_v45 = vunpack.i.h.bf16 %v9072_v17  ;;  %v6701_v55 = vunpack.i.l.bf16 %v6700_v49  ;;  %2278 = vmatprep.mubr.bf16.mxu0 %v11087_v47 }
 0x17d   : > { %v2147_v11 = vsel %vm11430_vm7, %v6686_v9, %v6691_v1  ;;  %vm11431_vm1 = vmmov %vm11428_vm0 }
 0x17e   : > { %v2149_v32 = vsel %vm11431_vm1, %v6681_v57, %v6686_v9  ;;  %vm5783_vm14 = vmpackc.low %vm7987_vm3, %vm7987_vm3  ;;  %v5784_v13 = vpack.c.bf16 %v2148_v46, %v2147_v11  ;;  %v10990_v57 = vunpack.i.l.bf16 %v9072_v17  ;;  %v6710_v9 = vpop.permute.xlu1 %6709  ;;  %6969 = vrot.lane.b32.xlu1 %v7618_v59, %s7338_s7  ;;  %v11438_v46 = vld [vmem:[#allocation44_spill] sm:$0xff]  ;;  %v2146_v49 = vsel %vm11431_vm1, %v6692_v43, %v6702_v14  ;;  %v11445_v43 = vld [vmem:[#allocation46_spill] sm:$0xff]  ;;  %6964 = vrot.lane.b32.xlu0 %v11361_v52, %s7338_s7 }
 0x17f   : > { %v5787_v39 = vpack.c.bf16 %v2150_v33, %v2149_v32  ;;  %vm5786_vm9 = vmpackc.low %vm11434_vm5, %vm11434_vm5  ;;  %v6705_v33 = vpop.permute.xlu0 %6704  ;;  %v9101_v32 = vld [vmem:[#allocation5 + $0x18] sm:$0xff]  }
 0x180   : > { %vm11435_vm13 = vmmov %vm11423_vm15  ;;  %5785 = vmatprep.subr.msk.bf16.mxu1 %vm5783_vm14, %v5784_v13  ;;  %v6706_v11 = vunpack.i.l.bf16 %v6705_v33  ;;  %v6712_v13 = vunpack.i.h.bf16 %v6710_v9 }
 0x181   : > { %5774 = vmatmul.mubr.msk.bf16.vlgmr.msra.gmra.mrb[12].mxu1 %vm11435_vm13, %v8743_v25  ;;  %vm11436_vm8 = vmmov %vm11428_vm0 }
 0x182   : > { %v2153_v41 = vsel %vm11436_vm8, %v10990_v57, %v6676_v18  ;;  %vm11437_vm12 = vmmov %vm11428_vm0  ;;  %5788 = vmatpush1.bf16.msk.msra.mxu1 %vm5786_vm9, %v5787_v39  ;;  %vm11439_vm0 = vnez %v11438_v46  ;;  %v6707_v18 = vunpack.i.h.bf16 %v6705_v33  ;;  %2321 = vmatprep.mubr.bf16.mxu1 %v11087_v47  ;;  %v6711_v39 = vunpack.i.l.bf16 %v6710_v9  ;;  %v6720_v33 = vpop.permute.xlu1 %6719 }
 0x183   : > { %v2154_v23 = vsel %vm11437_vm12, %v10989_v45, %v6677_v3  ;;  %vm5779_vm11 = vmpackc.low %vm11439_vm0, %vm11439_vm0  ;;  %6979 = vrot.lane.b32.xlu1 %v7630_v0, %s7338_s7  ;;  %v11443_v45 = vld [vmem:[#allocation45_spill] sm:$0xff]  ;;  %v6715_v57 = vpop.permute.xlu0 %6714  ;;  %vm11446_vm8 = vnez %v11445_v43  ;;  %v6721_v27 = vunpack.i.l.bf16 %v6720_v33  ;;  %6974 = vrot.lane.b32.xlu0 %v11383_v26, %s7338_s7 }
 0x184   : > { %v5780_v25 = vpack.c.bf16 %v2154_v23, %v2153_v41  ;;  %vm11440_vm7 = vmmov %vm11431_vm1  ;;  %vm11444_vm15 = vnez %v11443_v45  ;;  %v6717_v9 = vunpack.i.h.bf16 %v6715_v57 }
 0x185   : > { %v2145_v3 = vsel %vm11440_vm7, %v6691_v1, %v6701_v55  ;;  %vm11441_vm14 = vmmov %vm11431_vm1 }
 0x186   : > { %5781 = vmatpush1.bf16.msk.msra.mxu0 %vm5779_vm11, %v5780_v25  ;;  %v2144_v41 = vsel %vm11441_vm14, %v6702_v14, %v6707_v18  ;;  %vm11442_vm9 = vmmov %vm11431_vm1  ;;  %v5794_v14 = vpack.c.bf16 %v2146_v49, %v2145_v3  ;;  %vm11447_vm11 = vcmask 130048   ;;  %v6730_v49 = vpop.permute.xlu1 %6729 }
 0x187   : > { %v2143_v23 = vsel %vm11442_vm9, %v6701_v55, %v6706_v11  ;;  %vm5790_vm13 = vmpackc.low %vm11444_vm15, %vm11444_vm15  ;;  %v6716_v55 = vunpack.i.l.bf16 %v6715_v57  ;;  %6989 = vrot.lane.b32.xlu1 %v7580_v31, %s7338_s7  ;;  %v6731_v51 = vunpack.i.l.bf16 %v6730_v49  ;;  %6984 = vrot.lane.b32.xlu0 %v11216_v35, %s7338_s7 }
 0x188   : > { %v5791_v1 = vpack.c.bf16 %v2144_v41, %v2143_v23  ;;  %vm5793_vm12 = vmpackc.low %vm11446_vm8, %vm11446_vm8  ;;  %v2141_v41 = vsel %vm11431_vm1, %v6706_v11, %v6711_v39  ;;  %v6722_v23 = vunpack.i.h.bf16 %v6720_v33  ;;  %v6725_v11 = vpop.permute.xlu0 %6724  ;;  %v11454_v33 = vld [vmem:[#allocation48_spill] sm:$0xff] }
 0x189   : > { %5782 = vmatmul.mubr.msk.bf16.vlgmr.msra.gmra.mrb[0].mxu0 %vm11447_vm11, %v9101_v32  ;;  %vm11448_vm7 = vmmov %vm11431_vm1 }
 0x18a   : > { %v2142_v25 = vsel %vm11448_vm7, %v6707_v18, %v6712_v13  ;;  %vm11449_vm14 = vmmov %vm11447_vm11  ;;  %5792 = vmatprep.subr.msk.bf16.mxu0 %vm5790_vm13, %v5791_v1  ;;  %vm11453_vm11 = vnez %v11452_v63  ;;  %vm11455_vm13 = vnez %v11454_v33  ;;  %v6726_v1 = vunpack.i.l.bf16 %v6725_v11  ;;  %2364 = vmatprep.mubr.bf16.mxu0 %v11087_v47 }
 0x18b   : > { %5789 = vmatmul.mubr.msk.bf16.vlgmr.msra.gmra.mrb[0].mxu1 %vm11449_vm14, %v9101_v32  ;;  %vm11450_vm9 = vmmov %vm11431_vm1  ;;  %5795 = vmatpush1.bf16.msk.msra.mxu0 %vm5793_vm12, %v5794_v14 }
 0x18c   : > { %v2140_v3 = vsel %vm11450_vm9, %v6712_v13, %v6717_v9  ;;  %vm11451_vm8 = vmmov %vm11431_vm1  ;;  %v5801_v13 = vpack.c.bf16 %v2142_v25, %v2141_v41  ;;  %2407 = vmatprep.mubr.bf16.mxu1 %v11087_v47  ;;  %v6740_v41 = vpop.permute.xlu1 %6739  ;;  %6999 = vrot.lane.b32.xlu1 %v11346_v21, %s7339_s6 }
 0x18d   : > { %v2139_v57 = vsel %vm11451_vm8, %v6711_v39, %v6716_v55  ;;  %vm5797_vm7 = vmpackc.low %vm11453_vm11, %vm11453_vm11  ;;  %v6727_v39 = vunpack.i.h.bf16 %v6725_v11  ;;  %v2138_v14 = vsel %vm11451_vm8, %v6717_v9, %v6722_v23  ;;  %v11459_v11 = vld [vmem:[#allocation49_spill] sm:$0xff]  ;;  %v6735_v9 = vpop.permute.xlu0 %6734  ;;  %v6742_v21 = vunpack.i.h.bf16 %v6740_v41  ;;  %6994 = vrot.lane.b32.xlu0 %v11254_v10, %s7339_s6  ;;  %v7152_v10 = vld [vmem:[%s7534_s30 + $0x10] sm:$0xff] }
 0x18e   : > { %v5798_v18 = vpack.c.bf16 %v2140_v3, %v2139_v57  ;;  %vm5800_vm1 = vmpackc.low %vm11455_vm13, %vm11455_vm13  ;;  %v6732_v57 = vunpack.i.h.bf16 %v6730_v49  ;;  %vm11460_vm13 = vnez %v11459_v11  ;;  %v6736_v49 = vunpack.i.l.bf16 %v6735_v9 }
 0x18f   : > { %vm11456_vm12 = vmmov %vm11451_vm8  ;;  %v11476_v11 = vunpack.i.h.bf16 %v9072_v17 }
 0x190   : > { %v2137_v3 = vsel %vm11456_vm12, %v6716_v55, %v6721_v27  ;;  %5799 = vmatprep.subr.msk.bf16.mxu1 %vm5797_vm7, %v5798_v18  ;;  %vm11457_vm14 = vmmov %vm11451_vm8  ;;  %v11461_v55 = vld [vmem:[#allocation50_spill] sm:$0xff]  ;;  %7009 = vrot.lane.b32.xlu1 %v7576_v28, %s7339_s6 }
 0x191   : > { %v2136_v33 = vsel %vm11457_vm14, %v6722_v23, %v6727_v39  ;;  %vm11458_vm9 = vmmov %vm11451_vm8  ;;  %5802 = vmatpush1.bf16.msk.msra.mxu1 %vm5800_vm1, %v5801_v13  ;;  %vm11462_vm7 = vnez %v11461_v55  ;;  %v6737_v23 = vunpack.i.h.bf16 %v6735_v9  ;;  %vm11463_vm1 = vcmask 130048   ;;  %v6745_v55 = vpop.permute.xlu0 %6744  ;;  %7004 = vrot.lane.b32.xlu0 %v11273_v62, %s7339_s6 }
 0x192   : > { %v2135_v25 = vsel %vm11458_vm9, %v6721_v27, %v6726_v1  ;;  %vm5804_vm11 = vmpackc.low %vm11460_vm13, %vm11460_vm13  ;;  %v5808_v27 = vpack.c.bf16 %v2138_v14, %v2137_v3  ;;  %5796 = vmatmul.mubr.msk.bf16.vlgmr.msra.gmra.mrb[4].mxu0 %vm11463_vm1, %v9101_v32  ;;  %v6741_v13 = vunpack.i.l.bf16 %v6740_v41  ;;  %v6750_v3 = vpop.permute.xlu1 %6749 }
 0x193   : > { %v5805_v43 = vpack.c.bf16 %v2136_v33, %v2135_v25  ;;  %vm5807_vm8 = vmpackc.low %vm11462_vm7, %vm11462_vm7  ;;  %v6752_v41 = vunpack.i.h.bf16 %v6750_v3  ;;  %v6751_v9 = vunpack.i.l.bf16 %v6750_v3  ;;  %2450 = vmatprep.mubr.bf16.mxu0 %v11087_v47 }
 0x194   : > { %vm11464_vm12 = vmmov %vm11458_vm9  ;;  %7019 = vrot.lane.b32.xlu1 %v7588_v37, %s7339_s6  ;;  %v7148_v37 = vld [vmem:[%s7534_s30] sm:$0xff] }
 0x195   : > { %v2134_v18 = vsel %vm11464_vm12, %v6727_v39, %v6732_v57  ;;  %vm11465_vm14 = vmmov %vm11458_vm9  ;;  %5806 = vmatprep.subr.msk.bf16.mxu0 %vm5804_vm11, %v5805_v43  ;;  %v11471_v43 = vld [vmem:[#allocation32_spill] sm:$0xff]  ;;  %7014 = vrot.lane.b32.xlu0 %v11291_v54, %s7339_s6  ;;  %v7157_v54 = vld [vmem:[%s7534_s30 + $0x60] sm:$0xff] }
 0x196   : > { %v2133_v33 = vsel %vm11465_vm14, %v6726_v1, %v6731_v51  ;;  %vm11466_vm9 = vmmov %vm11463_vm1  ;;  %5809 = vmatpush1.bf16.msk.msra.mxu0 %vm5807_vm8, %v5808_v27  ;;  %v11469_v1 = vld [vmem:[#allocation51_spill] sm:$0xff]  ;;  %vm11472_vm11 = vnez %v11471_v43  ;;  %v6746_v27 = vunpack.i.l.bf16 %v6745_v55  ;;  %v11646_v43 = vld [vmem:[#allocation52_spill] sm:$0xff] }
 0x197   : > { %5803 = vmatmul.mubr.msk.bf16.vlgmr.msra.gmra.mrb[4].mxu1 %vm11466_vm9, %v9101_v32  ;;  %vm11467_vm7 = vmmov %vm11464_vm12  ;;  %vm11470_vm12 = vnez %v11469_v1 }
 0x198   : > { %v2132_v14 = vsel %vm11467_vm7, %v6732_v57, %v6737_v23  ;;  %vm11468_vm1 = vmmov %vm11467_vm7  ;;  %v6747_v57 = vunpack.i.h.bf16 %v6745_v55  ;;  %2493 = vmatprep.mubr.bf16.mxu1 %v11087_v47  ;;  %7029 = vrot.lane.b32.xlu1 %v11424_v8, %s7339_s6  ;;  %v7153_v8 = vld [vmem:[%s7534_s30 + $0x50] sm:$0xff] }
 0x199   : > { %v2131_v39 = vsel %vm11468_vm1, %v6731_v51, %v6736_v49  ;;  %vm5811_vm14 = vmpackc.low %vm11470_vm12, %vm11470_vm12  ;;  %v5815_v51 = vpack.c.bf16 %v2134_v18, %v2133_v33  ;;  %v11483_v33 = vld [vmem:[#allocation33_spill] sm:$0xff]  ;;  %7024 = vrot.lane.b32.xlu0 %v7584_v34, %s7339_s6 }
 0x19a   : > { %v5812_v25 = vpack.c.bf16 %v2132_v14, %v2131_v39  ;;  %vm11473_vm8 = vmmov %vm11468_vm1  ;;  %v11475_v39 = vunpack.i.l.bf16 %v9072_v17  ;;  %v2128_v17 = vsel %vm11468_vm1, %v6742_v21, %v6747_v57 }
 0x19b   : > { %v2130_v14 = vsel %vm11473_vm8, %v6737_v23, %v6742_v21  ;;  %vm11474_vm9 = vmmov %vm11468_vm1  ;;  %v11478_v23 = vld [vmem:[#allocation52_spill] sm:$0xff] }
 0x19c   : > { %v2129_v28 = vsel %vm11474_vm9, %v6736_v49, %v6741_v13  ;;  %v2123_v3 = vsel %vm11468_vm1, %v6751_v9, %v11475_v39  ;;  %vm11477_vm7 = vmmov %vm11468_vm1  ;;  %5813 = vmatprep.subr.msk.bf16.mxu1 %vm5811_vm14, %v5812_v25  ;;  %vm11479_vm8 = vnez %v11478_v23  ;;  %vm11484_vm14 = vnez %v11483_v33  ;;  %v9227_v25 = vpop.permute.xlu1 %6759  ;;  %v7151_v39 = vld [vmem:[%s7534_s30 + $0x48] sm:$0xff]  ;;  %7039 = vrot.lane.b32.xlu1 %v7608_v53, %s7339_s6 }
 0x19d   : > { %v2124_v55 = vsel %vm11477_vm7, %v6752_v41, %v11476_v11  ;;  %vm5825_vm9 = vmpackc.low %vm11479_vm8, %vm11479_vm8  ;;  %7034 = vrot.lane.b32.xlu0 %v11336_v42, %s7339_s6 }
 0x19e   : > { %v5826_v49 = vpack.c.bf16 %v2124_v55, %v2123_v3  ;;  %vm11480_vm13 = vmmov %vm11468_vm1  ;;  %v9250_v55 = vpop.permute.xlu0 %6754 }
 0x19f   : > { %v2126_v18 = vsel %vm11480_vm13, %v6747_v57, %v6752_v41  ;;  %vm11481_vm15 = vmmov %vm11468_vm1  ;;  %v6757_v42 = vunpack.i.h.bf16 %v9250_v55 }
 0x1a0   : > { %v2125_v11 = vsel %vm11481_vm15, %v6746_v27, %v6751_v9  ;;  %vm11482_vm7 = vmpackc.low %vm11472_vm11, %vm11472_vm11  ;;  %7049 = vrot.lane.b32.xlu1 %v7618_v59, %s7339_s6  ;;  %v7156_v59 = vld [vmem:[%s7534_s30 + $0x20] sm:$0xff] }
 0x1a1   : > { %5816 = vmatpush1.bf16.msk.msra.mxu1 %vm11482_vm7, %v5815_v51  ;;  %vm11485_vm13 = vmmov %vm11468_vm1  ;;  %v5829_v41 = vpack.c.bf16 %v2126_v18, %v2125_v11  ;;  %vm11486_vm1 = vcmask 130048   ;;  %vm11487_vm7 = vnez %v11230_v48  ;;  %v7149_v51 = vld [vmem:[%s7534_s30 + $0x40] sm:$0xff]  ;;  %v5838_v11 = vcombine.high %v7152_v10, %v7153_v8  ;;  %7044 = vrot.lane.b32.xlu0 %v11361_v52, %s7339_s6 }
 0x1a2   : > { %v2127_v21 = vsel %vm11485_vm13, %v6741_v13, %v6746_v27  ;;  %vm5828_vm15 = vmpackc.low %vm8463_vm6, %vm8463_vm6  ;;  %5810 = vmatmul.mubr.msk.bf16.vlgmr.msra.gmra.mrb[8].mxu0 %vm11486_vm1, %v9101_v32  ;;  %5827 = vmatprep.subr.msk.bf16.mxu1 %vm5825_vm9, %v5826_v49  ;;  %v5822_v13 = vpack.c.bf16 %v2130_v14, %v2129_v28  ;;  %v5834_v57 = vcombine.high %v7148_v37, %v7149_v51  ;;  %v7150_v27 = vld [vmem:[%s7534_s30 + $0x8] sm:$0xff]  ;;  %v9262_v14 = vpop.permute.xlu1 %6769  ;;  %v9269_v49 = vpop.permute.xlu0 %6764 }
 0x1a3   : > { %v5819_v9 = vpack.c.bf16 %v2128_v17, %v2127_v21  ;;  %vm5821_vm13 = vmpackc.low %vm11487_vm7, %vm11487_vm7  ;;  %2536 = vmatprep.mubr.bf16.mxu0 %v11087_v47  ;;  %v5836_v3 = vcombine.high %v7150_v27, %v7151_v39  ;;  %v5833_v28 = vcombine.low %v7148_v37, %v7149_v51  ;;  %v5835_v18 = vcombine.low %v7150_v27, %v7151_v39  ;;  %v7154_v21 = vld [vmem:[%s7534_s30 + $0x18] sm:$0xff]  ;;  %v7158_v27 = vld [vmem:[%s7534_s30 + $0x28] sm:$0xff] }
 0x1a4   : > { %vm11488_vm8 = vmmov %vm11486_vm1  ;;  %7059 = vrot.lane.b32.xlu1 %v7630_v0, %s7339_s6  ;;  %v7159_v39 = vld [vmem:[%s7534_s30 + $0x68] sm:$0xff]  ;;  %v5841_v0 = vcombine.low %v7156_v59, %v7157_v54 }
 0x1a5   : > { %5817 = vmatmul.mubr.msk.bf16.vlgmr.msra.gmra.mrb[8].mxu1 %vm11488_vm8, %v9101_v32  ;;  %vm11489_vm9 = vmpackc.low %vm11484_vm14, %vm11484_vm14  ;;  %7054 = vrot.lane.b32.xlu0 %v11383_v26, %s7339_s6  ;;  %vm11545_vm14 = vcmask 130048  }
 0x1a6   : > { %5820 = vmatprep.subr.msk.bf16.mxu0 %vm11489_vm9, %v5819_v9  ;;  %5830 = vmatpush1.bf16.msk.msra.mxu1 %vm5828_vm15, %v5829_v41  ;;  %v9271_v17 = vpop.permute.xlu1 %6779  ;;  %vm11490_vm8 = vmmov %vm11486_vm1  ;;  %v7155_v41 = vld [vmem:[%s7534_s30 + $0x58] sm:$0xff]  ;;  %v9291_v62 = vpop.permute.xlu0 %6774  ;;  %vm11004_vm9 = vcmp.lt.s32.totalorder %v7672_v2, 127 }
 0x1a7   : > { %5823 = vmatpush1.bf16.msk.msra.mxu0 %vm5821_vm13, %v5822_v13  ;;  %2579 = vmatprep.mubr.bf16.mxu1 %v11087_v47  ;;  %vm11491_vm15 = vmmov %vm11486_vm1  ;;  %v5840_v9 = vcombine.high %v7154_v21, %v7155_v41  ;;  %v5837_v13 = vcombine.low %v7152_v10, %v7153_v8  ;;  %v5839_v37 = vcombine.low %v7154_v21, %v7155_v41  ;;  %v7160_v8 = vld [vmem:[%s7534_s30 + $0x30] sm:$0xff]  ;;  %v7162_v41 = vld [vmem:[%s7534_s30 + $0x38] sm:$0xff] }
 0x1a8   : > { %2713 = vmatprep.subr.bf16.mxu0 %v5834_v57  ;;  %2756 = vmatprep.subr.bf16.mxu1 %v5836_v3  ;;  %v5842_v57 = vcombine.high %v7156_v59, %v7157_v54  ;;  %vm11492_vm13 = vmmov %vm11486_vm1  ;;  %v5844_v3 = vcombine.high %v7158_v27, %v7159_v39  ;;  %v11002_v59 = vunpack.i.h.bf16 %v9262_v14  ;;  %v11003_v54 = vunpack.i.l.bf16 %v9262_v14 }
 0x1a9   : > { %7069 = vrot.lane.b32.xlu1 %v7580_v31, %s7339_s6  ;;  %v6762_v31 = vunpack.i.h.bf16 %v9227_v25  ;;  %7064 = vrot.lane.b32.xlu0 %v11216_v35, %s7339_s6  ;;  %v6781_v35 = vunpack.i.l.bf16 %v9271_v17 }
 0x1aa   : > { %5824 = vmatmul.mubr.msk.bf16.vlgmr.msra.gmra.mrb[12].mxu0 %vm11490_vm8, %v9101_v32  ;;  %v9286_v53 = vpop.permute.xlu1 %6789  ;;  %vm11493_vm8 = vmmov %vm11486_vm1 }
 0x1ab   : > { %2714 = vmatpush1.bf16.msra.mxu0 %v5833_v28  ;;  %2745 = vmatprep.mubr.bf16.mxu0 %v11087_v47  ;;  %v9311_v28 = vpop.permute.xlu0 %6784 }
 0x1ac   : > { %2799 = vmatprep.subr.bf16.mxu0 %v5838_v11  ;;  %v7161_v11 = vld [vmem:[%s7534_s30 + $0x70] sm:$0xff]  ;;  %v6787_v26 = vunpack.i.h.bf16 %v9311_v28 }
 0x1ad   : > { %5831 = vmatmul.mubr.msk.bf16.vlgmr.msra.gmra.mrb[12].mxu1 %vm11491_vm15, %v9101_v32  ;;  %v9295_v32 = vld [vmem:[#allocation5 + $0x20] sm:$0xff]   ;;  %v5846_v21 = vcombine.high %v7160_v8, %v7161_v11  ;;  %vm11494_vm15 = vmmov %vm11486_vm1 }
 0x1ae   : > { %2757 = vmatpush1.bf16.msra.mxu1 %v5835_v18  ;;  %2788 = vmatprep.mubr.bf16.mxu1 %v11087_v47  ;;  %v9297_v51 = vpop.permute.xlu1 %6799  ;;  %v5843_v18 = vcombine.low %v7158_v27, %v7159_v39  ;;  %v6767_v27 = vunpack.i.h.bf16 %v9269_v49  ;;  %v6766_v39 = vunpack.i.l.bf16 %v9269_v49 }
 0x1af   : > { %2842 = vmatprep.subr.bf16.mxu1 %v5840_v9  ;;  %v7163_v9 = vld [vmem:[%s7534_s30 + $0x78] sm:$0xff]  ;;  %v9332_v56 = vpop.permute.xlu0 %6794  ;;  %s7340_s30 = smov [#allocation8]  }
 0x1b0   : > { %v3177_v52 = vsel %vm11004_vm9, %v6767_v27, %v11002_v59  ;;  %v3176_v49 = vsel %vm11004_vm9, %v6766_v39, %v11003_v54  ;;  %v5847_v33 = vcombine.low %v7162_v41, %v7163_v9  ;;  %v11007_v59 = vunpack.i.h.bf16 %v9291_v62  ;;  %s7254_s23 = sshll.u32 %s7340_s30, 4  ;;  %s7255_s23 = int_to_ptr.vmem [resolvable:$false] %s7254_s23 }
 0x1b1   : > { %v5866_v23 = vpack.c.bf16 %v3177_v52, %v3176_v49  ;;  %v11008_v54 = vunpack.i.l.bf16 %v9291_v62  ;;  %s7256_s26 = scalar_lea.vmem %s7255_s23, 8192  ;;  %p7257_p4 = scmp.lt.s32.totalorder %s10769_s19, %s7255_s23 }
 0x1b2   : > { %5849 = vmatmul.mubr.msk.bf16.vlgmr.msra.gmra.mrb[0].mxu0 %vm11486_vm1, %v9295_v32  ;;  %v9314_v34 = vpop.permute.xlu1 %6809  ;;  %vm11495_vm1 = vnez %v11247_v58  ;;  %p7258_p0 = scmp.lt.s32.totalorder %s7256_s26, %s7250_s27 }
 0x1b3   : > { %2800 = vmatpush1.bf16.msra.mxu0 %v5837_v13  ;;  %2831 = vmatprep.mubr.bf16.mxu0 %v11087_v47  ;;  %v5848_v13 = vcombine.high %v7162_v41, %v7163_v9  ;;  %v6791_v41 = vunpack.i.l.bf16 %v9286_v53  ;;  %v6797_v9 = vunpack.i.h.bf16 %v9332_v56 }
 0x1b4   : > { %2885 = vmatprep.subr.bf16.mxu0 %v5842_v57  ;;  %v6756_v57 = vunpack.i.l.bf16 %v9250_v55  ;;  %v3181_v55 = vsel %vm11004_vm9, %v6757_v42, %v6762_v31  ;;  %p7259_p7 = por %p7258_p0, %p7257_p4 }
 0x1b5   : > { %5850 = vmatmul.mubr.msk.bf16.vlgmr.msra.gmra.mrb[0].mxu1 %vm11492_vm13, %v9295_v32  ;;  %vm5858_vm13 = vmpackc.low %vm11495_vm1, %vm11495_vm1 }
 0x1b6   : > { %2843 = vmatpush1.bf16.msra.mxu1 %v5839_v37  ;;  %2874 = vmatprep.mubr.bf16.mxu1 %v11087_v47  ;;  %v9322_v10 = vpop.permute.xlu1 %6819  ;;  %v6761_v37 = vunpack.i.l.bf16 %v9227_v25  ;;  %p7260_p5 = pnand %p7259_p7, %p7253_p1 }
 0x1b7   : > { %2928 = vmatprep.subr.bf16.mxu1 %v5844_v3 }
 0x1b8   : > { %v3180_v3 = vsel %vm11004_vm9, %v6756_v57, %v6761_v37 }
 0x1b9   : > { %v5859_v48 = vpack.c.bf16 %v3181_v55, %v3180_v3 }
 0x1ba   : > { %5851 = vmatmul.mubr.msk.bf16.vlgmr.msra.gmra.mrb[4].mxu0 %vm11493_vm8, %v9295_v32  ;;  %v9345_v25 = vpop.permute.xlu1 %6829 }
 0x1bb   : > { %2886 = vmatpush1.bf16.msra.mxu0 %v5841_v0  ;;  %2917 = vmatprep.mubr.bf16.mxu0 %v11087_v47  ;;  %v5845_v0 = vcombine.low %v7160_v8, %v7161_v11  ;;  %v6786_v8 = vunpack.i.l.bf16 %v9311_v28  ;;  %v6792_v11 = vunpack.i.h.bf16 %v9286_v53  ;;  %v6782_v28 = vunpack.i.h.bf16 %v9271_v17 }
 0x1bc   : > { %2971 = vmatprep.subr.bf16.mxu0 %v5846_v21 }
 0x1bd   : > { %5852 = vmatmul.mubr.msk.bf16.vlgmr.msra.gmra.mrb[4].mxu1 %vm11494_vm15, %v9295_v32  ;;  %vm11496_vm15 = vmmov %vm11493_vm8 }
 0x1be   : > { %2929 = vmatpush1.bf16.msra.mxu1 %v5843_v18  ;;  %2960 = vmatprep.mubr.bf16.mxu1 %v11087_v47  ;;  %v9362_v18 = vpop.permute.xlu0 %6804  ;;  %v9364_v21 = vpop.permute.xlu1 %6839 }
 0x1bf   : > { %3014 = vmatprep.subr.bf16.mxu1 %v5848_v13  ;;  %v11010_v13 = vunpack.i.l.bf16 %v9332_v56 }
 0x1c2   : > { %5853 = vmatmul.mubr.msk.bf16.vlgmr.msra.gmra.mrb[8].mxu0 %vm11493_vm8, %v9295_v32  ;;  %vm11497_vm8 = vnez %v11250_v40  ;;  %v9393_v53 = vpop.permute.xlu1 %6849  ;;  %v9395_v55 = vpop.permute.xlu0 %6814 }
 0x1c3   : > { %2972 = vmatpush1.bf16.msra.mxu0 %v5845_v0  ;;  %vm5865_vm9 = vmpackc.low %vm11497_vm8, %vm11497_vm8  ;;  %3003 = vmatprep.mubr.bf16.mxu0 %v11087_v47  ;;  %v6807_v0 = vunpack.i.h.bf16 %v9362_v18 }
 0x1c4   : > { %5860 = vmatprep.subr.msk.bf16.mxu0 %vm5858_vm13, %v5859_v48 }
 0x1c5   : > { %5854 = vmatmul.mubr.msk.bf16.vlgmr.msra.gmra.mrb[8].mxu1 %vm11496_vm15, %v9295_v32  ;;  %vm11498_vm15 = vcmp.lt.s32.totalorder %v7672_v2, 127 }
 0x1c6   : > { %3015 = vmatpush1.bf16.msra.mxu1 %v5847_v33  ;;  %v3179_v3 = vsel %vm11498_vm15, %v6762_v31, %v6767_v27  ;;  %vm11499_vm8 = vmmov %vm11498_vm15  ;;  %3046 = vmatprep.mubr.bf16.mxu1 %v11087_v47 }
 0x1c7   : > { %v3178_v52 = vsel %vm11499_vm8, %v6761_v37, %v6766_v39  ;;  %vm11500_vm6 = vmmov %vm11499_vm8  ;;  %5867 = vmatprep.subr.msk.bf16.mxu1 %vm5865_vm9, %v5866_v23  ;;  %vm11507_vm9 = vnez %v11278_v7 }
 0x1c8   : > { %v3182_v33 = vsel %vm11500_vm6, %v11008_v54, %v6756_v57  ;;  %vm11501_vm13 = vmmov %vm11500_vm6  ;;  %v5869_v27 = vpack.c.bf16 %v3179_v3, %v3178_v52  ;;  %v6806_v3 = vunpack.i.l.bf16 %v9362_v18  ;;  %v9438_v52 = vpop.permute.xlu0 %6824  ;;  %v6802_v18 = vunpack.i.h.bf16 %v9297_v51 }
 0x1c9   : > { %v3183_v48 = vsel %vm11501_vm13, %v11007_v59, %v6757_v42  ;;  %vm11502_vm1 = vmmov %vm11500_vm6  ;;  %vm11506_vm13 = vnez %v11287_v20  ;;  %v9426_v42 = vpop.permute.xlu1 %6859 }
 0x1ca   : > { %v3173_v17 = vsel %vm11502_vm1, %v6782_v28, %v6787_v26  ;;  %vm11503_vm15 = vmmov %vm11502_vm1  ;;  %v5862_v39 = vpack.c.bf16 %v3183_v48, %v3182_v33  ;;  %v6812_v33 = vunpack.i.h.bf16 %v9314_v34  ;;  %v6811_v48 = vunpack.i.l.bf16 %v9314_v34  ;;  %v5377_v34 = vld [vmem:[#allocation7] sm:$0xff] }
 0x1cb   : > { %v3172_v31 = vsel %vm11503_vm15, %v6781_v35, %v6786_v8  ;;  %vm11504_vm8 = vmmov %vm11502_vm1  ;;  %vm11508_vm15 = vcmask 130048   ;;  %5381 = vperm.xlu0 %7073, %v5377_v34  }
 0x1cc   : > { %v3169_v37 = vsel %vm11504_vm8, %v6792_v11, %v6797_v9  ;;  %vm11505_vm6 = vmmov %vm11502_vm1  ;;  %v5873_v49 = vpack.c.bf16 %v3173_v17, %v3172_v31  ;;  %5855 = vmatmul.mubr.msk.bf16.vlgmr.msra.gmra.mrb[12].mxu0 %vm11508_vm15, %v9295_v32  ;;  %vm11509_vm8 = vnez %v11294_v50  ;;  %v6817_v17 = vunpack.i.h.bf16 %v9395_v55 }
 0x1cd   : > { %v3168_v57 = vsel %vm11505_vm6, %v6791_v41, %v11010_v13  ;;  %vm5861_vm7 = vmpackc.low %vm11506_vm13, %vm11506_vm13  ;;  %v6816_v31 = vunpack.i.l.bf16 %v9395_v55  ;;  %3309 = vmatprep.mubr.bf16.mxu0 %v11087_v47 }
 0x1ce   : > { %v5880_v23 = vpack.c.bf16 %v3169_v37, %v3168_v57  ;;  %5863 = vmatpush1.bf16.msk.msra.mxu0 %vm5861_vm7, %v5862_v39  ;;  %vm11510_vm1 = vmmov %vm11508_vm15  ;;  %vm11511_vm15 = vnez %v11313_v24  ;;  %v6801_v37 = vunpack.i.l.bf16 %v9297_v51  ;;  %v5378_v57 = vld [vmem:[#allocation7 + $0x8] sm:$0xff]  ;;  %v11513_v39 = vunpack.i.l.bf16 %v9262_v14 }
 0x1cf   : > { %5856 = vmatmul.mubr.msk.bf16.vlgmr.msra.gmra.mrb[12].mxu1 %vm11510_vm1, %v9295_v32  ;;  %vm11512_vm7 = vmpackc.low %vm11507_vm9, %vm11507_vm9  ;;  %v9457_v32 = vpop.permute.xlu1 %6869  ;;  %5386 = vperm.xlu1 %7074, %v5378_v57  }
 0x1d0   : > { %5870 = vmatpush1.bf16.msk.msra.mxu1 %vm11512_vm7, %v5869_v27  ;;  %vm11514_vm1 = vmmov %vm11505_vm6  ;;  %3352 = vmatprep.mubr.bf16.mxu1 %v11087_v47  ;;  %v11518_v27 = vunpack.i.h.bf16 %v9262_v14  ;;  %v6872_v46 = vunpack.i.h.bf16 %v9457_v32 }
 0x1d1   : > { %v3174_v59 = vsel %vm11514_vm1, %v11513_v39, %v6781_v35  ;;  %vm11515_vm13 = vmmov %vm11514_vm1  ;;  %v3165_v35 = vsel %vm11514_vm1, %v6802_v18, %v6807_v0  ;;  %v6827_v39 = vunpack.i.h.bf16 %v9438_v52 }
 0x1d2   : > { %v3171_v51 = vsel %vm11515_vm13, %v6787_v26, %v6792_v11  ;;  %vm11516_vm6 = vmmov %vm11514_vm1 }
 0x1d3   : > { %v3170_v54 = vsel %vm11516_vm6, %v6786_v8, %v6791_v41  ;;  %vm11517_vm7 = vmpackc.low %vm11509_vm8, %vm11509_vm8  ;;  %v9481_v8 = vld [vmem:[#allocation5 + $0x28] sm:$0xff]   ;;  %v9511_v57 = vpop.permute.xlu1 %6879 }
 0x1d4   : > { %5874 = vmatprep.subr.msk.bf16.mxu0 %vm11517_vm7, %v5873_v49  ;;  %vm11519_vm9 = vmmov %vm11514_vm1  ;;  %v5883_v41 = vpack.c.bf16 %v3171_v51, %v3170_v54  ;;  %v6826_v54 = vunpack.i.l.bf16 %v9438_v52  ;;  %v6832_v52 = vunpack.i.h.bf16 %v9345_v25  ;;  %v6831_v51 = vunpack.i.l.bf16 %v9345_v25 }
 0x1d5   : > { %v3175_v13 = vsel %vm11519_vm9, %v11518_v27, %v6782_v28  ;;  %vm11520_vm13 = vmmov %vm11514_vm1  ;;  %v9499_v28 = vpop.permute.xlu0 %6834 }
 0x1d6   : > { %v3164_v26 = vsel %vm11520_vm13, %v6801_v37, %v6806_v3  ;;  %vm11521_vm6 = vmpackc.low %vm11511_vm15, %vm11511_vm15  ;;  %v5876_v49 = vpack.c.bf16 %v3175_v13, %v3174_v59  ;;  %v6822_v59 = vunpack.i.h.bf16 %v9322_v10  ;;  %v6821_v13 = vunpack.i.l.bf16 %v9322_v10 }
 0x1d7   : > { %5881 = vmatprep.subr.msk.bf16.mxu1 %vm11521_vm6, %v5880_v23  ;;  %vm11522_vm7 = vmmov %vm11514_vm1  ;;  %v5887_v23 = vpack.c.bf16 %v3165_v35, %v3164_v26  ;;  %vm11525_vm6 = vnez %v11321_v4  ;;  %v11529_v35 = vunpack.i.l.bf16 %v9332_v56 }
 0x1d8   : > { %v3161_v14 = vsel %vm11522_vm7, %v6812_v33, %v6817_v17  ;;  %vm11523_vm9 = vmmov %vm11514_vm1  ;;  %vm11524_vm1 = vnez %v11304_v30  ;;  %vm11526_vm7 = vcmask 130048  }
 0x1d9   : > { %v3160_v11 = vsel %vm11523_vm9, %v6811_v48, %v6816_v31  ;;  %vm5875_vm13 = vmpackc.low %vm11524_vm1, %vm11524_vm1  ;;  %5864 = vmatmul.mubr.msk.bf16.vlgmr.msra.gmra.mrb[0].mxu0 %vm11526_vm7, %v9481_v8  ;;  %v3167_v27 = vsel %vm11523_vm9, %v6797_v9, %v6802_v18  ;;  %v9536_v26 = vpop.permute.xlu0 %6844 }
 0x1da   : > { %v5894_v34 = vpack.c.bf16 %v3161_v14, %v3160_v11  ;;  %5877 = vmatpush1.bf16.msk.msra.mxu0 %vm5875_vm13, %v5876_v49  ;;  %vm11527_vm15 = vmmov %vm11526_vm7  ;;  %vm11528_vm7 = vnez %v11344_v44  ;;  %3395 = vmatprep.mubr.bf16.mxu0 %v11087_v47  ;;  %v6842_v11 = vunpack.i.h.bf16 %v9364_v21  ;;  %v9569_v49 = vpop.permute.xlu1 %6889 }
 0x1db   : > { %5871 = vmatmul.mubr.msk.bf16.vlgmr.msra.gmra.mrb[0].mxu1 %vm11527_vm15, %v9481_v8  ;;  %vm5893_vm1 = vmpackc.low %vm11528_vm7, %vm11528_vm7 }
 0x1dc   : > { %vm11530_vm13 = vmmov %vm11523_vm9  ;;  %3438 = vmatprep.mubr.bf16.mxu1 %v11087_v47 }
 0x1dd   : > { %v3166_v10 = vsel %vm11530_vm13, %v11529_v35, %v6801_v37  ;;  %vm11531_vm15 = vmpackc.low %vm11525_vm6, %vm11525_vm6  ;;  %v6836_v35 = vunpack.i.l.bf16 %v9499_v28 }
 0x1de   : > { %5884 = vmatpush1.bf16.msk.msra.mxu1 %vm11531_vm15, %v5883_v41  ;;  %vm11532_vm7 = vmmov %vm11523_vm9  ;;  %v5890_v37 = vpack.c.bf16 %v3167_v27, %v3166_v10  ;;  %v6837_v27 = vunpack.i.h.bf16 %v9499_v28  ;;  %v11017_v10 = vunpack.i.h.bf16 %v9393_v53 }
 0x1df   : > { %v3163_v25 = vsel %vm11532_vm7, %v6807_v0, %v6812_v33  ;;  %vm11533_vm9 = vmmov %vm11532_vm7  ;;  %5895 = vmatprep.subr.msk.bf16.mxu1 %vm5893_vm1, %v5894_v34  ;;  %v11538_v0 = vld [vmem:[#allocation21_spill] sm:$0xff]  ;;  %vm11543_vm1 = vnez %v11360_v12 }
 0x1e0   : > { %v3162_v9 = vsel %vm11533_vm9, %v6806_v3, %v6811_v48  ;;  %vm11534_vm13 = vmpackc.low %vm8757_vm4, %vm8757_vm4  ;;  %vm11537_vm9 = vnez %v11340_v60  ;;  %v11539_v3 = vunpack.i.l.bf16 %v9291_v62  ;;  %v11541_v48 = vunpack.i.h.bf16 %v9291_v62  ;;  %v9577_v62 = vpop.permute.xlu0 %6854 }
 0x1e1   : > { %5888 = vmatprep.subr.msk.bf16.mxu0 %vm11534_vm13, %v5887_v23  ;;  %vm11535_vm15 = vmmov %vm11532_vm7  ;;  %v5897_v41 = vpack.c.bf16 %v3163_v25, %v3162_v9  ;;  %v6841_v23 = vunpack.i.l.bf16 %v9364_v21  ;;  %v6851_v25 = vunpack.i.l.bf16 %v9393_v53  ;;  %5878 = vmatmul.mubr.msk.bf16.vlgmr.msra.gmra.mrb[4].mxu0 %vm11545_vm14, %v9481_v8  ;;  %v6847_v9 = vunpack.i.h.bf16 %v9536_v26 }
 0x1e2   : > { %v3157_v56 = vsel %vm11535_vm15, %v6822_v59, %v6827_v39  ;;  %vm11536_vm6 = vmmov %vm11532_vm7  ;;  %vm11546_vm7 = vnez %v11381_v29  ;;  %3481 = vmatprep.mubr.bf16.mxu0 %v11087_v47 }
 0x1e3   : > { %v3156_v18 = vsel %vm11536_vm6, %v6821_v13, %v6826_v54  ;;  %vm5889_vm8 = vmpackc.low %vm11537_vm9, %vm11537_vm9 }
 0x1e4   : > { %vm11540_vm13 = vmmov %vm11536_vm6  ;;  %v5901_v34 = vpack.c.bf16 %v3157_v56, %v3156_v18  ;;  %v6846_v56 = vunpack.i.l.bf16 %v9536_v26  ;;  %5891 = vmatpush1.bf16.msk.msra.mxu0 %vm5889_vm8, %v5890_v37  ;;  %v9606_v26 = vpop.permute.xlu1 %6899  ;;  %v9657_v55 = vpop.permute.xlu0 %6864 }
 0x1e5   : > { %v3184_v33 = vsel %vm11540_vm13, %v6831_v51, %v11539_v3  ;;  %vm11542_vm15 = vmmov %vm11536_vm6  ;;  %vm11544_vm13 = vnez %v11367_v36 }
 0x1e6   : > { %v3185_v14 = vsel %vm11542_vm15, %v6832_v52, %v11541_v48  ;;  %vm5900_vm6 = vmpackc.low %vm11546_vm7, %vm11546_vm7 }
 0x1e7   : > { %v5908_v18 = vpack.c.bf16 %v3185_v14, %v3184_v33  ;;  %vm11547_vm15 = vmmov %vm11545_vm14  ;;  %vm11548_vm14 = vcmp.lt.s32.totalorder %v7672_v2, 127  ;;  %5902 = vmatprep.subr.msk.bf16.mxu0 %vm5900_vm6, %v5901_v34  ;;  %vm11558_vm6 = vcmp.lt.s32.totalorder %v7672_v2, 97 }
 0x1e8   : > { %5885 = vmatmul.mubr.msk.bf16.vlgmr.msra.gmra.mrb[4].mxu1 %vm11547_vm15, %v9481_v8  ;;  %v3155_v3 = vsel %vm11548_vm14, %v6827_v39, %v6832_v52  ;;  %vm11549_vm4 = vmpackc.low %vm11543_vm1, %vm11543_vm1  ;;  %v3154_v39 = vsel %vm11548_vm14, %v6826_v54, %v6831_v51  ;;  %vm11553_vm14 = vcmp.ne.s32.totalorder %v11538_v0, 31  ;;  %v3741_v16 = vsel %vm11558_vm6, %v6847_v9, %v11017_v10  ;;  %v9671_v14 = vpop.permute.xlu1 %6909  ;;  %v11582_v10 = vld [vmem:[#allocation26_spill] sm:$0xff] }
 0x1e9   : > { %5898 = vmatpush1.bf16.msk.msra.mxu1 %vm11549_vm4, %v5897_v41  ;;  %vm11550_vm4 = vcmp.lt.s32.totalorder %v7672_v2, 97  ;;  %vm11552_vm15 = vmpackc.low %vm11544_vm13, %vm11544_vm13  ;;  %3524 = vmatprep.mubr.bf16.mxu1 %v11087_v47 }
 0x1ea   : > { %v3745_v52 = vsel %vm11550_vm4, %v6837_v27, %v6842_v11  ;;  %vm11551_vm7 = vmmov %vm11550_vm4  ;;  %5909 = vmatprep.subr.msk.bf16.mxu1 %vm11552_vm15, %v5908_v18  ;;  %vm11556_vm4 = vcmp.lt.s32.totalorder %v7672_v2, 127  ;;  %vm11560_vm15 = vnez %v11389_v5  ;;  %v11568_v18 = vld [vmem:[#allocation24_spill] sm:$0xff] }
 0x1eb   : > { %v3744_v37 = vsel %vm11551_vm7, %v6836_v35, %v6841_v23  ;;  %vm9633_vm8 = vmand %vm11553_vm14, %vm7945_vm10  ;;  %v3159_v51 = vsel %vm11556_vm4, %v6817_v17, %v6822_v59  ;;  %v5911_v59 = vpack.c.bf16 %v3155_v3, %v3154_v39  ;;  %vm11565_vm14 = vcmp.ne.s32.totalorder %v7724_v22, 31  ;;  %v11593_v17 = vld [vmem:[#allocation28_spill] sm:$0xff] }
 0x1ec   : > { %vm11557_vm7 = vmmov %vm11556_vm4  ;;  %vm11561_vm4 = vcmp.ne.s32.totalorder %v7712_v15, 31  ;;  %v11019_v3 = vunpack.i.h.bf16 %v9577_v62  ;;  %v11020_v39 = vunpack.i.l.bf16 %v9577_v62 }
 0x1ed   : > { %v3158_v33 = vsel %vm11557_vm7, %v6816_v31, %v6821_v13  ;;  %vm11559_vm10 = vmmov %vm11558_vm6  ;;  %v11564_v31 = vld [vmem:[#allocation22_spill] sm:$0xff]  ;;  %v5916_v13 = vpack.c.bf16 %v3745_v52, %v3744_v37  ;;  %v6867_v52 = vunpack.i.h.bf16 %v9657_v55  ;;  %v6866_v37 = vunpack.i.l.bf16 %v9657_v55 }
 0x1ee   : > { %v3740_v48 = vsel %vm11559_vm10, %v6846_v56, %v6851_v25  ;;  %vm9663_vm7 = vmand %vm11561_vm4, %vm7987_vm3  ;;  %vm11016_vm6 = vcmp.ne.s32.totalorder %v11564_v31, 31  ;;  %v5904_v41 = vpack.c.bf16 %v3159_v51, %v3158_v33  ;;  %vm11569_vm10 = vcmask 130048   ;;  %v9700_v33 = vpop.permute.xlu0 %6874 }
 0x1ef   : > { %v5923_v34 = vpack.c.bf16 %v3741_v16, %v3740_v48  ;;  %vm9677_vm3 = vmand %vm11565_vm14, %vm11439_vm0  ;;  %5892 = vmatmul.mubr.msk.bf16.vlgmr.msra.gmra.mrb[8].mxu0 %vm11569_vm10, %v9481_v8  ;;  %v6871_v51 = vunpack.i.l.bf16 %v9457_v32  ;;  %v11573_v32 = vld [vmem:[#allocation27_spill] sm:$0xff]  ;;  %v6862_v48 = vunpack.i.h.bf16 %v9426_v42  ;;  %v6861_v55 = vunpack.i.l.bf16 %v9426_v42  ;;  %v9728_v42 = vpop.permute.xlu1 %6919 }
 0x1f0   : > { %vm11570_vm14 = vmpackc.low %vm8964_vm2, %vm8964_vm2  ;;  %5899 = vmatmul.mubr.msk.bf16.vlgmr.msra.gmra.mrb[8].mxu1 %vm11569_vm10, %v9481_v8  ;;  %v11023_v61 = vunpack.i.h.bf16 %v9700_v33  ;;  %3567 = vmatprep.mubr.bf16.mxu0 %v11087_v47 }
 0x1f1   : > { %5905 = vmatpush1.bf16.msk.msra.mxu0 %vm11570_vm14, %v5904_v41  ;;  %vm9706_vm0 = vmand %vm11016_vm6, %vm11434_vm5  ;;  %v11022_v41 = vunpack.i.l.bf16 %v9700_v33  ;;  %3610 = vmatprep.mubr.bf16.mxu1 %v11087_v47  ;;  %vm11579_vm6 = vcmp.ne.s32.totalorder %v11568_v18, 31 }
 0x1f2   : > { %vm11574_vm14 = vmpackc.low %vm11560_vm15, %vm11560_vm15  ;;  %vm11590_vm15 = vcmp.ne.s32.totalorder %v11573_v32, 31 }
 0x1f3   : > { %5912 = vmatpush1.bf16.msk.msra.mxu1 %vm11574_vm14, %v5911_v59  ;;  %vm11575_vm5 = vmpackc.low %vm9633_vm8, %vm9633_vm8  ;;  %vm11576_vm14 = vcmp.lt.s32.totalorder %v7672_v2, 97 }
 0x1f4   : > { %5917 = vmatprep.subr.msk.bf16.mxu0 %vm11575_vm5, %v5916_v13  ;;  %v3743_v59 = vsel %vm11576_vm14, %v6842_v11, %v6847_v9  ;;  %vm11577_vm8 = vmmov %vm11576_vm14  ;;  %vm11578_vm5 = vnez %v11443_v45  ;;  %v9869_v13 = vld [vmem:[#allocation5 + $0x30] sm:$0xff]  }
 0x1f5   : > { %v3742_v54 = vsel %vm11577_vm8, %v6841_v23, %v6846_v56  ;;  %vm9744_vm10 = vmand %vm11579_vm6, %vm11578_vm5  ;;  %v3747_v45 = vsel %vm11577_vm8, %v11019_v3, %v6837_v27  ;;  %v9789_v56 = vpop.permute.xlu0 %6884 }
 0x1f6   : > { %vm11583_vm14 = vmmov %vm11577_vm8  ;;  %v5926_v9 = vpack.c.bf16 %v3743_v59, %v3742_v54  ;;  %v6887_v59 = vunpack.i.h.bf16 %v9789_v56  ;;  %v6886_v54 = vunpack.i.l.bf16 %v9789_v56 }
 0x1f7   : > { %v3746_v21 = vsel %vm11583_vm14, %v11020_v39, %v6836_v35  ;;  %vm11584_vm6 = vmmov %vm11577_vm8  ;;  %v11594_v39 = vld [vmem:[#allocation46_spill] sm:$0xff]  ;;  %vm11596_vm14 = vcmp.ne.s32.totalorder %v11582_v10, 31 }
 0x1f8   : > { %v3737_v11 = vsel %vm11584_vm6, %v6862_v48, %v6867_v52  ;;  %vm11585_vm5 = vmmov %vm11584_vm6 }
 0x1f9   : > { %v3736_v23 = vsel %vm11585_vm5, %v6861_v55, %v6866_v37  ;;  %vm11586_vm4 = vmpackc.low %vm9663_vm7, %vm9663_vm7 }
 0x1fa   : > { %5924 = vmatprep.subr.msk.bf16.mxu1 %vm11586_vm4, %v5923_v34  ;;  %vm11587_vm8 = vmmov %vm11585_vm5  ;;  %v5919_v34 = vpack.c.bf16 %v3747_v45, %v3746_v21  ;;  %v5930_v3 = vpack.c.bf16 %v3737_v11, %v3736_v23  ;;  %v6891_v21 = vunpack.i.l.bf16 %v9569_v49  ;;  %v11602_v45 = vld [vmem:[#allocation48_spill] sm:$0xff]  ;;  %v11606_v23 = vld [vmem:[#allocation29_spill] sm:$0xff] }
 0x1fb   : > { %v3733_v28 = vsel %vm11587_vm8, %v6872_v46, %v11023_v61  ;;  %vm11588_vm6 = vmmov %vm11585_vm5  ;;  %vm11589_vm5 = vnez %v11452_v63  ;;  %vm11024_vm8 = vcmp.ne.s32.totalorder %v11593_v17, 31  ;;  %v9807_v61 = vpop.permute.xlu1 %6929  ;;  %v11634_v63 = vld [vmem:[#allocation37_spill] sm:$0xff] }
 0x1fc   : > { %v3732_v27 = vsel %vm11588_vm6, %v6871_v51, %v11022_v41  ;;  %vm9785_vm7 = vmand %vm11590_vm15, %vm11589_vm5  ;;  %vm11595_vm6 = vnez %v11594_v39  ;;  %vm11599_vm15 = vcmask 130048   ;;  %v6892_v39 = vunpack.i.h.bf16 %v9569_v49 }
 0x1fd   : > { %vm9799_vm2 = vmand %vm11596_vm14, %vm11595_vm6  ;;  %v5937_v41 = vpack.c.bf16 %v3733_v28, %v3732_v27  ;;  %5906 = vmatmul.mubr.msk.bf16.vlgmr.msra.gmra.mrb[12].mxu0 %vm11599_vm15, %v9481_v8  ;;  %vm11026_vm5 = vcmp.ne.s32.totalorder %v11606_v23, 31  ;;  %v6882_v49 = vunpack.i.h.bf16 %v9511_v57  ;;  %v6881_v28 = vunpack.i.l.bf16 %v9511_v57  ;;  %v11609_v27 = vld [vmem:[#allocation34_spill] sm:$0xff] }
 0x1fe   : > { %vm11600_vm14 = vmpackc.low %vm9677_vm3, %vm9677_vm3  ;;  %3889 = vmatprep.mubr.bf16.mxu0 %v11087_v47 }
 0x1ff   : > { %5920 = vmatpush1.bf16.msk.msra.mxu0 %vm11600_vm14, %v5919_v34  ;;  %vm11601_vm6 = vmmov %vm11599_vm15  ;;  %vm11603_vm15 = vnez %v11602_v45  ;;  %v9895_v35 = vpop.permute.xlu1 %6939 }
 0x200   : > { %5913 = vmatmul.mubr.msk.bf16.vlgmr.msra.gmra.mrb[12].mxu1 %vm11601_vm6, %v9481_v8  ;;  %vm9825_vm4 = vmand %vm11024_vm8, %vm11603_vm15  ;;  %v9837_v8 = vpop.permute.xlu0 %6894  ;;  %vm11028_vm6 = vcmp.ne.s32.totalorder %v11609_v27, 31  ;;  %vm11610_vm15 = vcmp.lt.s32.totalorder %v7672_v2, 97 }
 0x201   : > { %vm11607_vm3 = vmpackc.low %vm9706_vm0, %vm9706_vm0  ;;  %v3735_v56 = vsel %vm11610_vm15, %v6867_v52, %v6872_v46  ;;  %v11027_v34 = vunpack.i.h.bf16 %v9837_v8  ;;  %v11025_v16 = vunpack.i.l.bf16 %v9837_v8  ;;  %3932 = vmatprep.mubr.bf16.mxu1 %v11087_v47 }
 0x202   : > { %5927 = vmatpush1.bf16.msk.msra.mxu1 %vm11607_vm3, %v5926_v9  ;;  %vm11611_vm8 = vmmov %vm11610_vm15 }
 0x203   : > { %v3734_v57 = vsel %vm11611_vm8, %v6866_v37, %v6871_v51  ;;  %vm11612_vm0 = vmpackc.low %vm9744_vm10, %vm9744_vm10  ;;  %v3738_v52 = vsel %vm11611_vm8, %v6851_v25, %v6861_v55  ;;  %v11613_v37 = vunpack.i.h.bf16 %v9393_v53  ;;  %v9955_v11 = vpop.permute.xlu1 %6949 }
 0x204   : > { %5931 = vmatprep.subr.msk.bf16.mxu0 %vm11612_vm0, %v5930_v3  ;;  %vm5932_vm3 = vmpackc.low %vm9799_vm2, %vm9799_vm2 }
 0x205   : > { %vm11614_vm15 = vmmov %vm11611_vm8 }
 0x206   : > { %v3739_v46 = vsel %vm11614_vm15, %v11613_v37, %v6862_v48  ;;  %vm11615_vm14 = vmmov %vm11611_vm8  ;;  %v11620_v48 = vld [vmem:[#allocation49_spill] sm:$0xff] }
 0x207   : > { %v3729_v51 = vsel %vm11615_vm14, %v6882_v49, %v6887_v59  ;;  %vm11616_vm10 = vmmov %vm11611_vm8  ;;  %v5933_v45 = vpack.c.bf16 %v3739_v46, %v3738_v52  ;;  %v11632_v52 = vld [vmem:[#allocation35_spill] sm:$0xff]  ;;  %v11633_v46 = vld [vmem:[#allocation38_spill] sm:$0xff] }
 0x208   : > { %v3728_v3 = vsel %vm11616_vm10, %v6881_v28, %v6886_v54  ;;  %vm11617_vm0 = vmpackc.low %vm9785_vm7, %vm9785_vm7 }
 0x209   : > { %5938 = vmatprep.subr.msk.bf16.mxu1 %vm11617_vm0, %v5937_v41  ;;  %vm5939_vm8 = vmpackc.low %vm9825_vm4, %vm9825_vm4  ;;  %v5940_v41 = vpack.c.bf16 %v3735_v56, %v3734_v57  ;;  %v5944_v37 = vpack.c.bf16 %v3729_v51, %v3728_v3  ;;  %v6902_v51 = vunpack.i.h.bf16 %v9606_v26  ;;  %v6901_v3 = vunpack.i.l.bf16 %v9606_v26  ;;  %v11663_v56 = vld [vmem:[#allocation36_spill] sm:$0xff] }
 0x20a   : > { %vm11618_vm15 = vmmov %vm11616_vm10 }
 0x20b   : > { %v3725_v53 = vsel %vm11618_vm15, %v6892_v39, %v11027_v34  ;;  %vm11619_vm14 = vmmov %vm11616_vm10  ;;  %vm11621_vm10 = vnez %v11620_v48  ;;  %v9905_v48 = vpop.permute.xlu0 %6904 }
 0x20c   : > { %v3724_v25 = vsel %vm11619_vm14, %v6891_v21, %v11025_v16  ;;  %vm9891_vm7 = vmand %vm11026_vm5, %vm11621_vm10  ;;  %v11626_v16 = vld [vmem:[#allocation50_spill] sm:$0xff]  ;;  %vm11628_vm14 = vcmp.ne.s32.totalorder %v11608_v38, 31  ;;  %vm11631_vm5 = vcmask 130048   ;;  %v6907_v1 = vunpack.i.h.bf16 %v9905_v48 }
 0x20d   : > { %vm9901_vm0 = vmand %vm11028_vm6, %vm11470_vm12  ;;  %vm11627_vm15 = vnez %v11626_v16  ;;  %v5951_v57 = vpack.c.bf16 %v3725_v53, %v3724_v25  ;;  %5921 = vmatmul.mubr.msk.bf16.vlgmr.msra.gmra.mrb[0].mxu0 %vm11631_vm5, %v9869_v13  ;;  %v6906_v34 = vunpack.i.l.bf16 %v9905_v48  ;;  %vm11032_vm6 = vcmp.ne.s32.totalorder %v11632_v52, 31  ;;  %5928 = vmatmul.mubr.msk.bf16.vlgmr.msra.gmra.mrb[0].mxu1 %vm11631_vm5, %v9869_v13  ;;  %v11656_v48 = vld [vmem:[#allocation39_spill] sm:$0xff] }
 0x20e   : > { %vm9911_vm10 = vmand %vm11628_vm14, %vm11627_vm15  ;;  %v6911_v16 = vunpack.i.l.bf16 %v9671_v14  ;;  %5934 = vmatpush1.bf16.msk.msra.mxu0 %vm5932_vm3, %v5933_v45  ;;  %v6912_v53 = vunpack.i.h.bf16 %v9671_v14  ;;  %5941 = vmatpush1.bf16.msk.msra.mxu1 %vm5939_vm8, %v5940_v41  ;;  %vm11033_vm3 = vcmp.ne.s32.totalorder %v11634_v63, 31  ;;  %v11635_v25 = vunpack.i.h.bf16 %v9700_v33 }
 0x20f   : > { %vm5943_vm12 = vmpackc.low %vm9891_vm7, %vm9891_vm7  ;;  %vm11636_vm5 = vcmp.lt.s32.totalorder %v7672_v2, 97  ;;  %3975 = vmatprep.mubr.bf16.mxu0 %v11087_v47  ;;  %4018 = vmatprep.mubr.bf16.mxu1 %v11087_v47  ;;  %vm11647_vm7 = vnez %v11646_v43  ;;  %v9997_v41 = vpop.permute.xlu0 %6914  ;;  %v6921_v43 = vunpack.i.l.bf16 %v9728_v42 }
 0x210   : > { %vm5946_vm2 = vmpackc.low %vm9911_vm10, %vm9911_vm10  ;;  %v3731_v45 = vsel %vm11636_vm5, %v11635_v25, %v6882_v49  ;;  %5945 = vmatprep.subr.msk.bf16.mxu0 %vm5943_vm12, %v5944_v37  ;;  %vm11648_vm12 = vcmp.ne.s32.totalorder %v11633_v46, 31  ;;  %v11652_v37 = vld [vmem:[#allocation33_spill] sm:$0xff]  ;;  %v6917_v6 = vunpack.i.h.bf16 %v9997_v41  ;;  %v6916_v36 = vunpack.i.l.bf16 %v9997_v41 }
 0x211   : > { %vm11637_vm14 = vmmov %vm11636_vm5  ;;  %vm11664_vm10 = vnez %v11663_v56 }
 0x212   : > { %v3727_v26 = vsel %vm11637_vm14, %v6887_v59, %v6892_v39  ;;  %vm11638_vm15 = vmmov %vm11636_vm5  ;;  %v11641_v59 = vunpack.i.l.bf16 %v9700_v33 }
 0x213   : > { %v3726_v14 = vsel %vm11638_vm15, %v6886_v54, %v6891_v21  ;;  %vm9967_vm4 = vmand %vm11032_vm6, %vm11472_vm11 }
 0x214   : > { %vm11642_vm8 = vmmov %vm11636_vm5 }
 0x215   : > { %v3730_v54 = vsel %vm11642_vm8, %v11641_v59, %v6881_v28  ;;  %vm11643_vm15 = vmmov %vm11636_vm5  ;;  %v11651_v28 = vunpack.i.l.bf16 %v9577_v62  ;;  %v6922_v59 = vunpack.i.h.bf16 %v9728_v42  ;;  %v11660_v42 = vld [vmem:[#allocation40_spill] sm:$0xff] }
 0x216   : > { %v3721_v39 = vsel %vm11643_vm15, %v6902_v51, %v6907_v1  ;;  %vm11644_vm14 = vmmov %vm11636_vm5  ;;  %vm11653_vm15 = vnez %v11652_v37  ;;  %v5947_v37 = vpack.c.bf16 %v3731_v45, %v3730_v54  ;;  %vm11036_vm6 = vcmp.ne.s32.totalorder %v11660_v42, 31  ;;  %v6925_v54 = vpop.permute.xlu0 %6924 }
 0x217   : > { %v3720_v21 = vsel %vm11644_vm14, %v6901_v3, %v6906_v34  ;;  %vm11645_vm11 = vmpackc.low %vm9901_vm0, %vm9901_vm0  ;;  %v3748_v55 = vsel %vm11642_vm8, %v6911_v16, %v11651_v28  ;;  %vm362_vm14 = vcmp.ne.s32.totalorder %v11656_v48, 31  ;;  %v5954_v28 = vpack.c.bf16 %v3727_v26, %v3726_v14 }
 0x218   : > { %5952 = vmatprep.subr.msk.bf16.mxu1 %vm11645_vm11, %v5951_v57  ;;  %vm9989_vm5 = vmand %vm11648_vm12, %vm11647_vm7  ;;  %v11657_v57 = vunpack.i.h.bf16 %v9577_v62  ;;  %v5958_v5 = vpack.c.bf16 %v3721_v39, %v3720_v21  ;;  %v10022_v62 = vpop.permute.xlu1 %6959  ;;  %v6932_v26 = vunpack.i.h.bf16 %v9807_v61  ;;  %v6931_v14 = vunpack.i.l.bf16 %v9807_v61 }
 0x219   : > { %vm10003_vm0 = vmand %vm11033_vm3, %vm11653_vm15  ;;  %vm11659_vm15 = vcmask 130048   ;;  %v6927_v21 = vunpack.i.h.bf16 %v6925_v54 }
 0x21a   : > { %vm11658_vm11 = vmmov %vm11642_vm8  ;;  %vm4297_vm8 = vcmp.lt.s32.totalorder %v7672_v2, 96  ;;  %5935 = vmatmul.mubr.msk.bf16.vlgmr.msra.gmra.mrb[4].mxu0 %vm11659_vm15, %v9869_v13 }
 0x21b   : > { %v3749_v25 = vsel %vm11658_vm11, %v6912_v53, %v11657_v57  ;;  %vm5953_vm7 = vmpackc.low %vm9967_vm4, %vm9967_vm4  ;;  %5948 = vmatpush1.bf16.msk.msra.mxu0 %vm5946_vm2, %v5947_v37  ;;  %4061 = vmatprep.mubr.bf16.mxu0 %v11087_v47  ;;  %v4324_v49 = vsel %vm4297_vm8, %v6916_v36, %v6921_v43  ;;  %v11668_v57 = vld [vmem:[#allocation20_spill] sm:$0xff] }
 0x21c   : > { %vm5964_vm12 = vmpackc.low %vm9989_vm5, %vm9989_vm5  ;;  %v5965_v45 = vpack.c.bf16 %v3749_v25, %v3748_v55  ;;  %v6926_v55 = vunpack.i.l.bf16 %v6925_v54  ;;  %vm11669_vm4 = vnez %v11668_v57  ;;  %v11674_v25 = vunpack.i.l.bf16 %v9837_v8 }
 0x21d   : > { %vm5957_vm11 = vmpackc.low %vm10003_vm0, %vm10003_vm0 }
 0x21e   : > { %vm11661_vm3 = vmmov %vm11659_vm15  ;;  %vm11662_vm15 = vcmp.lt.s32.totalorder %v7672_v2, 97  ;;  %5959 = vmatprep.subr.msk.bf16.mxu0 %vm5957_vm11, %v5958_v5  ;;  %v4321_v5 = vsel %vm4297_vm8, %v6927_v21, %v6932_v26  ;;  %v4320_v37 = vsel %vm4297_vm8, %v6926_v55, %v6931_v14  ;;  %vm11676_vm11 = vcmp.ne.s32.totalorder %v11538_v0, 31 }
 0x21f   : > { %5942 = vmatmul.mubr.msk.bf16.vlgmr.msra.gmra.mrb[4].mxu1 %vm11661_vm3, %v9869_v13  ;;  %v3719_v39 = vsel %vm11662_vm15, %v6907_v1, %v6912_v53  ;;  %vm10052_vm2 = vmand %vm362_vm14, %vm11664_vm10  ;;  %v4325_v53 = vsel %vm4297_vm8, %v6917_v6, %v6922_v59  ;;  %v5980_v54 = vpack.c.bf16 %v4321_v5, %v4320_v37 }
 0x220   : > { %5955 = vmatpush1.bf16.msk.msra.mxu1 %vm5953_vm7, %v5954_v28  ;;  %vm11667_vm3 = vmmov %vm11662_vm15  ;;  %v10088_v28 = vpop.permute.xlu1 %6969  ;;  %4104 = vmatprep.mubr.bf16.mxu1 %v11087_v47 }
 0x221   : > { %v3718_v1 = vsel %vm11667_vm3, %v6906_v34, %v6911_v16  ;;  %5966 = vmatprep.subr.msk.bf16.mxu1 %vm5964_vm12, %v5965_v45  ;;  %vm10076_vm7 = vmand %vm11036_vm6, %vm11669_vm4  ;;  %v11672_v16 = vunpack.i.h.bf16 %v9837_v8  ;;  %vm11679_vm4 = vcmp.ne.s32.totalorder %v7712_v15, 31 }
 0x222   : > { %vm11673_vm15 = vmmov %vm11667_vm3  ;;  %v5968_v8 = vpack.c.bf16 %v3719_v39, %v3718_v1 }
 0x223   : > { %v3723_v33 = vsel %vm11673_vm15, %v11672_v16, %v6902_v51  ;;  %vm11675_vm5 = vmmov %vm11667_vm3  ;;  %v10099_v51 = vpop.permute.xlu0 %6934  ;;  %vm11677_vm3 = vcmask 130048   ;;  %vm11682_vm15 = vcmp.ne.s32.totalorder %v7724_v22, 31 }
 0x224   : > { %v3722_v9 = vsel %vm11675_vm5, %v11674_v25, %v6901_v3  ;;  %vm5960_vm0 = vmpackc.low %vm10052_vm2, %vm10052_vm2  ;;  %v5973_v3 = vpack.c.bf16 %v4325_v53, %v4324_v49  ;;  %v6937_v56 = vunpack.i.h.bf16 %v10099_v51  ;;  %v6936_v57 = vunpack.i.l.bf16 %v10099_v51  ;;  %5949 = vmatmul.mubr.msk.bf16.vlgmr.msra.gmra.mrb[8].mxu0 %vm11677_vm3, %v9869_v13  ;;  %v10114_v41 = vpop.permute.xlu1 %6979 }
 0x225   : > { %vm5967_vm12 = vmpackc.low %vm10076_vm7, %vm10076_vm7  ;;  %v5961_v45 = vpack.c.bf16 %v3723_v33, %v3722_v9  ;;  %v6942_v53 = vunpack.i.h.bf16 %v9895_v35  ;;  %v6941_v49 = vunpack.i.l.bf16 %v9895_v35  ;;  %v6952_v33 = vunpack.i.h.bf16 %v9955_v11  ;;  %4147 = vmatprep.mubr.bf16.mxu0 %v11087_v47 }
 0x226   : > { %vm5972_vm10 = vmpackc.low %vm11676_vm11, %vm11676_vm11  ;;  %v4323_v25 = vsel %vm4297_vm8, %v6922_v59, %v6927_v21  ;;  %v4322_v9 = vsel %vm4297_vm8, %v6921_v43, %v6926_v55  ;;  %v4326_v35 = vsel %vm4297_vm8, %v6936_v57, %v6916_v36  ;;  %v4327_v5 = vsel %vm4297_vm8, %v6937_v56, %v6917_v6 }
 0x227   : > { %5962 = vmatpush1.bf16.msk.msra.mxu0 %vm5960_vm0, %v5961_v45  ;;  %vm11678_vm2 = vmmov %vm11677_vm3  ;;  %v6945_v39 = vpop.permute.xlu0 %6944  ;;  %v6951_v21 = vunpack.i.l.bf16 %v9955_v11  ;;  %v5983_v36 = vpack.c.bf16 %v4323_v25, %v4322_v9  ;;  %v5976_v6 = vpack.c.bf16 %v4327_v5, %v4326_v35  ;;  %vm11683_vm0 = vcmp.ne.s32.totalorder %v11564_v31, 31 }
 0x228   : > { %5956 = vmatmul.mubr.msk.bf16.vlgmr.msra.gmra.mrb[8].mxu1 %vm11678_vm2, %v9869_v13  ;;  %vm10121_vm7 = vmpackc.low %vm11679_vm4, %vm11679_vm4  ;;  %v6947_v34 = vunpack.i.h.bf16 %v6945_v39  ;;  %v6946_v16 = vunpack.i.l.bf16 %v6945_v39  ;;  %5974 = vmatprep.subr.msk.bf16.mxu0 %vm5972_vm10, %v5973_v3  ;;  %v10149_v55 = vpop.permute.xlu1 %6989  ;;  %vm11685_vm10 = vcmp.ne.s32.totalorder %v11568_v18, 31  ;;  %vm11688_vm4 = vcmp.ne.s32.totalorder %v11573_v32, 31 }
 0x229   : > { %5969 = vmatpush1.bf16.msk.msra.mxu1 %vm5967_vm12, %v5968_v8  ;;  %4190 = vmatprep.mubr.bf16.mxu1 %v11087_v47  ;;  %vm5975_vm5 = vmpackc.low %vm11682_vm15, %vm11682_vm15  ;;  %v4318_v9 = vsel %vm4297_vm8, %v6931_v14, %v6941_v49  ;;  %v4319_v35 = vsel %vm4297_vm8, %v6932_v26, %v6942_v53  ;;  %v10195_v14 = vld [vmem:[#allocation5 + $0x38] sm:$0xff]   ;;  %vm11689_vm15 = vcmp.ne.s32.totalorder %v11582_v10, 31 }
 0x22a   : > { %v4317_v59 = vsel %vm4297_vm8, %v6942_v53, %v6947_v34  ;;  %v4316_v43 = vsel %vm4297_vm8, %v6941_v49, %v6946_v16  ;;  %5981 = vmatprep.subr.msk.bf16.mxu1 %vm10121_vm7, %v5980_v54  ;;  %vm5982_vm12 = vmpackc.low %vm11683_vm0, %vm11683_vm0  ;;  %v4315_v61 = vsel %vm4297_vm8, %v6947_v34, %v6952_v33  ;;  %v4314_v26 = vsel %vm4297_vm8, %v6946_v16, %v6951_v21 }
 0x22b   : > { %v6955_v37 = vpop.permute.xlu0 %6954  ;;  %v5987_v45 = vpack.c.bf16 %v4317_v59, %v4316_v43  ;;  %vm11684_vm11 = vmmov %vm11678_vm2  ;;  %v6961_v59 = vunpack.i.l.bf16 %v10022_v62  ;;  %v6972_v53 = vunpack.i.h.bf16 %v10088_v28  ;;  %v5990_v34 = vpack.c.bf16 %v4319_v35, %v4318_v9 }
 0x22c   : > { %v6957_v8 = vunpack.i.h.bf16 %v6955_v37  ;;  %v6956_v3 = vunpack.i.l.bf16 %v6955_v37  ;;  %5963 = vmatmul.mubr.msk.bf16.vlgmr.msra.gmra.mrb[12].mxu0 %vm11684_vm11, %v9869_v13  ;;  %vm10164_vm3 = vmpackc.low %vm11685_vm10, %vm11685_vm10  ;;  %v10172_v1 = vpop.permute.xlu1 %6999  ;;  %v5997_v16 = vpack.c.bf16 %v4315_v61, %v4314_v26  ;;  %vm11690_vm0 = vcmp.ne.s32.totalorder %v11593_v17, 31 }
 0x22d   : > { %5977 = vmatpush1.bf16.msk.msra.mxu0 %vm5975_vm5, %v5976_v6  ;;  %vm5993_vm7 = vmpackc.low %vm11688_vm4, %vm11688_vm4  ;;  %4453 = vmatprep.mubr.bf16.mxu0 %v11087_v47  ;;  %vm11694_vm10 = vcmp.ne.s32.totalorder %v11606_v23, 31 }
 0x22e   : > { %v4313_v54 = vsel %vm4297_vm8, %v6952_v33, %v6957_v8  ;;  %v4312_v39 = vsel %vm4297_vm8, %v6951_v21, %v6956_v3  ;;  %5988 = vmatprep.subr.msk.bf16.mxu0 %vm10164_vm3, %v5987_v45  ;;  %vm5989_vm5 = vmpackc.low %vm11689_vm15, %vm11689_vm15  ;;  %vm11699_vm15 = vcmp.ne.s32.totalorder %v11608_v38, 31 }
 0x22f   : > { %v6965_v25 = vpop.permute.xlu0 %6964  ;;  %v5994_v5 = vpack.c.bf16 %v4313_v54, %v4312_v39  ;;  %vm11693_vm11 = vmmov %vm11678_vm2  ;;  %v6992_v39 = vunpack.i.h.bf16 %v10149_v55 }
 0x230   : > { %5970 = vmatmul.mubr.msk.bf16.vlgmr.msra.gmra.mrb[12].mxu1 %vm11678_vm2, %v9869_v13  ;;  %v6962_v13 = vunpack.i.h.bf16 %v10022_v62  ;;  %v6967_v43 = vunpack.i.h.bf16 %v6965_v25  ;;  %v6966_v37 = vunpack.i.l.bf16 %v6965_v25  ;;  %v6971_v62 = vunpack.i.l.bf16 %v10088_v28  ;;  %v10203_v6 = vpop.permute.xlu1 %7009  ;;  %vm10224_vm3 = vmpackc.low %vm11694_vm10, %vm11694_vm10 }
 0x231   : > { %5984 = vmatpush1.bf16.msk.msra.mxu1 %vm5982_vm12, %v5983_v36  ;;  %4496 = vmatprep.mubr.bf16.mxu1 %v11087_v47  ;;  %vm10215_vm12 = vmpackc.low %vm11690_vm0, %vm11690_vm0  ;;  %v6991_v25 = vunpack.i.l.bf16 %v10149_v55  ;;  %vm11697_vm2 = vcmp.ne.s32.totalorder %v11609_v27, 31  ;;  %v6982_v55 = vunpack.i.h.bf16 %v10114_v41  ;;  %vm11700_vm0 = vcmp.ne.s32.totalorder %v11634_v63, 31 }
 0x232   : > { %5995 = vmatprep.subr.msk.bf16.mxu1 %vm5993_vm7, %v5994_v5  ;;  %v4309_v49 = vsel %vm4297_vm8, %v6962_v13, %v6967_v43  ;;  %v4308_v36 = vsel %vm4297_vm8, %v6961_v59, %v6966_v37  ;;  %vm6007_vm4 = vmpackc.low %vm11697_vm2, %vm11697_vm2 }
 0x233   : > { %v10205_v45 = vpop.permute.xlu0 %6974  ;;  %v6001_v33 = vpack.c.bf16 %v4309_v49, %v4308_v36  ;;  %vm11698_vm7 = vmmov %vm11693_vm11  ;;  %v4311_v49 = vsel %vm4297_vm8, %v6957_v8, %v6962_v13  ;;  %v4310_v36 = vsel %vm4297_vm8, %v6956_v3, %v6961_v59  ;;  %v4328_v8 = vsel %vm4297_vm8, %v6991_v25, %v6936_v57 }
 0x234   : > { %v11035_v21 = vunpack.i.h.bf16 %v10205_v45  ;;  %v11034_v28 = vunpack.i.l.bf16 %v10205_v45  ;;  %5978 = vmatmul.mubr.msk.bf16.vlgmr.msra.gmra.mrb[0].mxu0 %vm11693_vm11, %v10195_v14  ;;  %v10238_v5 = vpop.permute.xlu1 %7019  ;;  %v4329_v3 = vsel %vm4297_vm8, %v6992_v39, %v6937_v56  ;;  %v6004_v13 = vpack.c.bf16 %v4311_v49, %v4310_v36  ;;  %vm11701_vm10 = vmmov %vm11698_vm7 }
 0x235   : > { %5991 = vmatpush1.bf16.msk.msra.mxu0 %vm5989_vm5, %v5990_v34  ;;  %4539 = vmatprep.mubr.bf16.mxu0 %v11087_v47  ;;  %v7002_v59 = vunpack.i.h.bf16 %v10172_v1  ;;  %vm6003_vm5 = vmpackc.low %vm11699_vm15, %vm11699_vm15  ;;  %vm4861_vm11 = vcmp.lt.s32.totalorder %v7672_v2, 95  ;;  %v6022_v54 = vpack.c.bf16 %v4329_v3, %v4328_v8  ;;  %v11709_v8 = vunpack.i.h.bf16 %v10205_v45 }
 0x236   : > { %v4305_v9 = vsel %vm4297_vm8, %v6972_v53, %v11035_v21  ;;  %v4304_v35 = vsel %vm4297_vm8, %v6971_v62, %v11034_v28  ;;  %6002 = vmatprep.subr.msk.bf16.mxu0 %vm10224_vm3, %v6001_v33  ;;  %v4306_v21 = vsel %vm4297_vm8, %v6966_v37, %v6971_v62  ;;  %vm11702_vm3 = vcmp.ne.s32.totalorder %v11632_v52, 31  ;;  %vm11706_vm15 = vmmov %vm11701_vm10 }
 0x237   : > { %v6985_v61 = vpop.permute.xlu0 %6984  ;;  %v6008_v26 = vpack.c.bf16 %v4305_v9, %v4304_v35  ;;  %v6981_v9 = vunpack.i.l.bf16 %v10114_v41  ;;  %v4307_v35 = vsel %vm4297_vm8, %v6967_v43, %v6972_v53  ;;  %v7001_v43 = vunpack.i.l.bf16 %v10172_v1  ;;  %vm6010_vm2 = vmpackc.low %vm11702_vm3, %vm11702_vm3 }
 0x238   : > { %5985 = vmatmul.mubr.msk.bf16.vlgmr.msra.gmra.mrb[0].mxu1 %vm11698_vm7, %v10195_v14  ;;  %v6987_v34 = vunpack.i.h.bf16 %v6985_v61  ;;  %v6986_v28 = vunpack.i.l.bf16 %v6985_v61  ;;  %v6011_v51 = vpack.c.bf16 %v4307_v35, %v4306_v21  ;;  %v10280_v56 = vpop.permute.xlu1 %7029  ;;  %v7012_v1 = vunpack.i.h.bf16 %v10203_v6 }
 0x239   : > { %5998 = vmatpush1.bf16.msk.msra.mxu1 %vm10215_vm12, %v5997_v16  ;;  %4582 = vmatprep.mubr.bf16.mxu1 %v11087_v47  ;;  %vm6014_vm12 = vmpackc.low %vm11700_vm0, %vm11700_vm0  ;;  %v7011_v33 = vunpack.i.l.bf16 %v10203_v6  ;;  %v4303_v3 = vsel %vm4297_vm8, %v11709_v8, %v6982_v55  ;;  %vm11711_vm0 = vnez %v11247_v58  ;;  %vm11717_vm3 = vnez %v11250_v40 }
 0x23a   : > { %6009 = vmatprep.subr.msk.bf16.mxu1 %vm6007_vm4, %v6008_v26  ;;  %v4301_v41 = vsel %vm4297_vm8, %v6982_v55, %v6987_v34  ;;  %v4300_v37 = vsel %vm4297_vm8, %v6981_v9, %v6986_v28  ;;  %vm11703_vm4 = vcmp.ne.s32.totalorder %v11633_v46, 31  ;;  %v7022_v40 = vunpack.i.h.bf16 %v10238_v5 }
 0x23b   : > { %v10275_v53 = vpop.permute.xlu0 %6994  ;;  %v6015_v57 = vpack.c.bf16 %v4301_v41, %v4300_v37  ;;  %vm10298_vm7 = vmpackc.low %vm11703_vm4, %vm11703_vm4  ;;  %v11710_v41 = vunpack.i.l.bf16 %v10205_v45  ;;  %v4299_v37 = vsel %vm4297_vm8, %v6987_v34, %v6992_v39 }
 0x23c   : > { %v6997_v62 = vunpack.i.h.bf16 %v10275_v53  ;;  %v6996_v16 = vunpack.i.l.bf16 %v10275_v53  ;;  %5992 = vmatmul.mubr.msk.bf16.vlgmr.msra.gmra.mrb[4].mxu0 %vm11701_vm10, %v10195_v14  ;;  %v4298_v53 = vsel %vm4297_vm8, %v6986_v28, %v6991_v25  ;;  %v10339_v45 = vpop.permute.xlu1 %7039 }
 0x23d   : > { %6005 = vmatpush1.bf16.msk.msra.mxu0 %vm6003_vm5, %v6004_v13  ;;  %4625 = vmatprep.mubr.bf16.mxu0 %v11087_v47  ;;  %vm10313_vm5 = vmpackc.low %vm362_vm14, %vm362_vm14  ;;  %v4302_v13 = vsel %vm4297_vm8, %v11710_v41, %v6981_v9 }
 0x23e   : > { %6016 = vmatprep.subr.msk.bf16.mxu0 %vm6014_vm12, %v6015_v57  ;;  %v4889_v61 = vsel %vm4861_vm11, %v6997_v62, %v7002_v59  ;;  %v4888_v26 = vsel %vm4861_vm11, %v6996_v16, %v7001_v43  ;;  %vm11712_vm12 = vcmp.ne.s32.totalorder %v11538_v0, 31  ;;  %vm10352_vm8 = vmpackc.low %vm11036_vm6, %vm11036_vm6  ;;  %v6018_v9 = vpack.c.bf16 %v4303_v3, %v4302_v13 }
 0x23f   : > { %v7005_v11 = vpop.permute.xlu0 %7004  ;;  %vm10335_vm10 = vmand %vm11712_vm12, %vm11711_vm0  ;;  %v6030_v0 = vpack.c.bf16 %v4889_v61, %v4888_v26  ;;  %vm11721_vm0 = vnez %v11287_v20  ;;  %vm11722_vm12 = vcmp.ne.s32.totalorder %v7724_v22, 31  ;;  %vm11739_vm6 = vnez %v11304_v30 }
 0x240   : > { %5999 = vmatmul.mubr.msk.bf16.vlgmr.msra.gmra.mrb[4].mxu1 %vm11706_vm15, %v10195_v14  ;;  %v7007_v49 = vunpack.i.h.bf16 %v7005_v11  ;;  %v7006_v36 = vunpack.i.l.bf16 %v7005_v11  ;;  %v7021_v11 = vunpack.i.l.bf16 %v10238_v5  ;;  %v10403_v5 = vpop.permute.xlu1 %7049 }
 0x241   : > { %6012 = vmatpush1.bf16.msk.msra.mxu1 %vm6010_vm2, %v6011_v51  ;;  %4668 = vmatprep.mubr.bf16.mxu1 %v11087_v47  ;;  %vm11718_vm2 = vcmp.ne.s32.totalorder %v7712_v15, 31  ;;  %v6025_v51 = vpack.c.bf16 %v4299_v37, %v4298_v53  ;;  %v7042_v53 = vunpack.i.h.bf16 %v10339_v45  ;;  %v7051_v34 = vunpack.i.l.bf16 %v10403_v5 }
 0x242   : > { %6023 = vmatprep.subr.msk.bf16.mxu1 %vm10298_vm7, %v6022_v54  ;;  %v4885_v39 = vsel %vm4861_vm11, %v7007_v49, %v7012_v1  ;;  %v4884_v28 = vsel %vm4861_vm11, %v7006_v36, %v7011_v33  ;;  %vm10362_vm4 = vmand %vm11718_vm2, %vm11717_vm3  ;;  %v4887_v61 = vsel %vm4861_vm11, %v7002_v59, %v7007_v49  ;;  %v4886_v26 = vsel %vm4861_vm11, %v7001_v43, %v7006_v36 }
 0x243   : > { %v10356_v25 = vpop.permute.xlu0 %7014  ;;  %vm6029_vm7 = vmpackc.low %vm10335_vm10, %vm10335_vm10  ;;  %v6037_v57 = vpack.c.bf16 %v4885_v39, %v4884_v28  ;;  %v7032_v43 = vunpack.i.h.bf16 %v10280_v56  ;;  %v6040_v49 = vpack.c.bf16 %v4887_v61, %v4886_v26  ;;  %v4882_v30 = vsel %vm4861_vm11, %v7011_v33, %v7021_v11 }
 0x244   : > { %v7017_v21 = vunpack.i.h.bf16 %v10356_v25  ;;  %v7016_v54 = vunpack.i.l.bf16 %v10356_v25  ;;  %6006 = vmatmul.mubr.msk.bf16.vlgmr.msra.gmra.mrb[8].mxu0 %vm11706_vm15, %v10195_v14  ;;  %vm10377_vm3 = vmand %vm11722_vm12, %vm11721_vm0  ;;  %vm11727_vm0 = vcmp.ne.s32.totalorder %v11564_v31, 31  ;;  %vm11731_vm12 = vcmp.ne.s32.totalorder %v11568_v18, 31  ;;  %v11773_v25 = vld [vmem:[#allocation13_spill] sm:$0xff] }
 0x245   : > { %6019 = vmatpush1.bf16.msk.msra.mxu0 %vm10313_vm5, %v6018_v9  ;;  %4711 = vmatprep.mubr.bf16.mxu0 %v11087_v47  ;;  %vm6036_vm10 = vmpackc.low %vm10362_vm4, %vm10362_vm4 }
 0x246   : > { %vm11725_vm2 = vmmov %vm11706_vm15  ;;  %6031 = vmatprep.subr.msk.bf16.mxu0 %vm6029_vm7, %v6030_v0  ;;  %vm11726_vm15 = vnez %v11278_v7  ;;  %v4890_v7 = vsel %vm4861_vm11, %v7016_v54, %v6996_v16  ;;  %v4891_v31 = vsel %vm4861_vm11, %v7017_v21, %v6997_v62  ;;  %v7052_v0 = vunpack.i.h.bf16 %v10403_v5 }
 0x247   : > { %v7025_v22 = vpop.permute.xlu0 %7024  ;;  %vm10395_vm5 = vmand %vm11727_vm0, %vm11726_vm15  ;;  %vm11735_vm15 = vcmp.ne.s32.totalorder %v11573_v32, 31  ;;  %v6033_v3 = vpack.c.bf16 %v4891_v31, %v4890_v7  ;;  %v10466_v32 = vpop.permute.xlu1 %7059 }
 0x248   : > { %6013 = vmatmul.mubr.msk.bf16.vlgmr.msra.gmra.mrb[8].mxu1 %vm11725_vm2, %v10195_v14  ;;  %v7027_v35 = vunpack.i.h.bf16 %v7025_v22  ;;  %v7026_v8 = vunpack.i.l.bf16 %v7025_v22  ;;  %vm6032_vm7 = vmpackc.low %vm10377_vm3, %vm10377_vm3  ;;  %vm11744_vm3 = vnez %v11321_v4  ;;  %v7062_v60 = vunpack.i.h.bf16 %v10466_v32 }
 0x249   : > { %6026 = vmatpush1.bf16.msk.msra.mxu1 %vm10352_vm8, %v6025_v51  ;;  %4754 = vmatprep.mubr.bf16.mxu1 %v11087_v47  ;;  %vm11730_vm8 = vnez %v11294_v50  ;;  %vm6039_vm4 = vmpackc.low %vm10395_vm5, %vm10395_vm5  ;;  %v7031_v50 = vunpack.i.l.bf16 %v10280_v56  ;;  %vm11748_vm5 = vnez %v11327_v19 }
 0x24a   : > { %6038 = vmatprep.subr.msk.bf16.mxu1 %vm6036_vm10, %v6037_v57  ;;  %vm10428_vm2 = vmand %vm11731_vm12, %vm11730_vm8  ;;  %v4881_v16 = vsel %vm4861_vm11, %v7022_v40, %v7027_v35  ;;  %v4880_v62 = vsel %vm4861_vm11, %v7021_v11, %v7026_v8  ;;  %vm11734_vm10 = vnez %v11313_v24  ;;  %vm11738_vm12 = vcmask 130048  }
 0x24b   : > { %v10441_v18 = vpop.permute.xlu0 %7034  ;;  %vm10447_vm0 = vmand %vm11735_vm15, %vm11734_vm10  ;;  %v6044_v41 = vpack.c.bf16 %v4881_v16, %v4880_v62  ;;  %vm11740_vm10 = vcmp.ne.s32.totalorder %v11582_v10, 31  ;;  %v4883_v10 = vsel %vm4861_vm11, %v7012_v1, %v7022_v40  ;;  %v7041_v1 = vunpack.i.l.bf16 %v10339_v45  ;;  %v10520_v45 = vld [vmem:[#allocation5 + $0x40] sm:$0xff]   ;;  %v7070_v40 = vpop.permute.xlu1 %7069 }
 0x24c   : > { %v7037_v13 = vunpack.i.h.bf16 %v10441_v18  ;;  %v7036_v37 = vunpack.i.l.bf16 %v10441_v18  ;;  %vm6043_vm8 = vmpackc.low %vm10428_vm2, %vm10428_vm2  ;;  %6020 = vmatmul.mubr.msk.bf16.vlgmr.msra.gmra.mrb[12].mxu0 %vm11738_vm12, %v10195_v14  ;;  %v4879_v4 = vsel %vm4861_vm11, %v7027_v35, %v7032_v43  ;;  %v6047_v19 = vpack.c.bf16 %v4883_v10, %v4882_v30 }
 0x24d   : > { %vm10462_vm15 = vmand %vm11740_vm10, %vm11739_vm6  ;;  %6034 = vmatpush1.bf16.msk.msra.mxu0 %vm6032_vm7, %v6033_v3  ;;  %vm11743_vm6 = vcmask 130048   ;;  %5033 = vmatprep.mubr.bf16.mxu0 %v11087_v47  ;;  %vm11745_vm7 = vcmp.ne.s32.totalorder %v11593_v17, 31  ;;  %v4878_v17 = vsel %vm4861_vm11, %v7026_v8, %v7031_v50  ;;  %v7072_v26 = vunpack.i.h.bf16 %v7070_v40 }
 0x24e   : > { %v4877_v56 = vsel %vm4861_vm11, %v7032_v43, %v7037_v13  ;;  %vm6050_vm12 = vmpackc.low %vm10447_vm0, %vm10447_vm0  ;;  %v4876_v55 = vsel %vm4861_vm11, %v7031_v50, %v7036_v37  ;;  %6045 = vmatprep.subr.msk.bf16.mxu0 %vm6043_vm8, %v6044_v41  ;;  %v6054_v15 = vpack.c.bf16 %v4879_v4, %v4878_v17  ;;  %v7071_v8 = vunpack.i.l.bf16 %v7070_v40 }
 0x24f   : > { %v7045_v39 = vpop.permute.xlu0 %7044  ;;  %vm10498_vm10 = vmand %vm11745_vm7, %vm11744_vm3  ;;  %vm11752_vm3 = vnez %v11344_v44  ;;  %vm11753_vm7 = vcmp.ne.s32.totalorder %v11609_v27, 31  ;;  %v4875_v7 = vsel %vm4861_vm11, %v7037_v13, %v7042_v53  ;;  %v4874_v43 = vsel %vm4861_vm11, %v7036_v37, %v7041_v1  ;;  %v10696_v30 = vpop.permute.xlu1 %5386 }
 0x250   : > { %6027 = vmatmul.mubr.msk.bf16.vlgmr.msra.gmra.mrb[12].mxu1 %vm11743_vm6, %v10195_v14  ;;  %v6051_v14 = vpack.c.bf16 %v4877_v56, %v4876_v55  ;;  %v7047_v33 = vunpack.i.h.bf16 %v7045_v39  ;;  %v7046_v28 = vunpack.i.l.bf16 %v7045_v39  ;;  %vm6046_vm6 = vmpackc.low %vm10462_vm15, %vm10462_vm15  ;;  %v4892_v12 = vsel %vm4861_vm11, %v7071_v8, %v7016_v54 }
 0x251   : > { %6041 = vmatpush1.bf16.msk.msra.mxu1 %vm6039_vm4, %v6040_v49  ;;  %5076 = vmatprep.mubr.bf16.mxu1 %v11087_v47  ;;  %vm11749_vm4 = vcmp.ne.s32.totalorder %v11606_v23, 31  ;;  %vm6053_vm8 = vmpackc.low %vm10498_vm10, %vm10498_vm10  ;;  %vm11761_vm10 = vnez %v11381_v29  ;;  %v6061_v41 = vpack.c.bf16 %v4875_v7, %v4874_v43 }
 0x252   : > { %vm10527_vm2 = vmand %vm11749_vm4, %vm11748_vm5  ;;  %v4873_v9 = vsel %vm4861_vm11, %v7042_v53, %v7047_v33  ;;  %v4872_v51 = vsel %vm4861_vm11, %v7041_v1, %v7046_v28  ;;  %6052 = vmatprep.subr.msk.bf16.mxu1 %vm6050_vm12, %v6051_v14  ;;  %vm11756_vm12 = vcmask 130048   ;;  %vm11757_vm4 = vcmp.ne.s32.totalorder %v11608_v38, 31 }
 0x253   : > { %v7055_v23 = vpop.permute.xlu0 %7054  ;;  %vm10549_vm5 = vmand %vm11753_vm7, %vm11752_vm3  ;;  %v6058_v11 = vpack.c.bf16 %v4873_v9, %v4872_v51  ;;  %v7061_v38 = vunpack.i.l.bf16 %v10466_v32  ;;  %v4871_v16 = vsel %vm4861_vm11, %v7047_v33, %v7052_v0  ;;  %v4870_v62 = vsel %vm4861_vm11, %v7046_v28, %v7051_v34  ;;  %v11775_v32 = vld [vmem:[#allocation14_spill] sm:$0xff] }
 0x254   : > { %v7057_v22 = vunpack.i.h.bf16 %v7055_v23  ;;  %v7056_v20 = vunpack.i.l.bf16 %v7055_v23  ;;  %vm6057_vm0 = vmpackc.low %vm10527_vm2, %vm10527_vm2  ;;  %6035 = vmatmul.mubr.msk.bf16.vlgmr.msra.gmra.mrb[0].mxu0 %vm11756_vm12, %v10520_v45  ;;  %v6068_v13 = vpack.c.bf16 %v4871_v16, %v4870_v62 }
 0x255   : > { %vm10562_vm3 = vmand %vm11757_vm4, %vm11537_vm9  ;;  %6048 = vmatpush1.bf16.msk.msra.mxu0 %vm6046_vm6, %v6047_v19  ;;  %5119 = vmatprep.mubr.bf16.mxu0 %v11087_v47  ;;  %vm11762_vm6 = vcmp.ne.s32.totalorder %v11634_v63, 31 }
 0x256   : > { %v4869_v27 = vsel %vm4861_vm11, %v7052_v0, %v7057_v22  ;;  %v4868_v61 = vsel %vm4861_vm11, %v7051_v34, %v7056_v20  ;;  %vm6064_vm7 = vmpackc.low %vm10549_vm5, %vm10549_vm5  ;;  %6059 = vmatprep.subr.msk.bf16.mxu0 %vm6057_vm0, %v6058_v11  ;;  %vm11769_vm0 = vcmp.ne.s32.totalorder %v11633_v46, 31  ;;  %v4866_v54 = vsel %vm4861_vm11, %v7056_v20, %v7061_v38 }
 0x257   : > { %vm11760_vm9 = vmmov %vm11756_vm12  ;;  %v6065_v5 = vpack.c.bf16 %v4869_v27, %v4868_v61  ;;  %v7065_v35 = vpop.permute.xlu0 %7064 }
 0x258   : > { %6042 = vmatmul.mubr.msk.bf16.vlgmr.msra.gmra.mrb[0].mxu1 %vm11760_vm9, %v10520_v45  ;;  %vm6060_vm15 = vmpackc.low %vm10562_vm3, %vm10562_vm3  ;;  %v7067_v31 = vunpack.i.h.bf16 %v7065_v35  ;;  %v7066_v59 = vunpack.i.l.bf16 %v7065_v35 }
 0x259   : > { %6055 = vmatpush1.bf16.msk.msra.mxu1 %vm6053_vm8, %v6054_v15  ;;  %5162 = vmatprep.mubr.bf16.mxu1 %v11087_v47  ;;  %vm10616_vm2 = vmand %vm11762_vm6, %vm11761_vm10  ;;  %vm11765_vm8 = vcmp.ne.s32.totalorder %v11632_v52, 31  ;;  %v4893_v52 = vsel %vm4861_vm11, %v7072_v26, %v7017_v21  ;;  %vm11774_vm10 = vnez %v11773_v25  ;;  %v4867_v21 = vsel %vm4861_vm11, %v7057_v22, %v7062_v60 }
 0x25a   : > { %6066 = vmatprep.subr.msk.bf16.mxu1 %vm6064_vm7, %v6065_v5  ;;  %v4865_v49 = vsel %vm4861_vm11, %v7062_v60, %v7067_v31  ;;  %v4864_v18 = vsel %vm4861_vm11, %v7061_v38, %v7066_v59  ;;  %vm10628_vm5 = vmand %vm11765_vm8, %vm11543_vm1  ;;  %v6079_v46 = vpack.c.bf16 %v4893_v52, %v4892_v12  ;;  %v4863_v37 = vsel %vm4861_vm11, %v7067_v31, %v7072_v26 }
 0x25b   : > { %v6072_v29 = vpack.c.bf16 %v4865_v49, %v4864_v18  ;;  %vm10636_vm12 = vmand %vm11769_vm0, %vm11544_vm13  ;;  %v4862_v24 = vsel %vm4861_vm11, %v7066_v59, %v7071_v8  ;;  %vm11777_vm6 = vcmp.ne.s32.totalorder %v11660_v42, 31  ;;  %v6075_v48 = vpack.c.bf16 %v4867_v21, %v4866_v54  ;;  %v10694_v2 = vpop.permute.xlu0 %5381 }
 0x25c   : > { %vm6071_vm1 = vmpackc.low %vm10616_vm2, %vm10616_vm2  ;;  %v6082_v56 = vpack.c.bf16 %v4863_v37, %v4862_v24 }
 0x25d   : > { %vm11772_vm13 = vmmov %vm11760_vm9 }
 0x25e   : > { %6049 = vmatmul.mubr.msk.bf16.vlgmr.msra.gmra.mrb[4].mxu0 %vm11772_vm13, %v10520_v45  ;;  %vm6067_vm4 = vmpackc.low %vm10628_vm5, %vm10628_vm5 }
 0x25f   : > { %6062 = vmatpush1.bf16.msk.msra.mxu0 %vm6060_vm15, %v6061_v41  ;;  %vm6078_vm7 = vmpackc.low %vm10636_vm12, %vm10636_vm12  ;;  %5205 = vmatprep.mubr.bf16.mxu0 %v11087_v47  ;;  %vm11776_vm15 = vnez %v11775_v32 }
 0x260   : > { %6056 = vmatmul.mubr.msk.bf16.vlgmr.msra.gmra.mrb[4].mxu1 %vm11760_vm9, %v10520_v45  ;;  %6073 = vmatprep.subr.msk.bf16.mxu0 %vm6071_vm1, %v6072_v29  ;;  %vm4906_vm3 = vmand %vm362_vm14, %vm11774_vm10 }
 0x261   : > { %6069 = vmatpush1.bf16.msk.msra.mxu1 %vm6067_vm4, %v6068_v13  ;;  %5248 = vmatprep.mubr.bf16.mxu1 %v11087_v47  ;;  %vm4908_vm2 = vmand %vm11777_vm6, %vm11776_vm15 }
 0x262   : > { %6080 = vmatprep.subr.msk.bf16.mxu1 %vm6078_vm7, %v6079_v46  ;;  %vm6074_vm8 = vmpackc.low %vm4906_vm3, %vm4906_vm3 }
 0x263   : > { %vm11778_vm14 = vmmov %vm11760_vm9 }
 0x264   : > { %vm6081_vm5 = vmpackc.low %vm4908_vm2, %vm4908_vm2 }
 0x265   : > { %vm11779_vm0 = vmmov %vm11760_vm9 }
 0x266   : > { %6063 = vmatmul.mubr.msk.bf16.vlgmr.msra.gmra.mrb[8].mxu0 %vm11778_vm14, %v10520_v45  ;;  %vm11780_vm11 = vmmov %vm11779_vm0 }
 0x267   : > { %6076 = vmatpush1.bf16.msk.msra.mxu0 %vm6074_vm8, %v6075_v48  ;;  %5291 = vmatprep.mubr.bf16.mxu0 %v11087_v47  ;;  %vm11781_vm12 = vmmov %vm11779_vm0 }
 0x268   : > { %6070 = vmatmul.mubr.msk.bf16.vlgmr.msra.gmra.mrb[8].mxu1 %vm11779_vm0, %v10520_v45 }
 0x269   : > { %6083 = vmatpush1.bf16.msk.msra.mxu1 %vm6081_vm5, %v6082_v56  ;;  %5334 = vmatprep.mubr.bf16.mxu1 %v11087_v47 }
 0x26e   : > { %6077 = vmatmul.mubr.msk.bf16.vlgmr.msra.gmra.mrb[12].mxu0 %vm11780_vm11, %v10520_v45 }
 0x270   : > { %6084 = vmatmul.mubr.msk.bf16.vlgmr.msra.gmra.mrb[12].mxu1 %vm11781_vm12, %v10520_v45 }
 0x327   : > { %v5035_v42 = vpop.f32.mrb[0].mxu0 }
 0x328   : > { %v5389_v10 = vadd.f32 %v10694_v2, %v5035_v42  ;;  %v5037_v53 = vpop.f32.mrb[1].mxu0 }
 0x329   : > { %v5390_v55 = vadd.f32 %v10694_v2, %v5037_v53  ;;  %v5039_v6 = vpop.f32.mrb[2].mxu0 }
 0x32a   : > { %7084 = vtanh.f32 %v5389_v10  ;;  %v5405_v1 = vadd.f32 %v10696_v30, %v5039_v6  ;;  %v5041_v33 = vpop.f32.mrb[3].mxu0 }
 0x32b   : > { %v5078_v39 = vpop.f32.mrb[0].mxu1  ;;  %7086 = vtanh.f32 %v5390_v55  ;;  %v5406_v4 = vadd.f32 %v10696_v30, %v5041_v33 }
 0x32c   : > { %v5391_v47 = vadd.f32 %v10694_v2, %v5078_v39  ;;  %v5080_v14 = vpop.f32.mrb[1].mxu1 }
 0x32d   : > { %v5392_v28 = vadd.f32 %v10694_v2, %v5080_v14  ;;  %v5082_v17 = vpop.f32.mrb[2].mxu1 }
 0x32e   : > { %7088 = vtanh.f32 %v5391_v47  ;;  %v5407_v45 = vadd.f32 %v10696_v30, %v5082_v17  ;;  %v5084_v58 = vpop.f32.mrb[3].mxu1 }
 0x32f   : > { %7090 = vtanh.f32 %v5405_v1  ;;  %v5408_v0 = vadd.f32 %v10696_v30, %v5084_v58 }
 0x330   : > { %7092 = vtanh.f32 %v5392_v28 }
 0x331   : > { %7094 = vtanh.f32 %v5406_v4  ;;  %v5121_v34 = vpop.f32.mrb[4].mxu0 }
 0x332   : > { %7096 = vtanh.f32 %v5407_v45  ;;  %v5393_v9 = vadd.f32 %v10694_v2, %v5121_v34  ;;  %v5123_v51 = vpop.f32.mrb[5].mxu0 }
 0x333   : > { %7098 = vtanh.f32 %v5408_v0  ;;  %v5394_v19 = vadd.f32 %v10694_v2, %v5123_v51  ;;  %v5164_v23 = vpop.f32.mrb[4].mxu1  ;;  %v5125_v57 = vpop.f32.mrb[6].mxu0 }
 0x334   : > { %7100 = vtanh.f32 %v5393_v9  ;;  %v5395_v15 = vadd.f32 %v10694_v2, %v5164_v23  ;;  %v5409_v40 = vadd.f32 %v10696_v30, %v5125_v57  ;;  %v5166_v11 = vpop.f32.mrb[5].mxu1  ;;  %v5127_v22 = vpop.f32.mrb[7].mxu0 }
 0x335   : > { %7102 = vtanh.f32 %v5394_v19  ;;  %v5396_v20 = vadd.f32 %v10694_v2, %v5166_v11  ;;  %v5410_v44 = vadd.f32 %v10696_v30, %v5127_v22  ;;  %v5168_v27 = vpop.f32.mrb[6].mxu1  ;;  %v7085_v61 = vpop.eup %7084 }
 0x336   : > { %7104 = vtanh.f32 %v5395_v15  ;;  %v5411_v60 = vadd.f32 %v10696_v30, %v5168_v27  ;;  %v5170_v38 = vpop.f32.mrb[7].mxu1  ;;  %v7087_v26 = vpop.eup %7086  ;;  %5453 = vst [vmem:[%s10714_s9] sm:$0xff] %v7085_v61 }
 0x337   : > { %7106 = vtanh.f32 %v5409_v40  ;;  %v5412_v5 = vadd.f32 %v10696_v30, %v5170_v38  ;;  %5454 = vst [vmem:[%s10714_s9 + $0x8] sm:$0xff] %v7087_v26 }
 0x338   : > { %v7089_v35 = vpop.eup %7088  ;;  %7108 = vtanh.f32 %v5396_v20 }
 0x339   : > { %v7091_v8 = vpop.eup %7090  ;;  %5455 = vst [vmem:[%s10714_s9 + $0x10] sm:$0xff] %v7089_v35  ;;  %7110 = vtanh.f32 %v5410_v44  ;;  %v5207_v7 = vpop.f32.mrb[8].mxu0 }
 0x33a   : > { %v7093_v31 = vpop.eup %7092  ;;  %5469 = vst [vmem:[%s10714_s9 + $0x80] sm:$0xff] %v7091_v8  ;;  %7112 = vtanh.f32 %v5411_v60  ;;  %v5397_v59 = vadd.f32 %v10694_v2, %v5207_v7  ;;  %v5209_v43 = vpop.f32.mrb[9].mxu0 }
 0x33b   : > { %v7095_v16 = vpop.eup %7094  ;;  %5456 = vst [vmem:[%s10714_s9 + $0x18] sm:$0xff] %v7093_v31  ;;  %7114 = vtanh.f32 %v5412_v5  ;;  %v5398_v62 = vadd.f32 %v10694_v2, %v5209_v43  ;;  %v5250_v50 = vpop.f32.mrb[8].mxu1 }
 0x33c   : > { %v5211_v49 = vpop.f32.mrb[10].mxu0  ;;  %v7097_v18 = vpop.eup %7096  ;;  %5470 = vst [vmem:[%s10714_s9 + $0x88] sm:$0xff] %v7095_v16  ;;  %7116 = vtanh.f32 %v5397_v59  ;;  %v5399_v36 = vadd.f32 %v10694_v2, %v5250_v50 }
 0x33d   : > { %v5413_v29 = vadd.f32 %v10696_v30, %v5211_v49  ;;  %v5252_v63 = vpop.f32.mrb[9].mxu1  ;;  %v5213_v3 = vpop.f32.mrb[11].mxu0  ;;  %5471 = vst [vmem:[%s10714_s9 + $0x90] sm:$0xff] %v7097_v18  ;;  %7118 = vtanh.f32 %v5398_v62 }
 0x33e   : > { %v7099_v12 = vpop.eup %7098  ;;  %v5400_v52 = vadd.f32 %v10694_v2, %v5252_v63  ;;  %v5414_v41 = vadd.f32 %v10696_v30, %v5213_v3  ;;  %v5254_v13 = vpop.f32.mrb[10].mxu1  ;;  %7120 = vtanh.f32 %v5399_v36 }
 0x33f   : > { %v7101_v46 = vpop.eup %7100  ;;  %5472 = vst [vmem:[%s10714_s9 + $0x98] sm:$0xff] %v7099_v12  ;;  %v5415_v25 = vadd.f32 %v10696_v30, %v5254_v13  ;;  %v5256_v21 = vpop.f32.mrb[11].mxu1  ;;  %7122 = vtanh.f32 %v5413_v29 }
 0x340   : > { %v7103_v54 = vpop.eup %7102  ;;  %5457 = vst [vmem:[%s10714_s9 + $0x20] sm:$0xff] %v7101_v46  ;;  %v5416_v37 = vadd.f32 %v10696_v30, %v5256_v21  ;;  %7124 = vtanh.f32 %v5400_v52 }
 0x341   : > { %v7105_v24 = vpop.eup %7104  ;;  %5458 = vst [vmem:[%s10714_s9 + $0x28] sm:$0xff] %v7103_v54  ;;  %7126 = vtanh.f32 %v5414_v41  ;;  %v5293_v48 = vpop.f32.mrb[12].mxu0 }
 0x342   : > { %v7107_v32 = vpop.eup %7106  ;;  %5459 = vst [vmem:[%s10714_s9 + $0x30] sm:$0xff] %v7105_v24  ;;  %7128 = vtanh.f32 %v5415_v25  ;;  %v5401_v42 = vadd.f32 %v10694_v2, %v5293_v48  ;;  %v5295_v10 = vpop.f32.mrb[13].mxu0 }
 0x343   : > { %v7109_v56 = vpop.eup %7108  ;;  %5473 = vst [vmem:[%s10714_s9 + $0xa0] sm:$0xff] %v7107_v32  ;;  %7130 = vtanh.f32 %v5416_v37  ;;  %v5402_v55 = vadd.f32 %v10694_v2, %v5295_v10  ;;  %v5336_v39 = vpop.f32.mrb[12].mxu1 }
 0x344   : > { %v7111_v53 = vpop.eup %7110  ;;  %5460 = vst [vmem:[%s10714_s9 + $0x38] sm:$0xff] %v7109_v56  ;;  %v5297_v6 = vpop.f32.mrb[14].mxu0  ;;  %7132 = vtanh.f32 %v5401_v42  ;;  %v5403_v1 = vadd.f32 %v10694_v2, %v5336_v39 }
 0x345   : > { %v7113_v47 = vpop.eup %7112  ;;  %5474 = vst [vmem:[%s10714_s9 + $0xa8] sm:$0xff] %v7111_v53  ;;  %v5417_v14 = vadd.f32 %v10696_v30, %v5297_v6  ;;  %v5338_v33 = vpop.f32.mrb[13].mxu1  ;;  %7134 = vtanh.f32 %v5402_v55 }
 0x346   : > { %v5299_v28 = vpop.f32.mrb[15].mxu0  ;;  %v7115_v4 = vpop.eup %7114  ;;  %5475 = vst [vmem:[%s10714_s9 + $0xb0] sm:$0xff] %v7113_v47  ;;  %v5404_v17 = vadd.f32 %v10694_v2, %v5338_v33  ;;  %7136 = vtanh.f32 %v5403_v1 }
 0x347   : > { %v5418_v45 = vadd.f32 %v10696_v30, %v5299_v28  ;;  %v5340_v58 = vpop.f32.mrb[14].mxu1  ;;  %v7117_v0 = vpop.eup %7116  ;;  %5476 = vst [vmem:[%s10714_s9 + $0xb8] sm:$0xff] %v7115_v4  ;;  %7138 = vtanh.f32 %v5417_v14 }
 0x348   : > { %v5419_v34 = vadd.f32 %v10696_v30, %v5340_v58  ;;  %v5342_v9 = vpop.f32.mrb[15].mxu1  ;;  %v7119_v51 = vpop.eup %7118  ;;  %5461 = vst [vmem:[%s10714_s9 + $0x40] sm:$0xff] %v7117_v0  ;;  %7140 = vtanh.f32 %v5404_v17 }
 0x349   : > { %v5420_v19 = vadd.f32 %v10696_v30, %v5342_v9  ;;  %v7121_v2 = vpop.eup %7120  ;;  %5462 = vst [vmem:[%s10714_s9 + $0x48] sm:$0xff] %v7119_v51  ;;  %7142 = vtanh.f32 %v5418_v45 }
 0x34a   : > { %v7123_v23 = vpop.eup %7122  ;;  %5463 = vst [vmem:[%s10714_s9 + $0x50] sm:$0xff] %v7121_v2  ;;  %7144 = vtanh.f32 %v5419_v34 }
 0x34b   : > { %v7125_v57 = vpop.eup %7124  ;;  %5477 = vst [vmem:[%s10714_s9 + $0xc0] sm:$0xff] %v7123_v23  ;;  %7146 = vtanh.f32 %v5420_v19 }
 0x34c   : > { %v7127_v15 = vpop.eup %7126  ;;  %5464 = vst [vmem:[%s10714_s9 + $0x58] sm:$0xff] %v7125_v57 }
 0x34d   : > { %v7129_v30 = vpop.eup %7128  ;;  %5478 = vst [vmem:[%s10714_s9 + $0xc8] sm:$0xff] %v7127_v15 }
 0x34e   : > { %v7131_v40 = vpop.eup %7130  ;;  %5479 = vst [vmem:[%s10714_s9 + $0xd0] sm:$0xff] %v7129_v30 }
 0x34f   : > { %v7133_v11 = vpop.eup %7132  ;;  %5480 = vst [vmem:[%s10714_s9 + $0xd8] sm:$0xff] %v7131_v40 }
 0x350   : > { %v7135_v22 = vpop.eup %7134  ;;  %5465 = vst [vmem:[%s10714_s9 + $0x60] sm:$0xff] %v7133_v11 }
 0x351   : > { %v7137_v20 = vpop.eup %7136  ;;  %5466 = vst [vmem:[%s10714_s9 + $0x68] sm:$0xff] %v7135_v22 }
 0x352   : > { %v7139_v44 = vpop.eup %7138  ;;  %5467 = vst [vmem:[%s10714_s9 + $0x70] sm:$0xff] %v7137_v20 }
 0x353   : > { %v7141_v27 = vpop.eup %7140  ;;  %5481 = vst [vmem:[%s10714_s9 + $0xe0] sm:$0xff] %v7139_v44 }
 0x354   : > { %v7143_v61 = vpop.eup %7142  ;;  %5468 = vst [vmem:[%s10714_s9 + $0x78] sm:$0xff] %v7141_v27 }
 0x355   : > { %v7145_v60 = vpop.eup %7144  ;;  %5482 = vst [vmem:[%s10714_s9 + $0xe8] sm:$0xff] %v7143_v61 }
 0x356   : > { %v7147_v38 = vpop.eup %7146  ;;  %5483 = vst [vmem:[%s10714_s9 + $0xf0] sm:$0xff] %v7145_v60 }
 0x357   : > { %5484 = vst [vmem:[%s10714_s9 + $0xf8] sm:$0xff] %v7147_v38 }
 0x358   : > { %7263 = shalt.err (!%p7260_p5)
}
 0x359   : > { %s7264_s5 = scalar_lea.hbm %s10766_s20, 4096  ;;  %s7268_s29 = scalar_lea.hbm %s10818_s3, 16384 }
 0x35a   : > { %p7265_p11 = scmp.ne.s32.totalorder %s10766_s20, %s7264_s5  ;;  %p7269_p6 = scmp.lt.u32.totalorder %s10766_s20, %s10818_s3 }
 0x35b   : > { %p7270_p2 = scmp.lt.u32.totalorder %s7268_s29, %s7264_s5  ;;  %p7272_p8 = scmp.lt.u32.totalorder %s7264_s5, %s10766_s20 }
 0x35c   : > { %p7266_p12 = pnand %p7265_p11, %p11782_p9 }
 0x35d   : > { %p7271_p13 = por %p7270_p2, %p7269_p6 }
 0x35e   : > { %p7267_p3 = pneg %p7266_p12 }
 0x35f   : > { %p7273_p10 = por %p7272_p8, %p7271_p13 }
 0x361   : > { %p7274_p1 = pnand %p7273_p10, %p7267_p3 }
 0x363   : > { %7277 = shalt.err (!%p7274_p1)
}
 0x364   : > { %s7341_s8 = smov 2048   ;;  %s7342_s9 = smov 8192  }
 0x365   : > { %s7343_s10 = smov 128  }
 0x366   : > { %6358 = dma.vmem_to_hbm [thread:$0]  (%p11782_p9), %s10769_s19, 4096, %s10766_s20, %s5486_s16, %s7341_s8, %s7342_s9, %s7343_s10  }
 0x367 PF: > { %p6380_p4 = scmp.ge.s32.totalorder %s7320_s15, 2  ;;  %s5514_s11 = sand.u32 1, %s7308_s12  }
 0x368   : > { %p11783_p0 = scmp.ne.s32.totalorder %s11040_s25, 0  ;;  %s5515_s28 = scalar_lea.sflag [#allocation4], %s5514_s11 }
 0x36a   : > { %p6372_p7 = pnand %p6380_p4, %p11783_p0 }
 0x36c   : > { %7303 = dma.done.wait (!%p6372_p7), %s5515_s28, 4096  }
 0x36d   : > { %7305 = vsyncadd (!%p6372_p7), %s5515_s28, 4294963200  ;;  %p17_p5 = scmp.ge.s32.totalorder %s7389_s18, 6   ;;  %s11784_s12 = smov %s7312_s13 }
 0x36e   : > { %s11785_s13 = smov %s7316_s14  ;;  %s11786_s14 = smov %s7401_s21 }
 0x36f   : > { %s11787_s15 = smov %s7389_s18  ;;  %19 = sbr.rel (!%p17_p5) target bundleno = 6 (0x6), region = 93 }
 0x376   :  { %5520 = vsyncpa [#allocation3], 1 }
 0x377   :  { %5522 = vsyncpa [#allocation3 + $0x1], 1 }
 0x378   :  { %5523 = vsyncpa [#allocation6], 1 }
 0x379   :  { %5524 = vsyncpa [#allocation4], 1 }
 0x37a   :  { %5526 = vsyncpa [#allocation4 + $0x1], 1 }

</bundles_post_ra>
